<compile_context>
chip_gen: v6e
topology: v6e:2x2x1
jax: 0.10.0
libtpu: 0.0.40
codegen_flags: <defaults>
</compile_context>

<pallas_src>
import functools

import jax
import jax.numpy as jnp
from jax.experimental import pallas as pl
from jax.experimental.pallas import tpu as pltpu


# ----------------------------------------------------------------------------
# Fused kernel factory (all shape parameters are static closure values).
# ----------------------------------------------------------------------------
def _make_encoder_kernel(B, H, W, Cin, C1, C2, P1, P2, eps):
    H2, W2 = H // 2, W // 2
    hh, ww = H2 // P1, W2 // P2          # patch grid
    M1 = B * H * W                        # conv1 output rows
    M2 = B * H2 * W2                      # conv2 output rows
    MP = B * hh * ww                      # projection rows

    def kernel(x_ref, w1_ref, g1_ref, b1_ref, w2_ref, g2_ref, b2_ref, wp_ref,
               o_ref, xp1_ref, pat1_ref, xp2_ref, pat2_ref, zpat_ref):
        f32 = jnp.float32

        # ---- conv1: zero-pad input inside VMEM (no XLA pad op) -------------
        xp1_ref[...] = jnp.zeros_like(xp1_ref)
        xp1_ref[:, 1:H + 1, 1:W + 1, :] = x_ref[...].astype(f32)
        xp = xp1_ref[...]                                  # (B, H+2, W+2, Cin)

        # ---- conv1: im2col -> single MXU matmul (K = 9*Cin) ----------------
        for dy in range(3):
            for dx in range(3):
                k = dy * 3 + dx
                piece = xp[:, dy:dy + H, dx:dx + W, :].reshape(M1, Cin)
                pat1_ref[:, k * Cin:(k + 1) * Cin] = piece
        y1 = jnp.dot(pat1_ref[...], w1_ref[...],
                     preferred_element_type=f32)           # (M1, C1)

        # ---- BN1 (training batch stats, centered two-pass) + ReLU ----------
        n1 = float(M1)
        mean1 = jnp.sum(y1, axis=0, keepdims=True) / n1
        var1 = jnp.sum(jnp.square(y1 - mean1), axis=0, keepdims=True) / n1
        sc1 = g1_ref[...] * jax.lax.rsqrt(var1 + eps)
        bi1 = b1_ref[...] - mean1 * sc1
        z1 = jnp.maximum(y1 * sc1 + bi1, 0.0)

        # ---- MaxPool2d(2) (reshape+max keeps the lane dim untouched) -------
        z1 = jnp.max(z1.reshape(B, H2, 2, W, C1), axis=2)   # pool along H
        pool1 = jnp.max(z1.reshape(B, H2, W2, 2, C1), axis=3)  # (B,H2,W2,C1)

        # ---- conv2: pad + im2col -> single matmul (K = 9*C1) ---------------
        xp2_ref[...] = jnp.zeros_like(xp2_ref)
        xp2_ref[:, 1:H2 + 1, 1:W2 + 1, :] = pool1
        xq = xp2_ref[...]                                  # (B, H2+2, W2+2, C1)
        for dy in range(3):
            for dx in range(3):
                k = dy * 3 + dx
                piece = xq[:, dy:dy + H2, dx:dx + W2, :].reshape(M2, C1)
                pat2_ref[:, k * C1:(k + 1) * C1] = piece
        y2 = jnp.dot(pat2_ref[...], w2_ref[...],
                     preferred_element_type=f32)           # (M2, C2)

        # ---- BN2 + ReLU ------------------------------------------------------
        n2 = float(M2)
        mean2 = jnp.sum(y2, axis=0, keepdims=True) / n2
        var2 = jnp.sum(jnp.square(y2 - mean2), axis=0, keepdims=True) / n2
        sc2 = g2_ref[...] * jax.lax.rsqrt(var2 + eps)
        bi2 = b2_ref[...] - mean2 * sc2
        z2 = jnp.maximum(y2 * sc2 + bi2, 0.0)              # (M2, C2)

        # ---- einops 'b c (h p1) (w p2) -> b (p1 p2 c) h w' in-kernel --------
        # Rows of z2 are ordered (b, h2, w2); split h2=(h,p1), w2=(w,p2) with
        # lane-dim-preserving reshapes and gather the (p1,p2) blocks into a
        # lane-dense (MP, patch_dim) scratch via column-band stores.
        z2r = z2.reshape(B, hh, P1, ww, P2, C2)
        for q1 in range(P1):
            for q2 in range(P2):
                u = z2r[:, :, q1:q1 + 1, :, q2:q2 + 1, :].reshape(MP, C2)
                c0 = (q1 * P2 + q2) * C2
                zpat_ref[:, c0:c0 + C2] = u

        # ---- 1x1 conv == dense projection (single matmul) -------------------
        o_ref[...] = jnp.dot(zpat_ref[...], wp_ref[...],
                             preferred_element_type=f32)

    return kernel


# ----------------------------------------------------------------------------
# Public forward: NCHW in / NCHW out, PyTorch-native parameter layouts.
#   params["w1"]: (16, Cin, 3, 3)   (OIHW)      params["g1"], ["b1"]: (16,)
#   params["w2"]: (32, 16, 3, 3)    (OIHW)      params["g2"], ["b2"]: (32,)
#   params["wp"]: (O, patch_dim, 1, 1)          (Conv2d 1x1 weight)
# ----------------------------------------------------------------------------
@functools.partial(jax.jit, static_argnums=(2, 3))
def cnn_encoder4_forward(x_nchw, params, patch_height, patch_width):
    eps = 1e-5
    B, Cin, H, W = x_nchw.shape
    C1 = params["w1"].shape[0]
    C2 = params["w2"].shape[0]
    O = params["wp"].shape[0]
    P1, P2 = patch_height // 2, patch_width // 2
    H2, W2 = H // 2, W // 2
    hh, ww = H2 // P1, W2 // P2
    PD = P1 * P2 * C2

    # PyTorch layouts -> kernel layouts (weight-only glue, tiny).
    x = jnp.transpose(x_nchw, (0, 2, 3, 1)).astype(jnp.float32)       # NHWC
    w1 = jnp.transpose(params["w1"], (2, 3, 1, 0)).reshape(9 * Cin, C1)
    w2 = jnp.transpose(params["w2"], (2, 3, 1, 0)).reshape(9 * C1, C2)
    wp = jnp.transpose(params["wp"].reshape(O, PD), (1, 0))           # (PD, O)
    g1 = params["g1"].reshape(1, C1).astype(jnp.float32)
    b1 = params["b1"].reshape(1, C1).astype(jnp.float32)
    g2 = params["g2"].reshape(1, C2).astype(jnp.float32)
    b2 = params["b2"].reshape(1, C2).astype(jnp.float32)

    kernel = _make_encoder_kernel(B, H, W, Cin, C1, C2, P1, P2, eps)

    def full(shape):
        return pl.BlockSpec(shape, lambda i, _s=shape: (0,) * len(_s))

    out_flat = pl.pallas_call(
        kernel,
        out_shape=jax.ShapeDtypeStruct((B * hh * ww, O), jnp.float32),
        grid=(1,),
        in_specs=[full((B, H, W, Cin)),
                  full((9 * Cin, C1)), full((1, C1)), full((1, C1)),
                  full((9 * C1, C2)), full((1, C2)), full((1, C2)),
                  full((PD, O))],
        out_specs=full((B * hh * ww, O)),
        scratch_shapes=[
            pltpu.VMEM((B, H + 2, W + 2, Cin), jnp.float32),      # padded x
            pltpu.VMEM((B * H * W, 9 * Cin), jnp.float32),        # im2col #1
            pltpu.VMEM((B, H2 + 2, W2 + 2, C1), jnp.float32),     # padded p1
            pltpu.VMEM((B * H2 * W2, 9 * C1), jnp.float32),       # im2col #2
            pltpu.VMEM((B * hh * ww, PD), jnp.float32),           # patch feats
        ],
        compiler_params=pltpu.CompilerParams(
            dimension_semantics=("arbitrary",)),
    )(x, w1, g1, b1, w2, g2, b2, wp)

    return out_flat.reshape(B, hh, ww, O).transpose(0, 3, 1, 2)       # NCHW


# ----------------------------------------------------------------------------
# Pure-JAX reference (uses PyTorch-native layouts directly; independent of the
# kernel's weight-layout conversions).
# ----------------------------------------------------------------------------
def reference_forward(x_nchw, params, patch_height, patch_width, eps=1e-5):
    def conv(x, w):
        return jax.lax.conv_general_dilated(
            x, w, window_strides=(1, 1), padding="SAME",
            dimension_numbers=("NCHW", "OIHW", "NCHW"))

    def bn_train(y, g, b):
        mean = jnp.mean(y, axis=(0, 2, 3), keepdims=True)
        var = jnp.mean(jnp.square(y - mean), axis=(0, 2, 3), keepdims=True)
        return ((y - mean) * jax.lax.rsqrt(var + eps)
                * g.reshape(1, -1, 1, 1) + b.reshape(1, -1, 1, 1))

    x = x_nchw.astype(jnp.float32)
    y = jax.nn.relu(bn_train(conv(x, params["w1"]), params["g1"], params["b1"]))
    y = jax.lax.reduce_window(y, -jnp.inf, jax.lax.max,
                              (1, 1, 2, 2), (1, 1, 2, 2), "VALID")
    y = jax.nn.relu(bn_train(conv(y, params["w2"]), params["g2"], params["b2"]))

    B, C, H2, W2 = y.shape
    P1, P2 = patch_height // 2, patch_width // 2
    h, w = H2 // P1, W2 // P2
    z = y.reshape(B, C, h, P1, w, P2)
    z = jnp.transpose(z, (0, 3, 5, 1, 2, 4)).reshape(B, P1 * P2 * C, h, w)
    O = params["wp"].shape[0]
    wp2d = params["wp"].reshape(O, -1)
    return jnp.einsum("bkhw,ok->bohw", z, wp2d)


if __name__ == "__main__":
    # Small shapes consistent with the module: n_channels=4, patch 4x4, out=8.
    B, Cin, H, W = 2, 4, 16, 16
    patch_height = patch_width = 4
    out_channels = 8
    C1, C2 = 16, 32
    patch_dim = C2 * (patch_height // 2) * (patch_width // 2)   # = 128

    key = jax.random.PRNGKey(0)
    kx, k1, k2, k3 = jax.random.split(key, 4)
    x = jax.random.normal(kx, (B, Cin, H, W), jnp.float32)

    # PyTorch-native parameter layouts (OIHW conv weights, (O,PD,1,1) 1x1 conv).
    params = {
        "w1": jax.random.normal(k1, (C1, Cin, 3, 3), jnp.float32) * 0.2,
        "g1": jnp.ones((C1,), jnp.float32),      # BatchNorm2d(16) default init
        "b1": jnp.zeros((C1,), jnp.float32),
        "w2": jax.random.normal(k2, (C2, C1, 3, 3), jnp.float32) * 0.1,
        "g2": jnp.ones((C2,), jnp.float32),      # BatchNorm2d(32) default init
        "b2": jnp.zeros((C2,), jnp.float32),
        "wp": jax.random.normal(k3, (out_channels, patch_dim, 1, 1),
                                jnp.float32) * 0.05,
    }

    out = cnn_encoder4_forward(x, params, patch_height, patch_width)
    out = jax.block_until_ready(out)

    assert out.shape == (B, out_channels, H // patch_height, W // patch_width)
    ref = reference_forward(x, params, patch_height, patch_width)
    err = float(jnp.max(jnp.abs(out - ref)))
    assert jnp.allclose(out, ref, rtol=2e-3, atol=2e-3), f"max abs err {err}"

    print("KERNEL_OK")
</pallas_src>

<mosaic_0001>
module attributes {stable_mosaic.version = 11 : i64} {
  func.func @kernel(%arg0: i32, %arg1: memref<2x16x16x4xf32, #tpu.memory_space<vmem>>, %arg2: memref<36x16xf32, #tpu.memory_space<vmem>>, %arg3: memref<1x16xf32, #tpu.memory_space<vmem>>, %arg4: memref<1x16xf32, #tpu.memory_space<vmem>>, %arg5: memref<144x32xf32, #tpu.memory_space<vmem>>, %arg6: memref<1x32xf32, #tpu.memory_space<vmem>>, %arg7: memref<1x32xf32, #tpu.memory_space<vmem>>, %arg8: memref<128x8xf32, #tpu.memory_space<vmem>>, %arg9: memref<32x8xf32, #tpu.memory_space<vmem>>, %arg10: memref<2x18x18x4xf32, #tpu.memory_space<vmem>>, %arg11: memref<512x36xf32, #tpu.memory_space<vmem>>, %arg12: memref<2x10x10x16xf32, #tpu.memory_space<vmem>>, %arg13: memref<128x144xf32, #tpu.memory_space<vmem>>, %arg14: memref<32x128xf32, #tpu.memory_space<vmem>>) attributes {dimension_semantics = [#tpu.dimension_semantics<arbitrary>], iteration_bounds = array<i64: 1>, scalar_prefetch = 0 : i64, scratch_operands = 5 : i64, tpu.core_type = #tpu.core_type<tc>, window_params = [{pipeline_mode = #tpu.pipeline_mode<synchronous>, transform_indices = @transform_0, window_bounds = array<i64: 2, 16, 16, 4>}, {pipeline_mode = #tpu.pipeline_mode<synchronous>, transform_indices = @transform_1, window_bounds = array<i64: 36, 16>}, {pipeline_mode = #tpu.pipeline_mode<synchronous>, transform_indices = @transform_2, window_bounds = array<i64: 1, 16>}, {pipeline_mode = #tpu.pipeline_mode<synchronous>, transform_indices = @transform_3, window_bounds = array<i64: 1, 16>}, {pipeline_mode = #tpu.pipeline_mode<synchronous>, transform_indices = @transform_4, window_bounds = array<i64: 144, 32>}, {pipeline_mode = #tpu.pipeline_mode<synchronous>, transform_indices = @transform_5, window_bounds = array<i64: 1, 32>}, {pipeline_mode = #tpu.pipeline_mode<synchronous>, transform_indices = @transform_6, window_bounds = array<i64: 1, 32>}, {pipeline_mode = #tpu.pipeline_mode<synchronous>, transform_indices = @transform_7, window_bounds = array<i64: 128, 8>}, {pipeline_mode = #tpu.pipeline_mode<synchronous>, transform_indices = @transform_8, window_bounds = array<i64: 32, 8>}]} {
    %cst = arith.constant 0.000000e+00 : f32
    %0 = vector.broadcast %cst : f32 to vector<2x18x18x4xf32>
    %c0 = arith.constant 0 : index
    %c0_0 = arith.constant 0 : index
    %c0_1 = arith.constant 0 : index
    %c0_2 = arith.constant 0 : index
    %1 = vector.load %arg10[%c0, %c0_0, %c0_1, %c0_2] : memref<2x18x18x4xf32, #tpu.memory_space<vmem>>, vector<2x18x18x4xf32>
    tpu.vector_store %arg10[%c0, %c0_0, %c0_1, %c0_2], %0 {strides = array<i32>} : memref<2x18x18x4xf32, #tpu.memory_space<vmem>>, vector<2x18x18x4xf32>,
    %c0_3 = arith.constant 0 : index
    %c0_4 = arith.constant 0 : index
    %c0_5 = arith.constant 0 : index
    %c0_6 = arith.constant 0 : index
    %2 = vector.load %arg1[%c0_3, %c0_4, %c0_5, %c0_6] : memref<2x16x16x4xf32, #tpu.memory_space<vmem>>, vector<2x16x16x4xf32>
    %c0_7 = arith.constant 0 : index
    %c1 = arith.constant 1 : index
    %c1_8 = arith.constant 1 : index
    %c0_9 = arith.constant 0 : index
    %3 = vector.load %arg10[%c0_7, %c1, %c1_8, %c0_9] : memref<2x18x18x4xf32, #tpu.memory_space<vmem>>, vector<2x16x16x4xf32>
    tpu.vector_store %arg10[%c0_7, %c1, %c1_8, %c0_9], %2 {strides = array<i32>} : memref<2x18x18x4xf32, #tpu.memory_space<vmem>>, vector<2x16x16x4xf32>,
    %c0_10 = arith.constant 0 : index
    %c0_11 = arith.constant 0 : index
    %c0_12 = arith.constant 0 : index
    %c0_13 = arith.constant 0 : index
    %4 = vector.load %arg10[%c0_10, %c0_11, %c0_12, %c0_13] : memref<2x18x18x4xf32, #tpu.memory_space<vmem>>, vector<2x18x18x4xf32>
    %5 = vector.extract_strided_slice %4 {offsets = [0, 0, 0, 0], sizes = [2, 16, 16, 4], strides = [1, 1, 1, 1]} : vector<2x18x18x4xf32> to vector<2x16x16x4xf32>
    %6 = vector.shape_cast %5 : vector<2x16x16x4xf32> to vector<512x4xf32>
    %c0_14 = arith.constant 0 : index
    %c0_15 = arith.constant 0 : index
    %7 = vector.load %arg11[%c0_14, %c0_15] : memref<512x36xf32, #tpu.memory_space<vmem>>, vector<512x4xf32>
    tpu.vector_store %arg11[%c0_14, %c0_15], %6 {strides = array<i32>} : memref<512x36xf32, #tpu.memory_space<vmem>>, vector<512x4xf32>,
    %8 = vector.extract_strided_slice %4 {offsets = [0, 0, 1, 0], sizes = [2, 16, 16, 4], strides = [1, 1, 1, 1]} : vector<2x18x18x4xf32> to vector<2x16x16x4xf32>
    %9 = vector.shape_cast %8 : vector<2x16x16x4xf32> to vector<512x4xf32>
    %c0_16 = arith.constant 0 : index
    %c4 = arith.constant 4 : index
    %10 = vector.load %arg11[%c0_16, %c4] : memref<512x36xf32, #tpu.memory_space<vmem>>, vector<512x4xf32>
    tpu.vector_store %arg11[%c0_16, %c4], %9 {strides = array<i32>} : memref<512x36xf32, #tpu.memory_space<vmem>>, vector<512x4xf32>,
    %11 = vector.extract_strided_slice %4 {offsets = [0, 0, 2, 0], sizes = [2, 16, 16, 4], strides = [1, 1, 1, 1]} : vector<2x18x18x4xf32> to vector<2x16x16x4xf32>
    %12 = vector.shape_cast %11 : vector<2x16x16x4xf32> to vector<512x4xf32>
    %c0_17 = arith.constant 0 : index
    %c8 = arith.constant 8 : index
    %13 = vector.load %arg11[%c0_17, %c8] : memref<512x36xf32, #tpu.memory_space<vmem>>, vector<512x4xf32>
    tpu.vector_store %arg11[%c0_17, %c8], %12 {strides = array<i32>} : memref<512x36xf32, #tpu.memory_space<vmem>>, vector<512x4xf32>,
    %14 = vector.extract_strided_slice %4 {offsets = [0, 1, 0, 0], sizes = [2, 16, 16, 4], strides = [1, 1, 1, 1]} : vector<2x18x18x4xf32> to vector<2x16x16x4xf32>
    %15 = vector.shape_cast %14 : vector<2x16x16x4xf32> to vector<512x4xf32>
    %c0_18 = arith.constant 0 : index
    %c12 = arith.constant 12 : index
    %16 = vector.load %arg11[%c0_18, %c12] : memref<512x36xf32, #tpu.memory_space<vmem>>, vector<512x4xf32>
    tpu.vector_store %arg11[%c0_18, %c12], %15 {strides = array<i32>} : memref<512x36xf32, #tpu.memory_space<vmem>>, vector<512x4xf32>,
    %17 = vector.extract_strided_slice %4 {offsets = [0, 1, 1, 0], sizes = [2, 16, 16, 4], strides = [1, 1, 1, 1]} : vector<2x18x18x4xf32> to vector<2x16x16x4xf32>
    %18 = vector.shape_cast %17 : vector<2x16x16x4xf32> to vector<512x4xf32>
    %c0_19 = arith.constant 0 : index
    %c16 = arith.constant 16 : index
    %19 = vector.load %arg11[%c0_19, %c16] : memref<512x36xf32, #tpu.memory_space<vmem>>, vector<512x4xf32>
    tpu.vector_store %arg11[%c0_19, %c16], %18 {strides = array<i32>} : memref<512x36xf32, #tpu.memory_space<vmem>>, vector<512x4xf32>,
    %20 = vector.extract_strided_slice %4 {offsets = [0, 1, 2, 0], sizes = [2, 16, 16, 4], strides = [1, 1, 1, 1]} : vector<2x18x18x4xf32> to vector<2x16x16x4xf32>
    %21 = vector.shape_cast %20 : vector<2x16x16x4xf32> to vector<512x4xf32>
    %c0_20 = arith.constant 0 : index
    %c20 = arith.constant 20 : index
    %22 = vector.load %arg11[%c0_20, %c20] : memref<512x36xf32, #tpu.memory_space<vmem>>, vector<512x4xf32>
    tpu.vector_store %arg11[%c0_20, %c20], %21 {strides = array<i32>} : memref<512x36xf32, #tpu.memory_space<vmem>>, vector<512x4xf32>,
    %23 = vector.extract_strided_slice %4 {offsets = [0, 2, 0, 0], sizes = [2, 16, 16, 4], strides = [1, 1, 1, 1]} : vector<2x18x18x4xf32> to vector<2x16x16x4xf32>
    %24 = vector.shape_cast %23 : vector<2x16x16x4xf32> to vector<512x4xf32>
    %c0_21 = arith.constant 0 : index
    %c24 = arith.constant 24 : index
    %25 = vector.load %arg11[%c0_21, %c24] : memref<512x36xf32, #tpu.memory_space<vmem>>, vector<512x4xf32>
    tpu.vector_store %arg11[%c0_21, %c24], %24 {strides = array<i32>} : memref<512x36xf32, #tpu.memory_space<vmem>>, vector<512x4xf32>,
    %26 = vector.extract_strided_slice %4 {offsets = [0, 2, 1, 0], sizes = [2, 16, 16, 4], strides = [1, 1, 1, 1]} : vector<2x18x18x4xf32> to vector<2x16x16x4xf32>
    %27 = vector.shape_cast %26 : vector<2x16x16x4xf32> to vector<512x4xf32>
    %c0_22 = arith.constant 0 : index
    %c28 = arith.constant 28 : index
    %28 = vector.load %arg11[%c0_22, %c28] : memref<512x36xf32, #tpu.memory_space<vmem>>, vector<512x4xf32>
    tpu.vector_store %arg11[%c0_22, %c28], %27 {strides = array<i32>} : memref<512x36xf32, #tpu.memory_space<vmem>>, vector<512x4xf32>,
    %29 = vector.extract_strided_slice %4 {offsets = [0, 2, 2, 0], sizes = [2, 16, 16, 4], strides = [1, 1, 1, 1]} : vector<2x18x18x4xf32> to vector<2x16x16x4xf32>
    %30 = vector.shape_cast %29 : vector<2x16x16x4xf32> to vector<512x4xf32>
    %c0_23 = arith.constant 0 : index
    %c32 = arith.constant 32 : index
    %31 = vector.load %arg11[%c0_23, %c32] : memref<512x36xf32, #tpu.memory_space<vmem>>, vector<512x4xf32>
    tpu.vector_store %arg11[%c0_23, %c32], %30 {strides = array<i32>} : memref<512x36xf32, #tpu.memory_space<vmem>>, vector<512x4xf32>,
    %c0_24 = arith.constant 0 : index
    %c0_25 = arith.constant 0 : index
    %32 = vector.load %arg11[%c0_24, %c0_25] : memref<512x36xf32, #tpu.memory_space<vmem>>, vector<512x36xf32>
    %c0_26 = arith.constant 0 : index
    %c0_27 = arith.constant 0 : index
    %33 = vector.load %arg2[%c0_26, %c0_27] : memref<36x16xf32, #tpu.memory_space<vmem>>, vector<36x16xf32>
    %cst_28 = arith.constant dense<0.000000e+00> : vector<512x16xf32>
    %34 = tpu.matmul %32, %33, %cst_28 {dimension_numbers = #tpu.dot_dimension_numbers<[1], [0], [0], [1], [0, 0, 1, 1], [], []>} : vector<512x36xf32>, vector<36x16xf32>, vector<512x16xf32> -> vector<512x16xf32>
    %cst_29 = arith.constant dense<0.000000e+00> : vector<16xf32>
    %35 = vector.multi_reduction <add>, %34, %cst_29 [0] : vector<512x16xf32> to vector<16xf32>
    %36 = vector.shape_cast %35 : vector<16xf32> to vector<1x16xf32>
    %cst_30 = arith.constant 5.120000e+02 : f32
    %37 = vector.broadcast %cst_30 : f32 to vector<1x16xf32>
    %38 = arith.divf %36, %37 : vector<1x16xf32>
    %39 = vector.broadcast %38 : vector<1x16xf32> to vector<512x16xf32>
    %40 = arith.subf %34, %39 : vector<512x16xf32>
    %41 = arith.mulf %40, %40 : vector<512x16xf32>
    %cst_31 = arith.constant dense<0.000000e+00> : vector<16xf32>
    %42 = vector.multi_reduction <add>, %41, %cst_31 [0] : vector<512x16xf32> to vector<16xf32>
    %43 = vector.shape_cast %42 : vector<16xf32> to vector<1x16xf32>
    %cst_32 = arith.constant 5.120000e+02 : f32
    %44 = vector.broadcast %cst_32 : f32 to vector<1x16xf32>
    %45 = arith.divf %43, %44 : vector<1x16xf32>
    %c0_33 = arith.constant 0 : index
    %c0_34 = arith.constant 0 : index
    %46 = vector.load %arg3[%c0_33, %c0_34] : memref<1x16xf32, #tpu.memory_space<vmem>>, vector<1x16xf32>
    %cst_35 = arith.constant 9.99999974E-6 : f32
    %47 = vector.broadcast %cst_35 : f32 to vector<1x16xf32>
    %48 = arith.addf %45, %47 : vector<1x16xf32>
    %49 = math.rsqrt %48 : vector<1x16xf32>
    %50 = arith.mulf %46, %49 : vector<1x16xf32>
    %c0_36 = arith.constant 0 : index
    %c0_37 = arith.constant 0 : index
    %51 = vector.load %arg4[%c0_36, %c0_37] : memref<1x16xf32, #tpu.memory_space<vmem>>, vector<1x16xf32>
    %52 = arith.mulf %38, %50 : vector<1x16xf32>
    %53 = arith.subf %51, %52 : vector<1x16xf32>
    %54 = vector.broadcast %50 : vector<1x16xf32> to vector<512x16xf32>
    %55 = arith.mulf %34, %54 : vector<512x16xf32>
    %56 = vector.broadcast %53 : vector<1x16xf32> to vector<512x16xf32>
    %57 = arith.addf %55, %56 : vector<512x16xf32>
    %cst_38 = arith.constant 0.000000e+00 : f32
    %58 = vector.broadcast %cst_38 : f32 to vector<512x16xf32>
    %59 = arith.maximumf %57, %58 : vector<512x16xf32>
    %60 = vector.shape_cast %59 : vector<512x16xf32> to vector<2x8x2x16x16xf32>
    %cst_39 = arith.constant dense<0xFF800000> : vector<2x8x16x16xf32>
    %61 = vector.multi_reduction <maximumf>, %60, %cst_39 [2] : vector<2x8x2x16x16xf32> to vector<2x8x16x16xf32>
    %62 = vector.shape_cast %61 : vector<2x8x16x16xf32> to vector<2x8x8x2x16xf32>
    %cst_40 = arith.constant dense<0xFF800000> : vector<2x8x8x16xf32>
    %63 = vector.multi_reduction <maximumf>, %62, %cst_40 [3] : vector<2x8x8x2x16xf32> to vector<2x8x8x16xf32>
    %cst_41 = arith.constant 0.000000e+00 : f32
    %64 = vector.broadcast %cst_41 : f32 to vector<2x10x10x16xf32>
    %c0_42 = arith.constant 0 : index
    %c0_43 = arith.constant 0 : index
    %c0_44 = arith.constant 0 : index
    %c0_45 = arith.constant 0 : index
    %65 = vector.load %arg12[%c0_42, %c0_43, %c0_44, %c0_45] : memref<2x10x10x16xf32, #tpu.memory_space<vmem>>, vector<2x10x10x16xf32>
    tpu.vector_store %arg12[%c0_42, %c0_43, %c0_44, %c0_45], %64 {strides = array<i32>} : memref<2x10x10x16xf32, #tpu.memory_space<vmem>>, vector<2x10x10x16xf32>,
    %c0_46 = arith.constant 0 : index
    %c1_47 = arith.constant 1 : index
    %c1_48 = arith.constant 1 : index
    %c0_49 = arith.constant 0 : index
    %66 = vector.load %arg12[%c0_46, %c1_47, %c1_48, %c0_49] : memref<2x10x10x16xf32, #tpu.memory_space<vmem>>, vector<2x8x8x16xf32>
    tpu.vector_store %arg12[%c0_46, %c1_47, %c1_48, %c0_49], %63 {strides = array<i32>} : memref<2x10x10x16xf32, #tpu.memory_space<vmem>>, vector<2x8x8x16xf32>,
    %c0_50 = arith.constant 0 : index
    %c0_51 = arith.constant 0 : index
    %c0_52 = arith.constant 0 : index
    %c0_53 = arith.constant 0 : index
    %67 = vector.load %arg12[%c0_50, %c0_51, %c0_52, %c0_53] : memref<2x10x10x16xf32, #tpu.memory_space<vmem>>, vector<2x10x10x16xf32>
    %68 = vector.extract_strided_slice %67 {offsets = [0, 0, 0, 0], sizes = [2, 8, 8, 16], strides = [1, 1, 1, 1]} : vector<2x10x10x16xf32> to vector<2x8x8x16xf32>
    %69 = vector.shape_cast %68 : vector<2x8x8x16xf32> to vector<128x16xf32>
    %c0_54 = arith.constant 0 : index
    %c0_55 = arith.constant 0 : index
    %70 = vector.load %arg13[%c0_54, %c0_55] : memref<128x144xf32, #tpu.memory_space<vmem>>, vector<128x16xf32>
    tpu.vector_store %arg13[%c0_54, %c0_55], %69 {strides = array<i32>} : memref<128x144xf32, #tpu.memory_space<vmem>>, vector<128x16xf32>,
    %71 = vector.extract_strided_slice %67 {offsets = [0, 0, 1, 0], sizes = [2, 8, 8, 16], strides = [1, 1, 1, 1]} : vector<2x10x10x16xf32> to vector<2x8x8x16xf32>
    %72 = vector.shape_cast %71 : vector<2x8x8x16xf32> to vector<128x16xf32>
    %c0_56 = arith.constant 0 : index
    %c16_57 = arith.constant 16 : index
    %73 = vector.load %arg13[%c0_56, %c16_57] : memref<128x144xf32, #tpu.memory_space<vmem>>, vector<128x16xf32>
    tpu.vector_store %arg13[%c0_56, %c16_57], %72 {strides = array<i32>} : memref<128x144xf32, #tpu.memory_space<vmem>>, vector<128x16xf32>,
    %74 = vector.extract_strided_slice %67 {offsets = [0, 0, 2, 0], sizes = [2, 8, 8, 16], strides = [1, 1, 1, 1]} : vector<2x10x10x16xf32> to vector<2x8x8x16xf32>
    %75 = vector.shape_cast %74 : vector<2x8x8x16xf32> to vector<128x16xf32>
    %c0_58 = arith.constant 0 : index
    %c32_59 = arith.constant 32 : index
    %76 = vector.load %arg13[%c0_58, %c32_59] : memref<128x144xf32, #tpu.memory_space<vmem>>, vector<128x16xf32>
    tpu.vector_store %arg13[%c0_58, %c32_59], %75 {strides = array<i32>} : memref<128x144xf32, #tpu.memory_space<vmem>>, vector<128x16xf32>,
    %77 = vector.extract_strided_slice %67 {offsets = [0, 1, 0, 0], sizes = [2, 8, 8, 16], strides = [1, 1, 1, 1]} : vector<2x10x10x16xf32> to vector<2x8x8x16xf32>
    %78 = vector.shape_cast %77 : vector<2x8x8x16xf32> to vector<128x16xf32>
    %c0_60 = arith.constant 0 : index
    %c48 = arith.constant 48 : index
    %79 = vector.load %arg13[%c0_60, %c48] : memref<128x144xf32, #tpu.memory_space<vmem>>, vector<128x16xf32>
    tpu.vector_store %arg13[%c0_60, %c48], %78 {strides = array<i32>} : memref<128x144xf32, #tpu.memory_space<vmem>>, vector<128x16xf32>,
    %80 = vector.extract_strided_slice %67 {offsets = [0, 1, 1, 0], sizes = [2, 8, 8, 16], strides = [1, 1, 1, 1]} : vector<2x10x10x16xf32> to vector<2x8x8x16xf32>
    %81 = vector.shape_cast %80 : vector<2x8x8x16xf32> to vector<128x16xf32>
    %c0_61 = arith.constant 0 : index
    %c64 = arith.constant 64 : index
    %82 = vector.load %arg13[%c0_61, %c64] : memref<128x144xf32, #tpu.memory_space<vmem>>, vector<128x16xf32>
    tpu.vector_store %arg13[%c0_61, %c64], %81 {strides = array<i32>} : memref<128x144xf32, #tpu.memory_space<vmem>>, vector<128x16xf32>,
    %83 = vector.extract_strided_slice %67 {offsets = [0, 1, 2, 0], sizes = [2, 8, 8, 16], strides = [1, 1, 1, 1]} : vector<2x10x10x16xf32> to vector<2x8x8x16xf32>
    %84 = vector.shape_cast %83 : vector<2x8x8x16xf32> to vector<128x16xf32>
    %c0_62 = arith.constant 0 : index
    %c80 = arith.constant 80 : index
    %85 = vector.load %arg13[%c0_62, %c80] : memref<128x144xf32, #tpu.memory_space<vmem>>, vector<128x16xf32>
    tpu.vector_store %arg13[%c0_62, %c80], %84 {strides = array<i32>} : memref<128x144xf32, #tpu.memory_space<vmem>>, vector<128x16xf32>,
    %86 = vector.extract_strided_slice %67 {offsets = [0, 2, 0, 0], sizes = [2, 8, 8, 16], strides = [1, 1, 1, 1]} : vector<2x10x10x16xf32> to vector<2x8x8x16xf32>
    %87 = vector.shape_cast %86 : vector<2x8x8x16xf32> to vector<128x16xf32>
    %c0_63 = arith.constant 0 : index
    %c96 = arith.constant 96 : index
    %88 = vector.load %arg13[%c0_63, %c96] : memref<128x144xf32, #tpu.memory_space<vmem>>, vector<128x16xf32>
    tpu.vector_store %arg13[%c0_63, %c96], %87 {strides = array<i32>} : memref<128x144xf32, #tpu.memory_space<vmem>>, vector<128x16xf32>,
    %89 = vector.extract_strided_slice %67 {offsets = [0, 2, 1, 0], sizes = [2, 8, 8, 16], strides = [1, 1, 1, 1]} : vector<2x10x10x16xf32> to vector<2x8x8x16xf32>
    %90 = vector.shape_cast %89 : vector<2x8x8x16xf32> to vector<128x16xf32>
    %c0_64 = arith.constant 0 : index
    %c112 = arith.constant 112 : index
    %91 = vector.load %arg13[%c0_64, %c112] : memref<128x144xf32, #tpu.memory_space<vmem>>, vector<128x16xf32>
    tpu.vector_store %arg13[%c0_64, %c112], %90 {strides = array<i32>} : memref<128x144xf32, #tpu.memory_space<vmem>>, vector<128x16xf32>,
    %92 = vector.extract_strided_slice %67 {offsets = [0, 2, 2, 0], sizes = [2, 8, 8, 16], strides = [1, 1, 1, 1]} : vector<2x10x10x16xf32> to vector<2x8x8x16xf32>
    %93 = vector.shape_cast %92 : vector<2x8x8x16xf32> to vector<128x16xf32>
    %c0_65 = arith.constant 0 : index
    %c128 = arith.constant 128 : index
    %94 = vector.load %arg13[%c0_65, %c128] : memref<128x144xf32, #tpu.memory_space<vmem>>, vector<128x16xf32>
    tpu.vector_store %arg13[%c0_65, %c128], %93 {strides = array<i32>} : memref<128x144xf32, #tpu.memory_space<vmem>>, vector<128x16xf32>,
    %c0_66 = arith.constant 0 : index
    %c0_67 = arith.constant 0 : index
    %95 = vector.load %arg13[%c0_66, %c0_67] : memref<128x144xf32, #tpu.memory_space<vmem>>, vector<128x144xf32>
    %c0_68 = arith.constant 0 : index
    %c0_69 = arith.constant 0 : index
    %96 = vector.load %arg5[%c0_68, %c0_69] : memref<144x32xf32, #tpu.memory_space<vmem>>, vector<144x32xf32>
    %cst_70 = arith.constant dense<0.000000e+00> : vector<128x32xf32>
    %97 = tpu.matmul %95, %96, %cst_70 {dimension_numbers = #tpu.dot_dimension_numbers<[1], [0], [0], [1], [0, 0, 1, 1], [], []>} : vector<128x144xf32>, vector<144x32xf32>, vector<128x32xf32> -> vector<128x32xf32>
    %cst_71 = arith.constant dense<0.000000e+00> : vector<32xf32>
    %98 = vector.multi_reduction <add>, %97, %cst_71 [0] : vector<128x32xf32> to vector<32xf32>
    %99 = vector.shape_cast %98 : vector<32xf32> to vector<1x32xf32>
    %cst_72 = arith.constant 1.280000e+02 : f32
    %100 = vector.broadcast %cst_72 : f32 to vector<1x32xf32>
    %101 = arith.divf %99, %100 : vector<1x32xf32>
    %102 = vector.broadcast %101 : vector<1x32xf32> to vector<128x32xf32>
    %103 = arith.subf %97, %102 : vector<128x32xf32>
    %104 = arith.mulf %103, %103 : vector<128x32xf32>
    %cst_73 = arith.constant dense<0.000000e+00> : vector<32xf32>
    %105 = vector.multi_reduction <add>, %104, %cst_73 [0] : vector<128x32xf32> to vector<32xf32>
    %106 = vector.shape_cast %105 : vector<32xf32> to vector<1x32xf32>
    %cst_74 = arith.constant 1.280000e+02 : f32
    %107 = vector.broadcast %cst_74 : f32 to vector<1x32xf32>
    %108 = arith.divf %106, %107 : vector<1x32xf32>
    %c0_75 = arith.constant 0 : index
    %c0_76 = arith.constant 0 : index
    %109 = vector.load %arg6[%c0_75, %c0_76] : memref<1x32xf32, #tpu.memory_space<vmem>>, vector<1x32xf32>
    %cst_77 = arith.constant 9.99999974E-6 : f32
    %110 = vector.broadcast %cst_77 : f32 to vector<1x32xf32>
    %111 = arith.addf %108, %110 : vector<1x32xf32>
    %112 = math.rsqrt %111 : vector<1x32xf32>
    %113 = arith.mulf %109, %112 : vector<1x32xf32>
    %c0_78 = arith.constant 0 : index
    %c0_79 = arith.constant 0 : index
    %114 = vector.load %arg7[%c0_78, %c0_79] : memref<1x32xf32, #tpu.memory_space<vmem>>, vector<1x32xf32>
    %115 = arith.mulf %101, %113 : vector<1x32xf32>
    %116 = arith.subf %114, %115 : vector<1x32xf32>
    %117 = vector.broadcast %113 : vector<1x32xf32> to vector<128x32xf32>
    %118 = arith.mulf %97, %117 : vector<128x32xf32>
    %119 = vector.broadcast %116 : vector<1x32xf32> to vector<128x32xf32>
    %120 = arith.addf %118, %119 : vector<128x32xf32>
    %cst_80 = arith.constant 0.000000e+00 : f32
    %121 = vector.broadcast %cst_80 : f32 to vector<128x32xf32>
    %122 = arith.maximumf %120, %121 : vector<128x32xf32>
    %123 = vector.shape_cast %122 : vector<128x32xf32> to vector<2x4x2x4x2x32xf32>
    %124 = vector.extract_strided_slice %123 {offsets = [0, 0, 0, 0, 0, 0], sizes = [2, 4, 1, 4, 1, 32], strides = [1, 1, 1, 1, 1, 1]} : vector<2x4x2x4x2x32xf32> to vector<2x4x1x4x1x32xf32>
    %125 = vector.shape_cast %124 : vector<2x4x1x4x1x32xf32> to vector<32x32xf32>
    %c0_81 = arith.constant 0 : index
    %c0_82 = arith.constant 0 : index
    %126 = vector.load %arg14[%c0_81, %c0_82] : memref<32x128xf32, #tpu.memory_space<vmem>>, vector<32x32xf32>
    tpu.vector_store %arg14[%c0_81, %c0_82], %125 {strides = array<i32>} : memref<32x128xf32, #tpu.memory_space<vmem>>, vector<32x32xf32>,
    %127 = vector.extract_strided_slice %123 {offsets = [0, 0, 0, 0, 1, 0], sizes = [2, 4, 1, 4, 1, 32], strides = [1, 1, 1, 1, 1, 1]} : vector<2x4x2x4x2x32xf32> to vector<2x4x1x4x1x32xf32>
    %128 = vector.shape_cast %127 : vector<2x4x1x4x1x32xf32> to vector<32x32xf32>
    %c0_83 = arith.constant 0 : index
    %c32_84 = arith.constant 32 : index
    %129 = vector.load %arg14[%c0_83, %c32_84] : memref<32x128xf32, #tpu.memory_space<vmem>>, vector<32x32xf32>
    tpu.vector_store %arg14[%c0_83, %c32_84], %128 {strides = array<i32>} : memref<32x128xf32, #tpu.memory_space<vmem>>, vector<32x32xf32>,
    %130 = vector.extract_strided_slice %123 {offsets = [0, 0, 1, 0, 0, 0], sizes = [2, 4, 1, 4, 1, 32], strides = [1, 1, 1, 1, 1, 1]} : vector<2x4x2x4x2x32xf32> to vector<2x4x1x4x1x32xf32>
    %131 = vector.shape_cast %130 : vector<2x4x1x4x1x32xf32> to vector<32x32xf32>
    %c0_85 = arith.constant 0 : index
    %c64_86 = arith.constant 64 : index
    %132 = vector.load %arg14[%c0_85, %c64_86] : memref<32x128xf32, #tpu.memory_space<vmem>>, vector<32x32xf32>
    tpu.vector_store %arg14[%c0_85, %c64_86], %131 {strides = array<i32>} : memref<32x128xf32, #tpu.memory_space<vmem>>, vector<32x32xf32>,
    %133 = vector.extract_strided_slice %123 {offsets = [0, 0, 1, 0, 1, 0], sizes = [2, 4, 1, 4, 1, 32], strides = [1, 1, 1, 1, 1, 1]} : vector<2x4x2x4x2x32xf32> to vector<2x4x1x4x1x32xf32>
    %134 = vector.shape_cast %133 : vector<2x4x1x4x1x32xf32> to vector<32x32xf32>
    %c0_87 = arith.constant 0 : index
    %c96_88 = arith.constant 96 : index
    %135 = vector.load %arg14[%c0_87, %c96_88] : memref<32x128xf32, #tpu.memory_space<vmem>>, vector<32x32xf32>
    tpu.vector_store %arg14[%c0_87, %c96_88], %134 {strides = array<i32>} : memref<32x128xf32, #tpu.memory_space<vmem>>, vector<32x32xf32>,
    %c0_89 = arith.constant 0 : index
    %c0_90 = arith.constant 0 : index
    %136 = vector.load %arg14[%c0_89, %c0_90] : memref<32x128xf32, #tpu.memory_space<vmem>>, vector<32x128xf32>
    %c0_91 = arith.constant 0 : index
    %c0_92 = arith.constant 0 : index
    %137 = vector.load %arg8[%c0_91, %c0_92] : memref<128x8xf32, #tpu.memory_space<vmem>>, vector<128x8xf32>
    %cst_93 = arith.constant dense<0.000000e+00> : vector<32x8xf32>
    %138 = tpu.matmul %136, %137, %cst_93 {dimension_numbers = #tpu.dot_dimension_numbers<[1], [0], [0], [1], [0, 0, 1, 1], [], []>} : vector<32x128xf32>, vector<128x8xf32>, vector<32x8xf32> -> vector<32x8xf32>
    %c0_94 = arith.constant 0 : index
    %c0_95 = arith.constant 0 : index
    %139 = vector.load %arg9[%c0_94, %c0_95] : memref<32x8xf32, #tpu.memory_space<vmem>>, vector<32x8xf32>
    tpu.vector_store %arg9[%c0_94, %c0_95], %138 {strides = array<i32>} : memref<32x8xf32, #tpu.memory_space<vmem>>, vector<32x8xf32>,
    return
  }
  func.func @transform_0(%arg0: i32) -> (i32, i32, i32, i32) {
    %c0_i32 = arith.constant 0 : i32
    %c0_i32_0 = arith.constant 0 : i32
    %c0_i32_1 = arith.constant 0 : i32
    %c0_i32_2 = arith.constant 0 : i32
    %c0_i32_3 = arith.constant 0 : i32
    return %c0_i32, %c0_i32_0, %c0_i32_1, %c0_i32_2 : i32, i32, i32, i32
  }
  func.func @transform_1(%arg0: i32) -> (i32, i32) {
    %c0_i32 = arith.constant 0 : i32
    %c0_i32_0 = arith.constant 0 : i32
    %c0_i32_1 = arith.constant 0 : i32
    return %c0_i32, %c0_i32_0 : i32, i32
  }
  func.func @transform_2(%arg0: i32) -> (i32, i32) {
    %c0_i32 = arith.constant 0 : i32
    %c0_i32_0 = arith.constant 0 : i32
    %c0_i32_1 = arith.constant 0 : i32
    return %c0_i32, %c0_i32_0 : i32, i32
  }
  func.func @transform_3(%arg0: i32) -> (i32, i32) {
    %c0_i32 = arith.constant 0 : i32
    %c0_i32_0 = arith.constant 0 : i32
    %c0_i32_1 = arith.constant 0 : i32
    return %c0_i32, %c0_i32_0 : i32, i32
  }
  func.func @transform_4(%arg0: i32) -> (i32, i32) {
    %c0_i32 = arith.constant 0 : i32
    %c0_i32_0 = arith.constant 0 : i32
    %c0_i32_1 = arith.constant 0 : i32
    return %c0_i32, %c0_i32_0 : i32, i32
  }
  func.func @transform_5(%arg0: i32) -> (i32, i32) {
    %c0_i32 = arith.constant 0 : i32
    %c0_i32_0 = arith.constant 0 : i32
    %c0_i32_1 = arith.constant 0 : i32
    return %c0_i32, %c0_i32_0 : i32, i32
  }
  func.func @transform_6(%arg0: i32) -> (i32, i32) {
    %c0_i32 = arith.constant 0 : i32
    %c0_i32_0 = arith.constant 0 : i32
    %c0_i32_1 = arith.constant 0 : i32
    return %c0_i32, %c0_i32_0 : i32, i32
  }
  func.func @transform_7(%arg0: i32) -> (i32, i32) {
    %c0_i32 = arith.constant 0 : i32
    %c0_i32_0 = arith.constant 0 : i32
    %c0_i32_1 = arith.constant 0 : i32
    return %c0_i32, %c0_i32_0 : i32, i32
  }
  func.func @transform_8(%arg0: i32) -> (i32, i32) {
    %c0_i32 = arith.constant 0 : i32
    %c0_i32_0 = arith.constant 0 : i32
    %c0_i32_1 = arith.constant 0 : i32
    return %c0_i32, %c0_i32_0 : i32, i32
  }
}

</mosaic_0001>

<bundles_post_ra>
// kernel: cnn_encoder4_forward.1
= control target key start
LH: loop header
LB: loop body
LE: loop exit
PB: predicated region body
PF: predicated region fallthrough
CT: control target
= control target key end

     0   :  { %vm30_vm0 = vcmask 31744   ;;  %vm33_vm1 = vcmask 25600   ;;  %v16956_v2 = vmov 0.0   ;;  %s16947_s0 = inlined_call_operand.vmem [shape: f32[2,16,16,4], index: 0, kind: input, shape index: {}]   ;;  %s16948_s1 = inlined_call_operand.vmem [shape: f32[36,16], index: 1, kind: input, shape index: {}]   ;;  %s16949_s2 = inlined_call_operand.vmem [shape: f32[1,16], index: 2, kind: input, shape index: {}]   ;;  %s16950_s3 = inlined_call_operand.vmem [shape: f32[1,16], index: 3, kind: input, shape index: {}]   ;;  %s16951_s4 = inlined_call_operand.vmem [shape: f32[144,32], index: 4, kind: input, shape index: {}]   ;;  %s16952_s5 = inlined_call_operand.vmem [shape: f32[1,32], index: 5, kind: input, shape index: {}]   ;;  %s16953_s6 = inlined_call_operand.vmem [shape: f32[1,32], index: 6, kind: input, shape index: {}]   ;;  %s16954_s7 = inlined_call_operand.vmem [shape: f32[128,8], index: 7, kind: input, shape index: {}]   ;;  %s16955_s8 = inlined_call_operand.hbm [shape: f32[32,8], index: 8, kind: output, shape index: {}]  }
   0x1   :  { %v8896_v0 = vld [vmem:[%s16947_s0] sm:$0xff]  ;;  %v8901_v1 = vld [vmem:[%s16947_s0 + $0x8] sm:$0xff]  ;;  %35 = vst.msk [vmem:[#allocation2 + $0x18] sm:$0xff] %vm30_vm0, %v16956_v2  ;;  %36 = vst.msk [vmem:[#allocation2 + $0x20] sm:$0xff] %vm30_vm0, %v16956_v2  ;;  %7045 = vmatprep.subr.mxu1 %v16956_v2 }
   0x2   :  { %37 = vst.msk [vmem:[#allocation2 + $0x28] sm:$0x3] %vm33_vm1, %v16956_v2  ;;  %34 = vst.msk [vmem:[#allocation2 + $0x10] sm:$0x3] %vm33_vm1, %v16956_v2  ;;  %v142_v3 = vld [vmem:[%s16947_s0 + $0x10] sm:$0xff]  ;;  %v143_v4 = vld [vmem:[%s16947_s0 + $0x18] sm:$0xff] }
   0x3   :  { %31 = vst.msk [vmem:[#allocation2] sm:$0xff] %vm30_vm0, %v16956_v2  ;;  %32 = vst.msk [vmem:[#allocation2 + $0x8] sm:$0xff] %vm30_vm0, %v16956_v2  ;;  %v144_v5 = vld [vmem:[%s16947_s0 + $0x20] sm:$0xff]  ;;  %v145_v6 = vld [vmem:[%s16947_s0 + $0x28] sm:$0xff] }
   0x4   :  { %38 = vst.msk [vmem:[#allocation2 + $0x30] sm:$0xff] %vm30_vm0, %v16956_v2  ;;  %39 = vst.msk [vmem:[#allocation2 + $0x38] sm:$0xff] %vm30_vm0, %v16956_v2  ;;  %v146_v7 = vld [vmem:[%s16947_s0 + $0x30] sm:$0xff]  ;;  %v147_v8 = vld [vmem:[%s16947_s0 + $0x38] sm:$0xff] }
   0x5   :  { %40 = vst.msk [vmem:[#allocation2 + $0x40] sm:$0x3] %vm33_vm1, %v16956_v2  ;;  %43 = vst.msk [vmem:[#allocation2 + $0x58] sm:$0x3] %vm33_vm1, %v16956_v2  ;;  %v148_v9 = vld [vmem:[%s16947_s0 + $0x40] sm:$0xff]  ;;  %v149_v10 = vld [vmem:[%s16947_s0 + $0x48] sm:$0xff] }
   0x6   :  { %41 = vst.msk [vmem:[#allocation2 + $0x48] sm:$0xff] %vm30_vm0, %v16956_v2  ;;  %42 = vst.msk [vmem:[#allocation2 + $0x50] sm:$0xff] %vm30_vm0, %v16956_v2 }
   0x7   :  { %44 = vst.msk [vmem:[#allocation2 + $0x60] sm:$0xff] %vm30_vm0, %v16956_v2  ;;  %45 = vst.msk [vmem:[#allocation2 + $0x68] sm:$0xff] %vm30_vm0, %v16956_v2 }
   0x8   :  { %46 = vst.msk [vmem:[#allocation2 + $0x70] sm:$0x3] %vm33_vm1, %v16956_v2  ;;  %49 = vst.msk [vmem:[#allocation2 + $0x88] sm:$0x3] %vm33_vm1, %v16956_v2 }
   0x9   :  { %47 = vst.msk [vmem:[#allocation2 + $0x78] sm:$0xff] %vm30_vm0, %v16956_v2  ;;  %48 = vst.msk [vmem:[#allocation2 + $0x80] sm:$0xff] %vm30_vm0, %v16956_v2 }
   0xa   :  { %50 = vst.msk [vmem:[#allocation2 + $0x90] sm:$0xff] %vm30_vm0, %v16956_v2  ;;  %51 = vst.msk [vmem:[#allocation2 + $0x98] sm:$0xff] %vm30_vm0, %v16956_v2 }
   0xb   :  { %52 = vst.msk [vmem:[#allocation2 + $0xa0] sm:$0x3] %vm33_vm1, %v16956_v2  ;;  %55 = vst.msk [vmem:[#allocation2 + $0xb8] sm:$0x3] %vm33_vm1, %v16956_v2 }
   0xc   :  { %53 = vst.msk [vmem:[#allocation2 + $0xa8] sm:$0xff] %vm30_vm0, %v16956_v2  ;;  %54 = vst.msk [vmem:[#allocation2 + $0xb0] sm:$0xff] %vm30_vm0, %v16956_v2 }
   0xd   :  { %56 = vst.msk [vmem:[#allocation2 + $0xc0] sm:$0xff] %vm30_vm0, %v16956_v2  ;;  %57 = vst.msk [vmem:[#allocation2 + $0xc8] sm:$0xff] %vm30_vm0, %v16956_v2 }
   0xe   :  { %58 = vst.msk [vmem:[#allocation2 + $0xd0] sm:$0x3] %vm33_vm1, %v16956_v2  ;;  %61 = vst.msk [vmem:[#allocation2 + $0xe8] sm:$0x3] %vm33_vm1, %v16956_v2 }
   0xf   :  { %59 = vst.msk [vmem:[#allocation2 + $0xd8] sm:$0xff] %vm30_vm0, %v16956_v2  ;;  %60 = vst.msk [vmem:[#allocation2 + $0xe0] sm:$0xff] %vm30_vm0, %v16956_v2 }
  0x10   :  { %62 = vst.msk [vmem:[#allocation2 + $0xf0] sm:$0xff] %vm30_vm0, %v16956_v2  ;;  %63 = vst.msk [vmem:[#allocation2 + $0xf8] sm:$0xff] %vm30_vm0, %v16956_v2 }
  0x11   :  { %64 = vst.msk [vmem:[#allocation2 + $0x100] sm:$0x3] %vm33_vm1, %v16956_v2  ;;  %67 = vst.msk [vmem:[#allocation2 + $0x118] sm:$0x3] %vm33_vm1, %v16956_v2 }
  0x12   :  { %65 = vst.msk [vmem:[#allocation2 + $0x108] sm:$0xff] %vm30_vm0, %v16956_v2  ;;  %66 = vst.msk [vmem:[#allocation2 + $0x110] sm:$0xff] %vm30_vm0, %v16956_v2 }
  0x13   :  { %68 = vst.msk [vmem:[#allocation2 + $0x120] sm:$0xff] %vm30_vm0, %v16956_v2  ;;  %69 = vst.msk [vmem:[#allocation2 + $0x128] sm:$0xff] %vm30_vm0, %v16956_v2 }
  0x14   :  { %70 = vst.msk [vmem:[#allocation2 + $0x130] sm:$0x3] %vm33_vm1, %v16956_v2  ;;  %73 = vst.msk [vmem:[#allocation2 + $0x148] sm:$0x3] %vm33_vm1, %v16956_v2 }
  0x15   :  { %71 = vst.msk [vmem:[#allocation2 + $0x138] sm:$0xff] %vm30_vm0, %v16956_v2  ;;  %72 = vst.msk [vmem:[#allocation2 + $0x140] sm:$0xff] %vm30_vm0, %v16956_v2 }
  0x16   :  { %74 = vst.msk [vmem:[#allocation2 + $0x150] sm:$0xff] %vm30_vm0, %v16956_v2  ;;  %75 = vst.msk [vmem:[#allocation2 + $0x158] sm:$0xff] %vm30_vm0, %v16956_v2 }
  0x17   :  { %76 = vst.msk [vmem:[#allocation2 + $0x160] sm:$0x3] %vm33_vm1, %v16956_v2  ;;  %79 = vst.msk [vmem:[#allocation2 + $0x178] sm:$0x3] %vm33_vm1, %v16956_v2 }
  0x18   :  { %77 = vst.msk [vmem:[#allocation2 + $0x168] sm:$0xff] %vm30_vm0, %v16956_v2  ;;  %78 = vst.msk [vmem:[#allocation2 + $0x170] sm:$0xff] %vm30_vm0, %v16956_v2 }
  0x19   :  { %80 = vst.msk [vmem:[#allocation2 + $0x180] sm:$0xff] %vm30_vm0, %v16956_v2  ;;  %81 = vst.msk [vmem:[#allocation2 + $0x188] sm:$0xff] %vm30_vm0, %v16956_v2 }
  0x1a   :  { %82 = vst.msk [vmem:[#allocation2 + $0x190] sm:$0x3] %vm33_vm1, %v16956_v2  ;;  %85 = vst.msk [vmem:[#allocation2 + $0x1a8] sm:$0x3] %vm33_vm1, %v16956_v2 }
  0x1b   :  { %83 = vst.msk [vmem:[#allocation2 + $0x198] sm:$0xff] %vm30_vm0, %v16956_v2  ;;  %84 = vst.msk [vmem:[#allocation2 + $0x1a0] sm:$0xff] %vm30_vm0, %v16956_v2 }
  0x1c   :  { %86 = vst.msk [vmem:[#allocation2 + $0x1b0] sm:$0xff] %vm30_vm0, %v16956_v2  ;;  %87 = vst.msk [vmem:[#allocation2 + $0x1b8] sm:$0xff] %vm30_vm0, %v16956_v2 }
  0x1d   :  { %88 = vst.msk [vmem:[#allocation2 + $0x1c0] sm:$0x3] %vm33_vm1, %v16956_v2  ;;  %91 = vst.msk [vmem:[#allocation2 + $0x1d8] sm:$0x3] %vm33_vm1, %v16956_v2 }
  0x1e   :  { %89 = vst.msk [vmem:[#allocation2 + $0x1c8] sm:$0xff] %vm30_vm0, %v16956_v2  ;;  %90 = vst.msk [vmem:[#allocation2 + $0x1d0] sm:$0xff] %vm30_vm0, %v16956_v2 }
  0x1f   :  { %92 = vst.msk [vmem:[#allocation2 + $0x1e0] sm:$0xff] %vm30_vm0, %v16956_v2  ;;  %93 = vst.msk [vmem:[#allocation2 + $0x1e8] sm:$0xff] %vm30_vm0, %v16956_v2 }
  0x20   :  { %94 = vst.msk [vmem:[#allocation2 + $0x1f0] sm:$0x3] %vm33_vm1, %v16956_v2  ;;  %97 = vst.msk [vmem:[#allocation2 + $0x208] sm:$0x3] %vm33_vm1, %v16956_v2 }
  0x21   :  { %95 = vst.msk [vmem:[#allocation2 + $0x1f8] sm:$0xff] %vm30_vm0, %v16956_v2  ;;  %96 = vst.msk [vmem:[#allocation2 + $0x200] sm:$0xff] %vm30_vm0, %v16956_v2 }
  0x22   :  { %98 = vst.msk [vmem:[#allocation2 + $0x210] sm:$0xff] %vm30_vm0, %v16956_v2  ;;  %99 = vst.msk [vmem:[#allocation2 + $0x218] sm:$0xff] %vm30_vm0, %v16956_v2 }
  0x23   :  { %100 = vst.msk [vmem:[#allocation2 + $0x220] sm:$0x3] %vm33_vm1, %v16956_v2  ;;  %103 = vst.msk [vmem:[#allocation2 + $0x238] sm:$0x3] %vm33_vm1, %v16956_v2 }
  0x24   :  { %101 = vst.msk [vmem:[#allocation2 + $0x228] sm:$0xff] %vm30_vm0, %v16956_v2  ;;  %102 = vst.msk [vmem:[#allocation2 + $0x230] sm:$0xff] %vm30_vm0, %v16956_v2 }
  0x25   :  { %104 = vst.msk [vmem:[#allocation2 + $0x240] sm:$0xff] %vm30_vm0, %v16956_v2  ;;  %105 = vst.msk [vmem:[#allocation2 + $0x248] sm:$0xff] %vm30_vm0, %v16956_v2 }
  0x26   :  { %106 = vst.msk [vmem:[#allocation2 + $0x250] sm:$0x3] %vm33_vm1, %v16956_v2  ;;  %109 = vst.msk [vmem:[#allocation2 + $0x268] sm:$0x3] %vm33_vm1, %v16956_v2 }
  0x27   :  { %107 = vst.msk [vmem:[#allocation2 + $0x258] sm:$0xff] %vm30_vm0, %v16956_v2  ;;  %108 = vst.msk [vmem:[#allocation2 + $0x260] sm:$0xff] %vm30_vm0, %v16956_v2 }
  0x28   :  { %110 = vst.msk [vmem:[#allocation2 + $0x270] sm:$0xff] %vm30_vm0, %v16956_v2  ;;  %111 = vst.msk [vmem:[#allocation2 + $0x278] sm:$0xff] %vm30_vm0, %v16956_v2 }
  0x29   :  { %112 = vst.msk [vmem:[#allocation2 + $0x280] sm:$0x3] %vm33_vm1, %v16956_v2  ;;  %115 = vst.msk [vmem:[#allocation2 + $0x298] sm:$0x3] %vm33_vm1, %v16956_v2 }
  0x2a   :  { %113 = vst.msk [vmem:[#allocation2 + $0x288] sm:$0xff] %vm30_vm0, %v16956_v2  ;;  %114 = vst.msk [vmem:[#allocation2 + $0x290] sm:$0xff] %vm30_vm0, %v16956_v2 }
  0x2b   :  { %116 = vst.msk [vmem:[#allocation2 + $0x2a0] sm:$0xff] %vm30_vm0, %v16956_v2  ;;  %117 = vst.msk [vmem:[#allocation2 + $0x2a8] sm:$0xff] %vm30_vm0, %v16956_v2 }
  0x2c   :  { %118 = vst.msk [vmem:[#allocation2 + $0x2b0] sm:$0x3] %vm33_vm1, %v16956_v2  ;;  %121 = vst.msk [vmem:[#allocation2 + $0x2c8] sm:$0x3] %vm33_vm1, %v16956_v2 }
  0x2d   :  { %119 = vst.msk [vmem:[#allocation2 + $0x2b8] sm:$0xff] %vm30_vm0, %v16956_v2  ;;  %120 = vst.msk [vmem:[#allocation2 + $0x2c0] sm:$0xff] %vm30_vm0, %v16956_v2 }
  0x2e   :  { %122 = vst.msk [vmem:[#allocation2 + $0x2d0] sm:$0xff] %vm30_vm0, %v16956_v2  ;;  %123 = vst.msk [vmem:[#allocation2 + $0x2d8] sm:$0xff] %vm30_vm0, %v16956_v2 }
  0x2f   :  { %124 = vst.msk [vmem:[#allocation2 + $0x2e0] sm:$0x3] %vm33_vm1, %v16956_v2  ;;  %127 = vst.msk [vmem:[#allocation2 + $0x2f8] sm:$0x3] %vm33_vm1, %v16956_v2 }
  0x30   :  { %125 = vst.msk [vmem:[#allocation2 + $0x2e8] sm:$0xff] %vm30_vm0, %v16956_v2  ;;  %126 = vst.msk [vmem:[#allocation2 + $0x2f0] sm:$0xff] %vm30_vm0, %v16956_v2 }
  0x31   :  { %128 = vst.msk [vmem:[#allocation2 + $0x300] sm:$0xff] %vm30_vm0, %v16956_v2  ;;  %129 = vst.msk [vmem:[#allocation2 + $0x308] sm:$0xff] %vm30_vm0, %v16956_v2 }
  0x32   :  { %130 = vst.msk [vmem:[#allocation2 + $0x310] sm:$0x3] %vm33_vm1, %v16956_v2  ;;  %133 = vst.msk [vmem:[#allocation2 + $0x328] sm:$0x3] %vm33_vm1, %v16956_v2 }
  0x33   :  { %131 = vst.msk [vmem:[#allocation2 + $0x318] sm:$0xff] %vm30_vm0, %v16956_v2  ;;  %132 = vst.msk [vmem:[#allocation2 + $0x320] sm:$0xff] %vm30_vm0, %v16956_v2 }
  0x34   :  { %134 = vst.msk [vmem:[#allocation2 + $0x330] sm:$0xff] %vm30_vm0, %v16956_v2  ;;  %135 = vst.msk [vmem:[#allocation2 + $0x338] sm:$0xff] %vm30_vm0, %v16956_v2 }
  0x35   :  { %136 = vst.msk [vmem:[#allocation2 + $0x340] sm:$0x3] %vm33_vm1, %v16956_v2  ;;  %139 = vst.msk [vmem:[#allocation2 + $0x358] sm:$0x3] %vm33_vm1, %v16956_v2 }
  0x36   :  { %137 = vst.msk [vmem:[#allocation2 + $0x348] sm:$0xff] %vm30_vm0, %v16956_v2  ;;  %138 = vst.msk [vmem:[#allocation2 + $0x350] sm:$0xff] %vm30_vm0, %v16956_v2 }
  0x37   :  { %205 = vst.msk [vmem:[#allocation2 + $0x19] sm:$0xff] %vm30_vm0, %v8896_v0  ;;  %206 = vst.msk [vmem:[#allocation2 + $0x21] sm:$0xff] %vm30_vm0, %v8901_v1 }
  0x38   :  { %207 = vst.msk [vmem:[#allocation2 + $0x31] sm:$0xff] %vm30_vm0, %v142_v3  ;;  %208 = vst.msk [vmem:[#allocation2 + $0x39] sm:$0xff] %vm30_vm0, %v143_v4 }
  0x39   :  { %209 = vst.msk [vmem:[#allocation2 + $0x49] sm:$0xff] %vm30_vm0, %v144_v5  ;;  %210 = vst.msk [vmem:[#allocation2 + $0x51] sm:$0xff] %vm30_vm0, %v145_v6 }
  0x3a   :  { %211 = vst.msk [vmem:[#allocation2 + $0x61] sm:$0xff] %vm30_vm0, %v146_v7  ;;  %212 = vst.msk [vmem:[#allocation2 + $0x69] sm:$0xff] %vm30_vm0, %v147_v8 }
  0x3b   :  { %213 = vst.msk [vmem:[#allocation2 + $0x79] sm:$0xff] %vm30_vm0, %v148_v9 }
  0x3c   :  { %13 = vsyncpa [#allocation8], 0  ;;  %214 = vst.msk [vmem:[#allocation2 + $0x81] sm:$0xff] %vm30_vm0, %v149_v10  ;;  %v269_v11 = vld [vmem:[#allocation2] sm:$0xff]  ;;  %v270_v12 = vld [vmem:[#allocation2 + $0x8] sm:$0xff]  ;;  %vm955_vm2 = vcmask 1045504  }
  0x3d   :  { %vm537_vm3 = vcmask 1046528   ;;  %v271_v13 = vld [vmem:[#allocation2 + $0x10] sm:$0x3]  ;;  %v956_v16 = vrot.slane %v269_v11, 2  ;;  %v957_v17 = vrot.slane %v270_v12, 2  ;;  %377 = vst.msk [vmem:[#allocation3] sm:$0xff] %vm30_vm0, %v269_v11 }
  0x3e   :  { %v9156_v14 = vld [vmem:[#allocation2 + $0x20] sm:$0xff]  ;;  %v272_v15 = vld [vmem:[#allocation2 + $0x18] sm:$0xff]  ;;  %378 = vst.msk [vmem:[#allocation3 + $0x8] sm:$0xff] %vm30_vm0, %v270_v12  ;;  %v538_v18 = vrot.slane %v269_v11, 1  ;;  %v539_v19 = vrot.slane %v270_v12, 1  ;;  %s8832_s25 = smov 12  }
  0x3f   :  { %1379 = vrot.lane.b32.xlu1 %v9156_v14, %s8832_s25  ;;  %380 = vst.msk [vmem:[#allocation3 + $0x18] sm:$0xff] %vm30_vm0, %v9156_v14  ;;  %1377 = vrot.lane.b32.xlu0 %v272_v15, %s8832_s25  ;;  %379 = vst.msk [vmem:[#allocation3 + $0x10] sm:$0xff] %vm30_vm0, %v272_v15  ;;  %v958_v20 = vsel %vm955_vm2, %v956_v16, %v957_v17  ;;  %v959_v22 = vrot.slane %v271_v13, 2  ;;  %v541_v23 = vrot.slane %v271_v13, 1  ;;  %v9168_v24 = vld [vmem:[#allocation2 + $0x30] sm:$0xff]  ;;  %v9170_v25 = vld [vmem:[#allocation2 + $0x38] sm:$0xff] }
  0x40   :  { %v540_v21 = vsel %vm537_vm3, %v538_v18, %v539_v19  ;;  %381 = vst.msk [vmem:[#allocation3 + $0x20] sm:$0xff] %vm30_vm0, %v9168_v24  ;;  %382 = vst.msk [vmem:[#allocation3 + $0x28] sm:$0xff] %vm30_vm0, %v9170_v25  ;;  %v9176_v26 = vld [vmem:[#allocation2 + $0x48] sm:$0xff]  ;;  %v9178_v27 = vld [vmem:[#allocation2 + $0x50] sm:$0xff]  ;;  %s8833_s26 = smov 8   ;;  %s8834_s27 = smov 4  }
  0x41   :  { %383 = vst.msk [vmem:[#allocation3 + $0x30] sm:$0xff] %vm30_vm0, %v9176_v26  ;;  %384 = vst.msk [vmem:[#allocation3 + $0x38] sm:$0xff] %vm30_vm0, %v9178_v27  ;;  %v9184_v28 = vld [vmem:[#allocation2 + $0x60] sm:$0xff]  ;;  %v9186_v29 = vld [vmem:[#allocation2 + $0x68] sm:$0xff]  ;;  %v960_v32 = vsel %vm955_vm2, %v957_v17, %v959_v22  ;;  %v542_v33 = vsel %vm537_vm3, %v539_v19, %v541_v23  ;;  %v543_v34 = vrot.slane %v272_v15, 1  ;;  %v544_v35 = vrot.slane %v9156_v14, 1 }
  0x42   :  { %v9188_v30 = vld [vmem:[#allocation2 + $0x78] sm:$0xff]  ;;  %385 = vst.msk [vmem:[#allocation3 + $0x40] sm:$0xff] %vm30_vm0, %v9184_v28  ;;  %386 = vst.msk [vmem:[#allocation3 + $0x48] sm:$0xff] %vm30_vm0, %v9186_v29  ;;  %v274_v36 = vld [vmem:[#allocation2 + $0x28] sm:$0x3]  ;;  %v961_v38 = vrot.slane %v272_v15, 2 }
  0x43   :  { %1116 = vrot.lane.b32.xlu1 %v958_v20, %s8833_s26  ;;  %698 = vrot.lane.b32.xlu0 %v540_v21, %s8834_s27  ;;  %387 = vst.msk [vmem:[#allocation3 + $0x50] sm:$0xff] %vm30_vm0, %v9188_v30  ;;  %v9198_v31 = vld [vmem:[#allocation2 + $0x80] sm:$0xff]  ;;  %v545_v37 = vsel %vm537_vm3, %v543_v34, %v544_v35  ;;  %v962_v39 = vrot.slane %v9156_v14, 2  ;;  %v546_v40 = vrot.slane %v274_v36, 1  ;;  %s8835_s28 = smov 16   ;;  %v150_v43 = vld [vmem:[%s16947_s0 + $0x50] sm:$0xff] }
  0x44   :  { %388 = vst.msk [vmem:[#allocation3 + $0x58] sm:$0xff] %vm30_vm0, %v9198_v31  ;;  %s8836_s9 = smov 20   ;;  %215 = vst.msk [vmem:[#allocation2 + $0x91] sm:$0xff] %vm30_vm0, %v150_v43  ;;  %v964_v44 = vrot.slane %v274_v36, 2  ;;  %v151_v45 = vld [vmem:[%s16947_s0 + $0x58] sm:$0xff]  ;;  %s8837_s12 = smov 24  }
  0x45   :  { %v963_v41 = vsel %vm955_vm2, %v961_v38, %v962_v39  ;;  %v547_v42 = vsel %vm537_vm3, %v544_v35, %v546_v40  ;;  %216 = vst.msk [vmem:[#allocation2 + $0x99] sm:$0xff] %vm30_vm0, %v151_v45  ;;  %v548_v48 = vrot.slane %v9168_v24, 1  ;;  %v549_v49 = vrot.slane %v9170_v25, 1  ;;  %v277_v52 = vld [vmem:[#allocation2 + $0x40] sm:$0x3]  ;;  %s8838_s13 = smov 28  }
  0x46   :  { %v965_v46 = vsel %vm955_vm2, %v962_v39, %v964_v44  ;;  %v3035_v53 = vld [vmem:[%s16948_s1 + $0x20] sm:$0xf]  ;;  %vm3229_vm4 = vcmask 1043456   ;;  %v966_v54 = vrot.slane %v9168_v24, 2  ;;  %v967_v55 = vrot.slane %v9170_v25, 2  ;;  %v3034_v57 = vld [vmem:[%s16948_s1 + $0x18] sm:$0xff] }
  0x47   :  { %1118 = vrot.lane.b32.xlu1 %v960_v32, %s8833_s26  ;;  %700 = vrot.lane.b32.xlu0 %v542_v33, %s8834_s27  ;;  %v550_v51 = vsel %vm537_vm3, %v548_v48, %v549_v49  ;;  %v551_v56 = vrot.slane %v277_v52, 1  ;;  %v3033_v58 = vld [vmem:[%s16948_s1 + $0x10] sm:$0xff]  ;;  %v3032_v61 = vld [vmem:[%s16948_s1 + $0x8] sm:$0xff]  ;;  %s8839_s22 = smov 32   ;;  %v969_v63 = vrot.slane %v277_v52, 2  ;;  %v553_v5 = vrot.slane %v9176_v26, 1 }
  0x48   :  { %8644 = vmatprep.subr.msk.mxu0 %vm3229_vm4, %v3035_v53  ;;  %v968_v59 = vsel %vm955_vm2, %v966_v54, %v967_v55  ;;  %v3031_v62 = vld [vmem:[%s16948_s1] sm:$0xff]  ;;  %v153_v3 = vld [vmem:[%s16947_s0 + $0x68] sm:$0xff]  ;;  %v554_v6 = vrot.slane %v9178_v27, 1  ;;  %v280_v9 = vld [vmem:[#allocation2 + $0x58] sm:$0x3]  ;;  %v971_v10 = vrot.slane %v9176_v26, 2 }
  0x49   :  { %8645 = vmatpush3.msk.msra.mxu0 %vm3229_vm4, %v3035_v53  ;;  %v552_v60 = vsel %vm537_vm3, %v549_v49, %v551_v56  ;;  %v970_v0 = vsel %vm955_vm2, %v967_v55, %v969_v63  ;;  %v152_v1 = vld [vmem:[%s16947_s0 + $0x60] sm:$0xff]  ;;  %218 = vst.msk [vmem:[#allocation2 + $0xb1] sm:$0xff] %vm30_vm0, %v153_v3  ;;  %v972_v11 = vrot.slane %v9178_v27, 2  ;;  %v556_v12 = vrot.slane %v280_v9, 1  ;;  %v154_v17 = vld [vmem:[%s16947_s0 + $0x70] sm:$0xff]  ;;  %v155_v18 = vld [vmem:[%s16947_s0 + $0x78] sm:$0xff] }
  0x4a   :  { %8646 = vmatprep.subr.mxu0 %v3034_v57  ;;  %217 = vst.msk [vmem:[#allocation2 + $0xa9] sm:$0xff] %vm30_vm0, %v152_v1  ;;  %v555_v8 = vsel %vm537_vm3, %v553_v5, %v554_v6  ;;  %v974_v15 = vrot.slane %v280_v9, 2  ;;  %219 = vst.msk [vmem:[#allocation2 + $0xc1] sm:$0xff] %vm30_vm0, %v154_v17  ;;  %v558_v20 = vrot.slane %v9184_v28, 1  ;;  %v559_v21 = vrot.slane %v9186_v29, 1  ;;  %v156_v35 = vld [vmem:[%s16947_s0 + $0x80] sm:$0xff] }
  0x4b   :  { %702 = vrot.lane.b32.xlu1 %v545_v37, %s8834_s27  ;;  %1646 = vrot.lane.b32.xlu0 %v545_v37, %s8835_s28  ;;  %v9226_v47 = vld [vmem:[#allocation2 + $0x90] sm:$0xff]  ;;  %v973_v13 = vsel %vm955_vm2, %v971_v10, %v972_v11  ;;  %v557_v14 = vsel %vm537_vm3, %v554_v6, %v556_v12  ;;  %220 = vst.msk [vmem:[#allocation2 + $0xc9] sm:$0xff] %vm30_vm0, %v155_v18  ;;  %221 = vst.msk [vmem:[#allocation2 + $0xd9] sm:$0xff] %vm30_vm0, %v156_v35  ;;  %vm890_vm5 = vcmask 64544   ;;  %v157_v37 = vld [vmem:[%s16947_s0 + $0x88] sm:$0xff]  ;;  %vm1308_vm6 = vcmask 97344  }
  0x4c   :  { %389 = vst.msk [vmem:[#allocation3 + $0x60] sm:$0xff] %vm30_vm0, %v9226_v47  ;;  %v9238_v50 = vld [vmem:[#allocation2 + $0x98] sm:$0xff]  ;;  %8647 = vmatpush3.msra.mxu0 %v3034_v57  ;;  %v975_v16 = vsel %vm955_vm2, %v972_v11, %v974_v15  ;;  %v560_v23 = vsel %vm537_vm3, %v558_v20, %v559_v21  ;;  %222 = vst.msk [vmem:[#allocation2 + $0xe1] sm:$0xff] %vm30_vm0, %v157_v37  ;;  %vm1569_vm7 = vcmask 130144   ;;  %vm1838_vm8 = vcmask 162944   ;;  %v158_v1 = vld [vmem:[%s16947_s0 + $0x90] sm:$0xff] }
  0x4d   :  { %390 = vst.msk [vmem:[#allocation3 + $0x68] sm:$0xff] %vm30_vm0, %v9238_v50  ;;  %8648 = vmatprep.subr.mxu0 %v3033_v58  ;;  %vm2105_vm9 = vcmask 195744   ;;  %v981_v52 = vrot.slane %v9188_v30, 2  ;;  %v982_v53 = vrot.slane %v9198_v31, 2  ;;  %vm2366_vm10 = vcmask 228544   ;;  %223 = vst.msk [vmem:[#allocation2 + $0xf1] sm:$0xff] %vm30_vm0, %v158_v1 }
  0x4e   :  { %8649 = vmatpush3.msra.mxu0 %v3033_v58  ;;  %vm2635_vm11 = vcmask 261344   ;;  %v159_v6 = vld [vmem:[%s16947_s0 + $0x98] sm:$0xff]  ;;  %vm2902_vm12 = vcmask 294144   ;;  %v568_v11 = vrot.slane %v9226_v47, 1  ;;  %v569_v12 = vrot.slane %v9238_v50, 1  ;;  %s8845_s24 = smov 112  }
  0x4f   :  { %1913 = vrot.lane.b32.xlu1 %v963_v41, %s8836_s9  ;;  %1648 = vrot.lane.b32.xlu0 %v547_v42, %s8835_s28  ;;  %v983_v57 = vsel %vm955_vm2, %v981_v52, %v982_v53  ;;  %224 = vst.msk [vmem:[#allocation2 + $0xf9] sm:$0xff] %vm30_vm0, %v159_v6  ;;  %v289_v20 = vld [vmem:[#allocation2 + $0xa0] sm:$0x3]  ;;  %vm3036_vm13 = vcmask 293888   ;;  %vm3618_vm14 = vcmask 130048   ;;  %vm5027_vm15 = vcmask 123904  }
  0x50   :  { %8650 = vmatprep.subr.mxu0 %v3032_v61  ;;  %5924 = vst.msk [vmem:[#allocation4] sm:$0xff] %vm3618_vm14, %v16956_v2  ;;  %5926 = vst.msk [vmem:[#allocation4 + $0x10] sm:$0xff] %vm3618_vm14, %v16956_v2  ;;  %vm6094_vm1 = vcmask 1042434   ;;  %vm6096_vm4 = vcmask 1043459  }
  0x51   :  { %8651 = vmatpush3.msra.mxu0 %v3032_v61  ;;  %v9285_v4 = vld [vmem:[#allocation2 + $0xa8] sm:$0xff]  ;;  %v9297_v7 = vld [vmem:[#allocation2 + $0xb0] sm:$0xff]  ;;  %v9329_v19 = vld [vmem:[#allocation2 + $0xc0] sm:$0xff]  ;;  %5928 = vst.msk [vmem:[#allocation4 + $0x20] sm:$0xff] %vm3618_vm14, %v16956_v2 }
  0x52   :  { %8652 = vmatprep.subr.mxu0 %v3031_v62  ;;  %391 = vst.msk [vmem:[#allocation3 + $0x70] sm:$0xff] %vm30_vm0, %v9285_v4  ;;  %392 = vst.msk [vmem:[#allocation3 + $0x78] sm:$0xff] %vm30_vm0, %v9297_v7  ;;  %v9341_v22 = vld [vmem:[#allocation2 + $0xc8] sm:$0xff]  ;;  %v9374_v40 = vld [vmem:[#allocation2 + $0xd8] sm:$0xff] }
  0x53   :  { %1120 = vrot.lane.b32.xlu1 %v963_v41, %s8833_s26  ;;  %704 = vrot.lane.b32.xlu0 %v547_v42, %s8834_s27  ;;  %393 = vst.msk [vmem:[#allocation3 + $0x80] sm:$0xff] %vm30_vm0, %v9329_v19  ;;  %394 = vst.msk [vmem:[#allocation3 + $0x88] sm:$0xff] %vm30_vm0, %v9341_v22  ;;  %v563_v41 = vrot.slane %v9188_v30, 1  ;;  %v564_v42 = vrot.slane %v9198_v31, 1  ;;  %v9390_v45 = vld [vmem:[#allocation2 + $0xe0] sm:$0xff] }
  0x54   :  { %8653 = vmatpush3.msra.mxu0 %v3031_v62  ;;  %395 = vst.msk [vmem:[#allocation3 + $0x90] sm:$0xff] %vm30_vm0, %v9374_v40  ;;  %396 = vst.msk [vmem:[#allocation3 + $0x98] sm:$0xff] %vm30_vm0, %v9390_v45  ;;  %v9437_v10 = vld [vmem:[#allocation2 + $0xf0] sm:$0xff] }
  0x55   :  { %397 = vst.msk [vmem:[#allocation3 + $0xa0] sm:$0xff] %vm30_vm0, %v9437_v10 }
  0x56   :  { %v9451_v15 = vld [vmem:[#allocation2 + $0xf8] sm:$0xff]  ;;  %5930 = vst.msk [vmem:[#allocation4 + $0x30] sm:$0xff] %vm3618_vm14, %v16956_v2  ;;  %5932 = vst.msk [vmem:[#allocation4 + $0x40] sm:$0xff] %vm3618_vm14, %v16956_v2 }
  0x57   :  { %2174 = vrot.lane.b32.xlu1 %v9168_v24, %s8837_s12  ;;  %1915 = vrot.lane.b32.xlu0 %v965_v46, %s8836_s9  ;;  %398 = vst.msk [vmem:[#allocation3 + $0xa8] sm:$0xff] %vm30_vm0, %v9451_v15 }
  0x58   :  { %5934 = vst.msk [vmem:[#allocation4 + $0x50] sm:$0xff] %vm3618_vm14, %v16956_v2  ;;  %5936 = vst.msk [vmem:[#allocation4 + $0x60] sm:$0xff] %vm3618_vm14, %v16956_v2 }
  0x59   :  { %5938 = vst.msk [vmem:[#allocation4 + $0x70] sm:$0xff] %vm3618_vm14, %v16956_v2  ;;  %5940 = vst.msk [vmem:[#allocation4 + $0x80] sm:$0xff] %vm3618_vm14, %v16956_v2 }
  0x5a   :  { %5942 = vst.msk [vmem:[#allocation4 + $0x90] sm:$0xff] %vm3618_vm14, %v16956_v2  ;;  %5944 = vst.msk [vmem:[#allocation4 + $0xa0] sm:$0xff] %vm3618_vm14, %v16956_v2 }
  0x5b   :  { %1381 = vrot.lane.b32.xlu1 %v9168_v24, %s8832_s25  ;;  %1122 = vrot.lane.b32.xlu0 %v965_v46, %s8833_s26  ;;  %v283_v24 = vld [vmem:[#allocation2 + $0x70] sm:$0x3]  ;;  %v565_v46 = vsel %vm537_vm3, %v563_v41, %v564_v42  ;;  %5946 = vst.msk [vmem:[#allocation4 + $0xb0] sm:$0xff] %vm3618_vm14, %v16956_v2  ;;  %5948 = vst.msk [vmem:[#allocation4 + $0xc0] sm:$0xff] %vm3618_vm14, %v16956_v2 }
  0x5c   :  { %v979_v34 = vrot.slane %v283_v24, 2  ;;  %5950 = vst.msk [vmem:[#allocation4 + $0xd0] sm:$0xff] %vm3618_vm14, %v16956_v2  ;;  %5952 = vst.msk [vmem:[#allocation4 + $0xe0] sm:$0xff] %vm3618_vm14, %v16956_v2 }
  0x5d   :  { %5954 = vst.msk [vmem:[#allocation4 + $0xf0] sm:$0xff] %vm3618_vm14, %v16956_v2  ;;  %5956 = vst.msk [vmem:[#allocation4 + $0x100] sm:$0xff] %vm3618_vm14, %v16956_v2 }
  0x5e   :  { %5958 = vst.msk [vmem:[#allocation4 + $0x110] sm:$0xff] %vm3618_vm14, %v16956_v2  ;;  %5960 = vst.msk [vmem:[#allocation4 + $0x120] sm:$0xff] %vm3618_vm14, %v16956_v2 }
  0x5f   :  { %2443 = vrot.lane.b32.xlu1 %v550_v51, %s8838_s13  ;;  %2176 = vrot.lane.b32.xlu0 %v9170_v25, %s8837_s12  ;;  %5962 = vst.msk [vmem:[#allocation4 + $0x130] sm:$0xff] %vm3618_vm14, %v16956_v2 }
  0x60   :  { %5925 = vst.msk [vmem:[#allocation4 + $0x8] sm:$0x3] %vm5027_vm15, %v16956_v2  ;;  %5927 = vst.msk [vmem:[#allocation4 + $0x18] sm:$0x3] %vm5027_vm15, %v16956_v2 }
  0x61   :  { %5929 = vst.msk [vmem:[#allocation4 + $0x28] sm:$0x3] %vm5027_vm15, %v16956_v2  ;;  %5931 = vst.msk [vmem:[#allocation4 + $0x38] sm:$0x3] %vm5027_vm15, %v16956_v2 }
  0x62   :  { %5933 = vst.msk [vmem:[#allocation4 + $0x48] sm:$0x3] %vm5027_vm15, %v16956_v2  ;;  %5935 = vst.msk [vmem:[#allocation4 + $0x58] sm:$0x3] %vm5027_vm15, %v16956_v2 }
  0x63   :  { %1650 = vrot.lane.b32.xlu1 %v550_v51, %s8835_s28  ;;  %1383 = vrot.lane.b32.xlu0 %v9170_v25, %s8832_s25  ;;  %v976_v25 = vrot.slane %v9184_v28, 2  ;;  %5937 = vst.msk [vmem:[#allocation4 + $0x68] sm:$0x3] %vm5027_vm15, %v16956_v2  ;;  %5939 = vst.msk [vmem:[#allocation4 + $0x78] sm:$0x3] %vm5027_vm15, %v16956_v2 }
  0x64   :  { %5941 = vst.msk [vmem:[#allocation4 + $0x88] sm:$0x3] %vm5027_vm15, %v16956_v2  ;;  %5943 = vst.msk [vmem:[#allocation4 + $0x98] sm:$0x3] %vm5027_vm15, %v16956_v2 }
  0x65   :  { %5945 = vst.msk [vmem:[#allocation4 + $0xa8] sm:$0x3] %vm5027_vm15, %v16956_v2  ;;  %5947 = vst.msk [vmem:[#allocation4 + $0xb8] sm:$0x3] %vm5027_vm15, %v16956_v2 }
  0x66   :  { %5949 = vst.msk [vmem:[#allocation4 + $0xc8] sm:$0x3] %vm5027_vm15, %v16956_v2  ;;  %5951 = vst.msk [vmem:[#allocation4 + $0xd8] sm:$0x3] %vm5027_vm15, %v16956_v2 }
  0x67   :  { %2710 = vrot.lane.b32.xlu1 %v968_v59, %s8839_s22  ;;  %2445 = vrot.lane.b32.xlu0 %v552_v60, %s8838_s13  ;;  %5953 = vst.msk [vmem:[#allocation4 + $0xe8] sm:$0x3] %vm5027_vm15, %v16956_v2  ;;  %5955 = vst.msk [vmem:[#allocation4 + $0xf8] sm:$0x3] %vm5027_vm15, %v16956_v2 }
  0x68   :  { %5957 = vst.msk [vmem:[#allocation4 + $0x108] sm:$0x3] %vm5027_vm15, %v16956_v2  ;;  %5959 = vst.msk [vmem:[#allocation4 + $0x118] sm:$0x3] %vm5027_vm15, %v16956_v2 }
  0x69   :  { %5961 = vst.msk [vmem:[#allocation4 + $0x128] sm:$0x3] %vm5027_vm15, %v16956_v2  ;;  %5963 = vst.msk [vmem:[#allocation4 + $0x138] sm:$0x3] %vm5027_vm15, %v16956_v2 }
  0x6b   :  { %1652 = vrot.lane.b32.xlu1 %v552_v60, %s8835_s28  ;;  %706 = vrot.lane.b32.xlu0 %v550_v51, %s8834_s27  ;;  %v286_v51 = vld [vmem:[#allocation2 + $0x88] sm:$0x3] }
  0x6c   :  { %v566_v54 = vrot.slane %v286_v51, 1 }
  0x6e   :  { %v567_v58 = vsel %vm537_vm3, %v564_v42, %v566_v54 }
  0x6f   :  { %2712 = vrot.lane.b32.xlu1 %v970_v0, %s8839_s22  ;;  %1917 = vrot.lane.b32.xlu0 %v968_v59, %s8836_s9 }
  0x73   :  { %1124 = vrot.lane.b32.xlu1 %v968_v59, %s8833_s26  ;;  %708 = vrot.lane.b32.xlu0 %v552_v60, %s8834_s27  ;;  %v984_v60 = vrot.slane %v286_v51, 2  ;;  %v574_v51 = vrot.slane %v9297_v7, 1 }
  0x77   :  { %2178 = vrot.lane.b32.xlu1 %v9176_v26, %s8837_s12  ;;  %1919 = vrot.lane.b32.xlu0 %v970_v0, %s8836_s9 }
  0x7b   :  { %1385 = vrot.lane.b32.xlu1 %v9176_v26, %s8832_s25  ;;  %1126 = vrot.lane.b32.xlu0 %v970_v0, %s8833_s26  ;;  %v977_v26 = vrot.slane %v9186_v29, 2 }
  0x7d   :  { %v978_v32 = vsel %vm955_vm2, %v976_v25, %v977_v26 }
  0x7f   :  { %2447 = vrot.lane.b32.xlu1 %v555_v8, %s8838_s13  ;;  %2180 = vrot.lane.b32.xlu0 %v9178_v27, %s8837_s12 }
  0x83   :  { %1654 = vrot.lane.b32.xlu1 %v555_v8, %s8835_s28  ;;  %1387 = vrot.lane.b32.xlu0 %v9178_v27, %s8832_s25  ;;  %v561_v27 = vrot.slane %v283_v24, 1  ;;  %v571_v24 = vrot.slane %v289_v20, 1 }
  0x85   :  { %v562_v33 = vsel %vm537_vm3, %v559_v21, %v561_v27  ;;  %v986_v21 = vrot.slane %v9226_v47, 2 }
  0x87   :  { %2714 = vrot.lane.b32.xlu1 %v973_v13, %s8839_s22  ;;  %2449 = vrot.lane.b32.xlu0 %v557_v14, %s8838_s13 }
  0x8b   :  { %1656 = vrot.lane.b32.xlu1 %v557_v14, %s8835_s28  ;;  %710 = vrot.lane.b32.xlu0 %v555_v8, %s8834_s27 }
  0x8f   :  { %2716 = vrot.lane.b32.xlu1 %v975_v16, %s8839_s22  ;;  %1921 = vrot.lane.b32.xlu0 %v973_v13, %s8836_s9 }
  0x93   :  { %1128 = vrot.lane.b32.xlu1 %v973_v13, %s8833_s26  ;;  %712 = vrot.lane.b32.xlu0 %v557_v14, %s8834_s27 }
  0x97   :  { %2182 = vrot.lane.b32.xlu1 %v9184_v28, %s8837_s12  ;;  %1923 = vrot.lane.b32.xlu0 %v975_v16, %s8836_s9 }
  0x9b   :  { %1389 = vrot.lane.b32.xlu1 %v9184_v28, %s8832_s25  ;;  %1130 = vrot.lane.b32.xlu0 %v975_v16, %s8833_s26  ;;  %v980_v28 = vsel %vm955_vm2, %v977_v26, %v979_v34  ;;  %v570_v16 = vsel %vm537_vm3, %v568_v11, %v569_v12 }
  0x9f   :  { %2451 = vrot.lane.b32.xlu1 %v560_v23, %s8838_s13  ;;  %2184 = vrot.lane.b32.xlu0 %v9186_v29, %s8837_s12 }
  0xa3   :  { %1658 = vrot.lane.b32.xlu1 %v560_v23, %s8835_s28  ;;  %1391 = vrot.lane.b32.xlu0 %v9186_v29, %s8832_s25 }
  0xa7   :  { %2718 = vrot.lane.b32.xlu1 %v978_v32, %s8839_s22  ;;  %2453 = vrot.lane.b32.xlu0 %v562_v33, %s8838_s13 }
  0xab   :  { %1660 = vrot.lane.b32.xlu1 %v562_v33, %s8835_s28  ;;  %714 = vrot.lane.b32.xlu0 %v560_v23, %s8834_s27  ;;  %v987_v23 = vrot.slane %v9238_v50, 2 }
  0xaf   :  { %2720 = vrot.lane.b32.xlu1 %v980_v28, %s8839_s22  ;;  %1925 = vrot.lane.b32.xlu0 %v978_v32, %s8836_s9 }
  0xb1   :  { %v1380_v29 = vpop.permute.xlu1 %1379  ;;  %v1378_v36 = vpop.permute.xlu0 %1377 }
  0xb3   :  { %1132 = vrot.lane.b32.xlu1 %v978_v32, %s8833_s26  ;;  %716 = vrot.lane.b32.xlu0 %v562_v33, %s8834_s27  ;;  %v988_v32 = vsel %vm955_vm2, %v986_v21, %v987_v23  ;;  %v578_v21 = vrot.slane %v9329_v19, 1 }
  0xb5   :  { %v1117_v38 = vpop.permute.xlu1 %1116  ;;  %v699_v39 = vpop.permute.xlu0 %698 }
  0xb6   :  { %891 = vst.msk [vmem:[#allocation3] sm:$0xff] %vm890_vm5, %v699_v39  ;;  %v160_v39 = vld [vmem:[%s16947_s0 + $0xa0] sm:$0xff] }
  0xb7   :  { %1309 = vst.msk [vmem:[#allocation3] sm:$0xff] %vm1308_vm6, %v1117_v38  ;;  %2186 = vrot.lane.b32.xlu1 %v9188_v30, %s8837_s12  ;;  %1927 = vrot.lane.b32.xlu0 %v980_v28, %s8836_s9 }
  0xb8   :  { %1570 = vst.msk [vmem:[#allocation3] sm:$0xff] %vm1569_vm7, %v1378_v36 }
  0xb9   :  { %v1119_v43 = vpop.permute.xlu1 %1118  ;;  %v701_v44 = vpop.permute.xlu0 %700  ;;  %225 = vst.msk [vmem:[#allocation2 + $0x109] sm:$0xff] %vm30_vm0, %v160_v39 }
  0xba   :  { %892 = vst.msk [vmem:[#allocation3 + $0x8] sm:$0xff] %vm890_vm5, %v701_v44 }
  0xbb   :  { %1310 = vst.msk [vmem:[#allocation3 + $0x8] sm:$0xff] %vm1308_vm6, %v1119_v43  ;;  %1393 = vrot.lane.b32.xlu1 %v9188_v30, %s8832_s25  ;;  %1134 = vrot.lane.b32.xlu0 %v980_v28, %s8833_s26  ;;  %v989_v28 = vrot.slane %v289_v20, 2  ;;  %v161_v43 = vld [vmem:[%s16947_s0 + $0xa8] sm:$0xff] }
  0xbc   :  { %1571 = vst.msk [vmem:[#allocation3 + $0x8] sm:$0xff] %vm1569_vm7, %v1380_v29 }
  0xbd   :  { %v703_v48 = vpop.permute.xlu1 %702  ;;  %v1647_v49 = vpop.permute.xlu0 %1646  ;;  %226 = vst.msk [vmem:[#allocation2 + $0x111] sm:$0xff] %vm30_vm0, %v161_v43 }
  0xbe   :  { %893 = vst.msk [vmem:[#allocation3 + $0x10] sm:$0xff] %vm890_vm5, %v703_v48 }
  0xbf   :  { %1839 = vst.msk [vmem:[#allocation3] sm:$0xff] %vm1838_vm8, %v1647_v49  ;;  %2455 = vrot.lane.b32.xlu1 %v565_v46, %s8838_s13  ;;  %2188 = vrot.lane.b32.xlu0 %v9198_v31, %s8837_s12  ;;  %v573_v49 = vrot.slane %v9285_v4, 1 }
  0xc0   :  { %v9499_v48 = vld [vmem:[#allocation2 + $0x108] sm:$0xff] }
  0xc1   :  { %v1914_v55 = vpop.permute.xlu1 %1913  ;;  %v1649_v56 = vpop.permute.xlu0 %1648  ;;  %399 = vst.msk [vmem:[#allocation3 + $0xb0] sm:$0xff] %vm30_vm0, %v9499_v48 }
  0xc2   :  { %2106 = vst.msk [vmem:[#allocation3] sm:$0xff] %vm2105_vm9, %v1914_v55  ;;  %v575_v55 = vsel %vm537_vm3, %v573_v49, %v574_v51 }
  0xc3   :  { %1840 = vst.msk [vmem:[#allocation3 + $0x8] sm:$0xff] %vm1838_vm8, %v1649_v56  ;;  %1662 = vrot.lane.b32.xlu1 %v565_v46, %s8835_s28  ;;  %1395 = vrot.lane.b32.xlu0 %v9198_v31, %s8832_s25  ;;  %v985_v31 = vsel %vm955_vm2, %v982_v53, %v984_v60 }
  0xc4   :  { %v9513_v54 = vld [vmem:[#allocation2 + $0x110] sm:$0xff] }
  0xc5   :  { %v1121_v59 = vpop.permute.xlu1 %1120  ;;  %v705_v30 = vpop.permute.xlu0 %704  ;;  %400 = vst.msk [vmem:[#allocation3 + $0xb8] sm:$0xff] %vm30_vm0, %v9513_v54 }
  0xc6   :  { %1311 = vst.msk [vmem:[#allocation3 + $0x10] sm:$0xff] %vm1308_vm6, %v1121_v59  ;;  %v991_v59 = vrot.slane %v9285_v4, 2 }
  0xc7   :  { %894 = vst.msk [vmem:[#allocation3 + $0x18] sm:$0xff] %vm890_vm5, %v705_v30  ;;  %2722 = vrot.lane.b32.xlu1 %v983_v57, %s8839_s22  ;;  %2457 = vrot.lane.b32.xlu0 %v567_v58, %s8838_s13  ;;  %v992_v30 = vrot.slane %v9297_v7, 2 }
  0xc9   :  { %v2175_v61 = vpop.permute.xlu1 %2174  ;;  %v1916_v62 = vpop.permute.xlu0 %1915 }
  0xca   :  { %2367 = vst.msk [vmem:[#allocation3] sm:$0xff] %vm2366_vm10, %v2175_v61 }
  0xcb   :  { %2107 = vst.msk [vmem:[#allocation3 + $0x8] sm:$0xff] %vm2105_vm9, %v1916_v62  ;;  %1664 = vrot.lane.b32.xlu1 %v567_v58, %s8835_s28  ;;  %718 = vrot.lane.b32.xlu0 %v565_v46, %s8834_s27 }
  0xcd   :  { %v1382_v63 = vpop.permute.xlu1 %1381  ;;  %v1123_v0 = vpop.permute.xlu0 %1122 }
  0xce   :  { %1572 = vst.msk [vmem:[#allocation3 + $0x10] sm:$0xff] %vm1569_vm7, %v1382_v63  ;;  %v993_v63 = vsel %vm955_vm2, %v991_v59, %v992_v30  ;;  %v583_v59 = vrot.slane %v9374_v40, 1 }
  0xcf   :  { %1312 = vst.msk [vmem:[#allocation3 + $0x18] sm:$0xff] %vm1308_vm6, %v1123_v0  ;;  %2724 = vrot.lane.b32.xlu1 %v985_v31, %s8839_s22  ;;  %1929 = vrot.lane.b32.xlu0 %v983_v57, %s8836_s9 }
  0xd1   :  { %v2444_v3 = vpop.permute.xlu1 %2443  ;;  %v2177_v5 = vpop.permute.xlu0 %2176 }
  0xd2   :  { %2636 = vst.msk [vmem:[#allocation3] sm:$0xff] %vm2635_vm11, %v2444_v3 }
  0xd3   :  { %2368 = vst.msk [vmem:[#allocation3 + $0x8] sm:$0xff] %vm2366_vm10, %v2177_v5  ;;  %1136 = vrot.lane.b32.xlu1 %v983_v57, %s8833_s26  ;;  %720 = vrot.lane.b32.xlu0 %v567_v58, %s8834_s27  ;;  %v292_v58 = vld [vmem:[#allocation2 + $0xb8] sm:$0x3] }
  0xd4   :  { %v576_v60 = vrot.slane %v292_v58, 1  ;;  %v994_v3 = vrot.slane %v292_v58, 2 }
  0xd5   :  { %v1651_v8 = vpop.permute.xlu1 %1650  ;;  %v1384_v9 = vpop.permute.xlu0 %1383 }
  0xd6   :  { %1841 = vst.msk [vmem:[#allocation3 + $0x10] sm:$0xff] %vm1838_vm8, %v1651_v8 }
  0xd7   :  { %1573 = vst.msk [vmem:[#allocation3 + $0x18] sm:$0xff] %vm1569_vm7, %v1384_v9  ;;  %2190 = vrot.lane.b32.xlu1 %v9226_v47, %s8837_s12  ;;  %1931 = vrot.lane.b32.xlu0 %v985_v31, %s8836_s9 }
  0xd9   :  { %v2711_v13 = vpop.permute.xlu1 %2710  ;;  %v2446_v14 = vpop.permute.xlu0 %2445 }
  0xda   :  { %2903 = vst.msk [vmem:[#allocation3] sm:$0xff] %vm2902_vm12, %v2711_v13 }
  0xdb   :  { %2637 = vst.msk [vmem:[#allocation3 + $0x8] sm:$0xff] %vm2635_vm11, %v2446_v14  ;;  %1397 = vrot.lane.b32.xlu1 %v9226_v47, %s8832_s25  ;;  %1138 = vrot.lane.b32.xlu0 %v985_v31, %s8833_s26  ;;  %v572_v47 = vsel %vm537_vm3, %v569_v12, %v571_v24  ;;  %v162_v12 = vld [vmem:[%s16947_s0 + $0xb0] sm:$0xff] }
  0xdc   :  { %227 = vst.msk [vmem:[#allocation2 + $0x121] sm:$0xff] %vm30_vm0, %v162_v12 }
  0xdd   :  { %v1653_v17 = vpop.permute.xlu1 %1652  ;;  %v707_v18 = vpop.permute.xlu0 %706 }
  0xde   :  { %1842 = vst.msk [vmem:[#allocation3 + $0x18] sm:$0xff] %vm1838_vm8, %v1653_v17 }
  0xdf   :  { %895 = vst.msk [vmem:[#allocation3 + $0x20] sm:$0xff] %vm890_vm5, %v707_v18  ;;  %2459 = vrot.lane.b32.xlu1 %v570_v16, %s8838_s13  ;;  %2192 = vrot.lane.b32.xlu0 %v9238_v50, %s8837_s12 }
  0xe1   :  { %v2713_v25 = vpop.permute.xlu1 %2712  ;;  %v1918_v26 = vpop.permute.xlu0 %1917  ;;  %v2967_v27 = vld [vmem:[#allocation3] sm:$0xff] }
  0xe2   :  { %2904 = vst.msk [vmem:[#allocation3 + $0x8] sm:$0xff] %vm2902_vm12, %v2713_v25  ;;  %8654 = vmatprep.mubr.msk.f32.mxu0 %vm3036_vm13, %v2967_v27 }
  0xe3   :  { %2108 = vst.msk [vmem:[#allocation3 + $0x10] sm:$0xff] %vm2105_vm9, %v1918_v26  ;;  %1666 = vrot.lane.b32.xlu1 %v570_v16, %s8835_s28  ;;  %1399 = vrot.lane.b32.xlu0 %v9238_v50, %s8832_s25  ;;  %v990_v50 = vsel %vm955_vm2, %v987_v23, %v989_v28  ;;  %v9561_v20 = vld [vmem:[#allocation2 + $0x120] sm:$0xff]  ;;  %v579_v23 = vrot.slane %v9341_v22, 1  ;;  %v997_v28 = vrot.slane %v9341_v22, 2 }
  0xe4   :  { %401 = vst.msk [vmem:[#allocation3 + $0xc0] sm:$0xff] %vm30_vm0, %v9561_v20 }
  0xe5   :  { %v1125_v33 = vpop.permute.xlu1 %1124  ;;  %v709_v34 = vpop.permute.xlu0 %708  ;;  %v580_v27 = vsel %vm537_vm3, %v578_v21, %v579_v23 }
  0xe6   :  { %1313 = vst.msk [vmem:[#allocation3 + $0x20] sm:$0xff] %vm1308_vm6, %v1125_v33  ;;  %v295_v33 = vld [vmem:[#allocation2 + $0xd0] sm:$0x3] }
  0xe7   :  { %896 = vst.msk [vmem:[#allocation3 + $0x28] sm:$0xff] %vm890_vm5, %v709_v34  ;;  %2726 = vrot.lane.b32.xlu1 %v988_v32, %s8839_s22  ;;  %2461 = vrot.lane.b32.xlu0 %v572_v47, %s8838_s13  ;;  %v996_v34 = vrot.slane %v9329_v19, 2 }
  0xe9   :  { %v2179_v35 = vpop.permute.xlu1 %2178  ;;  %v1920_v29 = vpop.permute.xlu0 %1919  ;;  %v2968_v36 = vld [vmem:[#allocation3 + $0x8] sm:$0xff] }
  0xea   :  { %2369 = vst.msk [vmem:[#allocation3 + $0x10] sm:$0xff] %vm2366_vm10, %v2179_v35  ;;  %8655 = vmatmul.mubr.msk.f32.vlgmr.msra.gmra.mxu0 %vm3036_vm13, %v2968_v36  ;;  %v581_v35 = vrot.slane %v295_v33, 1 }
  0xeb   :  { %2109 = vst.msk [vmem:[#allocation3 + $0x18] sm:$0xff] %vm2105_vm9, %v1920_v29  ;;  %1668 = vrot.lane.b32.xlu1 %v572_v47, %s8835_s28  ;;  %722 = vrot.lane.b32.xlu0 %v570_v16, %s8834_s27  ;;  %v163_v16 = vld [vmem:[%s16947_s0 + $0xb8] sm:$0xff] }
  0xec   :  { %228 = vst.msk [vmem:[#allocation2 + $0x129] sm:$0xff] %vm30_vm0, %v163_v16 }
  0xed   :  { %v1386_v37 = vpop.permute.xlu1 %1385  ;;  %v1127_v38 = vpop.permute.xlu0 %1126 }
  0xee   :  { %1574 = vst.msk [vmem:[#allocation3 + $0x20] sm:$0xff] %vm1569_vm7, %v1386_v37  ;;  %v998_v37 = vsel %vm955_vm2, %v996_v34, %v997_v28  ;;  %v588_v34 = vrot.slane %v9437_v10, 1 }
  0xef   :  { %1314 = vst.msk [vmem:[#allocation3 + $0x28] sm:$0xff] %vm1308_vm6, %v1127_v38  ;;  %2728 = vrot.lane.b32.xlu1 %v990_v50, %s8839_s22  ;;  %1933 = vrot.lane.b32.xlu0 %v988_v32, %s8836_s9 }
  0xf1   :  { %v2448_v41 = vpop.permute.xlu1 %2447  ;;  %v2181_v42 = vpop.permute.xlu0 %2180 }
  0xf2   :  { %2638 = vst.msk [vmem:[#allocation3 + $0x10] sm:$0xff] %vm2635_vm11, %v2448_v41  ;;  %v999_v41 = vrot.slane %v295_v33, 2 }
  0xf3   :  { %2370 = vst.msk [vmem:[#allocation3 + $0x18] sm:$0xff] %vm2366_vm10, %v2181_v42  ;;  %1140 = vrot.lane.b32.xlu1 %v988_v32, %s8833_s26  ;;  %724 = vrot.lane.b32.xlu0 %v572_v47, %s8834_s27  ;;  %v9575_v26 = vld [vmem:[#allocation2 + $0x128] sm:$0xff] }
  0xf4   :  { %402 = vst.msk [vmem:[#allocation3 + $0xc8] sm:$0xff] %vm30_vm0, %v9575_v26 }
  0xf5   :  { %v1655_v44 = vpop.permute.xlu1 %1654  ;;  %v1388_v46 = vpop.permute.xlu0 %1387 }
  0xf6   :  { %1843 = vst.msk [vmem:[#allocation3 + $0x20] sm:$0xff] %vm1838_vm8, %v1655_v44 }
  0xf7   :  { %1575 = vst.msk [vmem:[#allocation3 + $0x28] sm:$0xff] %vm1569_vm7, %v1388_v46  ;;  %2194 = vrot.lane.b32.xlu1 %v9285_v4, %s8837_s12  ;;  %1935 = vrot.lane.b32.xlu0 %v990_v50, %s8836_s9 }
  0xf9   :  { %v2715_v52 = vpop.permute.xlu1 %2714  ;;  %v2450_v53 = vpop.permute.xlu0 %2449 }
  0xfa   :  { %2905 = vst.msk [vmem:[#allocation3 + $0x10] sm:$0xff] %vm2902_vm12, %v2715_v52 }
  0xfb   :  { %2639 = vst.msk [vmem:[#allocation3 + $0x18] sm:$0xff] %vm2635_vm11, %v2450_v53  ;;  %1401 = vrot.lane.b32.xlu1 %v9285_v4, %s8832_s25  ;;  %1142 = vrot.lane.b32.xlu0 %v990_v50, %s8833_s26  ;;  %v577_v4 = vsel %vm537_vm3, %v574_v51, %v576_v60  ;;  %v164_v51 = vld [vmem:[%s16947_s0 + $0xc0] sm:$0xff] }
  0xfc   :  { %229 = vst.msk [vmem:[#allocation2 + $0x139] sm:$0xff] %vm30_vm0, %v164_v51 }
  0xfd   :  { %v1657_v56 = vpop.permute.xlu1 %1656  ;;  %v711_v57 = vpop.permute.xlu0 %710 }
  0xfe   :  { %1844 = vst.msk [vmem:[#allocation3 + $0x28] sm:$0xff] %vm1838_vm8, %v1657_v56 }
  0xff   :  { %897 = vst.msk [vmem:[#allocation3 + $0x30] sm:$0xff] %vm890_vm5, %v711_v57  ;;  %2463 = vrot.lane.b32.xlu1 %v575_v55, %s8838_s13  ;;  %2196 = vrot.lane.b32.xlu0 %v9297_v7, %s8837_s12 }
 0x101   :  { %v2717_v61 = vpop.permute.xlu1 %2716  ;;  %v1922_v62 = vpop.permute.xlu0 %1921  ;;  %v2969_v31 = vld [vmem:[#allocation3 + $0x10] sm:$0xff] }
 0x102   :  { %2906 = vst.msk [vmem:[#allocation3 + $0x18] sm:$0xff] %vm2902_vm12, %v2717_v61  ;;  %8657 = vmatprep.mubr.msk.f32.mxu0 %vm3036_vm13, %v2969_v31 }
 0x103   :  { %2110 = vst.msk [vmem:[#allocation3 + $0x20] sm:$0xff] %vm2105_vm9, %v1922_v62  ;;  %1670 = vrot.lane.b32.xlu1 %v575_v55, %s8835_s28  ;;  %1403 = vrot.lane.b32.xlu0 %v9297_v7, %s8832_s25  ;;  %v995_v7 = vsel %vm955_vm2, %v992_v30, %v994_v3  ;;  %v9663_v58 = vld [vmem:[#allocation2 + $0x138] sm:$0xff]  ;;  %v584_v30 = vrot.slane %v9390_v45, 1  ;;  %v1002_v3 = vrot.slane %v9390_v45, 2 }
 0x104   :  { %403 = vst.msk [vmem:[#allocation3 + $0xd0] sm:$0xff] %vm30_vm0, %v9663_v58 }
 0x105   :  { %v1129_v0 = vpop.permute.xlu1 %1128  ;;  %v713_v1 = vpop.permute.xlu0 %712  ;;  %v585_v31 = vsel %vm537_vm3, %v583_v59, %v584_v30 }
 0x106   :  { %1315 = vst.msk [vmem:[#allocation3 + $0x30] sm:$0xff] %vm1308_vm6, %v1129_v0  ;;  %v298_v0 = vld [vmem:[#allocation2 + $0xe8] sm:$0x3] }
 0x107   :  { %898 = vst.msk [vmem:[#allocation3 + $0x38] sm:$0xff] %vm890_vm5, %v713_v1  ;;  %2730 = vrot.lane.b32.xlu1 %v993_v63, %s8839_s22  ;;  %2465 = vrot.lane.b32.xlu0 %v577_v4, %s8838_s13  ;;  %v1001_v1 = vrot.slane %v9374_v40, 2 }
 0x109   :  { %v2183_v5 = vpop.permute.xlu1 %2182  ;;  %v1924_v6 = vpop.permute.xlu0 %1923  ;;  %v2970_v8 = vld [vmem:[#allocation3 + $0x18] sm:$0xff] }
 0x10a   :  { %2371 = vst.msk [vmem:[#allocation3 + $0x20] sm:$0xff] %vm2366_vm10, %v2183_v5  ;;  %8658 = vmatmul.mubr.msk.f32.gmra.mxu0 %vm3036_vm13, %v2970_v8  ;;  %v586_v5 = vrot.slane %v298_v0, 1 }
 0x10b   :  { %2111 = vst.msk [vmem:[#allocation3 + $0x28] sm:$0xff] %vm2105_vm9, %v1924_v6  ;;  %1672 = vrot.lane.b32.xlu1 %v577_v4, %s8835_s28  ;;  %726 = vrot.lane.b32.xlu0 %v575_v55, %s8834_s27  ;;  %v165_v55 = vld [vmem:[%s16947_s0 + $0xc8] sm:$0xff] }
 0x10c   :  { %230 = vst.msk [vmem:[#allocation2 + $0x141] sm:$0xff] %vm30_vm0, %v165_v55 }
 0x10d   :  { %v1390_v9 = vpop.permute.xlu1 %1389  ;;  %v1131_v11 = vpop.permute.xlu0 %1130 }
 0x10e   :  { %1576 = vst.msk [vmem:[#allocation3 + $0x30] sm:$0xff] %vm1569_vm7, %v1390_v9  ;;  %v1003_v9 = vsel %vm955_vm2, %v1001_v1, %v1002_v3  ;;  %v593_v1 = vrot.slane %v9499_v48, 1 }
 0x10f   :  { %1316 = vst.msk [vmem:[#allocation3 + $0x38] sm:$0xff] %vm1308_vm6, %v1131_v11  ;;  %2732 = vrot.lane.b32.xlu1 %v995_v7, %s8839_s22  ;;  %1937 = vrot.lane.b32.xlu0 %v993_v63, %s8836_s9 }
 0x111   :  { %v2452_v13 = vpop.permute.xlu1 %2451  ;;  %v2185_v14 = vpop.permute.xlu0 %2184 }
 0x112   :  { %2640 = vst.msk [vmem:[#allocation3 + $0x20] sm:$0xff] %vm2635_vm11, %v2452_v13  ;;  %v1004_v13 = vrot.slane %v298_v0, 2 }
 0x113   :  { %2372 = vst.msk [vmem:[#allocation3 + $0x28] sm:$0xff] %vm2366_vm10, %v2185_v14  ;;  %1144 = vrot.lane.b32.xlu1 %v993_v63, %s8833_s26  ;;  %728 = vrot.lane.b32.xlu0 %v577_v4, %s8834_s27  ;;  %v9677_v62 = vld [vmem:[#allocation2 + $0x140] sm:$0xff] }
 0x114   :  { %404 = vst.msk [vmem:[#allocation3 + $0xd8] sm:$0xff] %vm30_vm0, %v9677_v62 }
 0x115   :  { %v1659_v17 = vpop.permute.xlu1 %1658  ;;  %v1392_v18 = vpop.permute.xlu0 %1391 }
 0x116   :  { %1845 = vst.msk [vmem:[#allocation3 + $0x30] sm:$0xff] %vm1838_vm8, %v1659_v17 }
 0x117   :  { %1577 = vst.msk [vmem:[#allocation3 + $0x38] sm:$0xff] %vm1569_vm7, %v1392_v18  ;;  %2198 = vrot.lane.b32.xlu1 %v9329_v19, %s8837_s12  ;;  %1939 = vrot.lane.b32.xlu0 %v995_v7, %s8836_s9 }
 0x119   :  { %v2719_v24 = vpop.permute.xlu1 %2718  ;;  %v2454_v25 = vpop.permute.xlu0 %2453 }
 0x11a   :  { %2907 = vst.msk [vmem:[#allocation3 + $0x20] sm:$0xff] %vm2902_vm12, %v2719_v24 }
 0x11b   :  { %2641 = vst.msk [vmem:[#allocation3 + $0x28] sm:$0xff] %vm2635_vm11, %v2454_v25  ;;  %1405 = vrot.lane.b32.xlu1 %v9329_v19, %s8832_s25  ;;  %1146 = vrot.lane.b32.xlu0 %v995_v7, %s8833_s26  ;;  %v582_v19 = vsel %vm537_vm3, %v579_v23, %v581_v35  ;;  %v166_v23 = vld [vmem:[%s16947_s0 + $0xd0] sm:$0xff] }
 0x11c   :  { %231 = vst.msk [vmem:[#allocation2 + $0x151] sm:$0xff] %vm30_vm0, %v166_v23 }
 0x11d   :  { %v1661_v32 = vpop.permute.xlu1 %1660  ;;  %v715_v47 = vpop.permute.xlu0 %714 }
 0x11e   :  { %1846 = vst.msk [vmem:[#allocation3 + $0x38] sm:$0xff] %vm1838_vm8, %v1661_v32 }
 0x11f   :  { %899 = vst.msk [vmem:[#allocation3 + $0x40] sm:$0xff] %vm890_vm5, %v715_v47  ;;  %2467 = vrot.lane.b32.xlu1 %v580_v27, %s8838_s13  ;;  %2200 = vrot.lane.b32.xlu0 %v9341_v22, %s8837_s12 }
 0x121   :  { %v2721_v29 = vpop.permute.xlu1 %2720  ;;  %v1926_v36 = vpop.permute.xlu0 %1925  ;;  %v2971_v50 = vld [vmem:[#allocation3 + $0x20] sm:$0xff] }
 0x122   :  { %2908 = vst.msk [vmem:[#allocation3 + $0x28] sm:$0xff] %vm2902_vm12, %v2721_v29  ;;  %8660 = vmatprep.mubr.msk.f32.mxu0 %vm3036_vm13, %v2971_v50 }
 0x123   :  { %2112 = vst.msk [vmem:[#allocation3 + $0x30] sm:$0xff] %vm2105_vm9, %v1926_v36  ;;  %1674 = vrot.lane.b32.xlu1 %v580_v27, %s8835_s28  ;;  %1407 = vrot.lane.b32.xlu0 %v9341_v22, %s8832_s25  ;;  %v1000_v22 = vsel %vm955_vm2, %v997_v28, %v999_v41  ;;  %v9765_v33 = vld [vmem:[#allocation2 + $0x150] sm:$0xff]  ;;  %v589_v28 = vrot.slane %v9451_v15, 1  ;;  %v1007_v41 = vrot.slane %v9451_v15, 2 }
 0x124   :  { %405 = vst.msk [vmem:[#allocation3 + $0xe0] sm:$0xff] %vm30_vm0, %v9765_v33 }
 0x125   :  { %v1133_v38 = vpop.permute.xlu1 %1132  ;;  %v717_v39 = vpop.permute.xlu0 %716  ;;  %v590_v50 = vsel %vm537_vm3, %v588_v34, %v589_v28 }
 0x126   :  { %1317 = vst.msk [vmem:[#allocation3 + $0x40] sm:$0xff] %vm1308_vm6, %v1133_v38  ;;  %v301_v38 = vld [vmem:[#allocation2 + $0x100] sm:$0x3] }
 0x127   :  { %900 = vst.msk [vmem:[#allocation3 + $0x48] sm:$0xff] %vm890_vm5, %v717_v39  ;;  %2734 = vrot.lane.b32.xlu1 %v998_v37, %s8839_s22  ;;  %2469 = vrot.lane.b32.xlu0 %v582_v19, %s8838_s13  ;;  %v1006_v39 = vrot.slane %v9437_v10, 2 }
 0x129   :  { %v2187_v42 = vpop.permute.xlu1 %2186  ;;  %v1928_v43 = vpop.permute.xlu0 %1927  ;;  %v2972_v44 = vld [vmem:[#allocation3 + $0x28] sm:$0xff] }
 0x12a   :  { %2373 = vst.msk [vmem:[#allocation3 + $0x30] sm:$0xff] %vm2366_vm10, %v2187_v42  ;;  %8661 = vmatmul.mubr.msk.f32.gmra.mxu0 %vm3036_vm13, %v2972_v44  ;;  %v591_v42 = vrot.slane %v301_v38, 1 }
 0x12b   :  { %2113 = vst.msk [vmem:[#allocation3 + $0x38] sm:$0xff] %vm2105_vm9, %v1928_v43  ;;  %1676 = vrot.lane.b32.xlu1 %v582_v19, %s8835_s28  ;;  %730 = vrot.lane.b32.xlu0 %v580_v27, %s8834_s27  ;;  %v167_v27 = vld [vmem:[%s16947_s0 + $0xd8] sm:$0xff] }
 0x12c   :  { %232 = vst.msk [vmem:[#allocation2 + $0x159] sm:$0xff] %vm30_vm0, %v167_v27 }
 0x12d   :  { %v1394_v46 = vpop.permute.xlu1 %1393  ;;  %v1135_v49 = vpop.permute.xlu0 %1134 }
 0x12e   :  { %1578 = vst.msk [vmem:[#allocation3 + $0x40] sm:$0xff] %vm1569_vm7, %v1394_v46  ;;  %v1008_v46 = vsel %vm955_vm2, %v1006_v39, %v1007_v41  ;;  %v599_v39 = vrot.slane %v9575_v26, 1 }
 0x12f   :  { %1318 = vst.msk [vmem:[#allocation3 + $0x48] sm:$0xff] %vm1308_vm6, %v1135_v49  ;;  %2736 = vrot.lane.b32.xlu1 %v1000_v22, %s8839_s22  ;;  %1941 = vrot.lane.b32.xlu0 %v998_v37, %s8836_s9 }
 0x131   :  { %v2456_v52 = vpop.permute.xlu1 %2455  ;;  %v2189_v53 = vpop.permute.xlu0 %2188 }
 0x132   :  { %2642 = vst.msk [vmem:[#allocation3 + $0x30] sm:$0xff] %vm2635_vm11, %v2456_v52  ;;  %v1009_v52 = vrot.slane %v301_v38, 2  ;;  %v598_v38 = vrot.slane %v9561_v20, 1 }
 0x133   :  { %2374 = vst.msk [vmem:[#allocation3 + $0x38] sm:$0xff] %vm2366_vm10, %v2189_v53  ;;  %1148 = vrot.lane.b32.xlu1 %v998_v37, %s8833_s26  ;;  %732 = vrot.lane.b32.xlu0 %v582_v19, %s8834_s27  ;;  %v9779_v36 = vld [vmem:[#allocation2 + $0x158] sm:$0xff] }
 0x134   :  { %406 = vst.msk [vmem:[#allocation3 + $0xe8] sm:$0xff] %vm30_vm0, %v9779_v36 }
 0x135   :  { %v1663_v56 = vpop.permute.xlu1 %1662  ;;  %v1396_v57 = vpop.permute.xlu0 %1395 }
 0x136   :  { %1847 = vst.msk [vmem:[#allocation3 + $0x40] sm:$0xff] %vm1838_vm8, %v1663_v56 }
 0x137   :  { %1579 = vst.msk [vmem:[#allocation3 + $0x48] sm:$0xff] %vm1569_vm7, %v1396_v57  ;;  %2202 = vrot.lane.b32.xlu1 %v9374_v40, %s8837_s12  ;;  %1943 = vrot.lane.b32.xlu0 %v1000_v22, %s8836_s9 }
 0x139   :  { %v2723_v60 = vpop.permute.xlu1 %2722  ;;  %v2458_v61 = vpop.permute.xlu0 %2457 }
 0x13a   :  { %2909 = vst.msk [vmem:[#allocation3 + $0x30] sm:$0xff] %vm2902_vm12, %v2723_v60 }
 0x13b   :  { %2643 = vst.msk [vmem:[#allocation3 + $0x38] sm:$0xff] %vm2635_vm11, %v2458_v61  ;;  %1409 = vrot.lane.b32.xlu1 %v9374_v40, %s8832_s25  ;;  %1150 = vrot.lane.b32.xlu0 %v1000_v22, %s8833_s26  ;;  %v587_v40 = vsel %vm537_vm3, %v584_v30, %v586_v5  ;;  %v168_v30 = vld [vmem:[%s16947_s0 + $0xe0] sm:$0xff] }
 0x13c   :  { %233 = vst.msk [vmem:[#allocation2 + $0x169] sm:$0xff] %vm30_vm0, %v168_v30  ;;  %v9919_v30 = vld [vmem:[#allocation2 + $0x1b8] sm:$0xff] }
 0x13d   :  { %v1665_v63 = vpop.permute.xlu1 %1664  ;;  %v719_v4 = vpop.permute.xlu0 %718  ;;  %410 = vst.msk [vmem:[#allocation3 + $0x108] sm:$0xff] %vm30_vm0, %v9919_v30 }
 0x13e   :  { %1848 = vst.msk [vmem:[#allocation3 + $0x48] sm:$0xff] %vm1838_vm8, %v1665_v63 }
 0x13f   :  { %901 = vst.msk [vmem:[#allocation3 + $0x50] sm:$0xff] %vm890_vm5, %v719_v4  ;;  %2471 = vrot.lane.b32.xlu1 %v585_v31, %s8838_s13  ;;  %2204 = vrot.lane.b32.xlu0 %v9390_v45, %s8837_s12 }
 0x141   :  { %v2725_v6 = vpop.permute.xlu1 %2724  ;;  %v1930_v8 = vpop.permute.xlu0 %1929  ;;  %v2973_v7 = vld [vmem:[#allocation3 + $0x30] sm:$0xff] }
 0x142   :  { %2910 = vst.msk [vmem:[#allocation3 + $0x38] sm:$0xff] %vm2902_vm12, %v2725_v6  ;;  %8663 = vmatprep.mubr.msk.f32.mxu0 %vm3036_vm13, %v2973_v7 }
 0x143   :  { %2114 = vst.msk [vmem:[#allocation3 + $0x40] sm:$0xff] %vm2105_vm9, %v1930_v8  ;;  %1678 = vrot.lane.b32.xlu1 %v585_v31, %s8835_s28  ;;  %1411 = vrot.lane.b32.xlu0 %v9390_v45, %s8832_s25  ;;  %v1005_v45 = vsel %vm955_vm2, %v1002_v3, %v1004_v13  ;;  %v9827_v0 = vld [vmem:[#allocation2 + $0x168] sm:$0xff]  ;;  %v594_v3 = vrot.slane %v9513_v54, 1  ;;  %v1012_v13 = vrot.slane %v9513_v54, 2 }
 0x144   :  { %407 = vst.msk [vmem:[#allocation3 + $0xf0] sm:$0xff] %vm30_vm0, %v9827_v0 }
 0x145   :  { %v1137_v11 = vpop.permute.xlu1 %1136  ;;  %v721_v12 = vpop.permute.xlu0 %720  ;;  %v595_v7 = vsel %vm537_vm3, %v593_v1, %v594_v3 }
 0x146   :  { %1319 = vst.msk [vmem:[#allocation3 + $0x50] sm:$0xff] %vm1308_vm6, %v1137_v11  ;;  %v304_v11 = vld [vmem:[#allocation2 + $0x118] sm:$0x3] }
 0x147   :  { %902 = vst.msk [vmem:[#allocation3 + $0x58] sm:$0xff] %vm890_vm5, %v721_v12  ;;  %2738 = vrot.lane.b32.xlu1 %v1003_v9, %s8839_s22  ;;  %2473 = vrot.lane.b32.xlu0 %v587_v40, %s8838_s13  ;;  %v1011_v12 = vrot.slane %v9499_v48, 2 }
 0x149   :  { %v2191_v14 = vpop.permute.xlu1 %2190  ;;  %v1932_v16 = vpop.permute.xlu0 %1931  ;;  %v2974_v17 = vld [vmem:[#allocation3 + $0x38] sm:$0xff] }
 0x14a   :  { %2375 = vst.msk [vmem:[#allocation3 + $0x40] sm:$0xff] %vm2366_vm10, %v2191_v14  ;;  %8664 = vmatmul.mubr.msk.f32.gmra.mxu0 %vm3036_vm13, %v2974_v17  ;;  %v596_v14 = vrot.slane %v304_v11, 1 }
 0x14b   :  { %2115 = vst.msk [vmem:[#allocation3 + $0x48] sm:$0xff] %vm2105_vm9, %v1932_v16  ;;  %1680 = vrot.lane.b32.xlu1 %v587_v40, %s8835_s28  ;;  %734 = vrot.lane.b32.xlu0 %v585_v31, %s8834_s27  ;;  %v169_v31 = vld [vmem:[%s16947_s0 + $0xe8] sm:$0xff] }
 0x14c   :  { %234 = vst.msk [vmem:[#allocation2 + $0x171] sm:$0xff] %vm30_vm0, %v169_v31 }
 0x14d   :  { %v1398_v18 = vpop.permute.xlu1 %1397  ;;  %v1139_v21 = vpop.permute.xlu0 %1138 }
 0x14e   :  { %1580 = vst.msk [vmem:[#allocation3 + $0x50] sm:$0xff] %vm1569_vm7, %v1398_v18  ;;  %v1013_v18 = vsel %vm955_vm2, %v1011_v12, %v1012_v13 }
 0x14f   :  { %1320 = vst.msk [vmem:[#allocation3 + $0x58] sm:$0xff] %vm1308_vm6, %v1139_v21  ;;  %2740 = vrot.lane.b32.xlu1 %v1005_v45, %s8839_s22  ;;  %1945 = vrot.lane.b32.xlu0 %v1003_v9, %s8836_s9 }
 0x151   :  { %v2460_v24 = vpop.permute.xlu1 %2459  ;;  %v2193_v25 = vpop.permute.xlu0 %2192 }
 0x152   :  { %2644 = vst.msk [vmem:[#allocation3 + $0x40] sm:$0xff] %vm2635_vm11, %v2460_v24  ;;  %v1014_v24 = vrot.slane %v304_v11, 2 }
 0x153   :  { %2376 = vst.msk [vmem:[#allocation3 + $0x48] sm:$0xff] %vm2366_vm10, %v2193_v25  ;;  %1152 = vrot.lane.b32.xlu1 %v1003_v9, %s8833_s26  ;;  %736 = vrot.lane.b32.xlu0 %v587_v40, %s8834_s27  ;;  %v9841_v8 = vld [vmem:[#allocation2 + $0x170] sm:$0xff] }
 0x154   :  { %408 = vst.msk [vmem:[#allocation3 + $0xf8] sm:$0xff] %vm30_vm0, %v9841_v8 }
 0x155   :  { %v1667_v32 = vpop.permute.xlu1 %1666  ;;  %v1400_v47 = vpop.permute.xlu0 %1399 }
 0x156   :  { %1849 = vst.msk [vmem:[#allocation3 + $0x50] sm:$0xff] %vm1838_vm8, %v1667_v32 }
 0x157   :  { %1581 = vst.msk [vmem:[#allocation3 + $0x58] sm:$0xff] %vm1569_vm7, %v1400_v47  ;;  %2206 = vrot.lane.b32.xlu1 %v9437_v10, %s8837_s12  ;;  %1947 = vrot.lane.b32.xlu0 %v1005_v45, %s8836_s9 }
 0x159   :  { %v2727_v35 = vpop.permute.xlu1 %2726  ;;  %v2462_v29 = vpop.permute.xlu0 %2461 }
 0x15a   :  { %2911 = vst.msk [vmem:[#allocation3 + $0x40] sm:$0xff] %vm2902_vm12, %v2727_v35 }
 0x15b   :  { %2645 = vst.msk [vmem:[#allocation3 + $0x48] sm:$0xff] %vm2635_vm11, %v2462_v29  ;;  %1413 = vrot.lane.b32.xlu1 %v9437_v10, %s8832_s25  ;;  %1154 = vrot.lane.b32.xlu0 %v1005_v45, %s8833_s26  ;;  %v592_v10 = vsel %vm537_vm3, %v589_v28, %v591_v42  ;;  %v170_v28 = vld [vmem:[%s16947_s0 + $0xf0] sm:$0xff] }
 0x15c   :  { %235 = vst.msk [vmem:[#allocation2 + $0x181] sm:$0xff] %vm30_vm0, %v170_v28 }
 0x15d   :  { %v1669_v37 = vpop.permute.xlu1 %1668  ;;  %v723_v19 = vpop.permute.xlu0 %722 }
 0x15e   :  { %1850 = vst.msk [vmem:[#allocation3 + $0x58] sm:$0xff] %vm1838_vm8, %v1669_v37 }
 0x15f   :  { %903 = vst.msk [vmem:[#allocation3 + $0x60] sm:$0xff] %vm890_vm5, %v723_v19  ;;  %2475 = vrot.lane.b32.xlu1 %v590_v50, %s8838_s13  ;;  %2208 = vrot.lane.b32.xlu0 %v9451_v15, %s8837_s12 }
 0x161   :  { %v2729_v43 = vpop.permute.xlu1 %2728  ;;  %v1934_v44 = vpop.permute.xlu0 %1933  ;;  %v2975_v22 = vld [vmem:[#allocation3 + $0x40] sm:$0xff] }
 0x162   :  { %2912 = vst.msk [vmem:[#allocation3 + $0x48] sm:$0xff] %vm2902_vm12, %v2729_v43  ;;  %8666 = vmatprep.mubr.msk.f32.mxu0 %vm3036_vm13, %v2975_v22  ;;  %v600_v43 = vsel %vm537_vm3, %v598_v38, %v599_v39 }
 0x163   :  { %2116 = vst.msk [vmem:[#allocation3 + $0x50] sm:$0xff] %vm2105_vm9, %v1934_v44  ;;  %1682 = vrot.lane.b32.xlu1 %v590_v50, %s8835_s28  ;;  %1415 = vrot.lane.b32.xlu0 %v9451_v15, %s8832_s25  ;;  %v1010_v15 = vsel %vm955_vm2, %v1007_v41, %v1009_v52 }
 0x165   :  { %v1141_v49 = vpop.permute.xlu1 %1140  ;;  %v725_v51 = vpop.permute.xlu0 %724 }
 0x166   :  { %1321 = vst.msk [vmem:[#allocation3 + $0x60] sm:$0xff] %vm1308_vm6, %v1141_v49  ;;  %v1017_v49 = vrot.slane %v9575_v26, 2 }
 0x167   :  { %904 = vst.msk [vmem:[#allocation3 + $0x68] sm:$0xff] %vm890_vm5, %v725_v51  ;;  %2742 = vrot.lane.b32.xlu1 %v1008_v46, %s8839_s22  ;;  %2477 = vrot.lane.b32.xlu0 %v592_v10, %s8838_s13 }
 0x169   :  { %v2195_v53 = vpop.permute.xlu1 %2194  ;;  %v1936_v55 = vpop.permute.xlu0 %1935  ;;  %v2976_v56 = vld [vmem:[#allocation3 + $0x48] sm:$0xff] }
 0x16a   :  { %2377 = vst.msk [vmem:[#allocation3 + $0x50] sm:$0xff] %vm2366_vm10, %v2195_v53  ;;  %8667 = vmatmul.mubr.msk.f32.gmra.mxu0 %vm3036_vm13, %v2976_v56 }
 0x16b   :  { %2117 = vst.msk [vmem:[#allocation3 + $0x58] sm:$0xff] %vm2105_vm9, %v1936_v55  ;;  %1684 = vrot.lane.b32.xlu1 %v592_v10, %s8835_s28  ;;  %738 = vrot.lane.b32.xlu0 %v590_v50, %s8834_s27  ;;  %v171_v50 = vld [vmem:[%s16947_s0 + $0xf8] sm:$0xff] }
 0x16c   :  { %236 = vst.msk [vmem:[#allocation2 + $0x189] sm:$0xff] %vm30_vm0, %v171_v50 }
 0x16d   :  { %v1402_v57 = vpop.permute.xlu1 %1401  ;;  %v1143_v59 = vpop.permute.xlu0 %1142 }
 0x16e   :  { %1582 = vst.msk [vmem:[#allocation3 + $0x60] sm:$0xff] %vm1569_vm7, %v1402_v57 }
 0x16f   :  { %1322 = vst.msk [vmem:[#allocation3 + $0x68] sm:$0xff] %vm1308_vm6, %v1143_v59  ;;  %2744 = vrot.lane.b32.xlu1 %v1010_v15, %s8839_s22  ;;  %1949 = vrot.lane.b32.xlu0 %v1008_v46, %s8836_s9  ;;  %v323_v59 = vld [vmem:[#allocation2 + $0x1b0] sm:$0xff] }
 0x170   :  { %409 = vst.msk [vmem:[#allocation3 + $0x100] sm:$0xff] %vm30_vm0, %v323_v59 }
 0x171   :  { %v2464_v60 = vpop.permute.xlu1 %2463  ;;  %v2197_v61 = vpop.permute.xlu0 %2196 }
 0x172   :  { %2646 = vst.msk [vmem:[#allocation3 + $0x50] sm:$0xff] %vm2635_vm11, %v2464_v60 }
 0x173   :  { %2378 = vst.msk [vmem:[#allocation3 + $0x58] sm:$0xff] %vm2366_vm10, %v2197_v61  ;;  %1156 = vrot.lane.b32.xlu1 %v1008_v46, %s8833_s26  ;;  %740 = vrot.lane.b32.xlu0 %v592_v10, %s8834_s27  ;;  %v307_v46 = vld [vmem:[#allocation2 + $0x130] sm:$0x3]  ;;  %v1016_v10 = vrot.slane %v9561_v20, 2  ;;  %v618_v61 = vrot.slane %v323_v59, 1 }
 0x174   :  { %v601_v51 = vrot.slane %v307_v46, 1  ;;  %v1019_v60 = vrot.slane %v307_v46, 2  ;;  %v174_v46 = vld [vmem:[%s16947_s0 + $0x110] sm:$0xff] }
 0x175   :  { %v1671_v63 = vpop.permute.xlu1 %1670  ;;  %v1404_v4 = vpop.permute.xlu0 %1403  ;;  %v1018_v56 = vsel %vm955_vm2, %v1016_v10, %v1017_v49  ;;  %239 = vst.msk [vmem:[#allocation2 + $0x1e1] sm:$0xff] %vm30_vm0, %v174_v46 }
 0x176   :  { %1851 = vst.msk [vmem:[#allocation3 + $0x60] sm:$0xff] %vm1838_vm8, %v1671_v63 }
 0x177   :  { %1583 = vst.msk [vmem:[#allocation3 + $0x68] sm:$0xff] %vm1569_vm7, %v1404_v4  ;;  %2210 = vrot.lane.b32.xlu1 %v9499_v48, %s8837_s12  ;;  %1951 = vrot.lane.b32.xlu0 %v1010_v15, %s8836_s9 }
 0x179   :  { %v2731_v5 = vpop.permute.xlu1 %2730  ;;  %v2466_v6 = vpop.permute.xlu0 %2465 }
 0x17a   :  { %2913 = vst.msk [vmem:[#allocation3 + $0x50] sm:$0xff] %vm2902_vm12, %v2731_v5 }
 0x17b   :  { %2647 = vst.msk [vmem:[#allocation3 + $0x58] sm:$0xff] %vm2635_vm11, %v2466_v6  ;;  %1417 = vrot.lane.b32.xlu1 %v9499_v48, %s8832_s25  ;;  %1158 = vrot.lane.b32.xlu0 %v1010_v15, %s8833_s26  ;;  %v597_v48 = vsel %vm537_vm3, %v594_v3, %v596_v14  ;;  %v1020_v3 = vsel %vm955_vm2, %v1017_v49, %v1019_v60 }
 0x17d   :  { %v1673_v9 = vpop.permute.xlu1 %1672  ;;  %v727_v40 = vpop.permute.xlu0 %726 }
 0x17e   :  { %1852 = vst.msk [vmem:[#allocation3 + $0x68] sm:$0xff] %vm1838_vm8, %v1673_v9  ;;  %v1037_v9 = vrot.slane %v9919_v30, 2 }
 0x17f   :  { %905 = vst.msk [vmem:[#allocation3 + $0x70] sm:$0xff] %vm890_vm5, %v727_v40  ;;  %2479 = vrot.lane.b32.xlu1 %v595_v7, %s8838_s13  ;;  %2212 = vrot.lane.b32.xlu0 %v9513_v54, %s8837_s12 }
 0x181   :  { %v2733_v16 = vpop.permute.xlu1 %2732  ;;  %v1938_v17 = vpop.permute.xlu0 %1937  ;;  %v2977_v45 = vld [vmem:[#allocation3 + $0x50] sm:$0xff] }
 0x182   :  { %2914 = vst.msk [vmem:[#allocation3 + $0x58] sm:$0xff] %vm2902_vm12, %v2733_v16  ;;  %8669 = vmatprep.mubr.msk.f32.mxu0 %vm3036_vm13, %v2977_v45  ;;  %v603_v45 = vrot.slane %v9663_v58, 1 }
 0x183   :  { %2118 = vst.msk [vmem:[#allocation3 + $0x60] sm:$0xff] %vm2105_vm9, %v1938_v17  ;;  %1686 = vrot.lane.b32.xlu1 %v595_v7, %s8835_s28  ;;  %1419 = vrot.lane.b32.xlu0 %v9513_v54, %s8832_s25  ;;  %v1015_v54 = vsel %vm955_vm2, %v1012_v13, %v1014_v24  ;;  %v172_v13 = vld [vmem:[%s16947_s0 + $0x100] sm:$0xff]  ;;  %v173_v17 = vld [vmem:[%s16947_s0 + $0x108] sm:$0xff] }
 0x184   :  { %237 = vst.msk [vmem:[#allocation2 + $0x1c9] sm:$0xff] %vm30_vm0, %v172_v13  ;;  %238 = vst.msk [vmem:[#allocation2 + $0x1d1] sm:$0xff] %vm30_vm0, %v173_v17 }
 0x185   :  { %v1145_v21 = vpop.permute.xlu1 %1144  ;;  %v729_v23 = vpop.permute.xlu0 %728 }
 0x186   :  { %1323 = vst.msk [vmem:[#allocation3 + $0x70] sm:$0xff] %vm1308_vm6, %v1145_v21 }
 0x187   :  { %906 = vst.msk [vmem:[#allocation3 + $0x78] sm:$0xff] %vm890_vm5, %v729_v23  ;;  %2746 = vrot.lane.b32.xlu1 %v1013_v18, %s8839_s22  ;;  %2481 = vrot.lane.b32.xlu0 %v597_v48, %s8838_s13 }
 0x189   :  { %v2199_v25 = vpop.permute.xlu1 %2198  ;;  %v1940_v27 = vpop.permute.xlu0 %1939  ;;  %v2978_v32 = vld [vmem:[#allocation3 + $0x58] sm:$0xff] }
 0x18a   :  { %2379 = vst.msk [vmem:[#allocation3 + $0x60] sm:$0xff] %vm2366_vm10, %v2199_v25  ;;  %8670 = vmatmul.mubr.msk.f32.gmra.mxu0 %vm3036_vm13, %v2978_v32  ;;  %v310_v32 = vld [vmem:[#allocation2 + $0x148] sm:$0x3] }
 0x18b   :  { %2119 = vst.msk [vmem:[#allocation3 + $0x68] sm:$0xff] %vm2105_vm9, %v1940_v27  ;;  %1688 = vrot.lane.b32.xlu1 %v597_v48, %s8835_s28  ;;  %742 = vrot.lane.b32.xlu0 %v595_v7, %s8834_s27  ;;  %v1036_v7 = vrot.slane %v323_v59, 2  ;;  %v9967_v23 = vld [vmem:[#allocation2 + $0x1c8] sm:$0xff]  ;;  %v606_v28 = vrot.slane %v310_v32, 1 }
 0x18c   :  { %411 = vst.msk [vmem:[#allocation3 + $0x110] sm:$0xff] %vm30_vm0, %v9967_v23 }
 0x18d   :  { %v1406_v47 = vpop.permute.xlu1 %1405  ;;  %v1147_v34 = vpop.permute.xlu0 %1146  ;;  %v9946_v12 = vsel %vm955_vm2, %v1036_v7, %v1037_v9 }
 0x18e   :  { %1584 = vst.msk [vmem:[#allocation3 + $0x70] sm:$0xff] %vm1569_vm7, %v1406_v47  ;;  %v1021_v47 = vrot.slane %v9663_v58, 2 }
 0x18f   :  { %1324 = vst.msk [vmem:[#allocation3 + $0x78] sm:$0xff] %vm1308_vm6, %v1147_v34  ;;  %2748 = vrot.lane.b32.xlu1 %v1015_v54, %s8839_s22  ;;  %1953 = vrot.lane.b32.xlu0 %v1013_v18, %s8836_s9  ;;  %v1022_v34 = vrot.slane %v9677_v62, 2 }
 0x191   :  { %v2468_v35 = vpop.permute.xlu1 %2467  ;;  %v2201_v29 = vpop.permute.xlu0 %2200 }
 0x192   :  { %2648 = vst.msk [vmem:[#allocation3 + $0x60] sm:$0xff] %vm2635_vm11, %v2468_v35 }
 0x193   :  { %2380 = vst.msk [vmem:[#allocation3 + $0x68] sm:$0xff] %vm2366_vm10, %v2201_v29  ;;  %1160 = vrot.lane.b32.xlu1 %v1013_v18, %s8833_s26  ;;  %744 = vrot.lane.b32.xlu0 %v597_v48, %s8834_s27  ;;  %v604_v18 = vrot.slane %v9677_v62, 1 }
 0x195   :  { %v1675_v37 = vpop.permute.xlu1 %1674  ;;  %v1408_v19 = vpop.permute.xlu0 %1407  ;;  %v605_v24 = vsel %vm537_vm3, %v603_v45, %v604_v18 }
 0x196   :  { %1853 = vst.msk [vmem:[#allocation3 + $0x70] sm:$0xff] %vm1838_vm8, %v1675_v37  ;;  %v607_v37 = vsel %vm537_vm3, %v604_v18, %v606_v28 }
 0x197   :  { %1585 = vst.msk [vmem:[#allocation3 + $0x78] sm:$0xff] %vm1569_vm7, %v1408_v19  ;;  %2214 = vrot.lane.b32.xlu1 %v9561_v20, %s8837_s12  ;;  %1955 = vrot.lane.b32.xlu0 %v1015_v54, %s8836_s9 }
 0x199   :  { %v2735_v41 = vpop.permute.xlu1 %2734  ;;  %v2470_v42 = vpop.permute.xlu0 %2469 }
 0x19a   :  { %2915 = vst.msk [vmem:[#allocation3 + $0x60] sm:$0xff] %vm2902_vm12, %v2735_v41 }
 0x19b   :  { %2649 = vst.msk [vmem:[#allocation3 + $0x68] sm:$0xff] %vm2635_vm11, %v2470_v42  ;;  %1421 = vrot.lane.b32.xlu1 %v9561_v20, %s8832_s25  ;;  %1162 = vrot.lane.b32.xlu0 %v1015_v54, %s8833_s26  ;;  %v602_v20 = vsel %vm537_vm3, %v599_v39, %v601_v51  ;;  %v9980_v54 = vld [vmem:[#allocation2 + $0x1d0] sm:$0xff]  ;;  %v1024_v39 = vrot.slane %v310_v32, 2  ;;  %v175_v51 = vld [vmem:[%s16947_s0 + $0x118] sm:$0xff]  ;;  %v177_v32 = vld [vmem:[%s16947_s0 + $0x128] sm:$0xff] }
 0x19c   :  { %412 = vst.msk [vmem:[#allocation3 + $0x118] sm:$0xff] %vm30_vm0, %v9980_v54  ;;  %240 = vst.msk [vmem:[#allocation2 + $0x1e9] sm:$0xff] %vm30_vm0, %v175_v51 }
 0x19d   :  { %v1677_v44 = vpop.permute.xlu1 %1676  ;;  %v731_v22 = vpop.permute.xlu0 %730  ;;  %242 = vst.msk [vmem:[#allocation2 + $0x201] sm:$0xff] %vm30_vm0, %v177_v32 }
 0x19e   :  { %1854 = vst.msk [vmem:[#allocation3 + $0x78] sm:$0xff] %vm1838_vm8, %v1677_v44 }
 0x19f   :  { %907 = vst.msk [vmem:[#allocation3 + $0x80] sm:$0xff] %vm890_vm5, %v731_v22  ;;  %2483 = vrot.lane.b32.xlu1 %v600_v43, %s8838_s13  ;;  %2216 = vrot.lane.b32.xlu0 %v9575_v26, %s8837_s12 }
 0x1a1   :  { %v2737_v52 = vpop.permute.xlu1 %2736  ;;  %v1942_v53 = vpop.permute.xlu0 %1941  ;;  %v2979_v55 = vld [vmem:[#allocation3 + $0x60] sm:$0xff] }
 0x1a2   :  { %2916 = vst.msk [vmem:[#allocation3 + $0x68] sm:$0xff] %vm2902_vm12, %v2737_v52  ;;  %8672 = vmatprep.mubr.msk.f32.mxu0 %vm3036_vm13, %v2979_v55  ;;  %v10022_v55 = vld [vmem:[#allocation2 + $0x1e0] sm:$0xff] }
 0x1a3   :  { %2120 = vst.msk [vmem:[#allocation3 + $0x70] sm:$0xff] %vm2105_vm9, %v1942_v53  ;;  %1690 = vrot.lane.b32.xlu1 %v600_v43, %s8835_s28  ;;  %1423 = vrot.lane.b32.xlu0 %v9575_v26, %s8832_s25  ;;  %v619_v26 = vrot.slane %v9919_v30, 1  ;;  %v10036_v59 = vld [vmem:[#allocation2 + $0x1e8] sm:$0xff] }
 0x1a4   :  { %413 = vst.msk [vmem:[#allocation3 + $0x120] sm:$0xff] %vm30_vm0, %v10022_v55  ;;  %414 = vst.msk [vmem:[#allocation3 + $0x128] sm:$0xff] %vm30_vm0, %v10036_v59 }
 0x1a5   :  { %v1149_v15 = vpop.permute.xlu1 %1148  ;;  %v733_v57 = vpop.permute.xlu0 %732  ;;  %v9931_v1 = vsel %vm537_vm3, %v618_v61, %v619_v26 }
 0x1a6   :  { %1325 = vst.msk [vmem:[#allocation3 + $0x80] sm:$0xff] %vm1308_vm6, %v1149_v15 }
 0x1a7   :  { %908 = vst.msk [vmem:[#allocation3 + $0x88] sm:$0xff] %vm890_vm5, %v733_v57  ;;  %2750 = vrot.lane.b32.xlu1 %v1018_v56, %s8839_s22  ;;  %2485 = vrot.lane.b32.xlu0 %v602_v20, %s8838_s13 }
 0x1a9   :  { %v2203_v31 = vpop.permute.xlu1 %2202  ;;  %v1944_v63 = vpop.permute.xlu0 %1943  ;;  %v2980_v4 = vld [vmem:[#allocation3 + $0x68] sm:$0xff] }
 0x1aa   :  { %2381 = vst.msk [vmem:[#allocation3 + $0x70] sm:$0xff] %vm2366_vm10, %v2203_v31  ;;  %8673 = vmatmul.mubr.msk.f32.gmra.mxu0 %vm3036_vm13, %v2980_v4  ;;  %v1026_v4 = vrot.slane %v9765_v33, 2 }
 0x1ab   :  { %2121 = vst.msk [vmem:[#allocation3 + $0x78] sm:$0xff] %vm2105_vm9, %v1944_v63  ;;  %1692 = vrot.lane.b32.xlu1 %v602_v20, %s8835_s28  ;;  %746 = vrot.lane.b32.xlu0 %v600_v43, %s8834_s27  ;;  %v313_v63 = vld [vmem:[#allocation2 + $0x160] sm:$0x3] }
 0x1ad   :  { %v1410_v5 = vpop.permute.xlu1 %1409  ;;  %v1151_v6 = vpop.permute.xlu0 %1150 }
 0x1ae   :  { %1586 = vst.msk [vmem:[#allocation3 + $0x80] sm:$0xff] %vm1569_vm7, %v1410_v5  ;;  %v611_v5 = vrot.slane %v313_v63, 1 }
 0x1af   :  { %1326 = vst.msk [vmem:[#allocation3 + $0x88] sm:$0xff] %vm1308_vm6, %v1151_v6  ;;  %2752 = vrot.lane.b32.xlu1 %v1020_v3, %s8839_s22  ;;  %1957 = vrot.lane.b32.xlu0 %v1018_v56, %s8836_s9 }
 0x1b1   :  { %v2472_v40 = vpop.permute.xlu1 %2471  ;;  %v2205_v11 = vpop.permute.xlu0 %2204 }
 0x1b2   :  { %2650 = vst.msk [vmem:[#allocation3 + $0x70] sm:$0xff] %vm2635_vm11, %v2472_v40 }
 0x1b3   :  { %2382 = vst.msk [vmem:[#allocation3 + $0x78] sm:$0xff] %vm2366_vm10, %v2205_v11  ;;  %1164 = vrot.lane.b32.xlu1 %v1018_v56, %s8833_s26  ;;  %748 = vrot.lane.b32.xlu0 %v602_v20, %s8834_s27  ;;  %v608_v56 = vrot.slane %v9765_v33, 1  ;;  %v609_v20 = vrot.slane %v9779_v36, 1 }
 0x1b5   :  { %v1679_v14 = vpop.permute.xlu1 %1678  ;;  %v1412_v16 = vpop.permute.xlu0 %1411  ;;  %v610_v60 = vsel %vm537_vm3, %v608_v56, %v609_v20 }
 0x1b6   :  { %1855 = vst.msk [vmem:[#allocation3 + $0x80] sm:$0xff] %vm1838_vm8, %v1679_v14 }
 0x1b7   :  { %1587 = vst.msk [vmem:[#allocation3 + $0x88] sm:$0xff] %vm1569_vm7, %v1412_v16  ;;  %2218 = vrot.lane.b32.xlu1 %v9663_v58, %s8837_s12  ;;  %1959 = vrot.lane.b32.xlu0 %v1020_v3, %s8836_s9  ;;  %v1029_v16 = vrot.slane %v313_v63, 2  ;;  %v179_v63 = vld [vmem:[%s16947_s0 + $0x138] sm:$0xff] }
 0x1b8   :  { %244 = vst.msk [vmem:[#allocation2 + $0x219] sm:$0xff] %vm30_vm0, %v179_v63 }
 0x1b9   :  { %v2739_v48 = vpop.permute.xlu1 %2738  ;;  %v2474_v21 = vpop.permute.xlu0 %2473 }
 0x1ba   :  { %2917 = vst.msk [vmem:[#allocation3 + $0x70] sm:$0xff] %vm2902_vm12, %v2739_v48 }
 0x1bb   :  { %2651 = vst.msk [vmem:[#allocation3 + $0x78] sm:$0xff] %vm2635_vm11, %v2474_v21  ;;  %1425 = vrot.lane.b32.xlu1 %v9663_v58, %s8832_s25  ;;  %1166 = vrot.lane.b32.xlu0 %v1020_v3, %s8833_s26  ;;  %v1023_v58 = vsel %vm955_vm2, %v1021_v47, %v1022_v34  ;;  %v1027_v3 = vrot.slane %v9779_v36, 2 }
 0x1bd   :  { %v1681_v25 = vpop.permute.xlu1 %1680  ;;  %v735_v27 = vpop.permute.xlu0 %734  ;;  %v1028_v11 = vsel %vm955_vm2, %v1026_v4, %v1027_v3  ;;  %v317_v4 = vld [vmem:[#allocation2 + $0x180] sm:$0xff] }
 0x1be   :  { %1856 = vst.msk [vmem:[#allocation3 + $0x88] sm:$0xff] %vm1838_vm8, %v1681_v25 }
 0x1bf   :  { %909 = vst.msk [vmem:[#allocation3 + $0x90] sm:$0xff] %vm890_vm5, %v735_v27  ;;  %2487 = vrot.lane.b32.xlu1 %v605_v24, %s8838_s13  ;;  %2220 = vrot.lane.b32.xlu0 %v9677_v62, %s8837_s12 }
 0x1c1   :  { %v2741_v35 = vpop.permute.xlu1 %2740  ;;  %v1946_v29 = vpop.permute.xlu0 %1945  ;;  %v2981_v50 = vld [vmem:[#allocation3 + $0x70] sm:$0xff] }
 0x1c2   :  { %2918 = vst.msk [vmem:[#allocation3 + $0x78] sm:$0xff] %vm2902_vm12, %v2741_v35  ;;  %8675 = vmatprep.mubr.msk.f32.mxu0 %vm3036_vm13, %v2981_v50  ;;  %v613_v35 = vrot.slane %v9827_v0, 1 }
 0x1c3   :  { %2122 = vst.msk [vmem:[#allocation3 + $0x80] sm:$0xff] %vm2105_vm9, %v1946_v29  ;;  %1694 = vrot.lane.b32.xlu1 %v605_v24, %s8835_s28  ;;  %1427 = vrot.lane.b32.xlu0 %v9677_v62, %s8832_s25  ;;  %v1025_v62 = vsel %vm955_vm2, %v1022_v34, %v1024_v39  ;;  %v614_v29 = vrot.slane %v9841_v8, 1 }
 0x1c5   :  { %v1153_v19 = vpop.permute.xlu1 %1152  ;;  %v737_v38 = vpop.permute.xlu0 %736 }
 0x1c6   :  { %1327 = vst.msk [vmem:[#allocation3 + $0x90] sm:$0xff] %vm1308_vm6, %v1153_v19  ;;  %v615_v19 = vsel %vm537_vm3, %v613_v35, %v614_v29 }
 0x1c7   :  { %910 = vst.msk [vmem:[#allocation3 + $0x98] sm:$0xff] %vm890_vm5, %v737_v38  ;;  %2754 = vrot.lane.b32.xlu1 %v1023_v58, %s8839_s22  ;;  %2489 = vrot.lane.b32.xlu0 %v607_v37, %s8838_s13 }
 0x1c9   :  { %v2207_v41 = vpop.permute.xlu1 %2206  ;;  %v1948_v42 = vpop.permute.xlu0 %1947  ;;  %v2982_v43 = vld [vmem:[#allocation3 + $0x78] sm:$0xff] }
 0x1ca   :  { %2383 = vst.msk [vmem:[#allocation3 + $0x80] sm:$0xff] %vm2366_vm10, %v2207_v41  ;;  %8676 = vmatmul.mubr.msk.f32.gmra.mxu0 %vm3036_vm13, %v2982_v43  ;;  %v316_v41 = vld [vmem:[#allocation2 + $0x178] sm:$0x3]  ;;  %v1032_v43 = vrot.slane %v9841_v8, 2 }
 0x1cb   :  { %2123 = vst.msk [vmem:[#allocation3 + $0x88] sm:$0xff] %vm2105_vm9, %v1948_v42  ;;  %1696 = vrot.lane.b32.xlu1 %v607_v37, %s8835_s28  ;;  %750 = vrot.lane.b32.xlu0 %v605_v24, %s8834_s27  ;;  %v176_v24 = vld [vmem:[%s16947_s0 + $0x120] sm:$0xff]  ;;  %v1031_v42 = vrot.slane %v9827_v0, 2 }
 0x1cc   :  { %241 = vst.msk [vmem:[#allocation2 + $0x1f9] sm:$0xff] %vm30_vm0, %v176_v24 }
 0x1cd   :  { %v1414_v44 = vpop.permute.xlu1 %1413  ;;  %v1155_v22 = vpop.permute.xlu0 %1154 }
 0x1ce   :  { %1588 = vst.msk [vmem:[#allocation3 + $0x90] sm:$0xff] %vm1569_vm7, %v1414_v44 }
 0x1cf   :  { %1328 = vst.msk [vmem:[#allocation3 + $0x98] sm:$0xff] %vm1308_vm6, %v1155_v22  ;;  %2756 = vrot.lane.b32.xlu1 %v1025_v62, %s8839_s22  ;;  %1961 = vrot.lane.b32.xlu0 %v1023_v58, %s8836_s9 }
 0x1d1   :  { %v2476_v10 = vpop.permute.xlu1 %2475  ;;  %v2209_v49 = vpop.permute.xlu0 %2208 }
 0x1d2   :  { %2652 = vst.msk [vmem:[#allocation3 + $0x80] sm:$0xff] %vm2635_vm11, %v2476_v10  ;;  %v1033_v10 = vsel %vm955_vm2, %v1031_v42, %v1032_v43 }
 0x1d3   :  { %2384 = vst.msk [vmem:[#allocation3 + $0x88] sm:$0xff] %vm2366_vm10, %v2209_v49  ;;  %1168 = vrot.lane.b32.xlu1 %v1023_v58, %s8833_s26  ;;  %752 = vrot.lane.b32.xlu0 %v607_v37, %s8834_s27  ;;  %v10084_v28 = vld [vmem:[#allocation2 + $0x1f8] sm:$0xff]  ;;  %v10098_v37 = vld [vmem:[#allocation2 + $0x200] sm:$0xff] }
 0x1d4   :  { %415 = vst.msk [vmem:[#allocation3 + $0x130] sm:$0xff] %vm30_vm0, %v10084_v28  ;;  %416 = vst.msk [vmem:[#allocation3 + $0x138] sm:$0xff] %vm30_vm0, %v10098_v37 }
 0x1d5   :  { %v1683_v52 = vpop.permute.xlu1 %1682  ;;  %v1416_v53 = vpop.permute.xlu0 %1415 }
 0x1d6   :  { %1857 = vst.msk [vmem:[#allocation3 + $0x90] sm:$0xff] %vm1838_vm8, %v1683_v52  ;;  %v1034_v52 = vrot.slane %v316_v41, 2 }
 0x1d7   :  { %1589 = vst.msk [vmem:[#allocation3 + $0x98] sm:$0xff] %vm1569_vm7, %v1416_v53  ;;  %2222 = vrot.lane.b32.xlu1 %v9765_v33, %s8837_s12  ;;  %1963 = vrot.lane.b32.xlu0 %v1025_v62, %s8836_s9 }
 0x1d9   :  { %v2743_v15 = vpop.permute.xlu1 %2742  ;;  %v2478_v57 = vpop.permute.xlu0 %2477 }
 0x1da   :  { %2919 = vst.msk [vmem:[#allocation3 + $0x80] sm:$0xff] %vm2902_vm12, %v2743_v15 }
 0x1db   :  { %2653 = vst.msk [vmem:[#allocation3 + $0x88] sm:$0xff] %vm2635_vm11, %v2478_v57  ;;  %1429 = vrot.lane.b32.xlu1 %v9765_v33, %s8832_s25  ;;  %1170 = vrot.lane.b32.xlu0 %v1025_v62, %s8833_s26  ;;  %v612_v33 = vsel %vm537_vm3, %v609_v20, %v611_v5  ;;  %v616_v62 = vrot.slane %v316_v41, 1 }
 0x1dd   :  { %v1685_v61 = vpop.permute.xlu1 %1684  ;;  %v739_v31 = vpop.permute.xlu0 %738 }
 0x1de   :  { %1858 = vst.msk [vmem:[#allocation3 + $0x98] sm:$0xff] %vm1838_vm8, %v1685_v61 }
 0x1df   :  { %911 = vst.msk [vmem:[#allocation3 + $0xa0] sm:$0xff] %vm890_vm5, %v739_v31  ;;  %2491 = vrot.lane.b32.xlu1 %v610_v60, %s8838_s13  ;;  %2224 = vrot.lane.b32.xlu0 %v9779_v36, %s8837_s12 }
 0x1e1   :  { %v2745_v6 = vpop.permute.xlu1 %2744  ;;  %v1950_v7 = vpop.permute.xlu0 %1949  ;;  %v2983_v40 = vld [vmem:[#allocation3 + $0x80] sm:$0xff] }
 0x1e2   :  { %2920 = vst.msk [vmem:[#allocation3 + $0x88] sm:$0xff] %vm2902_vm12, %v2745_v6  ;;  %8678 = vmatprep.mubr.msk.f32.mxu0 %vm3036_vm13, %v2983_v40  ;;  %v318_v6 = vld [vmem:[#allocation2 + $0x188] sm:$0xff]  ;;  %v1636_v40 = vrot.slane %v317_v4, 1 }
 0x1e3   :  { %2124 = vst.msk [vmem:[#allocation3 + $0x90] sm:$0xff] %vm2105_vm9, %v1950_v7  ;;  %1698 = vrot.lane.b32.xlu1 %v610_v60, %s8835_s28  ;;  %1431 = vrot.lane.b32.xlu0 %v9779_v36, %s8832_s25  ;;  %v1030_v36 = vsel %vm955_vm2, %v1027_v3, %v1029_v16 }
 0x1e5   :  { %v1157_v13 = vpop.permute.xlu1 %1156  ;;  %v741_v14 = vpop.permute.xlu0 %740 }
 0x1e6   :  { %1329 = vst.msk [vmem:[#allocation3 + $0xa0] sm:$0xff] %vm1308_vm6, %v1157_v13 }
 0x1e7   :  { %912 = vst.msk [vmem:[#allocation3 + $0xa8] sm:$0xff] %vm890_vm5, %v741_v14  ;;  %2758 = vrot.lane.b32.xlu1 %v1028_v11, %s8839_s22  ;;  %2493 = vrot.lane.b32.xlu0 %v612_v33, %s8838_s13 }
 0x1e9   :  { %v2211_v17 = vpop.permute.xlu1 %2210  ;;  %v1952_v45 = vpop.permute.xlu0 %1951  ;;  %v2984_v18 = vld [vmem:[#allocation3 + $0x88] sm:$0xff] }
 0x1ea   :  { %2385 = vst.msk [vmem:[#allocation3 + $0x90] sm:$0xff] %vm2366_vm10, %v2211_v17  ;;  %8679 = vmatmul.mubr.msk.f32.gmra.mxu0 %vm3036_vm13, %v2984_v18  ;;  %v319_v18 = vld [vmem:[#allocation2 + $0x190] sm:$0x3] }
 0x1eb   :  { %2125 = vst.msk [vmem:[#allocation3 + $0x98] sm:$0xff] %vm2105_vm9, %v1952_v45  ;;  %1700 = vrot.lane.b32.xlu1 %v612_v33, %s8835_s28  ;;  %754 = vrot.lane.b32.xlu0 %v610_v60, %s8834_s27  ;;  %v178_v60 = vld [vmem:[%s16947_s0 + $0x130] sm:$0xff] }
 0x1ec   :  { %243 = vst.msk [vmem:[#allocation2 + $0x211] sm:$0xff] %vm30_vm0, %v178_v60 }
 0x1ed   :  { %v1418_v48 = vpop.permute.xlu1 %1417  ;;  %v1159_v21 = vpop.permute.xlu0 %1158 }
 0x1ee   :  { %1590 = vst.msk [vmem:[#allocation3 + $0xa0] sm:$0xff] %vm1569_vm7, %v1418_v48  ;;  %v1904_v48 = vrot.slane %v318_v6, 2 }
 0x1ef   :  { %1330 = vst.msk [vmem:[#allocation3 + $0xa8] sm:$0xff] %vm1308_vm6, %v1159_v21  ;;  %2760 = vrot.lane.b32.xlu1 %v1030_v36, %s8839_s22  ;;  %1965 = vrot.lane.b32.xlu0 %v1028_v11, %s8836_s9  ;;  %v1639_v21 = vrot.slane %v319_v18, 1 }
 0x1f1   :  { %v2480_v25 = vpop.permute.xlu1 %2479  ;;  %v2213_v27 = vpop.permute.xlu0 %2212 }
 0x1f2   :  { %2654 = vst.msk [vmem:[#allocation3 + $0x90] sm:$0xff] %vm2635_vm11, %v2480_v25 }
 0x1f3   :  { %2386 = vst.msk [vmem:[#allocation3 + $0x98] sm:$0xff] %vm2366_vm10, %v2213_v27  ;;  %1172 = vrot.lane.b32.xlu1 %v1028_v11, %s8833_s26  ;;  %756 = vrot.lane.b32.xlu0 %v612_v33, %s8834_s27  ;;  %v10146_v7 = vld [vmem:[#allocation2 + $0x210] sm:$0xff]  ;;  %v1637_v11 = vrot.slane %v318_v6, 1  ;;  %v10156_v14 = vld [vmem:[#allocation2 + $0x218] sm:$0xff] }
 0x1f4   :  { %417 = vst.msk [vmem:[#allocation3 + $0x140] sm:$0xff] %vm30_vm0, %v10146_v7  ;;  %418 = vst.msk [vmem:[#allocation3 + $0x148] sm:$0xff] %vm30_vm0, %v10156_v14 }
 0x1f5   :  { %v1687_v47 = vpop.permute.xlu1 %1686  ;;  %v1420_v34 = vpop.permute.xlu0 %1419  ;;  %v1638_v16 = vsel %vm537_vm3, %v1636_v40, %v1637_v11 }
 0x1f6   :  { %1859 = vst.msk [vmem:[#allocation3 + $0xa0] sm:$0xff] %vm1838_vm8, %v1687_v47  ;;  %v1640_v47 = vsel %vm537_vm3, %v1637_v11, %v1639_v21 }
 0x1f7   :  { %1591 = vst.msk [vmem:[#allocation3 + $0xa8] sm:$0xff] %vm1569_vm7, %v1420_v34  ;;  %2226 = vrot.lane.b32.xlu1 %v9827_v0, %s8837_s12  ;;  %1967 = vrot.lane.b32.xlu0 %v1030_v36, %s8836_s9 }
 0x1f9   :  { %v2747_v50 = vpop.permute.xlu1 %2746  ;;  %v2482_v58 = vpop.permute.xlu0 %2481 }
 0x1fa   :  { %2921 = vst.msk [vmem:[#allocation3 + $0x90] sm:$0xff] %vm2902_vm12, %v2747_v50 }
 0x1fb   :  { %2655 = vst.msk [vmem:[#allocation3 + $0x98] sm:$0xff] %vm2635_vm11, %v2482_v58  ;;  %1433 = vrot.lane.b32.xlu1 %v9827_v0, %s8832_s25  ;;  %1174 = vrot.lane.b32.xlu0 %v1030_v36, %s8833_s26  ;;  %v617_v0 = vsel %vm537_vm3, %v614_v29, %v616_v62  ;;  %v1903_v36 = vrot.slane %v317_v4, 2  ;;  %v1906_v29 = vrot.slane %v319_v18, 2  ;;  %v180_v62 = vld [vmem:[%s16947_s0 + $0x140] sm:$0xff] }
 0x1fc   :  { %245 = vst.msk [vmem:[#allocation2 + $0x229] sm:$0xff] %vm30_vm0, %v180_v62  ;;  %v629_v62 = vrot.slane %v10036_v59, 1 }
 0x1fd   :  { %v1689_v38 = vpop.permute.xlu1 %1688  ;;  %v743_v39 = vpop.permute.xlu0 %742  ;;  %v1905_v32 = vsel %vm955_vm2, %v1903_v36, %v1904_v48  ;;  %v1041_v36 = vrot.slane %v9967_v23, 2 }
 0x1fe   :  { %1860 = vst.msk [vmem:[#allocation3 + $0xa8] sm:$0xff] %vm1838_vm8, %v1689_v38  ;;  %v325_v38 = vld [vmem:[#allocation2 + $0x1c0] sm:$0x3] }
 0x1ff   :  { %913 = vst.msk [vmem:[#allocation3 + $0xb0] sm:$0xff] %vm890_vm5, %v743_v39  ;;  %2495 = vrot.lane.b32.xlu1 %v615_v19, %s8838_s13  ;;  %2228 = vrot.lane.b32.xlu0 %v9841_v8, %s8837_s12  ;;  %v1907_v39 = vsel %vm955_vm2, %v1904_v48, %v1906_v29  ;;  %v621_v41 = vrot.slane %v325_v38, 1 }
 0x201   :  { %v2749_v44 = vpop.permute.xlu1 %2748  ;;  %v1954_v22 = vpop.permute.xlu0 %1953  ;;  %v2985_v46 = vld [vmem:[#allocation3 + $0x90] sm:$0xff] }
 0x202   :  { %2922 = vst.msk [vmem:[#allocation3 + $0x98] sm:$0xff] %vm2902_vm12, %v2749_v44  ;;  %8681 = vmatprep.mubr.msk.f32.mxu0 %vm3036_vm13, %v2985_v46  ;;  %v181_v46 = vld [vmem:[%s16947_s0 + $0x148] sm:$0xff] }
 0x203   :  { %2126 = vst.msk [vmem:[#allocation3 + $0xa0] sm:$0xff] %vm2105_vm9, %v1954_v22  ;;  %1702 = vrot.lane.b32.xlu1 %v615_v19, %s8835_s28  ;;  %1435 = vrot.lane.b32.xlu0 %v9841_v8, %s8832_s25  ;;  %v1035_v8 = vsel %vm955_vm2, %v1032_v43, %v1034_v52  ;;  %v10207_v52 = vld [vmem:[#allocation2 + $0x228] sm:$0xff] }
 0x204   :  { %246 = vst.msk [vmem:[#allocation2 + $0x231] sm:$0xff] %vm30_vm0, %v181_v46  ;;  %419 = vst.msk [vmem:[#allocation3 + $0x150] sm:$0xff] %vm30_vm0, %v10207_v52 }
 0x205   :  { %v1161_v49 = vpop.permute.xlu1 %1160  ;;  %v745_v51 = vpop.permute.xlu0 %744 }
 0x206   :  { %1331 = vst.msk [vmem:[#allocation3 + $0xb0] sm:$0xff] %vm1308_vm6, %v1161_v49 }
 0x207   :  { %914 = vst.msk [vmem:[#allocation3 + $0xb8] sm:$0xff] %vm890_vm5, %v745_v51  ;;  %2762 = vrot.lane.b32.xlu1 %v1033_v10, %s8839_s22  ;;  %2497 = vrot.lane.b32.xlu0 %v617_v0, %s8838_s13  ;;  %v10203_v51 = vld [vmem:[#allocation2 + $0x1a0] sm:$0xff] }
 0x209   :  { %v2215_v53 = vpop.permute.xlu1 %2214  ;;  %v1956_v56 = vpop.permute.xlu0 %1955  ;;  %v2986_v20 = vld [vmem:[#allocation3 + $0x98] sm:$0xff] }
 0x20a   :  { %2387 = vst.msk [vmem:[#allocation3 + $0xa0] sm:$0xff] %vm2366_vm10, %v2215_v53  ;;  %8682 = vmatmul.mubr.msk.f32.gmra.mxu0 %vm3036_vm13, %v2986_v20 }
 0x20b   :  { %2127 = vst.msk [vmem:[#allocation3 + $0xa8] sm:$0xff] %vm2105_vm9, %v1956_v56  ;;  %1704 = vrot.lane.b32.xlu1 %v617_v0, %s8835_s28  ;;  %758 = vrot.lane.b32.xlu0 %v615_v19, %s8834_s27  ;;  %v2434_v56 = vrot.slane %v10203_v51, 1 }
 0x20d   :  { %v1422_v15 = vpop.permute.xlu1 %1421  ;;  %v1163_v57 = vpop.permute.xlu0 %1162 }
 0x20e   :  { %1592 = vst.msk [vmem:[#allocation3 + $0xb0] sm:$0xff] %vm1569_vm7, %v1422_v15  ;;  %v10222_v15 = vld [vmem:[#allocation2 + $0x230] sm:$0xff] }
 0x20f   :  { %1332 = vst.msk [vmem:[#allocation3 + $0xb8] sm:$0xff] %vm1308_vm6, %v1163_v57  ;;  %2764 = vrot.lane.b32.xlu1 %v1035_v8, %s8839_s22  ;;  %1969 = vrot.lane.b32.xlu0 %v1033_v10, %s8836_s9  ;;  %v623_v57 = vrot.slane %v9967_v23, 1 }
 0x210   :  { %420 = vst.msk [vmem:[#allocation3 + $0x158] sm:$0xff] %vm30_vm0, %v10222_v15 }
 0x211   :  { %v2484_v61 = vpop.permute.xlu1 %2483  ;;  %v2217_v31 = vpop.permute.xlu0 %2216 }
 0x212   :  { %2656 = vst.msk [vmem:[#allocation3 + $0xa0] sm:$0xff] %vm2635_vm11, %v2484_v61 }
 0x213   :  { %2388 = vst.msk [vmem:[#allocation3 + $0xa8] sm:$0xff] %vm2366_vm10, %v2217_v31  ;;  %1176 = vrot.lane.b32.xlu1 %v1033_v10, %s8833_s26  ;;  %760 = vrot.lane.b32.xlu0 %v617_v0, %s8834_s27  ;;  %v320_v10 = vld [vmem:[#allocation2 + $0x198] sm:$0xff]  ;;  %v1039_v0 = vrot.slane %v325_v38, 2  ;;  %v322_v31 = vld [vmem:[#allocation2 + $0x1a8] sm:$0x3] }
 0x214   :  { %v2700_v63 = vrot.slane %v320_v10, 2  ;;  %v2703_v21 = vrot.slane %v322_v31, 2 }
 0x215   :  { %v1691_v3 = vpop.permute.xlu1 %1690  ;;  %v1424_v5 = vpop.permute.xlu0 %1423  ;;  %v1040_v53 = vsel %vm955_vm2, %v1037_v9, %v1039_v0  ;;  %v624_v9 = vrot.slane %v9980_v54, 1 }
 0x216   :  { %1861 = vst.msk [vmem:[#allocation3 + $0xb0] sm:$0xff] %vm1838_vm8, %v1691_v3  ;;  %v2701_v3 = vrot.slane %v10203_v51, 2 }
 0x217   :  { %1593 = vst.msk [vmem:[#allocation3 + $0xb8] sm:$0xff] %vm1569_vm7, %v1424_v5  ;;  %2230 = vrot.lane.b32.xlu1 %v317_v4, %s8837_s12  ;;  %1971 = vrot.lane.b32.xlu0 %v1035_v8, %s8836_s9  ;;  %v2436_v5 = vrot.slane %v322_v31, 1 }
 0x219   :  { %v2751_v33 = vpop.permute.xlu1 %2750  ;;  %v2486_v13 = vpop.permute.xlu0 %2485 }
 0x21a   :  { %2923 = vst.msk [vmem:[#allocation3 + $0xa0] sm:$0xff] %vm2902_vm12, %v2751_v33  ;;  %v328_v33 = vld [vmem:[#allocation2 + $0x1d8] sm:$0x3] }
 0x21b   :  { %2657 = vst.msk [vmem:[#allocation3 + $0xa8] sm:$0xff] %vm2635_vm11, %v2486_v13  ;;  %1437 = vrot.lane.b32.xlu1 %v317_v4, %s8832_s25  ;;  %1178 = vrot.lane.b32.xlu0 %v1035_v8, %s8833_s26  ;;  %v625_v4 = vsel %vm537_vm3, %v623_v57, %v624_v9  ;;  %v2702_v13 = vsel %vm955_vm2, %v2700_v63, %v2701_v3  ;;  %v1044_v29 = vrot.slane %v328_v33, 2 }
 0x21d   :  { %v1693_v17 = vpop.permute.xlu1 %1692  ;;  %v747_v45 = vpop.permute.xlu0 %746 }
 0x21e   :  { %1862 = vst.msk [vmem:[#allocation3 + $0xb8] sm:$0xff] %vm1838_vm8, %v1693_v17  ;;  %v626_v17 = vrot.slane %v328_v33, 1 }
 0x21f   :  { %915 = vst.msk [vmem:[#allocation3 + $0xc0] sm:$0xff] %vm890_vm5, %v747_v45  ;;  %2499 = vrot.lane.b32.xlu1 %v1638_v16, %s8838_s13  ;;  %2232 = vrot.lane.b32.xlu0 %v318_v6, %s8837_s12 }
 0x220   :  { %v627_v48 = vsel %vm537_vm3, %v624_v9, %v626_v17  ;;  %v634_v17 = vrot.slane %v10098_v37, 1 }
 0x221   :  { %v2753_v24 = vpop.permute.xlu1 %2752  ;;  %v1958_v25 = vpop.permute.xlu0 %1957  ;;  %v2987_v27 = vld [vmem:[#allocation3 + $0xa0] sm:$0xff] }
 0x222   :  { %2924 = vst.msk [vmem:[#allocation3 + $0xa8] sm:$0xff] %vm2902_vm12, %v2753_v24  ;;  %8684 = vmatprep.mubr.msk.f32.mxu0 %vm3036_vm13, %v2987_v27  ;;  %v1042_v24 = vrot.slane %v9980_v54, 2 }
 0x223   :  { %2128 = vst.msk [vmem:[#allocation3 + $0xb0] sm:$0xff] %vm2105_vm9, %v1958_v25  ;;  %1706 = vrot.lane.b32.xlu1 %v1638_v16, %s8835_s28  ;;  %1439 = vrot.lane.b32.xlu0 %v318_v6, %s8832_s25  ;;  %v2437_v16 = vsel %vm537_vm3, %v2434_v56, %v2436_v5 }
 0x224   :  { %v1045_v38 = vsel %vm955_vm2, %v1042_v24, %v1044_v29 }
 0x225   :  { %v1165_v34 = vpop.permute.xlu1 %1164  ;;  %v749_v35 = vpop.permute.xlu0 %748 }
 0x226   :  { %1333 = vst.msk [vmem:[#allocation3 + $0xc0] sm:$0xff] %vm1308_vm6, %v1165_v34 }
 0x227   :  { %916 = vst.msk [vmem:[#allocation3 + $0xc8] sm:$0xff] %vm890_vm5, %v749_v35  ;;  %2766 = vrot.lane.b32.xlu1 %v1905_v32, %s8839_s22  ;;  %2501 = vrot.lane.b32.xlu0 %v1640_v47, %s8838_s13 }
 0x229   :  { %v2219_v50 = vpop.permute.xlu1 %2218  ;;  %v1960_v58 = vpop.permute.xlu0 %1959  ;;  %v2988_v19 = vld [vmem:[#allocation3 + $0xa8] sm:$0xff] }
 0x22a   :  { %2389 = vst.msk [vmem:[#allocation3 + $0xb0] sm:$0xff] %vm2366_vm10, %v2219_v50  ;;  %8685 = vmatmul.mubr.msk.f32.gmra.mxu0 %vm3036_vm13, %v2988_v19  ;;  %v183_v19 = vld [vmem:[%s16947_s0 + $0x158] sm:$0xff] }
 0x22b   :  { %2129 = vst.msk [vmem:[#allocation3 + $0xb8] sm:$0xff] %vm2105_vm9, %v1960_v58  ;;  %1708 = vrot.lane.b32.xlu1 %v1640_v47, %s8835_s28  ;;  %762 = vrot.lane.b32.xlu0 %v9931_v1, %s8834_s27  ;;  %v622_v1 = vsel %vm537_vm3, %v619_v26, %v621_v41  ;;  %v1043_v47 = vsel %vm955_vm2, %v1041_v36, %v1042_v24 }
 0x22c   :  { %248 = vst.msk [vmem:[#allocation2 + $0x249] sm:$0xff] %vm30_vm0, %v183_v19 }
 0x22d   :  { %v1426_v42 = vpop.permute.xlu1 %1425  ;;  %v1167_v43 = vpop.permute.xlu0 %1166 }
 0x22e   :  { %1594 = vst.msk [vmem:[#allocation3 + $0xc0] sm:$0xff] %vm1569_vm7, %v1426_v42 }
 0x22f   :  { %1334 = vst.msk [vmem:[#allocation3 + $0xc8] sm:$0xff] %vm1308_vm6, %v1167_v43  ;;  %2768 = vrot.lane.b32.xlu1 %v1907_v39, %s8839_s22  ;;  %1973 = vrot.lane.b32.xlu0 %v1905_v32, %s8836_s9  ;;  %v628_v43 = vrot.slane %v10022_v55, 1 }
 0x231   :  { %v2488_v44 = vpop.permute.xlu1 %2487  ;;  %v2221_v22 = vpop.permute.xlu0 %2220  ;;  %v630_v46 = vsel %vm537_vm3, %v628_v43, %v629_v62 }
 0x232   :  { %2658 = vst.msk [vmem:[#allocation3 + $0xb0] sm:$0xff] %vm2635_vm11, %v2488_v44 }
 0x233   :  { %2390 = vst.msk [vmem:[#allocation3 + $0xb8] sm:$0xff] %vm2366_vm10, %v2221_v22  ;;  %1180 = vrot.lane.b32.xlu1 %v9946_v12, %s8833_s26  ;;  %764 = vrot.lane.b32.xlu0 %v622_v1, %s8834_s27  ;;  %v2433_v12 = vrot.slane %v320_v10, 1 }
 0x235   :  { %v1695_v26 = vpop.permute.xlu1 %1694  ;;  %v1428_v49 = vpop.permute.xlu0 %1427  ;;  %v2435_v30 = vsel %vm537_vm3, %v2433_v12, %v2434_v56 }
 0x236   :  { %1863 = vst.msk [vmem:[#allocation3 + $0xc0] sm:$0xff] %vm1838_vm8, %v1695_v26  ;;  %v331_v26 = vld [vmem:[#allocation2 + $0x1f0] sm:$0x3] }
 0x237   :  { %1595 = vst.msk [vmem:[#allocation3 + $0xc8] sm:$0xff] %vm1569_vm7, %v1428_v49  ;;  %2234 = vrot.lane.b32.xlu1 %v320_v10, %s8837_s12  ;;  %1975 = vrot.lane.b32.xlu0 %v1907_v39, %s8836_s9  ;;  %v1046_v49 = vrot.slane %v10022_v55, 2  ;;  %v631_v12 = vrot.slane %v331_v26, 1  ;;  %v1049_v9 = vrot.slane %v331_v26, 2 }
 0x239   :  { %v2755_v20 = vpop.permute.xlu1 %2754  ;;  %v2490_v8 = vpop.permute.xlu0 %2489 }
 0x23a   :  { %2925 = vst.msk [vmem:[#allocation3 + $0xb0] sm:$0xff] %vm2902_vm12, %v2755_v20 }
 0x23b   :  { %2659 = vst.msk [vmem:[#allocation3 + $0xb8] sm:$0xff] %vm2635_vm11, %v2490_v8  ;;  %1441 = vrot.lane.b32.xlu1 %v9967_v23, %s8832_s25  ;;  %1182 = vrot.lane.b32.xlu0 %v1040_v53, %s8833_s26  ;;  %v2704_v23 = vsel %vm955_vm2, %v2701_v3, %v2703_v21  ;;  %v184_v3 = vld [vmem:[%s16947_s0 + $0x160] sm:$0xff] }
 0x23c   :  { %249 = vst.msk [vmem:[#allocation2 + $0x259] sm:$0xff] %vm30_vm0, %v184_v3 }
 0x23d   :  { %v1697_v60 = vpop.permute.xlu1 %1696  ;;  %v751_v61 = vpop.permute.xlu0 %750 }
 0x23e   :  { %1864 = vst.msk [vmem:[#allocation3 + $0xc8] sm:$0xff] %vm1838_vm8, %v1697_v60 }
 0x23f   :  { %917 = vst.msk [vmem:[#allocation3 + $0xd0] sm:$0xff] %vm890_vm5, %v751_v61  ;;  %2503 = vrot.lane.b32.xlu1 %v2435_v30, %s8838_s13  ;;  %2236 = vrot.lane.b32.xlu0 %v10203_v51, %s8837_s12  ;;  %v1047_v51 = vrot.slane %v10036_v59, 2 }
 0x241   :  { %v2757_v6 = vpop.permute.xlu1 %2756  ;;  %v1962_v40 = vpop.permute.xlu0 %1961  ;;  %v2989_v11 = vld [vmem:[#allocation3 + $0xb0] sm:$0xff]  ;;  %v1048_v8 = vsel %vm955_vm2, %v1046_v49, %v1047_v51  ;;  %v638_v49 = vrot.slane %v10146_v7, 1 }
 0x242   :  { %2926 = vst.msk [vmem:[#allocation3 + $0xb8] sm:$0xff] %vm2902_vm12, %v2757_v6  ;;  %8687 = vmatprep.mubr.msk.f32.mxu0 %vm3036_vm13, %v2989_v11 }
 0x243   :  { %2130 = vst.msk [vmem:[#allocation3 + $0xc0] sm:$0xff] %vm2105_vm9, %v1962_v40  ;;  %1710 = vrot.lane.b32.xlu1 %v625_v4, %s8835_s28  ;;  %1443 = vrot.lane.b32.xlu0 %v9980_v54, %s8832_s25  ;;  %v182_v54 = vld [vmem:[%s16947_s0 + $0x150] sm:$0xff]  ;;  %v185_v40 = vld [vmem:[%s16947_s0 + $0x168] sm:$0xff] }
 0x244   :  { %247 = vst.msk [vmem:[#allocation2 + $0x241] sm:$0xff] %vm30_vm0, %v182_v54  ;;  %250 = vst.msk [vmem:[#allocation2 + $0x261] sm:$0xff] %vm30_vm0, %v185_v40 }
 0x245   :  { %v1169_v45 = vpop.permute.xlu1 %1168  ;;  %v753_v18 = vpop.permute.xlu0 %752 }
 0x246   :  { %1335 = vst.msk [vmem:[#allocation3 + $0xd0] sm:$0xff] %vm1308_vm6, %v1169_v45 }
 0x247   :  { %918 = vst.msk [vmem:[#allocation3 + $0xd8] sm:$0xff] %vm890_vm5, %v753_v18  ;;  %2770 = vrot.lane.b32.xlu1 %v2702_v13, %s8839_s22  ;;  %2505 = vrot.lane.b32.xlu0 %v2437_v16, %s8838_s13  ;;  %v10339_v13 = vld [vmem:[#allocation2 + $0x258] sm:$0xff]  ;;  %v633_v16 = vrot.slane %v10084_v28, 1 }
 0x248   :  { %423 = vst.msk [vmem:[#allocation3 + $0x170] sm:$0xff] %vm30_vm0, %v10339_v13 }
 0x249   :  { %v2223_v25 = vpop.permute.xlu1 %2222  ;;  %v1964_v27 = vpop.permute.xlu0 %1963  ;;  %v2990_v32 = vld [vmem:[#allocation3 + $0xb8] sm:$0xff] }
 0x24a   :  { %2391 = vst.msk [vmem:[#allocation3 + $0xc0] sm:$0xff] %vm2366_vm10, %v2223_v25  ;;  %8688 = vmatmul.mubr.msk.f32.gmra.mxu0 %vm3036_vm13, %v2990_v32  ;;  %v334_v25 = vld [vmem:[#allocation2 + $0x208] sm:$0x3]  ;;  %v1052_v32 = vrot.slane %v10098_v37, 2 }
 0x24b   :  { %2131 = vst.msk [vmem:[#allocation3 + $0xc8] sm:$0xff] %vm2105_vm9, %v1964_v27  ;;  %1712 = vrot.lane.b32.xlu1 %v627_v48, %s8835_s28  ;;  %766 = vrot.lane.b32.xlu0 %v625_v4, %s8834_s27  ;;  %v10277_v42 = vld [vmem:[#allocation2 + $0x240] sm:$0xff]  ;;  %v10291_v22 = vld [vmem:[#allocation2 + $0x248] sm:$0xff]  ;;  %v1051_v27 = vrot.slane %v10084_v28, 2 }
 0x24c   :  { %421 = vst.msk [vmem:[#allocation3 + $0x160] sm:$0xff] %vm30_vm0, %v10277_v42  ;;  %422 = vst.msk [vmem:[#allocation3 + $0x168] sm:$0xff] %vm30_vm0, %v10291_v22  ;;  %v10353_v36 = vld [vmem:[#allocation2 + $0x260] sm:$0xff] }
 0x24d   :  { %v1430_v34 = vpop.permute.xlu1 %1429  ;;  %v1171_v35 = vpop.permute.xlu0 %1170  ;;  %424 = vst.msk [vmem:[#allocation3 + $0x178] sm:$0xff] %vm30_vm0, %v10353_v36  ;;  %v1053_v54 = vsel %vm955_vm2, %v1051_v27, %v1052_v32  ;;  %v643_v27 = vrot.slane %v10207_v52, 1 }
 0x24e   :  { %1596 = vst.msk [vmem:[#allocation3 + $0xd0] sm:$0xff] %vm1569_vm7, %v1430_v34 }
 0x24f   :  { %1336 = vst.msk [vmem:[#allocation3 + $0xd8] sm:$0xff] %vm1308_vm6, %v1171_v35  ;;  %2772 = vrot.lane.b32.xlu1 %v2704_v23, %s8839_s22  ;;  %1977 = vrot.lane.b32.xlu0 %v1043_v47, %s8836_s9  ;;  %v636_v23 = vrot.slane %v334_v25, 1 }
 0x251   :  { %v2492_v50 = vpop.permute.xlu1 %2491  ;;  %v2225_v58 = vpop.permute.xlu0 %2224 }
 0x252   :  { %2660 = vst.msk [vmem:[#allocation3 + $0xc0] sm:$0xff] %vm2635_vm11, %v2492_v50 }
 0x253   :  { %2392 = vst.msk [vmem:[#allocation3 + $0xc8] sm:$0xff] %vm2366_vm10, %v2225_v58  ;;  %1184 = vrot.lane.b32.xlu1 %v1043_v47, %s8833_s26  ;;  %768 = vrot.lane.b32.xlu0 %v627_v48, %s8834_s27  ;;  %v635_v48 = vsel %vm537_vm3, %v633_v16, %v634_v17  ;;  %v1054_v58 = vrot.slane %v334_v25, 2 }
 0x255   :  { %v1699_v39 = vpop.permute.xlu1 %1698  ;;  %v1432_v41 = vpop.permute.xlu0 %1431 }
 0x256   :  { %1865 = vst.msk [vmem:[#allocation3 + $0xd0] sm:$0xff] %vm1838_vm8, %v1699_v39 }
 0x257   :  { %1597 = vst.msk [vmem:[#allocation3 + $0xd8] sm:$0xff] %vm1569_vm7, %v1432_v41  ;;  %2238 = vrot.lane.b32.xlu1 %v10022_v55, %s8837_s12  ;;  %1979 = vrot.lane.b32.xlu0 %v1045_v38, %s8836_s9 }
 0x259   :  { %v2759_v1 = vpop.permute.xlu1 %2758  ;;  %v2494_v44 = vpop.permute.xlu0 %2493 }
 0x25a   :  { %2927 = vst.msk [vmem:[#allocation3 + $0xc0] sm:$0xff] %vm2902_vm12, %v2759_v1 }
 0x25b   :  { %2661 = vst.msk [vmem:[#allocation3 + $0xc8] sm:$0xff] %vm2635_vm11, %v2494_v44  ;;  %1445 = vrot.lane.b32.xlu1 %v10022_v55, %s8832_s25  ;;  %1186 = vrot.lane.b32.xlu0 %v1045_v38, %s8833_s26  ;;  %v632_v55 = vsel %vm537_vm3, %v629_v62, %v631_v12  ;;  %v186_v62 = vld [vmem:[%s16947_s0 + $0x170] sm:$0xff] }
 0x25c   :  { %251 = vst.msk [vmem:[#allocation2 + $0x271] sm:$0xff] %vm30_vm0, %v186_v62 }
 0x25d   :  { %v1701_v10 = vpop.permute.xlu1 %1700  ;;  %v755_v0 = vpop.permute.xlu0 %754 }
 0x25e   :  { %1866 = vst.msk [vmem:[#allocation3 + $0xd8] sm:$0xff] %vm1838_vm8, %v1701_v10 }
 0x25f   :  { %919 = vst.msk [vmem:[#allocation3 + $0xe0] sm:$0xff] %vm890_vm5, %v755_v0  ;;  %2507 = vrot.lane.b32.xlu1 %v630_v46, %s8838_s13  ;;  %2240 = vrot.lane.b32.xlu0 %v10036_v59, %s8837_s12 }
 0x261   :  { %v2761_v53 = vpop.permute.xlu1 %2760  ;;  %v1966_v56 = vpop.permute.xlu0 %1965  ;;  %v2991_v20 = vld [vmem:[#allocation3 + $0xc0] sm:$0xff] }
 0x262   :  { %2928 = vst.msk [vmem:[#allocation3 + $0xc8] sm:$0xff] %vm2902_vm12, %v2761_v53  ;;  %8690 = vmatprep.mubr.msk.f32.mxu0 %vm3036_vm13, %v2991_v20 }
 0x263   :  { %2132 = vst.msk [vmem:[#allocation3 + $0xd0] sm:$0xff] %vm2105_vm9, %v1966_v56  ;;  %1714 = vrot.lane.b32.xlu1 %v630_v46, %s8835_s28  ;;  %1447 = vrot.lane.b32.xlu0 %v10036_v59, %s8832_s25  ;;  %v1050_v59 = vsel %vm955_vm2, %v1047_v51, %v1049_v9  ;;  %v10401_v26 = vld [vmem:[#allocation2 + $0x270] sm:$0xff]  ;;  %v639_v51 = vrot.slane %v10156_v14, 1  ;;  %v1057_v9 = vrot.slane %v10156_v14, 2 }
 0x264   :  { %425 = vst.msk [vmem:[#allocation3 + $0x180] sm:$0xff] %vm30_vm0, %v10401_v26 }
 0x265   :  { %v1173_v57 = vpop.permute.xlu1 %1172  ;;  %v757_v30 = vpop.permute.xlu0 %756  ;;  %v640_v20 = vsel %vm537_vm3, %v638_v49, %v639_v51 }
 0x266   :  { %1337 = vst.msk [vmem:[#allocation3 + $0xe0] sm:$0xff] %vm1308_vm6, %v1173_v57  ;;  %v337_v57 = vld [vmem:[#allocation2 + $0x220] sm:$0x3] }
 0x267   :  { %920 = vst.msk [vmem:[#allocation3 + $0xe8] sm:$0xff] %vm890_vm5, %v757_v30  ;;  %2774 = vrot.lane.b32.xlu1 %v1048_v8, %s8839_s22  ;;  %2509 = vrot.lane.b32.xlu0 %v632_v55, %s8838_s13  ;;  %v1056_v30 = vrot.slane %v10146_v7, 2 }
 0x269   :  { %v2227_v60 = vpop.permute.xlu1 %2226  ;;  %v1968_v61 = vpop.permute.xlu0 %1967  ;;  %v2992_v31 = vld [vmem:[#allocation3 + $0xc8] sm:$0xff] }
 0x26a   :  { %2393 = vst.msk [vmem:[#allocation3 + $0xd0] sm:$0xff] %vm2366_vm10, %v2227_v60  ;;  %8691 = vmatmul.mubr.msk.f32.gmra.mxu0 %vm3036_vm13, %v2992_v31  ;;  %v641_v60 = vrot.slane %v337_v57, 1 }
 0x26b   :  { %2133 = vst.msk [vmem:[#allocation3 + $0xd8] sm:$0xff] %vm2105_vm9, %v1968_v61  ;;  %1716 = vrot.lane.b32.xlu1 %v632_v55, %s8835_s28  ;;  %770 = vrot.lane.b32.xlu0 %v630_v46, %s8834_s27  ;;  %v187_v46 = vld [vmem:[%s16947_s0 + $0x178] sm:$0xff] }
 0x26c   :  { %252 = vst.msk [vmem:[#allocation2 + $0x279] sm:$0xff] %vm30_vm0, %v187_v46 }
 0x26d   :  { %v1434_v63 = vpop.permute.xlu1 %1433  ;;  %v1175_v4 = vpop.permute.xlu0 %1174 }
 0x26e   :  { %1598 = vst.msk [vmem:[#allocation3 + $0xe0] sm:$0xff] %vm1569_vm7, %v1434_v63  ;;  %v1058_v63 = vsel %vm955_vm2, %v1056_v30, %v1057_v9  ;;  %v648_v30 = vrot.slane %v10277_v42, 1 }
 0x26f   :  { %1338 = vst.msk [vmem:[#allocation3 + $0xe8] sm:$0xff] %vm1308_vm6, %v1175_v4  ;;  %2776 = vrot.lane.b32.xlu1 %v1050_v59, %s8839_s22  ;;  %1981 = vrot.lane.b32.xlu0 %v1048_v8, %s8836_s9 }
 0x271   :  { %v2496_v5 = vpop.permute.xlu1 %2495  ;;  %v2229_v6 = vpop.permute.xlu0 %2228 }
 0x272   :  { %2662 = vst.msk [vmem:[#allocation3 + $0xd0] sm:$0xff] %vm2635_vm11, %v2496_v5  ;;  %v1059_v5 = vrot.slane %v337_v57, 2 }
 0x273   :  { %2394 = vst.msk [vmem:[#allocation3 + $0xd8] sm:$0xff] %vm2366_vm10, %v2229_v6  ;;  %1188 = vrot.lane.b32.xlu1 %v1048_v8, %s8833_s26  ;;  %772 = vrot.lane.b32.xlu0 %v632_v55, %s8834_s27  ;;  %v10415_v56 = vld [vmem:[#allocation2 + $0x278] sm:$0xff] }
 0x274   :  { %426 = vst.msk [vmem:[#allocation3 + $0x188] sm:$0xff] %vm30_vm0, %v10415_v56 }
 0x275   :  { %v1703_v11 = vpop.permute.xlu1 %1702  ;;  %v1436_v33 = vpop.permute.xlu0 %1435 }
 0x276   :  { %1867 = vst.msk [vmem:[#allocation3 + $0xe0] sm:$0xff] %vm1838_vm8, %v1703_v11 }
 0x277   :  { %1599 = vst.msk [vmem:[#allocation3 + $0xe8] sm:$0xff] %vm1569_vm7, %v1436_v33  ;;  %2242 = vrot.lane.b32.xlu1 %v10084_v28, %s8837_s12  ;;  %1983 = vrot.lane.b32.xlu0 %v1050_v59, %s8836_s9 }
 0x279   :  { %v2763_v45 = vpop.permute.xlu1 %2762  ;;  %v2498_v18 = vpop.permute.xlu0 %2497 }
 0x27a   :  { %2929 = vst.msk [vmem:[#allocation3 + $0xd0] sm:$0xff] %vm2902_vm12, %v2763_v45 }
 0x27b   :  { %2663 = vst.msk [vmem:[#allocation3 + $0xd8] sm:$0xff] %vm2635_vm11, %v2498_v18  ;;  %1449 = vrot.lane.b32.xlu1 %v10084_v28, %s8832_s25  ;;  %1190 = vrot.lane.b32.xlu0 %v1050_v59, %s8833_s26  ;;  %v637_v28 = vsel %vm537_vm3, %v634_v17, %v636_v23  ;;  %v188_v17 = vld [vmem:[%s16947_s0 + $0x180] sm:$0xff] }
 0x27c   :  { %253 = vst.msk [vmem:[#allocation2 + $0x289] sm:$0xff] %vm30_vm0, %v188_v17 }
 0x27d   :  { %v1705_v21 = vpop.permute.xlu1 %1704  ;;  %v759_v24 = vpop.permute.xlu0 %758 }
 0x27e   :  { %1868 = vst.msk [vmem:[#allocation3 + $0xe8] sm:$0xff] %vm1838_vm8, %v1705_v21 }
 0x27f   :  { %921 = vst.msk [vmem:[#allocation3 + $0xf0] sm:$0xff] %vm890_vm5, %v759_v24  ;;  %2511 = vrot.lane.b32.xlu1 %v635_v48, %s8838_s13  ;;  %2244 = vrot.lane.b32.xlu0 %v10098_v37, %s8837_s12 }
 0x281   :  { %v2765_v47 = vpop.permute.xlu1 %2764  ;;  %v1970_v34 = vpop.permute.xlu0 %1969  ;;  %v2993_v35 = vld [vmem:[#allocation3 + $0xd0] sm:$0xff] }
 0x282   :  { %2930 = vst.msk [vmem:[#allocation3 + $0xd8] sm:$0xff] %vm2902_vm12, %v2765_v47  ;;  %8693 = vmatprep.mubr.msk.f32.mxu0 %vm3036_vm13, %v2993_v35 }
 0x283   :  { %2134 = vst.msk [vmem:[#allocation3 + $0xe0] sm:$0xff] %vm2105_vm9, %v1970_v34  ;;  %1718 = vrot.lane.b32.xlu1 %v635_v48, %s8835_s28  ;;  %1451 = vrot.lane.b32.xlu0 %v10098_v37, %s8832_s25  ;;  %v1055_v37 = vsel %vm955_vm2, %v1052_v32, %v1054_v58  ;;  %v10463_v25 = vld [vmem:[#allocation2 + $0x288] sm:$0xff]  ;;  %v644_v32 = vrot.slane %v10222_v15, 1  ;;  %v1062_v58 = vrot.slane %v10222_v15, 2 }
 0x284   :  { %427 = vst.msk [vmem:[#allocation3 + $0x190] sm:$0xff] %vm30_vm0, %v10463_v25 }
 0x285   :  { %v1177_v29 = vpop.permute.xlu1 %1176  ;;  %v761_v50 = vpop.permute.xlu0 %760  ;;  %v645_v35 = vsel %vm537_vm3, %v643_v27, %v644_v32 }
 0x286   :  { %1339 = vst.msk [vmem:[#allocation3 + $0xf0] sm:$0xff] %vm1308_vm6, %v1177_v29  ;;  %v340_v29 = vld [vmem:[#allocation2 + $0x238] sm:$0x3] }
 0x287   :  { %922 = vst.msk [vmem:[#allocation3 + $0xf8] sm:$0xff] %vm890_vm5, %v761_v50  ;;  %2778 = vrot.lane.b32.xlu1 %v1053_v54, %s8839_s22  ;;  %2513 = vrot.lane.b32.xlu0 %v637_v28, %s8838_s13  ;;  %v1061_v50 = vrot.slane %v10207_v52, 2 }
 0x289   :  { %v2231_v19 = vpop.permute.xlu1 %2230  ;;  %v1972_v38 = vpop.permute.xlu0 %1971  ;;  %v2994_v39 = vld [vmem:[#allocation3 + $0xd8] sm:$0xff] }
 0x28a   :  { %2395 = vst.msk [vmem:[#allocation3 + $0xe0] sm:$0xff] %vm2366_vm10, %v2231_v19  ;;  %8694 = vmatmul.mubr.msk.f32.gmra.mxu0 %vm3036_vm13, %v2994_v39  ;;  %v646_v19 = vrot.slane %v340_v29, 1 }
 0x28b   :  { %2135 = vst.msk [vmem:[#allocation3 + $0xe8] sm:$0xff] %vm2105_vm9, %v1972_v38  ;;  %1720 = vrot.lane.b32.xlu1 %v637_v28, %s8835_s28  ;;  %774 = vrot.lane.b32.xlu0 %v635_v48, %s8834_s27  ;;  %v189_v48 = vld [vmem:[%s16947_s0 + $0x188] sm:$0xff] }
 0x28c   :  { %254 = vst.msk [vmem:[#allocation2 + $0x291] sm:$0xff] %vm30_vm0, %v189_v48 }
 0x28d   :  { %v1438_v41 = vpop.permute.xlu1 %1437  ;;  %v1179_v43 = vpop.permute.xlu0 %1178 }
 0x28e   :  { %1600 = vst.msk [vmem:[#allocation3 + $0xf0] sm:$0xff] %vm1569_vm7, %v1438_v41  ;;  %v1063_v41 = vsel %vm955_vm2, %v1061_v50, %v1062_v58  ;;  %v653_v50 = vrot.slane %v10339_v13, 1 }
 0x28f   :  { %1340 = vst.msk [vmem:[#allocation3 + $0xf8] sm:$0xff] %vm1308_vm6, %v1179_v43  ;;  %2780 = vrot.lane.b32.xlu1 %v1055_v37, %s8839_s22  ;;  %1985 = vrot.lane.b32.xlu0 %v1053_v54, %s8836_s9 }
 0x291   :  { %v2500_v1 = vpop.permute.xlu1 %2499  ;;  %v2233_v44 = vpop.permute.xlu0 %2232 }
 0x292   :  { %2664 = vst.msk [vmem:[#allocation3 + $0xe0] sm:$0xff] %vm2635_vm11, %v2500_v1  ;;  %v1064_v1 = vrot.slane %v340_v29, 2 }
 0x293   :  { %2396 = vst.msk [vmem:[#allocation3 + $0xe8] sm:$0xff] %vm2366_vm10, %v2233_v44  ;;  %1192 = vrot.lane.b32.xlu1 %v1053_v54, %s8833_s26  ;;  %776 = vrot.lane.b32.xlu0 %v637_v28, %s8834_s27  ;;  %v10477_v34 = vld [vmem:[#allocation2 + $0x290] sm:$0xff] }
 0x294   :  { %428 = vst.msk [vmem:[#allocation3 + $0x198] sm:$0xff] %vm30_vm0, %v10477_v34 }
 0x295   :  { %v1707_v10 = vpop.permute.xlu1 %1706  ;;  %v1440_v0 = vpop.permute.xlu0 %1439 }
 0x296   :  { %1869 = vst.msk [vmem:[#allocation3 + $0xf0] sm:$0xff] %vm1838_vm8, %v1707_v10 }
 0x297   :  { %1601 = vst.msk [vmem:[#allocation3 + $0xf8] sm:$0xff] %vm1569_vm7, %v1440_v0  ;;  %2246 = vrot.lane.b32.xlu1 %v10146_v7, %s8837_s12  ;;  %1987 = vrot.lane.b32.xlu0 %v1055_v37, %s8836_s9 }
 0x299   :  { %v2767_v12 = vpop.permute.xlu1 %2766  ;;  %v2502_v53 = vpop.permute.xlu0 %2501 }
 0x29a   :  { %2931 = vst.msk [vmem:[#allocation3 + $0xe0] sm:$0xff] %vm2902_vm12, %v2767_v12 }
 0x29b   :  { %2665 = vst.msk [vmem:[#allocation3 + $0xe8] sm:$0xff] %vm2635_vm11, %v2502_v53  ;;  %1453 = vrot.lane.b32.xlu1 %v10146_v7, %s8832_s25  ;;  %1194 = vrot.lane.b32.xlu0 %v1055_v37, %s8833_s26  ;;  %v642_v7 = vsel %vm537_vm3, %v639_v51, %v641_v60  ;;  %v190_v51 = vld [vmem:[%s16947_s0 + $0x190] sm:$0xff] }
 0x29c   :  { %255 = vst.msk [vmem:[#allocation2 + $0x2a1] sm:$0xff] %vm30_vm0, %v190_v51 }
 0x29d   :  { %v1709_v8 = vpop.permute.xlu1 %1708  ;;  %v763_v55 = vpop.permute.xlu0 %762 }
 0x29e   :  { %1870 = vst.msk [vmem:[#allocation3 + $0xf8] sm:$0xff] %vm1838_vm8, %v1709_v8 }
 0x29f   :  { %923 = vst.msk [vmem:[#allocation3 + $0x100] sm:$0xff] %vm890_vm5, %v763_v55  ;;  %2515 = vrot.lane.b32.xlu1 %v640_v20, %s8838_s13  ;;  %2248 = vrot.lane.b32.xlu0 %v10156_v14, %s8837_s12 }
 0x2a1   :  { %v2769_v61 = vpop.permute.xlu1 %2768  ;;  %v1974_v31 = vpop.permute.xlu0 %1973  ;;  %v2995_v59 = vld [vmem:[#allocation3 + $0xe0] sm:$0xff] }
 0x2a2   :  { %2932 = vst.msk [vmem:[#allocation3 + $0xe8] sm:$0xff] %vm2902_vm12, %v2769_v61  ;;  %8696 = vmatprep.mubr.msk.f32.mxu0 %vm3036_vm13, %v2995_v59 }
 0x2a3   :  { %2136 = vst.msk [vmem:[#allocation3 + $0xf0] sm:$0xff] %vm2105_vm9, %v1974_v31  ;;  %1722 = vrot.lane.b32.xlu1 %v640_v20, %s8835_s28  ;;  %1455 = vrot.lane.b32.xlu0 %v10156_v14, %s8832_s25  ;;  %v1060_v14 = vsel %vm955_vm2, %v1057_v9, %v1059_v5  ;;  %v10525_v57 = vld [vmem:[#allocation2 + $0x2a0] sm:$0xff]  ;;  %v649_v9 = vrot.slane %v10291_v22, 1  ;;  %v1067_v5 = vrot.slane %v10291_v22, 2 }
 0x2a4   :  { %429 = vst.msk [vmem:[#allocation3 + $0x1a0] sm:$0xff] %vm30_vm0, %v10525_v57 }
 0x2a5   :  { %v1181_v4 = vpop.permute.xlu1 %1180  ;;  %v765_v3 = vpop.permute.xlu0 %764  ;;  %v650_v59 = vsel %vm537_vm3, %v648_v30, %v649_v9 }
 0x2a6   :  { %1341 = vst.msk [vmem:[#allocation3 + $0x100] sm:$0xff] %vm1308_vm6, %v1181_v4  ;;  %v343_v4 = vld [vmem:[#allocation2 + $0x250] sm:$0x3] }
 0x2a7   :  { %924 = vst.msk [vmem:[#allocation3 + $0x108] sm:$0xff] %vm890_vm5, %v765_v3  ;;  %2782 = vrot.lane.b32.xlu1 %v1058_v63, %s8839_s22  ;;  %2517 = vrot.lane.b32.xlu0 %v642_v7, %s8838_s13  ;;  %v1066_v3 = vrot.slane %v10277_v42, 2 }
 0x2a9   :  { %v2235_v6 = vpop.permute.xlu1 %2234  ;;  %v1976_v40 = vpop.permute.xlu0 %1975  ;;  %v2996_v11 = vld [vmem:[#allocation3 + $0xe8] sm:$0xff] }
 0x2aa   :  { %2397 = vst.msk [vmem:[#allocation3 + $0xf0] sm:$0xff] %vm2366_vm10, %v2235_v6  ;;  %8697 = vmatmul.mubr.msk.f32.gmra.mxu0 %vm3036_vm13, %v2996_v11  ;;  %v651_v6 = vrot.slane %v343_v4, 1 }
 0x2ab   :  { %2137 = vst.msk [vmem:[#allocation3 + $0xf8] sm:$0xff] %vm2105_vm9, %v1976_v40  ;;  %1724 = vrot.lane.b32.xlu1 %v642_v7, %s8835_s28  ;;  %778 = vrot.lane.b32.xlu0 %v640_v20, %s8834_s27  ;;  %v191_v20 = vld [vmem:[%s16947_s0 + $0x198] sm:$0xff] }
 0x2ac   :  { %256 = vst.msk [vmem:[#allocation2 + $0x2a9] sm:$0xff] %vm30_vm0, %v191_v20 }
 0x2ad   :  { %v1442_v33 = vpop.permute.xlu1 %1441  ;;  %v1183_v16 = vpop.permute.xlu0 %1182 }
 0x2ae   :  { %1602 = vst.msk [vmem:[#allocation3 + $0x100] sm:$0xff] %vm1569_vm7, %v1442_v33  ;;  %v1068_v33 = vsel %vm955_vm2, %v1066_v3, %v1067_v5  ;;  %v658_v3 = vrot.slane %v10401_v26, 1 }
 0x2af   :  { %1342 = vst.msk [vmem:[#allocation3 + $0x108] sm:$0xff] %vm1308_vm6, %v1183_v16  ;;  %2784 = vrot.lane.b32.xlu1 %v1060_v14, %s8839_s22  ;;  %1989 = vrot.lane.b32.xlu0 %v1058_v63, %s8836_s9 }
 0x2b1   :  { %v2504_v45 = vpop.permute.xlu1 %2503  ;;  %v2237_v18 = vpop.permute.xlu0 %2236 }
 0x2b2   :  { %2666 = vst.msk [vmem:[#allocation3 + $0xf0] sm:$0xff] %vm2635_vm11, %v2504_v45  ;;  %v1069_v45 = vrot.slane %v343_v4, 2 }
 0x2b3   :  { %2398 = vst.msk [vmem:[#allocation3 + $0xf8] sm:$0xff] %vm2366_vm10, %v2237_v18  ;;  %1196 = vrot.lane.b32.xlu1 %v1058_v63, %s8833_s26  ;;  %780 = vrot.lane.b32.xlu0 %v642_v7, %s8834_s27  ;;  %v10539_v31 = vld [vmem:[#allocation2 + $0x2a8] sm:$0xff] }
 0x2b4   :  { %430 = vst.msk [vmem:[#allocation3 + $0x1a8] sm:$0xff] %vm30_vm0, %v10539_v31 }
 0x2b5   :  { %v1711_v21 = vpop.permute.xlu1 %1710  ;;  %v1444_v24 = vpop.permute.xlu0 %1443 }
 0x2b6   :  { %1871 = vst.msk [vmem:[#allocation3 + $0x100] sm:$0xff] %vm1838_vm8, %v1711_v21 }
 0x2b7   :  { %1603 = vst.msk [vmem:[#allocation3 + $0x108] sm:$0xff] %vm1569_vm7, %v1444_v24  ;;  %2250 = vrot.lane.b32.xlu1 %v10207_v52, %s8837_s12  ;;  %1991 = vrot.lane.b32.xlu0 %v1060_v14, %s8836_s9 }
 0x2b9   :  { %v2771_v23 = vpop.permute.xlu1 %2770  ;;  %v2506_v47 = vpop.permute.xlu0 %2505 }
 0x2ba   :  { %2933 = vst.msk [vmem:[#allocation3 + $0xf0] sm:$0xff] %vm2902_vm12, %v2771_v23 }
 0x2bb   :  { %2667 = vst.msk [vmem:[#allocation3 + $0xf8] sm:$0xff] %vm2635_vm11, %v2506_v47  ;;  %1457 = vrot.lane.b32.xlu1 %v10207_v52, %s8832_s25  ;;  %1198 = vrot.lane.b32.xlu0 %v1060_v14, %s8833_s26  ;;  %v647_v52 = vsel %vm537_vm3, %v644_v32, %v646_v19  ;;  %v192_v32 = vld [vmem:[%s16947_s0 + $0x1a0] sm:$0xff] }
 0x2bc   :  { %257 = vst.msk [vmem:[#allocation2 + $0x2b9] sm:$0xff] %vm30_vm0, %v192_v32 }
 0x2bd   :  { %v1713_v54 = vpop.permute.xlu1 %1712  ;;  %v767_v28 = vpop.permute.xlu0 %766 }
 0x2be   :  { %1872 = vst.msk [vmem:[#allocation3 + $0x108] sm:$0xff] %vm1838_vm8, %v1713_v54 }
 0x2bf   :  { %925 = vst.msk [vmem:[#allocation3 + $0x110] sm:$0xff] %vm890_vm5, %v767_v28  ;;  %2519 = vrot.lane.b32.xlu1 %v645_v35, %s8838_s13  ;;  %2252 = vrot.lane.b32.xlu0 %v10222_v15, %s8837_s12 }
 0x2c1   :  { %v2773_v38 = vpop.permute.xlu1 %2772  ;;  %v1978_v39 = vpop.permute.xlu0 %1977  ;;  %v2997_v37 = vld [vmem:[#allocation3 + $0xf0] sm:$0xff] }
 0x2c2   :  { %2934 = vst.msk [vmem:[#allocation3 + $0xf8] sm:$0xff] %vm2902_vm12, %v2773_v38  ;;  %8699 = vmatprep.mubr.msk.f32.mxu0 %vm3036_vm13, %v2997_v37 }
 0x2c3   :  { %2138 = vst.msk [vmem:[#allocation3 + $0x100] sm:$0xff] %vm2105_vm9, %v1978_v39  ;;  %1726 = vrot.lane.b32.xlu1 %v645_v35, %s8835_s28  ;;  %1459 = vrot.lane.b32.xlu0 %v10222_v15, %s8832_s25  ;;  %v1065_v15 = vsel %vm955_vm2, %v1062_v58, %v1064_v1  ;;  %v10587_v29 = vld [vmem:[#allocation2 + $0x2b8] sm:$0xff]  ;;  %v654_v58 = vrot.slane %v10353_v36, 1  ;;  %v1072_v1 = vrot.slane %v10353_v36, 2 }
 0x2c4   :  { %431 = vst.msk [vmem:[#allocation3 + $0x1b0] sm:$0xff] %vm30_vm0, %v10587_v29 }
 0x2c5   :  { %v1185_v43 = vpop.permute.xlu1 %1184  ;;  %v769_v62 = vpop.permute.xlu0 %768  ;;  %v655_v37 = vsel %vm537_vm3, %v653_v50, %v654_v58 }
 0x2c6   :  { %1343 = vst.msk [vmem:[#allocation3 + $0x110] sm:$0xff] %vm1308_vm6, %v1185_v43  ;;  %v346_v43 = vld [vmem:[#allocation2 + $0x268] sm:$0x3] }
 0x2c7   :  { %926 = vst.msk [vmem:[#allocation3 + $0x118] sm:$0xff] %vm890_vm5, %v769_v62  ;;  %2786 = vrot.lane.b32.xlu1 %v1063_v41, %s8839_s22  ;;  %2521 = vrot.lane.b32.xlu0 %v647_v52, %s8838_s13  ;;  %v1071_v62 = vrot.slane %v10339_v13, 2 }
 0x2c9   :  { %v2239_v44 = vpop.permute.xlu1 %2238  ;;  %v1980_v46 = vpop.permute.xlu0 %1979  ;;  %v2998_v10 = vld [vmem:[#allocation3 + $0xf8] sm:$0xff] }
 0x2ca   :  { %2399 = vst.msk [vmem:[#allocation3 + $0x100] sm:$0xff] %vm2366_vm10, %v2239_v44  ;;  %8700 = vmatmul.mubr.msk.f32.gmra.mxu0 %vm3036_vm13, %v2998_v10  ;;  %v656_v44 = vrot.slane %v346_v43, 1 }
 0x2cb   :  { %2139 = vst.msk [vmem:[#allocation3 + $0x108] sm:$0xff] %vm2105_vm9, %v1980_v46  ;;  %1728 = vrot.lane.b32.xlu1 %v647_v52, %s8835_s28  ;;  %782 = vrot.lane.b32.xlu0 %v645_v35, %s8834_s27  ;;  %v193_v35 = vld [vmem:[%s16947_s0 + $0x1a8] sm:$0xff] }
 0x2cc   :  { %258 = vst.msk [vmem:[#allocation2 + $0x2c1] sm:$0xff] %vm30_vm0, %v193_v35 }
 0x2cd   :  { %v1446_v0 = vpop.permute.xlu1 %1445  ;;  %v1187_v49 = vpop.permute.xlu0 %1186 }
 0x2ce   :  { %1604 = vst.msk [vmem:[#allocation3 + $0x110] sm:$0xff] %vm1569_vm7, %v1446_v0  ;;  %v1073_v0 = vsel %vm955_vm2, %v1071_v62, %v1072_v1  ;;  %v663_v62 = vrot.slane %v10463_v25, 1 }
 0x2cf   :  { %1344 = vst.msk [vmem:[#allocation3 + $0x118] sm:$0xff] %vm1308_vm6, %v1187_v49  ;;  %2788 = vrot.lane.b32.xlu1 %v1065_v15, %s8839_s22  ;;  %1993 = vrot.lane.b32.xlu0 %v1063_v41, %s8836_s9 }
 0x2d1   :  { %v2508_v12 = vpop.permute.xlu1 %2507  ;;  %v2241_v53 = vpop.permute.xlu0 %2240 }
 0x2d2   :  { %2668 = vst.msk [vmem:[#allocation3 + $0x100] sm:$0xff] %vm2635_vm11, %v2508_v12  ;;  %v1074_v12 = vrot.slane %v346_v43, 2 }
 0x2d3   :  { %2400 = vst.msk [vmem:[#allocation3 + $0x108] sm:$0xff] %vm2366_vm10, %v2241_v53  ;;  %1200 = vrot.lane.b32.xlu1 %v1063_v41, %s8833_s26  ;;  %784 = vrot.lane.b32.xlu0 %v647_v52, %s8834_s27  ;;  %v10601_v39 = vld [vmem:[#allocation2 + $0x2c0] sm:$0xff] }
 0x2d4   :  { %432 = vst.msk [vmem:[#allocation3 + $0x1b8] sm:$0xff] %vm30_vm0, %v10601_v39 }
 0x2d5   :  { %v1715_v8 = vpop.permute.xlu1 %1714  ;;  %v1448_v55 = vpop.permute.xlu0 %1447 }
 0x2d6   :  { %1873 = vst.msk [vmem:[#allocation3 + $0x110] sm:$0xff] %vm1838_vm8, %v1715_v8 }
 0x2d7   :  { %1605 = vst.msk [vmem:[#allocation3 + $0x118] sm:$0xff] %vm1569_vm7, %v1448_v55  ;;  %2254 = vrot.lane.b32.xlu1 %v10277_v42, %s8837_s12  ;;  %1995 = vrot.lane.b32.xlu0 %v1065_v15, %s8836_s9 }
 0x2d9   :  { %v2775_v60 = vpop.permute.xlu1 %2774  ;;  %v2510_v61 = vpop.permute.xlu0 %2509 }
 0x2da   :  { %2935 = vst.msk [vmem:[#allocation3 + $0x100] sm:$0xff] %vm2902_vm12, %v2775_v60 }
 0x2db   :  { %2669 = vst.msk [vmem:[#allocation3 + $0x108] sm:$0xff] %vm2635_vm11, %v2510_v61  ;;  %1461 = vrot.lane.b32.xlu1 %v10277_v42, %s8832_s25  ;;  %1202 = vrot.lane.b32.xlu0 %v1065_v15, %s8833_s26  ;;  %v652_v42 = vsel %vm537_vm3, %v649_v9, %v651_v6  ;;  %v194_v9 = vld [vmem:[%s16947_s0 + $0x1b0] sm:$0xff] }
 0x2dc   :  { %259 = vst.msk [vmem:[#allocation2 + $0x2d1] sm:$0xff] %vm30_vm0, %v194_v9 }
 0x2dd   :  { %v1717_v63 = vpop.permute.xlu1 %1716  ;;  %v771_v7 = vpop.permute.xlu0 %770 }
 0x2de   :  { %1874 = vst.msk [vmem:[#allocation3 + $0x118] sm:$0xff] %vm1838_vm8, %v1717_v63 }
 0x2df   :  { %927 = vst.msk [vmem:[#allocation3 + $0x120] sm:$0xff] %vm890_vm5, %v771_v7  ;;  %2523 = vrot.lane.b32.xlu1 %v650_v59, %s8838_s13  ;;  %2256 = vrot.lane.b32.xlu0 %v10291_v22, %s8837_s12 }
 0x2e1   :  { %v2777_v40 = vpop.permute.xlu1 %2776  ;;  %v1982_v11 = vpop.permute.xlu0 %1981  ;;  %v2999_v14 = vld [vmem:[#allocation3 + $0x100] sm:$0xff] }
 0x2e2   :  { %2936 = vst.msk [vmem:[#allocation3 + $0x108] sm:$0xff] %vm2902_vm12, %v2777_v40  ;;  %8702 = vmatprep.mubr.msk.f32.mxu0 %vm3036_vm13, %v2999_v14 }
 0x2e3   :  { %2140 = vst.msk [vmem:[#allocation3 + $0x110] sm:$0xff] %vm2105_vm9, %v1982_v11  ;;  %1730 = vrot.lane.b32.xlu1 %v650_v59, %s8835_s28  ;;  %1463 = vrot.lane.b32.xlu0 %v10291_v22, %s8832_s25  ;;  %v1070_v22 = vsel %vm955_vm2, %v1067_v5, %v1069_v45  ;;  %v10649_v4 = vld [vmem:[#allocation2 + $0x2d0] sm:$0xff]  ;;  %v659_v5 = vrot.slane %v10415_v56, 1  ;;  %v1077_v45 = vrot.slane %v10415_v56, 2 }
 0x2e4   :  { %433 = vst.msk [vmem:[#allocation3 + $0x1c0] sm:$0xff] %vm30_vm0, %v10649_v4 }
 0x2e5   :  { %v1189_v16 = vpop.permute.xlu1 %1188  ;;  %v773_v17 = vpop.permute.xlu0 %772  ;;  %v660_v14 = vsel %vm537_vm3, %v658_v3, %v659_v5 }
 0x2e6   :  { %1345 = vst.msk [vmem:[#allocation3 + $0x120] sm:$0xff] %vm1308_vm6, %v1189_v16  ;;  %v349_v16 = vld [vmem:[#allocation2 + $0x280] sm:$0x3] }
 0x2e7   :  { %928 = vst.msk [vmem:[#allocation3 + $0x128] sm:$0xff] %vm890_vm5, %v773_v17  ;;  %2790 = vrot.lane.b32.xlu1 %v1068_v33, %s8839_s22  ;;  %2525 = vrot.lane.b32.xlu0 %v652_v42, %s8838_s13  ;;  %v1076_v17 = vrot.slane %v10401_v26, 2 }
 0x2e9   :  { %v2243_v18 = vpop.permute.xlu1 %2242  ;;  %v1984_v48 = vpop.permute.xlu0 %1983  ;;  %v3000_v21 = vld [vmem:[#allocation3 + $0x108] sm:$0xff] }
 0x2ea   :  { %2401 = vst.msk [vmem:[#allocation3 + $0x110] sm:$0xff] %vm2366_vm10, %v2243_v18  ;;  %8703 = vmatmul.mubr.msk.f32.gmra.mxu0 %vm3036_vm13, %v3000_v21  ;;  %v661_v18 = vrot.slane %v349_v16, 1 }
 0x2eb   :  { %2141 = vst.msk [vmem:[#allocation3 + $0x118] sm:$0xff] %vm2105_vm9, %v1984_v48  ;;  %1732 = vrot.lane.b32.xlu1 %v652_v42, %s8835_s28  ;;  %786 = vrot.lane.b32.xlu0 %v650_v59, %s8834_s27  ;;  %v195_v59 = vld [vmem:[%s16947_s0 + $0x1b8] sm:$0xff] }
 0x2ec   :  { %260 = vst.msk [vmem:[#allocation2 + $0x2d9] sm:$0xff] %vm30_vm0, %v195_v59 }
 0x2ed   :  { %v1450_v24 = vpop.permute.xlu1 %1449  ;;  %v1191_v27 = vpop.permute.xlu0 %1190 }
 0x2ee   :  { %1606 = vst.msk [vmem:[#allocation3 + $0x120] sm:$0xff] %vm1569_vm7, %v1450_v24  ;;  %v1078_v24 = vsel %vm955_vm2, %v1076_v17, %v1077_v45  ;;  %v668_v17 = vrot.slane %v10525_v57, 1 }
 0x2ef   :  { %1346 = vst.msk [vmem:[#allocation3 + $0x128] sm:$0xff] %vm1308_vm6, %v1191_v27  ;;  %2792 = vrot.lane.b32.xlu1 %v1070_v22, %s8839_s22  ;;  %1997 = vrot.lane.b32.xlu0 %v1068_v33, %s8836_s9 }
 0x2f1   :  { %v2512_v23 = vpop.permute.xlu1 %2511  ;;  %v2245_v47 = vpop.permute.xlu0 %2244 }
 0x2f2   :  { %2670 = vst.msk [vmem:[#allocation3 + $0x110] sm:$0xff] %vm2635_vm11, %v2512_v23  ;;  %v1079_v23 = vrot.slane %v349_v16, 2 }
 0x2f3   :  { %2402 = vst.msk [vmem:[#allocation3 + $0x118] sm:$0xff] %vm2366_vm10, %v2245_v47  ;;  %1204 = vrot.lane.b32.xlu1 %v1068_v33, %s8833_s26  ;;  %788 = vrot.lane.b32.xlu0 %v652_v42, %s8834_s27  ;;  %v10663_v11 = vld [vmem:[#allocation2 + $0x2d8] sm:$0xff] }
 0x2f4   :  { %434 = vst.msk [vmem:[#allocation3 + $0x1c8] sm:$0xff] %vm30_vm0, %v10663_v11 }
 0x2f5   :  { %v1719_v54 = vpop.permute.xlu1 %1718  ;;  %v1452_v28 = vpop.permute.xlu0 %1451 }
 0x2f6   :  { %1875 = vst.msk [vmem:[#allocation3 + $0x120] sm:$0xff] %vm1838_vm8, %v1719_v54 }
 0x2f7   :  { %1607 = vst.msk [vmem:[#allocation3 + $0x128] sm:$0xff] %vm1569_vm7, %v1452_v28  ;;  %2258 = vrot.lane.b32.xlu1 %v10339_v13, %s8837_s12  ;;  %1999 = vrot.lane.b32.xlu0 %v1070_v22, %s8836_s9 }
 0x2f9   :  { %v2779_v19 = vpop.permute.xlu1 %2778  ;;  %v2514_v38 = vpop.permute.xlu0 %2513 }
 0x2fa   :  { %2937 = vst.msk [vmem:[#allocation3 + $0x110] sm:$0xff] %vm2902_vm12, %v2779_v19 }
 0x2fb   :  { %2671 = vst.msk [vmem:[#allocation3 + $0x118] sm:$0xff] %vm2635_vm11, %v2514_v38  ;;  %1465 = vrot.lane.b32.xlu1 %v10339_v13, %s8832_s25  ;;  %1206 = vrot.lane.b32.xlu0 %v1070_v22, %s8833_s26  ;;  %v657_v13 = vsel %vm537_vm3, %v654_v58, %v656_v44  ;;  %v196_v58 = vld [vmem:[%s16947_s0 + $0x1c0] sm:$0xff] }
 0x2fc   :  { %261 = vst.msk [vmem:[#allocation2 + $0x2e9] sm:$0xff] %vm30_vm0, %v196_v58 }
 0x2fd   :  { %v1721_v41 = vpop.permute.xlu1 %1720  ;;  %v775_v52 = vpop.permute.xlu0 %774 }
 0x2fe   :  { %1876 = vst.msk [vmem:[#allocation3 + $0x128] sm:$0xff] %vm1838_vm8, %v1721_v41 }
 0x2ff   :  { %929 = vst.msk [vmem:[#allocation3 + $0x130] sm:$0xff] %vm890_vm5, %v775_v52  ;;  %2527 = vrot.lane.b32.xlu1 %v655_v37, %s8838_s13  ;;  %2260 = vrot.lane.b32.xlu0 %v10353_v36, %s8837_s12 }
 0x301   :  { %v2781_v46 = vpop.permute.xlu1 %2780  ;;  %v1986_v10 = vpop.permute.xlu0 %1985  ;;  %v3001_v15 = vld [vmem:[#allocation3 + $0x110] sm:$0xff] }
 0x302   :  { %2938 = vst.msk [vmem:[#allocation3 + $0x118] sm:$0xff] %vm2902_vm12, %v2781_v46  ;;  %8705 = vmatprep.mubr.msk.f32.mxu0 %vm3036_vm13, %v3001_v15 }
 0x303   :  { %2142 = vst.msk [vmem:[#allocation3 + $0x120] sm:$0xff] %vm2105_vm9, %v1986_v10  ;;  %1734 = vrot.lane.b32.xlu1 %v655_v37, %s8835_s28  ;;  %1467 = vrot.lane.b32.xlu0 %v10353_v36, %s8832_s25  ;;  %v1075_v36 = vsel %vm955_vm2, %v1072_v1, %v1074_v12  ;;  %v10711_v43 = vld [vmem:[#allocation2 + $0x2e8] sm:$0xff]  ;;  %v664_v1 = vrot.slane %v10477_v34, 1  ;;  %v1082_v12 = vrot.slane %v10477_v34, 2 }
 0x304   :  { %435 = vst.msk [vmem:[#allocation3 + $0x1d0] sm:$0xff] %vm30_vm0, %v10711_v43 }
 0x305   :  { %v1193_v49 = vpop.permute.xlu1 %1192  ;;  %v777_v51 = vpop.permute.xlu0 %776  ;;  %v665_v15 = vsel %vm537_vm3, %v663_v62, %v664_v1 }
 0x306   :  { %1347 = vst.msk [vmem:[#allocation3 + $0x130] sm:$0xff] %vm1308_vm6, %v1193_v49  ;;  %v352_v49 = vld [vmem:[#allocation2 + $0x298] sm:$0x3] }
 0x307   :  { %930 = vst.msk [vmem:[#allocation3 + $0x138] sm:$0xff] %vm890_vm5, %v777_v51  ;;  %2794 = vrot.lane.b32.xlu1 %v1073_v0, %s8839_s22  ;;  %2529 = vrot.lane.b32.xlu0 %v657_v13, %s8838_s13  ;;  %v1081_v51 = vrot.slane %v10463_v25, 2 }
 0x309   :  { %v2247_v53 = vpop.permute.xlu1 %2246  ;;  %v1988_v20 = vpop.permute.xlu0 %1987  ;;  %v3002_v8 = vld [vmem:[#allocation3 + $0x118] sm:$0xff] }
 0x30a   :  { %2403 = vst.msk [vmem:[#allocation3 + $0x120] sm:$0xff] %vm2366_vm10, %v2247_v53  ;;  %8706 = vmatmul.mubr.msk.f32.gmra.mxu0 %vm3036_vm13, %v3002_v8  ;;  %v666_v53 = vrot.slane %v352_v49, 1 }
 0x30b   :  { %2143 = vst.msk [vmem:[#allocation3 + $0x128] sm:$0xff] %vm2105_vm9, %v1988_v20  ;;  %1736 = vrot.lane.b32.xlu1 %v657_v13, %s8835_s28  ;;  %790 = vrot.lane.b32.xlu0 %v655_v37, %s8834_s27  ;;  %v197_v37 = vld [vmem:[%s16947_s0 + $0x1c8] sm:$0xff] }
 0x30c   :  { %262 = vst.msk [vmem:[#allocation2 + $0x2f1] sm:$0xff] %vm30_vm0, %v197_v37 }
 0x30d   :  { %v1454_v55 = vpop.permute.xlu1 %1453  ;;  %v1195_v30 = vpop.permute.xlu0 %1194 }
 0x30e   :  { %1608 = vst.msk [vmem:[#allocation3 + $0x130] sm:$0xff] %vm1569_vm7, %v1454_v55  ;;  %v1083_v55 = vsel %vm955_vm2, %v1081_v51, %v1082_v12  ;;  %v673_v51 = vrot.slane %v10587_v29, 1 }
 0x30f   :  { %1348 = vst.msk [vmem:[#allocation3 + $0x138] sm:$0xff] %vm1308_vm6, %v1195_v30  ;;  %2796 = vrot.lane.b32.xlu1 %v1075_v36, %s8839_s22  ;;  %2001 = vrot.lane.b32.xlu0 %v1073_v0, %s8836_s9 }
 0x311   :  { %v2516_v60 = vpop.permute.xlu1 %2515  ;;  %v2249_v61 = vpop.permute.xlu0 %2248 }
 0x312   :  { %2672 = vst.msk [vmem:[#allocation3 + $0x120] sm:$0xff] %vm2635_vm11, %v2516_v60  ;;  %v1084_v60 = vrot.slane %v352_v49, 2 }
 0x313   :  { %2404 = vst.msk [vmem:[#allocation3 + $0x128] sm:$0xff] %vm2366_vm10, %v2249_v61  ;;  %1208 = vrot.lane.b32.xlu1 %v1073_v0, %s8833_s26  ;;  %792 = vrot.lane.b32.xlu0 %v657_v13, %s8834_s27  ;;  %v10725_v10 = vld [vmem:[#allocation2 + $0x2f0] sm:$0xff] }
 0x314   :  { %436 = vst.msk [vmem:[#allocation3 + $0x1d8] sm:$0xff] %vm30_vm0, %v10725_v10 }
 0x315   :  { %v1723_v63 = vpop.permute.xlu1 %1722  ;;  %v1456_v7 = vpop.permute.xlu0 %1455 }
 0x316   :  { %1877 = vst.msk [vmem:[#allocation3 + $0x130] sm:$0xff] %vm1838_vm8, %v1723_v63 }
 0x317   :  { %1609 = vst.msk [vmem:[#allocation3 + $0x138] sm:$0xff] %vm1569_vm7, %v1456_v7  ;;  %2262 = vrot.lane.b32.xlu1 %v10401_v26, %s8837_s12  ;;  %2003 = vrot.lane.b32.xlu0 %v1075_v36, %s8836_s9 }
 0x319   :  { %v2783_v6 = vpop.permute.xlu1 %2782  ;;  %v2518_v40 = vpop.permute.xlu0 %2517 }
 0x31a   :  { %2939 = vst.msk [vmem:[#allocation3 + $0x120] sm:$0xff] %vm2902_vm12, %v2783_v6 }
 0x31b   :  { %2673 = vst.msk [vmem:[#allocation3 + $0x128] sm:$0xff] %vm2635_vm11, %v2518_v40  ;;  %1469 = vrot.lane.b32.xlu1 %v10401_v26, %s8832_s25  ;;  %1210 = vrot.lane.b32.xlu0 %v1075_v36, %s8833_s26  ;;  %v662_v26 = vsel %vm537_vm3, %v659_v5, %v661_v18  ;;  %v198_v5 = vld [vmem:[%s16947_s0 + $0x1d0] sm:$0xff] }
 0x31c   :  { %263 = vst.msk [vmem:[#allocation2 + $0x301] sm:$0xff] %vm30_vm0, %v198_v5 }
 0x31d   :  { %v1725_v33 = vpop.permute.xlu1 %1724  ;;  %v779_v42 = vpop.permute.xlu0 %778 }
 0x31e   :  { %1878 = vst.msk [vmem:[#allocation3 + $0x138] sm:$0xff] %vm1838_vm8, %v1725_v33 }
 0x31f   :  { %931 = vst.msk [vmem:[#allocation3 + $0x140] sm:$0xff] %vm890_vm5, %v779_v42  ;;  %2531 = vrot.lane.b32.xlu1 %v660_v14, %s8838_s13  ;;  %2264 = vrot.lane.b32.xlu0 %v10415_v56, %s8837_s12 }
 0x321   :  { %v2785_v48 = vpop.permute.xlu1 %2784  ;;  %v1990_v21 = vpop.permute.xlu0 %1989  ;;  %v3003_v22 = vld [vmem:[#allocation3 + $0x120] sm:$0xff] }
 0x322   :  { %2940 = vst.msk [vmem:[#allocation3 + $0x128] sm:$0xff] %vm2902_vm12, %v2785_v48  ;;  %8708 = vmatprep.mubr.msk.f32.mxu0 %vm3036_vm13, %v3003_v22 }
 0x323   :  { %2144 = vst.msk [vmem:[#allocation3 + $0x130] sm:$0xff] %vm2105_vm9, %v1990_v21  ;;  %1738 = vrot.lane.b32.xlu1 %v660_v14, %s8835_s28  ;;  %1471 = vrot.lane.b32.xlu0 %v10415_v56, %s8832_s25  ;;  %v1080_v56 = vsel %vm955_vm2, %v1077_v45, %v1079_v23  ;;  %v10773_v16 = vld [vmem:[#allocation2 + $0x300] sm:$0xff]  ;;  %v669_v45 = vrot.slane %v10539_v31, 1  ;;  %v1087_v23 = vrot.slane %v10539_v31, 2 }
 0x324   :  { %437 = vst.msk [vmem:[#allocation3 + $0x1e0] sm:$0xff] %vm30_vm0, %v10773_v16 }
 0x325   :  { %v1197_v27 = vpop.permute.xlu1 %1196  ;;  %v781_v32 = vpop.permute.xlu0 %780  ;;  %v670_v22 = vsel %vm537_vm3, %v668_v17, %v669_v45 }
 0x326   :  { %1349 = vst.msk [vmem:[#allocation3 + $0x140] sm:$0xff] %vm1308_vm6, %v1197_v27  ;;  %v355_v27 = vld [vmem:[#allocation2 + $0x2b0] sm:$0x3] }
 0x327   :  { %932 = vst.msk [vmem:[#allocation3 + $0x148] sm:$0xff] %vm890_vm5, %v781_v32  ;;  %2798 = vrot.lane.b32.xlu1 %v1078_v24, %s8839_s22  ;;  %2533 = vrot.lane.b32.xlu0 %v662_v26, %s8838_s13  ;;  %v1086_v32 = vrot.slane %v10525_v57, 2 }
 0x329   :  { %v2251_v47 = vpop.permute.xlu1 %2250  ;;  %v1992_v35 = vpop.permute.xlu0 %1991  ;;  %v3004_v54 = vld [vmem:[#allocation3 + $0x128] sm:$0xff] }
 0x32a   :  { %2405 = vst.msk [vmem:[#allocation3 + $0x130] sm:$0xff] %vm2366_vm10, %v2251_v47  ;;  %8709 = vmatmul.mubr.msk.f32.gmra.mxu0 %vm3036_vm13, %v3004_v54  ;;  %v671_v47 = vrot.slane %v355_v27, 1 }
 0x32b   :  { %2145 = vst.msk [vmem:[#allocation3 + $0x138] sm:$0xff] %vm2105_vm9, %v1992_v35  ;;  %1740 = vrot.lane.b32.xlu1 %v662_v26, %s8835_s28  ;;  %794 = vrot.lane.b32.xlu0 %v660_v14, %s8834_s27  ;;  %v199_v14 = vld [vmem:[%s16947_s0 + $0x1d8] sm:$0xff] }
 0x32c   :  { %264 = vst.msk [vmem:[#allocation2 + $0x309] sm:$0xff] %vm30_vm0, %v199_v14 }
 0x32d   :  { %v1458_v28 = vpop.permute.xlu1 %1457  ;;  %v1199_v50 = vpop.permute.xlu0 %1198 }
 0x32e   :  { %1610 = vst.msk [vmem:[#allocation3 + $0x140] sm:$0xff] %vm1569_vm7, %v1458_v28  ;;  %v1088_v28 = vsel %vm955_vm2, %v1086_v32, %v1087_v23  ;;  %v679_v32 = vrot.slane %v10663_v11, 1 }
 0x32f   :  { %1350 = vst.msk [vmem:[#allocation3 + $0x148] sm:$0xff] %vm1308_vm6, %v1199_v50  ;;  %2800 = vrot.lane.b32.xlu1 %v1080_v56, %s8839_s22  ;;  %2005 = vrot.lane.b32.xlu0 %v1078_v24, %s8836_s9 }
 0x331   :  { %v2520_v19 = vpop.permute.xlu1 %2519  ;;  %v2253_v38 = vpop.permute.xlu0 %2252 }
 0x332   :  { %2674 = vst.msk [vmem:[#allocation3 + $0x130] sm:$0xff] %vm2635_vm11, %v2520_v19  ;;  %v1089_v19 = vrot.slane %v355_v27, 2  ;;  %v678_v27 = vrot.slane %v10649_v4, 1 }
 0x333   :  { %2406 = vst.msk [vmem:[#allocation3 + $0x138] sm:$0xff] %vm2366_vm10, %v2253_v38  ;;  %1212 = vrot.lane.b32.xlu1 %v1078_v24, %s8833_s26  ;;  %796 = vrot.lane.b32.xlu0 %v662_v26, %s8834_s27  ;;  %v10787_v21 = vld [vmem:[#allocation2 + $0x308] sm:$0xff] }
 0x334   :  { %438 = vst.msk [vmem:[#allocation3 + $0x1e8] sm:$0xff] %vm30_vm0, %v10787_v21 }
 0x335   :  { %v1727_v41 = vpop.permute.xlu1 %1726  ;;  %v1460_v52 = vpop.permute.xlu0 %1459 }
 0x336   :  { %1879 = vst.msk [vmem:[#allocation3 + $0x140] sm:$0xff] %vm1838_vm8, %v1727_v41 }
 0x337   :  { %1611 = vst.msk [vmem:[#allocation3 + $0x148] sm:$0xff] %vm1569_vm7, %v1460_v52  ;;  %2266 = vrot.lane.b32.xlu1 %v10463_v25, %s8837_s12  ;;  %2007 = vrot.lane.b32.xlu0 %v1080_v56, %s8836_s9 }
 0x339   :  { %v2787_v44 = vpop.permute.xlu1 %2786  ;;  %v2522_v46 = vpop.permute.xlu0 %2521 }
 0x33a   :  { %2941 = vst.msk [vmem:[#allocation3 + $0x130] sm:$0xff] %vm2902_vm12, %v2787_v44 }
 0x33b   :  { %2675 = vst.msk [vmem:[#allocation3 + $0x138] sm:$0xff] %vm2635_vm11, %v2522_v46  ;;  %1473 = vrot.lane.b32.xlu1 %v10463_v25, %s8832_s25  ;;  %1214 = vrot.lane.b32.xlu0 %v1080_v56, %s8833_s26  ;;  %v667_v25 = vsel %vm537_vm3, %v664_v1, %v666_v53  ;;  %v200_v1 = vld [vmem:[%s16947_s0 + $0x1e0] sm:$0xff] }
 0x33c   :  { %265 = vst.msk [vmem:[#allocation2 + $0x319] sm:$0xff] %vm30_vm0, %v200_v1 }
 0x33d   :  { %v1729_v0 = vpop.permute.xlu1 %1728  ;;  %v783_v13 = vpop.permute.xlu0 %782 }
 0x33e   :  { %1880 = vst.msk [vmem:[#allocation3 + $0x148] sm:$0xff] %vm1838_vm8, %v1729_v0 }
 0x33f   :  { %933 = vst.msk [vmem:[#allocation3 + $0x150] sm:$0xff] %vm890_vm5, %v783_v13  ;;  %2535 = vrot.lane.b32.xlu1 %v665_v15, %s8838_s13  ;;  %2268 = vrot.lane.b32.xlu0 %v10477_v34, %s8837_s12 }
 0x341   :  { %v2789_v20 = vpop.permute.xlu1 %2788  ;;  %v1994_v8 = vpop.permute.xlu0 %1993  ;;  %v3005_v36 = vld [vmem:[#allocation3 + $0x130] sm:$0xff] }
 0x342   :  { %2942 = vst.msk [vmem:[#allocation3 + $0x138] sm:$0xff] %vm2902_vm12, %v2789_v20  ;;  %8711 = vmatprep.mubr.msk.f32.mxu0 %vm3036_vm13, %v3005_v36 }
 0x343   :  { %2146 = vst.msk [vmem:[#allocation3 + $0x140] sm:$0xff] %vm2105_vm9, %v1994_v8  ;;  %1742 = vrot.lane.b32.xlu1 %v665_v15, %s8835_s28  ;;  %1475 = vrot.lane.b32.xlu0 %v10477_v34, %s8832_s25  ;;  %v1085_v34 = vsel %vm955_vm2, %v1082_v12, %v1084_v60  ;;  %v10835_v49 = vld [vmem:[#allocation2 + $0x318] sm:$0xff]  ;;  %v674_v12 = vrot.slane %v10601_v39, 1  ;;  %v1092_v60 = vrot.slane %v10601_v39, 2 }
 0x344   :  { %439 = vst.msk [vmem:[#allocation3 + $0x1f0] sm:$0xff] %vm30_vm0, %v10835_v49 }
 0x345   :  { %v1201_v30 = vpop.permute.xlu1 %1200  ;;  %v785_v9 = vpop.permute.xlu0 %784  ;;  %v675_v36 = vsel %vm537_vm3, %v673_v51, %v674_v12 }
 0x346   :  { %1351 = vst.msk [vmem:[#allocation3 + $0x150] sm:$0xff] %vm1308_vm6, %v1201_v30  ;;  %v358_v30 = vld [vmem:[#allocation2 + $0x2c8] sm:$0x3] }
 0x347   :  { %934 = vst.msk [vmem:[#allocation3 + $0x158] sm:$0xff] %vm890_vm5, %v785_v9  ;;  %2802 = vrot.lane.b32.xlu1 %v1083_v55, %s8839_s22  ;;  %2537 = vrot.lane.b32.xlu0 %v667_v25, %s8838_s13  ;;  %v1091_v9 = vrot.slane %v10587_v29, 2 }
 0x349   :  { %v2255_v61 = vpop.permute.xlu1 %2254  ;;  %v1996_v59 = vpop.permute.xlu0 %1995  ;;  %v3006_v63 = vld [vmem:[#allocation3 + $0x138] sm:$0xff] }
 0x34a   :  { %2407 = vst.msk [vmem:[#allocation3 + $0x140] sm:$0xff] %vm2366_vm10, %v2255_v61  ;;  %8712 = vmatmul.mubr.msk.f32.gmra.mxu0 %vm3036_vm13, %v3006_v63  ;;  %v676_v61 = vrot.slane %v358_v30, 1 }
 0x34b   :  { %2147 = vst.msk [vmem:[#allocation3 + $0x148] sm:$0xff] %vm2105_vm9, %v1996_v59  ;;  %1744 = vrot.lane.b32.xlu1 %v667_v25, %s8835_s28  ;;  %798 = vrot.lane.b32.xlu0 %v665_v15, %s8834_s27  ;;  %v201_v15 = vld [vmem:[%s16947_s0 + $0x1e8] sm:$0xff] }
 0x34c   :  { %266 = vst.msk [vmem:[#allocation2 + $0x321] sm:$0xff] %vm30_vm0, %v201_v15 }
 0x34d   :  { %v1462_v7 = vpop.permute.xlu1 %1461  ;;  %v1203_v3 = vpop.permute.xlu0 %1202 }
 0x34e   :  { %1612 = vst.msk [vmem:[#allocation3 + $0x150] sm:$0xff] %vm1569_vm7, %v1462_v7  ;;  %v1093_v7 = vsel %vm955_vm2, %v1091_v9, %v1092_v60 }
 0x34f   :  { %1352 = vst.msk [vmem:[#allocation3 + $0x158] sm:$0xff] %vm1308_vm6, %v1203_v3  ;;  %2804 = vrot.lane.b32.xlu1 %v1085_v34, %s8839_s22  ;;  %2009 = vrot.lane.b32.xlu0 %v1083_v55, %s8836_s9 }
 0x351   :  { %v2524_v6 = vpop.permute.xlu1 %2523  ;;  %v2257_v40 = vpop.permute.xlu0 %2256 }
 0x352   :  { %2676 = vst.msk [vmem:[#allocation3 + $0x140] sm:$0xff] %vm2635_vm11, %v2524_v6  ;;  %v1094_v6 = vrot.slane %v358_v30, 2 }
 0x353   :  { %2408 = vst.msk [vmem:[#allocation3 + $0x148] sm:$0xff] %vm2366_vm10, %v2257_v40  ;;  %1216 = vrot.lane.b32.xlu1 %v1083_v55, %s8833_s26  ;;  %800 = vrot.lane.b32.xlu0 %v667_v25, %s8834_s27  ;;  %v10849_v8 = vld [vmem:[#allocation2 + $0x320] sm:$0xff] }
 0x354   :  { %440 = vst.msk [vmem:[#allocation3 + $0x1f8] sm:$0xff] %vm30_vm0, %v10849_v8 }
 0x355   :  { %v1731_v33 = vpop.permute.xlu1 %1730  ;;  %v1464_v42 = vpop.permute.xlu0 %1463 }
 0x356   :  { %1881 = vst.msk [vmem:[#allocation3 + $0x150] sm:$0xff] %vm1838_vm8, %v1731_v33 }
 0x357   :  { %1613 = vst.msk [vmem:[#allocation3 + $0x158] sm:$0xff] %vm1569_vm7, %v1464_v42  ;;  %2270 = vrot.lane.b32.xlu1 %v10525_v57, %s8837_s12  ;;  %2011 = vrot.lane.b32.xlu0 %v1085_v34, %s8836_s9 }
 0x359   :  { %v2791_v18 = vpop.permute.xlu1 %2790  ;;  %v2526_v48 = vpop.permute.xlu0 %2525 }
 0x35a   :  { %2943 = vst.msk [vmem:[#allocation3 + $0x140] sm:$0xff] %vm2902_vm12, %v2791_v18 }
 0x35b   :  { %2677 = vst.msk [vmem:[#allocation3 + $0x148] sm:$0xff] %vm2635_vm11, %v2526_v48  ;;  %1477 = vrot.lane.b32.xlu1 %v10525_v57, %s8832_s25  ;;  %1218 = vrot.lane.b32.xlu0 %v1085_v34, %s8833_s26  ;;  %v672_v57 = vsel %vm537_vm3, %v669_v45, %v671_v47  ;;  %v202_v45 = vld [vmem:[%s16947_s0 + $0x1f0] sm:$0xff] }
 0x35c   :  { %267 = vst.msk [vmem:[#allocation2 + $0x331] sm:$0xff] %vm30_vm0, %v202_v45 }
 0x35d   :  { %v1733_v24 = vpop.permute.xlu1 %1732  ;;  %v787_v26 = vpop.permute.xlu0 %786 }
 0x35e   :  { %1882 = vst.msk [vmem:[#allocation3 + $0x158] sm:$0xff] %vm1838_vm8, %v1733_v24 }
 0x35f   :  { %935 = vst.msk [vmem:[#allocation3 + $0x160] sm:$0xff] %vm890_vm5, %v787_v26  ;;  %2539 = vrot.lane.b32.xlu1 %v670_v22, %s8838_s13  ;;  %2272 = vrot.lane.b32.xlu0 %v10539_v31, %s8837_s12 }
 0x361   :  { %v2793_v35 = vpop.permute.xlu1 %2792  ;;  %v1998_v54 = vpop.permute.xlu0 %1997  ;;  %v3007_v56 = vld [vmem:[#allocation3 + $0x140] sm:$0xff] }
 0x362   :  { %2944 = vst.msk [vmem:[#allocation3 + $0x148] sm:$0xff] %vm2902_vm12, %v2793_v35  ;;  %8714 = vmatprep.mubr.msk.f32.mxu0 %vm3036_vm13, %v3007_v56  ;;  %v680_v35 = vsel %vm537_vm3, %v678_v27, %v679_v32  ;;  %v689_v27 = vrot.slane %v10787_v21, 1 }
 0x363   :  { %2148 = vst.msk [vmem:[#allocation3 + $0x150] sm:$0xff] %vm2105_vm9, %v1998_v54  ;;  %1746 = vrot.lane.b32.xlu1 %v670_v22, %s8835_s28  ;;  %1479 = vrot.lane.b32.xlu0 %v10539_v31, %s8832_s25  ;;  %v1090_v31 = vsel %vm955_vm2, %v1087_v23, %v1089_v19 }
 0x365   :  { %v1205_v50 = vpop.permute.xlu1 %1204  ;;  %v789_v58 = vpop.permute.xlu0 %788 }
 0x366   :  { %1353 = vst.msk [vmem:[#allocation3 + $0x160] sm:$0xff] %vm1308_vm6, %v1205_v50  ;;  %v1097_v50 = vrot.slane %v10663_v11, 2 }
 0x367   :  { %936 = vst.msk [vmem:[#allocation3 + $0x168] sm:$0xff] %vm890_vm5, %v789_v58  ;;  %2806 = vrot.lane.b32.xlu1 %v1088_v28, %s8839_s22  ;;  %2541 = vrot.lane.b32.xlu0 %v672_v57, %s8838_s13 }
 0x369   :  { %v2259_v38 = vpop.permute.xlu1 %2258  ;;  %v2000_v37 = vpop.permute.xlu0 %1999  ;;  %v3008_v41 = vld [vmem:[#allocation3 + $0x148] sm:$0xff] }
 0x36a   :  { %2409 = vst.msk [vmem:[#allocation3 + $0x150] sm:$0xff] %vm2366_vm10, %v2259_v38  ;;  %8715 = vmatmul.mubr.msk.f32.gmra.mxu0 %vm3036_vm13, %v3008_v41 }
 0x36b   :  { %2149 = vst.msk [vmem:[#allocation3 + $0x158] sm:$0xff] %vm2105_vm9, %v2000_v37  ;;  %1748 = vrot.lane.b32.xlu1 %v672_v57, %s8835_s28  ;;  %802 = vrot.lane.b32.xlu0 %v670_v22, %s8834_s27  ;;  %v203_v22 = vld [vmem:[%s16947_s0 + $0x1f8] sm:$0xff] }
 0x36c   :  { %268 = vst.msk [vmem:[#allocation2 + $0x339] sm:$0xff] %vm30_vm0, %v203_v22  ;;  %vm17355_vm0 = vcmask 1041409  }
 0x36d   :  { %v1466_v52 = vpop.permute.xlu1 %1465  ;;  %v1207_v62 = vpop.permute.xlu0 %1206 }
 0x36e   :  { %1614 = vst.msk [vmem:[#allocation3 + $0x160] sm:$0xff] %vm1569_vm7, %v1466_v52 }
 0x36f   :  { %1354 = vst.msk [vmem:[#allocation3 + $0x168] sm:$0xff] %vm1308_vm6, %v1207_v62  ;;  %2808 = vrot.lane.b32.xlu1 %v1090_v31, %s8839_s22  ;;  %2013 = vrot.lane.b32.xlu0 %v1088_v28, %s8836_s9 }
 0x371   :  { %v2528_v44 = vpop.permute.xlu1 %2527  ;;  %v2261_v46 = vpop.permute.xlu0 %2260 }
 0x372   :  { %2678 = vst.msk [vmem:[#allocation3 + $0x150] sm:$0xff] %vm2635_vm11, %v2528_v44 }
 0x373   :  { %2410 = vst.msk [vmem:[#allocation3 + $0x158] sm:$0xff] %vm2366_vm10, %v2261_v46  ;;  %1220 = vrot.lane.b32.xlu1 %v1088_v28, %s8833_s26  ;;  %804 = vrot.lane.b32.xlu0 %v672_v57, %s8834_s27  ;;  %v361_v28 = vld [vmem:[#allocation2 + $0x2e0] sm:$0x3]  ;;  %v1096_v57 = vrot.slane %v10649_v4, 2 }
 0x374   :  { %v681_v58 = vrot.slane %v361_v28, 1  ;;  %v1099_v62 = vrot.slane %v361_v28, 2  ;;  %v1106_v28 = vrot.slane %v10773_v16, 2 }
 0x375   :  { %v1735_v0 = vpop.permute.xlu1 %1734  ;;  %v1468_v13 = vpop.permute.xlu0 %1467  ;;  %v1098_v41 = vsel %vm955_vm2, %v1096_v57, %v1097_v50  ;;  %v1107_v57 = vrot.slane %v10787_v21, 2 }
 0x376   :  { %1883 = vst.msk [vmem:[#allocation3 + $0x160] sm:$0xff] %vm1838_vm8, %v1735_v0 }
 0x377   :  { %1615 = vst.msk [vmem:[#allocation3 + $0x168] sm:$0xff] %vm1569_vm7, %v1468_v13  ;;  %2274 = vrot.lane.b32.xlu1 %v10587_v29, %s8837_s12  ;;  %2015 = vrot.lane.b32.xlu0 %v1090_v31, %s8836_s9 }
 0x379   :  { %v2795_v53 = vpop.permute.xlu1 %2794  ;;  %v2530_v20 = vpop.permute.xlu0 %2529 }
 0x37a   :  { %2945 = vst.msk [vmem:[#allocation3 + $0x150] sm:$0xff] %vm2902_vm12, %v2795_v53 }
 0x37b   :  { %2679 = vst.msk [vmem:[#allocation3 + $0x158] sm:$0xff] %vm2635_vm11, %v2530_v20  ;;  %1481 = vrot.lane.b32.xlu1 %v10587_v29, %s8832_s25  ;;  %1222 = vrot.lane.b32.xlu0 %v1090_v31, %s8833_s26  ;;  %v677_v29 = vsel %vm537_vm3, %v674_v12, %v676_v61  ;;  %v683_v20 = vrot.slane %v10711_v43, 1  ;;  %v364_v61 = vld [vmem:[#allocation2 + $0x2f8] sm:$0x3] }
 0x37d   :  { %v1737_v55 = vpop.permute.xlu1 %1736  ;;  %v791_v25 = vpop.permute.xlu0 %790 }
 0x37e   :  { %1884 = vst.msk [vmem:[#allocation3 + $0x168] sm:$0xff] %vm1838_vm8, %v1737_v55 }
 0x37f   :  { %937 = vst.msk [vmem:[#allocation3 + $0x170] sm:$0xff] %vm890_vm5, %v791_v25  ;;  %2543 = vrot.lane.b32.xlu1 %v675_v36, %s8838_s13  ;;  %2276 = vrot.lane.b32.xlu0 %v10601_v39, %s8837_s12 }
 0x381   :  { %v2797_v59 = vpop.permute.xlu1 %2796  ;;  %v2002_v63 = vpop.permute.xlu0 %2001  ;;  %v3009_v34 = vld [vmem:[#allocation3 + $0x150] sm:$0xff] }
 0x382   :  { %2946 = vst.msk [vmem:[#allocation3 + $0x158] sm:$0xff] %vm2902_vm12, %v2797_v59  ;;  %8717 = vmatprep.mubr.msk.f32.mxu0 %vm3036_vm13, %v3009_v34  ;;  %v1101_v59 = vrot.slane %v10711_v43, 2  ;;  %v686_v34 = vrot.slane %v364_v61, 1 }
 0x383   :  { %2150 = vst.msk [vmem:[#allocation3 + $0x160] sm:$0xff] %vm2105_vm9, %v2002_v63  ;;  %1750 = vrot.lane.b32.xlu1 %v675_v36, %s8835_s28  ;;  %1483 = vrot.lane.b32.xlu0 %v10601_v39, %s8832_s25  ;;  %v1095_v39 = vsel %vm955_vm2, %v1092_v60, %v1094_v6  ;;  %v1102_v63 = vrot.slane %v10725_v10, 2 }
 0x385   :  { %v1209_v3 = vpop.permute.xlu1 %1208  ;;  %v793_v5 = vpop.permute.xlu0 %792 }
 0x386   :  { %1355 = vst.msk [vmem:[#allocation3 + $0x170] sm:$0xff] %vm1308_vm6, %v1209_v3 }
 0x387   :  { %938 = vst.msk [vmem:[#allocation3 + $0x178] sm:$0xff] %vm890_vm5, %v793_v5  ;;  %2810 = vrot.lane.b32.xlu1 %v1093_v7, %s8839_s22  ;;  %2545 = vrot.lane.b32.xlu0 %v677_v29, %s8838_s13  ;;  %v1103_v5 = vsel %vm955_vm2, %v1101_v59, %v1102_v63 }
 0x389   :  { %v2263_v40 = vpop.permute.xlu1 %2262  ;;  %v2004_v14 = vpop.permute.xlu0 %2003  ;;  %v3010_v33 = vld [vmem:[#allocation3 + $0x158] sm:$0xff] }
 0x38a   :  { %2411 = vst.msk [vmem:[#allocation3 + $0x160] sm:$0xff] %vm2366_vm10, %v2263_v40  ;;  %8718 = vmatmul.mubr.msk.f32.gmra.mxu0 %vm3036_vm13, %v3010_v33 }
 0x38b   :  { %2151 = vst.msk [vmem:[#allocation3 + $0x168] sm:$0xff] %vm2105_vm9, %v2004_v14  ;;  %1752 = vrot.lane.b32.xlu1 %v677_v29, %s8835_s28  ;;  %806 = vrot.lane.b32.xlu0 %v675_v36, %s8834_s27  ;;  %v684_v36 = vrot.slane %v10725_v10, 1  ;;  %v1104_v14 = vrot.slane %v364_v61, 2 }
 0x38d   :  { %v1470_v42 = vpop.permute.xlu1 %1469  ;;  %v1211_v17 = vpop.permute.xlu0 %1210  ;;  %v685_v30 = vsel %vm537_vm3, %v683_v20, %v684_v36 }
 0x38e   :  { %1616 = vst.msk [vmem:[#allocation3 + $0x170] sm:$0xff] %vm1569_vm7, %v1470_v42 }
 0x38f   :  { %1356 = vst.msk [vmem:[#allocation3 + $0x178] sm:$0xff] %vm1308_vm6, %v1211_v17  ;;  %2812 = vrot.lane.b32.xlu1 %v1095_v39, %s8839_s22  ;;  %2017 = vrot.lane.b32.xlu0 %v1093_v7, %s8836_s9 }
 0x391   :  { %v2532_v18 = vpop.permute.xlu1 %2531  ;;  %v2265_v48 = vpop.permute.xlu0 %2264 }
 0x392   :  { %2680 = vst.msk [vmem:[#allocation3 + $0x160] sm:$0xff] %vm2635_vm11, %v2532_v18 }
 0x393   :  { %2412 = vst.msk [vmem:[#allocation3 + $0x168] sm:$0xff] %vm2366_vm10, %v2265_v48  ;;  %1224 = vrot.lane.b32.xlu1 %v1093_v7, %s8833_s26  ;;  %808 = vrot.lane.b32.xlu0 %v677_v29, %s8834_s27 }
 0x395   :  { %v1739_v24 = vpop.permute.xlu1 %1738  ;;  %v1472_v26 = vpop.permute.xlu0 %1471 }
 0x396   :  { %1885 = vst.msk [vmem:[#allocation3 + $0x170] sm:$0xff] %vm1838_vm8, %v1739_v24 }
 0x397   :  { %1617 = vst.msk [vmem:[#allocation3 + $0x178] sm:$0xff] %vm1569_vm7, %v1472_v26  ;;  %2278 = vrot.lane.b32.xlu1 %v10649_v4, %s8837_s12  ;;  %2019 = vrot.lane.b32.xlu0 %v1095_v39, %s8836_s9  ;;  %v688_v26 = vrot.slane %v10773_v16, 1 }
 0x399   :  { %v2799_v23 = vpop.permute.xlu1 %2798  ;;  %v2534_v47 = vpop.permute.xlu0 %2533 }
 0x39a   :  { %2947 = vst.msk [vmem:[#allocation3 + $0x160] sm:$0xff] %vm2902_vm12, %v2799_v23 }
 0x39b   :  { %2681 = vst.msk [vmem:[#allocation3 + $0x168] sm:$0xff] %vm2635_vm11, %v2534_v47  ;;  %1485 = vrot.lane.b32.xlu1 %v10649_v4, %s8832_s25  ;;  %1226 = vrot.lane.b32.xlu0 %v1095_v39, %s8833_s26  ;;  %v682_v4 = vsel %vm537_vm3, %v679_v32, %v681_v58  ;;  %v690_v47 = vsel %vm537_vm3, %v688_v26, %v689_v27 }
 0x39d   :  { %v1741_v54 = vpop.permute.xlu1 %1740  ;;  %v795_v56 = vpop.permute.xlu0 %794 }
 0x39e   :  { %1886 = vst.msk [vmem:[#allocation3 + $0x178] sm:$0xff] %vm1838_vm8, %v1741_v54 }
 0x39f   :  { %939 = vst.msk [vmem:[#allocation3 + $0x180] sm:$0xff] %vm890_vm5, %v795_v56  ;;  %2547 = vrot.lane.b32.xlu1 %v680_v35, %s8838_s13  ;;  %2280 = vrot.lane.b32.xlu0 %v10663_v11, %s8837_s12  ;;  %v367_v56 = vld [vmem:[#allocation2 + $0x310] sm:$0x3] }
 0x3a1   :  { %v2801_v19 = vpop.permute.xlu1 %2800  ;;  %v2006_v38 = vpop.permute.xlu0 %2005  ;;  %v3011_v37 = vld [vmem:[#allocation3 + $0x160] sm:$0xff] }
 0x3a2   :  { %2948 = vst.msk [vmem:[#allocation3 + $0x168] sm:$0xff] %vm2902_vm12, %v2801_v19  ;;  %8720 = vmatprep.mubr.msk.f32.mxu0 %vm3036_vm13, %v3011_v37  ;;  %v1108_v37 = vsel %vm955_vm2, %v1106_v28, %v1107_v57 }
 0x3a3   :  { %2152 = vst.msk [vmem:[#allocation3 + $0x170] sm:$0xff] %vm2105_vm9, %v2006_v38  ;;  %1754 = vrot.lane.b32.xlu1 %v680_v35, %s8835_s28  ;;  %1487 = vrot.lane.b32.xlu0 %v10663_v11, %s8832_s25  ;;  %v1100_v11 = vsel %vm955_vm2, %v1097_v50, %v1099_v62  ;;  %v691_v50 = vrot.slane %v367_v56, 1 }
 0x3a5   :  { %v1213_v31 = vpop.permute.xlu1 %1212  ;;  %v797_v52 = vpop.permute.xlu0 %796 }
 0x3a6   :  { %1357 = vst.msk [vmem:[#allocation3 + $0x180] sm:$0xff] %vm1308_vm6, %v1213_v31  ;;  %v1109_v31 = vrot.slane %v367_v56, 2 }
 0x3a7   :  { %940 = vst.msk [vmem:[#allocation3 + $0x188] sm:$0xff] %vm890_vm5, %v797_v52  ;;  %2814 = vrot.lane.b32.xlu1 %v1098_v41, %s8839_s22  ;;  %2549 = vrot.lane.b32.xlu0 %v682_v4, %s8838_s13 }
 0x3a9   :  { %v2267_v1 = vpop.permute.xlu1 %2266  ;;  %v2008_v44 = vpop.permute.xlu0 %2007  ;;  %v3012_v46 = vld [vmem:[#allocation3 + $0x168] sm:$0xff] }
 0x3aa   :  { %2413 = vst.msk [vmem:[#allocation3 + $0x170] sm:$0xff] %vm2366_vm10, %v2267_v1  ;;  %8721 = vmatmul.mubr.msk.f32.gmra.mxu0 %vm3036_vm13, %v3012_v46 }
 0x3ab   :  { %2153 = vst.msk [vmem:[#allocation3 + $0x178] sm:$0xff] %vm2105_vm9, %v2008_v44  ;;  %1756 = vrot.lane.b32.xlu1 %v682_v4, %s8835_s28  ;;  %810 = vrot.lane.b32.xlu0 %v680_v35, %s8834_s27 }
 0x3ad   :  { %v1474_v15 = vpop.permute.xlu1 %1473  ;;  %v1215_v0 = vpop.permute.xlu0 %1214 }
 0x3ae   :  { %1618 = vst.msk [vmem:[#allocation3 + $0x180] sm:$0xff] %vm1569_vm7, %v1474_v15 }
 0x3af   :  { %1358 = vst.msk [vmem:[#allocation3 + $0x188] sm:$0xff] %vm1308_vm6, %v1215_v0  ;;  %2816 = vrot.lane.b32.xlu1 %v1100_v11, %s8839_s22  ;;  %2021 = vrot.lane.b32.xlu0 %v1098_v41, %s8836_s9 }
 0x3b1   :  { %v2536_v13 = vpop.permute.xlu1 %2535  ;;  %v2269_v51 = vpop.permute.xlu0 %2268 }
 0x3b2   :  { %2682 = vst.msk [vmem:[#allocation3 + $0x170] sm:$0xff] %vm2635_vm11, %v2536_v13 }
 0x3b3   :  { %2414 = vst.msk [vmem:[#allocation3 + $0x178] sm:$0xff] %vm2366_vm10, %v2269_v51  ;;  %1228 = vrot.lane.b32.xlu1 %v1098_v41, %s8833_s26  ;;  %812 = vrot.lane.b32.xlu0 %v682_v4, %s8834_s27  ;;  %v693_v51 = vrot.slane %v10835_v49, 1 }
 0x3b5   :  { %v1743_v12 = vpop.permute.xlu1 %1742  ;;  %v1476_v53 = vpop.permute.xlu0 %1475 }
 0x3b6   :  { %1887 = vst.msk [vmem:[#allocation3 + $0x180] sm:$0xff] %vm1838_vm8, %v1743_v12  ;;  %v694_v12 = vrot.slane %v10849_v8, 1 }
 0x3b7   :  { %1619 = vst.msk [vmem:[#allocation3 + $0x188] sm:$0xff] %vm1569_vm7, %v1476_v53  ;;  %2282 = vrot.lane.b32.xlu1 %v10711_v43, %s8837_s12  ;;  %2023 = vrot.lane.b32.xlu0 %v1100_v11, %s8836_s9 }
 0x3b9   :  { %v2803_v55 = vpop.permute.xlu1 %2802  ;;  %v2538_v25 = vpop.permute.xlu0 %2537 }
 0x3ba   :  { %2949 = vst.msk [vmem:[#allocation3 + $0x170] sm:$0xff] %vm2902_vm12, %v2803_v55 }
 0x3bb   :  { %2683 = vst.msk [vmem:[#allocation3 + $0x178] sm:$0xff] %vm2635_vm11, %v2538_v25  ;;  %1489 = vrot.lane.b32.xlu1 %v10711_v43, %s8832_s25  ;;  %1230 = vrot.lane.b32.xlu0 %v1100_v11, %s8833_s26  ;;  %v687_v43 = vsel %vm537_vm3, %v684_v36, %v686_v34  ;;  %v695_v36 = vsel %vm537_vm3, %v693_v51, %v694_v12 }
 0x3bd   :  { %v1745_v9 = vpop.permute.xlu1 %1744  ;;  %v799_v60 = vpop.permute.xlu0 %798 }
 0x3be   :  { %1888 = vst.msk [vmem:[#allocation3 + $0x188] sm:$0xff] %vm1838_vm8, %v1745_v9  ;;  %v1111_v9 = vrot.slane %v10835_v49, 2 }
 0x3bf   :  { %941 = vst.msk [vmem:[#allocation3 + $0x190] sm:$0xff] %vm890_vm5, %v799_v60  ;;  %2551 = vrot.lane.b32.xlu1 %v685_v30, %s8838_s13  ;;  %2284 = vrot.lane.b32.xlu0 %v10725_v10, %s8837_s12  ;;  %v1112_v60 = vrot.slane %v10849_v8, 2 }
 0x3c1   :  { %v2805_v7 = vpop.permute.xlu1 %2804  ;;  %v2010_v29 = vpop.permute.xlu0 %2009  ;;  %v3013_v3 = vld [vmem:[#allocation3 + $0x170] sm:$0xff] }
 0x3c2   :  { %2950 = vst.msk [vmem:[#allocation3 + $0x178] sm:$0xff] %vm2902_vm12, %v2805_v7  ;;  %8723 = vmatprep.mubr.msk.f32.mxu0 %vm3036_vm13, %v3013_v3  ;;  %v1113_v7 = vsel %vm955_vm2, %v1111_v9, %v1112_v60 }
 0x3c3   :  { %2154 = vst.msk [vmem:[#allocation3 + $0x180] sm:$0xff] %vm2105_vm9, %v2010_v29  ;;  %1758 = vrot.lane.b32.xlu1 %v685_v30, %s8835_s28  ;;  %1491 = vrot.lane.b32.xlu0 %v10725_v10, %s8832_s25  ;;  %v1105_v10 = vsel %vm955_vm2, %v1102_v63, %v1104_v14 }
 0x3c5   :  { %v1217_v6 = vpop.permute.xlu1 %1216  ;;  %v801_v40 = vpop.permute.xlu0 %800 }
 0x3c6   :  { %1359 = vst.msk [vmem:[#allocation3 + $0x190] sm:$0xff] %vm1308_vm6, %v1217_v6 }
 0x3c7   :  { %942 = vst.msk [vmem:[#allocation3 + $0x198] sm:$0xff] %vm890_vm5, %v801_v40  ;;  %2818 = vrot.lane.b32.xlu1 %v1103_v5, %s8839_s22  ;;  %2553 = vrot.lane.b32.xlu0 %v687_v43, %s8838_s13 }
 0x3c9   :  { %v2271_v33 = vpop.permute.xlu1 %2270  ;;  %v2012_v39 = vpop.permute.xlu0 %2011  ;;  %v3014_v42 = vld [vmem:[#allocation3 + $0x178] sm:$0xff] }
 0x3ca   :  { %2415 = vst.msk [vmem:[#allocation3 + $0x180] sm:$0xff] %vm2366_vm10, %v2271_v33  ;;  %8724 = vmatmul.mubr.msk.f32.gmra.mxu0 %vm3036_vm13, %v3014_v42 }
 0x3cb   :  { %2155 = vst.msk [vmem:[#allocation3 + $0x188] sm:$0xff] %vm2105_vm9, %v2012_v39  ;;  %1760 = vrot.lane.b32.xlu1 %v687_v43, %s8835_s28  ;;  %814 = vrot.lane.b32.xlu0 %v685_v30, %s8834_s27  ;;  %v370_v30 = vld [vmem:[#allocation2 + $0x328] sm:$0x3] }
 0x3cc   :  { %v696_v61 = vrot.slane %v370_v30, 1 }
 0x3cd   :  { %v1478_v17 = vpop.permute.xlu1 %1477  ;;  %v1219_v45 = vpop.permute.xlu0 %1218 }
 0x3ce   :  { %1620 = vst.msk [vmem:[#allocation3 + $0x190] sm:$0xff] %vm1569_vm7, %v1478_v17 }
 0x3cf   :  { %1360 = vst.msk [vmem:[#allocation3 + $0x198] sm:$0xff] %vm1308_vm6, %v1219_v45  ;;  %2820 = vrot.lane.b32.xlu1 %v1105_v10, %s8839_s22  ;;  %2025 = vrot.lane.b32.xlu0 %v1103_v5, %s8836_s9 }
 0x3d1   :  { %v2540_v18 = vpop.permute.xlu1 %2539  ;;  %v2273_v48 = vpop.permute.xlu0 %2272 }
 0x3d2   :  { %2684 = vst.msk [vmem:[#allocation3 + $0x180] sm:$0xff] %vm2635_vm11, %v2540_v18  ;;  %v372_v18 = vld [vmem:[#allocation2 + $0x338] sm:$0xff] }
 0x3d3   :  { %2416 = vst.msk [vmem:[#allocation3 + $0x188] sm:$0xff] %vm2366_vm10, %v2273_v48  ;;  %1232 = vrot.lane.b32.xlu1 %v1103_v5, %s8833_s26  ;;  %816 = vrot.lane.b32.xlu0 %v687_v43, %s8834_s27  ;;  %v1114_v5 = vrot.slane %v370_v30, 2 }
 0x3d5   :  { %v1747_v22 = vpop.permute.xlu1 %1746  ;;  %v1480_v24 = vpop.permute.xlu0 %1479 }
 0x3d6   :  { %1889 = vst.msk [vmem:[#allocation3 + $0x190] sm:$0xff] %vm1838_vm8, %v1747_v22  ;;  %v1642_v22 = vrot.slane %v372_v18, 1 }
 0x3d7   :  { %1621 = vst.msk [vmem:[#allocation3 + $0x198] sm:$0xff] %vm1569_vm7, %v1480_v24  ;;  %2286 = vrot.lane.b32.xlu1 %v10773_v16, %s8837_s12  ;;  %2027 = vrot.lane.b32.xlu0 %v1105_v10, %s8836_s9 }
 0x3d9   :  { %v2807_v32 = vpop.permute.xlu1 %2806  ;;  %v2542_v23 = vpop.permute.xlu0 %2541 }
 0x3da   :  { %2951 = vst.msk [vmem:[#allocation3 + $0x180] sm:$0xff] %vm2902_vm12, %v2807_v32 }
 0x3db   :  { %2685 = vst.msk [vmem:[#allocation3 + $0x188] sm:$0xff] %vm2635_vm11, %v2542_v23  ;;  %1493 = vrot.lane.b32.xlu1 %v10773_v16, %s8832_s25  ;;  %1234 = vrot.lane.b32.xlu0 %v1105_v10, %s8833_s26  ;;  %v692_v16 = vsel %vm537_vm3, %v689_v27, %v691_v50  ;;  %v371_v10 = vld [vmem:[#allocation2 + $0x330] sm:$0xff] }
 0x3dc   :  { %v1641_v48 = vrot.slane %v371_v10, 1 }
 0x3dd   :  { %v1749_v35 = vpop.permute.xlu1 %1748  ;;  %v803_v54 = vpop.permute.xlu0 %802 }
 0x3de   :  { %1890 = vst.msk [vmem:[#allocation3 + $0x198] sm:$0xff] %vm1838_vm8, %v1749_v35  ;;  %v1643_v27 = vsel %vm537_vm3, %v1641_v48, %v1642_v22  ;;  %v1908_v35 = vrot.slane %v371_v10, 2 }
 0x3df   :  { %943 = vst.msk [vmem:[#allocation3 + $0x1a0] sm:$0xff] %vm890_vm5, %v803_v54  ;;  %2555 = vrot.lane.b32.xlu1 %v690_v47, %s8838_s13  ;;  %2288 = vrot.lane.b32.xlu0 %v10787_v21, %s8837_s12  ;;  %v1909_v54 = vrot.slane %v372_v18, 2 }
 0x3e1   :  { %v2809_v58 = vpop.permute.xlu1 %2808  ;;  %v2014_v19 = vpop.permute.xlu0 %2013  ;;  %v3015_v38 = vld [vmem:[#allocation3 + $0x180] sm:$0xff] }
 0x3e2   :  { %2952 = vst.msk [vmem:[#allocation3 + $0x188] sm:$0xff] %vm2902_vm12, %v2809_v58  ;;  %8726 = vmatprep.mubr.msk.f32.mxu0 %vm3036_vm13, %v3015_v38 }
 0x3e3   :  { %2156 = vst.msk [vmem:[#allocation3 + $0x190] sm:$0xff] %vm2105_vm9, %v2014_v19  ;;  %1762 = vrot.lane.b32.xlu1 %v690_v47, %s8835_s28  ;;  %1495 = vrot.lane.b32.xlu0 %v10787_v21, %s8832_s25  ;;  %v1110_v21 = vsel %vm955_vm2, %v1107_v57, %v1109_v31  ;;  %v1910_v19 = vsel %vm955_vm2, %v1908_v35, %v1909_v54 }
 0x3e5   :  { %v1221_v41 = vpop.permute.xlu1 %1220  ;;  %v805_v4 = vpop.permute.xlu0 %804 }
 0x3e6   :  { %1361 = vst.msk [vmem:[#allocation3 + $0x1a0] sm:$0xff] %vm1308_vm6, %v1221_v41 }
 0x3e7   :  { %944 = vst.msk [vmem:[#allocation3 + $0x1a8] sm:$0xff] %vm890_vm5, %v805_v4  ;;  %2822 = vrot.lane.b32.xlu1 %v1108_v37, %s8839_s22  ;;  %2557 = vrot.lane.b32.xlu0 %v692_v16, %s8838_s13 }
 0x3e9   :  { %v2275_v52 = vpop.permute.xlu1 %2274  ;;  %v2016_v62 = vpop.permute.xlu0 %2015  ;;  %v3016_v1 = vld [vmem:[#allocation3 + $0x188] sm:$0xff] }
 0x3ea   :  { %2417 = vst.msk [vmem:[#allocation3 + $0x190] sm:$0xff] %vm2366_vm10, %v2275_v52  ;;  %8727 = vmatmul.mubr.msk.f32.gmra.mxu0 %vm3036_vm13, %v3016_v1 }
 0x3eb   :  { %2157 = vst.msk [vmem:[#allocation3 + $0x198] sm:$0xff] %vm2105_vm9, %v2016_v62  ;;  %1764 = vrot.lane.b32.xlu1 %v692_v16, %s8835_s28  ;;  %818 = vrot.lane.b32.xlu0 %v690_v47, %s8834_s27  ;;  %v373_v47 = vld [vmem:[#allocation2 + $0x340] sm:$0x3] }
 0x3ec   :  { %v1644_v56 = vrot.slane %v373_v47, 1 }
 0x3ed   :  { %v1482_v44 = vpop.permute.xlu1 %1481  ;;  %v1223_v46 = vpop.permute.xlu0 %1222 }
 0x3ee   :  { %1622 = vst.msk [vmem:[#allocation3 + $0x1a0] sm:$0xff] %vm1569_vm7, %v1482_v44  ;;  %v1645_v58 = vsel %vm537_vm3, %v1642_v22, %v1644_v56  ;;  %v375_v44 = vld [vmem:[#allocation2 + $0x350] sm:$0xff] }
 0x3ef   :  { %1362 = vst.msk [vmem:[#allocation3 + $0x1a8] sm:$0xff] %vm1308_vm6, %v1223_v46  ;;  %2824 = vrot.lane.b32.xlu1 %v1110_v21, %s8839_s22  ;;  %2029 = vrot.lane.b32.xlu0 %v1108_v37, %s8836_s9  ;;  %v376_v46 = vld [vmem:[#allocation2 + $0x358] sm:$0x3] }
 0x3f1   :  { %v2544_v11 = vpop.permute.xlu1 %2543  ;;  %v2277_v15 = vpop.permute.xlu0 %2276 }
 0x3f2   :  { %2686 = vst.msk [vmem:[#allocation3 + $0x190] sm:$0xff] %vm2635_vm11, %v2544_v11 }
 0x3f3   :  { %2418 = vst.msk [vmem:[#allocation3 + $0x198] sm:$0xff] %vm2366_vm10, %v2277_v15  ;;  %1236 = vrot.lane.b32.xlu1 %v1108_v37, %s8833_s26  ;;  %820 = vrot.lane.b32.xlu0 %v692_v16, %s8834_s27  ;;  %v1911_v16 = vrot.slane %v373_v47, 2  ;;  %v2439_v15 = vrot.slane %v375_v44, 1 }
 0x3f5   :  { %v1751_v0 = vpop.permute.xlu1 %1750  ;;  %v1484_v13 = vpop.permute.xlu0 %1483  ;;  %v1912_v52 = vsel %vm955_vm2, %v1909_v54, %v1911_v16 }
 0x3f6   :  { %1891 = vst.msk [vmem:[#allocation3 + $0x1a0] sm:$0xff] %vm1838_vm8, %v1751_v0  ;;  %v2441_v0 = vrot.slane %v376_v46, 1 }
 0x3f7   :  { %1623 = vst.msk [vmem:[#allocation3 + $0x1a8] sm:$0xff] %vm1569_vm7, %v1484_v13  ;;  %2290 = vrot.lane.b32.xlu1 %v10835_v49, %s8837_s12  ;;  %2031 = vrot.lane.b32.xlu0 %v1110_v21, %s8836_s9 }
 0x3f9   :  { %v2811_v53 = vpop.permute.xlu1 %2810  ;;  %v2546_v20 = vpop.permute.xlu0 %2545 }
 0x3fa   :  { %2953 = vst.msk [vmem:[#allocation3 + $0x190] sm:$0xff] %vm2902_vm12, %v2811_v53  ;;  %v2706_v53 = vrot.slane %v375_v44, 2 }
 0x3fb   :  { %2687 = vst.msk [vmem:[#allocation3 + $0x198] sm:$0xff] %vm2635_vm11, %v2546_v20  ;;  %1497 = vrot.lane.b32.xlu1 %v10835_v49, %s8832_s25  ;;  %1238 = vrot.lane.b32.xlu0 %v1110_v21, %s8833_s26  ;;  %v697_v49 = vsel %vm537_vm3, %v694_v12, %v696_v61  ;;  %v374_v21 = vld [vmem:[#allocation2 + $0x348] sm:$0xff] }
 0x3fc   :  { %v2438_v11 = vrot.slane %v374_v21, 1  ;;  %v2705_v12 = vrot.slane %v374_v21, 2 }
 0x3fd   :  { %v1753_v55 = vpop.permute.xlu1 %1752  ;;  %v807_v25 = vpop.permute.xlu0 %806 }
 0x3fe   :  { %1892 = vst.msk [vmem:[#allocation3 + $0x1a8] sm:$0xff] %vm1838_vm8, %v1753_v55  ;;  %v2440_v20 = vsel %vm537_vm3, %v2438_v11, %v2439_v15  ;;  %v2708_v55 = vrot.slane %v376_v46, 2  ;;  %v2707_v9 = vsel %vm955_vm2, %v2705_v12, %v2706_v53 }
 0x3ff   :  { %945 = vst.msk [vmem:[#allocation3 + $0x1b0] sm:$0xff] %vm890_vm5, %v807_v25  ;;  %2559 = vrot.lane.b32.xlu1 %v695_v36, %s8838_s13  ;;  %2292 = vrot.lane.b32.xlu0 %v10849_v8, %s8837_s12 }
 0x401   :  { %v2813_v59 = vpop.permute.xlu1 %2812  ;;  %v2018_v63 = vpop.permute.xlu0 %2017  ;;  %v3017_v34 = vld [vmem:[#allocation3 + $0x190] sm:$0xff] }
 0x402   :  { %2954 = vst.msk [vmem:[#allocation3 + $0x198] sm:$0xff] %vm2902_vm12, %v2813_v59  ;;  %8729 = vmatprep.mubr.msk.f32.mxu0 %vm3036_vm13, %v3017_v34 }
 0x403   :  { %2158 = vst.msk [vmem:[#allocation3 + $0x1a0] sm:$0xff] %vm2105_vm9, %v2018_v63  ;;  %1766 = vrot.lane.b32.xlu1 %v695_v36, %s8835_s28  ;;  %1499 = vrot.lane.b32.xlu0 %v10849_v8, %s8832_s25  ;;  %v1115_v8 = vsel %vm955_vm2, %v1112_v60, %v1114_v5  ;;  %v2709_v60 = vsel %vm955_vm2, %v2706_v53, %v2708_v55 }
 0x405   :  { %v1225_v29 = vpop.permute.xlu1 %1224  ;;  %v809_v3 = vpop.permute.xlu0 %808 }
 0x406   :  { %1363 = vst.msk [vmem:[#allocation3 + $0x1b0] sm:$0xff] %vm1308_vm6, %v1225_v29 }
 0x407   :  { %946 = vst.msk [vmem:[#allocation3 + $0x1b8] sm:$0xff] %vm890_vm5, %v809_v3  ;;  %2826 = vrot.lane.b32.xlu1 %v1113_v7, %s8839_s22  ;;  %2561 = vrot.lane.b32.xlu0 %v697_v49, %s8838_s13 }
 0x409   :  { %v2279_v43 = vpop.permute.xlu1 %2278  ;;  %v2020_v6 = vpop.permute.xlu0 %2019  ;;  %v3018_v40 = vld [vmem:[#allocation3 + $0x198] sm:$0xff] }
 0x40a   :  { %2419 = vst.msk [vmem:[#allocation3 + $0x1a0] sm:$0xff] %vm2366_vm10, %v2279_v43  ;;  %8730 = vmatmul.mubr.msk.f32.gmra.mxu0 %vm3036_vm13, %v3018_v40 }
 0x40b   :  { %2159 = vst.msk [vmem:[#allocation3 + $0x1a8] sm:$0xff] %vm2105_vm9, %v2020_v6  ;;  %1768 = vrot.lane.b32.xlu1 %v697_v49, %s8835_s28  ;;  %822 = vrot.lane.b32.xlu0 %v695_v36, %s8834_s27  ;;  %v2442_v36 = vsel %vm537_vm3, %v2439_v15, %v2441_v0 }
 0x40d   :  { %v1486_v14 = vpop.permute.xlu1 %1485  ;;  %v1227_v33 = vpop.permute.xlu0 %1226 }
 0x40e   :  { %1624 = vst.msk [vmem:[#allocation3 + $0x1b0] sm:$0xff] %vm1569_vm7, %v1486_v14 }
 0x40f   :  { %1364 = vst.msk [vmem:[#allocation3 + $0x1b8] sm:$0xff] %vm1308_vm6, %v1227_v33  ;;  %2828 = vrot.lane.b32.xlu1 %v1115_v8, %s8839_s22  ;;  %2033 = vrot.lane.b32.xlu0 %v1113_v7, %s8836_s9 }
 0x411   :  { %v2548_v39 = vpop.permute.xlu1 %2547  ;;  %v2281_v42 = vpop.permute.xlu0 %2280 }
 0x412   :  { %2688 = vst.msk [vmem:[#allocation3 + $0x1a0] sm:$0xff] %vm2635_vm11, %v2548_v39 }
 0x413   :  { %2420 = vst.msk [vmem:[#allocation3 + $0x1a8] sm:$0xff] %vm2366_vm10, %v2281_v42  ;;  %824 = vrot.lane.b32.xlu0 %v697_v49, %s8834_s27  ;;  %1240 = vrot.lane.b32.xlu1 %v1113_v7, %s8833_s26 }
 0x415   :  { %v1755_v17 = vpop.permute.xlu1 %1754  ;;  %v1488_v45 = vpop.permute.xlu0 %1487 }
 0x416   :  { %1893 = vst.msk [vmem:[#allocation3 + $0x1b0] sm:$0xff] %vm1838_vm8, %v1755_v17 }
 0x417   :  { %1625 = vst.msk [vmem:[#allocation3 + $0x1b8] sm:$0xff] %vm1569_vm7, %v1488_v45  ;;  %2035 = vrot.lane.b32.xlu0 %v1115_v8, %s8836_s9  ;;  %2294 = vrot.lane.b32.xlu1 %v371_v10, %s8837_s12 }
 0x419   :  { %v2815_v24 = vpop.permute.xlu1 %2814  ;;  %v2550_v26 = vpop.permute.xlu0 %2549 }
 0x41a   :  { %2955 = vst.msk [vmem:[#allocation3 + $0x1a0] sm:$0xff] %vm2902_vm12, %v2815_v24 }
 0x41b   :  { %2689 = vst.msk [vmem:[#allocation3 + $0x1a8] sm:$0xff] %vm2635_vm11, %v2550_v26  ;;  %1242 = vrot.lane.b32.xlu0 %v1115_v8, %s8833_s26  ;;  %1501 = vrot.lane.b32.xlu1 %v371_v10, %s8832_s25 }
 0x41d   :  { %v1757_v32 = vpop.permute.xlu1 %1756  ;;  %v811_v23 = vpop.permute.xlu0 %810 }
 0x41e   :  { %1894 = vst.msk [vmem:[#allocation3 + $0x1b8] sm:$0xff] %vm1838_vm8, %v1757_v32 }
 0x41f   :  { %947 = vst.msk [vmem:[#allocation3 + $0x1c0] sm:$0xff] %vm890_vm5, %v811_v23  ;;  %2296 = vrot.lane.b32.xlu0 %v372_v18, %s8837_s12  ;;  %2563 = vrot.lane.b32.xlu1 %v1643_v27, %s8838_s13 }
 0x421   :  { %v2817_v28 = vpop.permute.xlu1 %2816  ;;  %v2022_v57 = vpop.permute.xlu0 %2021  ;;  %v3019_v50 = vld [vmem:[#allocation3 + $0x1a0] sm:$0xff] }
 0x422   :  { %2956 = vst.msk [vmem:[#allocation3 + $0x1a8] sm:$0xff] %vm2902_vm12, %v2817_v28  ;;  %8732 = vmatprep.mubr.msk.f32.mxu0 %vm3036_vm13, %v3019_v50 }
 0x423   :  { %2160 = vst.msk [vmem:[#allocation3 + $0x1b0] sm:$0xff] %vm2105_vm9, %v2022_v57  ;;  %1503 = vrot.lane.b32.xlu0 %v372_v18, %s8832_s25  ;;  %1770 = vrot.lane.b32.xlu1 %v1643_v27, %s8835_s28 }
 0x425   :  { %v1229_v38 = vpop.permute.xlu1 %1228  ;;  %v813_v37 = vpop.permute.xlu0 %812 }
 0x426   :  { %1365 = vst.msk [vmem:[#allocation3 + $0x1c0] sm:$0xff] %vm1308_vm6, %v1229_v38 }
 0x427   :  { %948 = vst.msk [vmem:[#allocation3 + $0x1c8] sm:$0xff] %vm890_vm5, %v813_v37  ;;  %2565 = vrot.lane.b32.xlu0 %v1645_v58, %s8838_s13  ;;  %2830 = vrot.lane.b32.xlu1 %v1910_v19, %s8839_s22 }
 0x429   :  { %v2283_v41 = vpop.permute.xlu1 %2282  ;;  %v2024_v4 = vpop.permute.xlu0 %2023  ;;  %v3020_v31 = vld [vmem:[#allocation3 + $0x1a8] sm:$0xff] }
 0x42a   :  { %2421 = vst.msk [vmem:[#allocation3 + $0x1b0] sm:$0xff] %vm2366_vm10, %v2283_v41  ;;  %8733 = vmatmul.mubr.msk.f32.gmra.mxu0 %vm3036_vm13, %v3020_v31 }
 0x42b   :  { %2161 = vst.msk [vmem:[#allocation3 + $0x1b8] sm:$0xff] %vm2105_vm9, %v2024_v4  ;;  %1772 = vrot.lane.b32.xlu0 %v1645_v58, %s8835_s28  ;;  %2037 = vrot.lane.b32.xlu1 %v1910_v19, %s8836_s9 }
 0x42d   :  { %v1490_v62 = vpop.permute.xlu1 %1489  ;;  %v1231_v1 = vpop.permute.xlu0 %1230 }
 0x42e   :  { %1626 = vst.msk [vmem:[#allocation3 + $0x1c0] sm:$0xff] %vm1569_vm7, %v1490_v62 }
 0x42f   :  { %1366 = vst.msk [vmem:[#allocation3 + $0x1c8] sm:$0xff] %vm1308_vm6, %v1231_v1  ;;  %2832 = vrot.lane.b32.xlu0 %v1912_v52, %s8839_s22  ;;  %2039 = vrot.lane.b32.xlu1 %v1912_v52, %s8836_s9 }
 0x431   :  { %v2552_v13 = vpop.permute.xlu1 %2551  ;;  %v2285_v51 = vpop.permute.xlu0 %2284 }
 0x432   :  { %2690 = vst.msk [vmem:[#allocation3 + $0x1b0] sm:$0xff] %vm2635_vm11, %v2552_v13 }
 0x433   :  { %2422 = vst.msk [vmem:[#allocation3 + $0x1b8] sm:$0xff] %vm2366_vm10, %v2285_v51  ;;  %2298 = vrot.lane.b32.xlu0 %v374_v21, %s8837_s12  ;;  %2300 = vrot.lane.b32.xlu1 %v375_v44, %s8837_s12  ;;  %s8843_s12 = smov 80  }
 0x435   :  { %v1759_v25 = vpop.permute.xlu1 %1758  ;;  %v1492_v30 = vpop.permute.xlu0 %1491 }
 0x436   :  { %1895 = vst.msk [vmem:[#allocation3 + $0x1c0] sm:$0xff] %vm1838_vm8, %v1759_v25 }
 0x437   :  { %1627 = vst.msk [vmem:[#allocation3 + $0x1c8] sm:$0xff] %vm1569_vm7, %v1492_v30  ;;  %2567 = vrot.lane.b32.xlu0 %v2440_v20, %s8838_s13  ;;  %2569 = vrot.lane.b32.xlu1 %v2442_v36, %s8838_s13  ;;  %s8844_s13 = smov 96  }
 0x439   :  { %v2819_v61 = vpop.permute.xlu1 %2818  ;;  %v2554_v59 = vpop.permute.xlu0 %2553 }
 0x43a   :  { %2957 = vst.msk [vmem:[#allocation3 + $0x1b0] sm:$0xff] %vm2902_vm12, %v2819_v61 }
 0x43b   :  { %2691 = vst.msk [vmem:[#allocation3 + $0x1b8] sm:$0xff] %vm2635_vm11, %v2554_v59  ;;  %2834 = vrot.lane.b32.xlu0 %v2707_v9, %s8839_s22  ;;  %2836 = vrot.lane.b32.xlu1 %v2709_v60, %s8839_s22 }
 0x43d   :  { %v1761_v63 = vpop.permute.xlu1 %1760  ;;  %v815_v34 = vpop.permute.xlu0 %814 }
 0x43e   :  { %1896 = vst.msk [vmem:[#allocation3 + $0x1c8] sm:$0xff] %vm1838_vm8, %v1761_v63 }
 0x43f   :  { %949 = vst.msk [vmem:[#allocation3 + $0x1d0] sm:$0xff] %vm890_vm5, %v815_v34 }
 0x441   :  { %v2821_v7 = vpop.permute.xlu1 %2820  ;;  %v2026_v49 = vpop.permute.xlu0 %2025  ;;  %v3021_v29 = vld [vmem:[#allocation3 + $0x1b0] sm:$0xff] }
 0x442   :  { %2958 = vst.msk [vmem:[#allocation3 + $0x1b8] sm:$0xff] %vm2902_vm12, %v2821_v7  ;;  %8735 = vmatprep.mubr.msk.f32.mxu0 %vm3036_vm13, %v3021_v29 }
 0x443   :  { %2162 = vst.msk [vmem:[#allocation3 + $0x1c0] sm:$0xff] %vm2105_vm9, %v2026_v49 }
 0x445   :  { %v1233_v3 = vpop.permute.xlu1 %1232  ;;  %v817_v5 = vpop.permute.xlu0 %816 }
 0x446   :  { %1367 = vst.msk [vmem:[#allocation3 + $0x1d0] sm:$0xff] %vm1308_vm6, %v1233_v3  ;;  %v11197_v3 = vpop.f32.mrf.mxu0 }
 0x447   :  { %950 = vst.msk [vmem:[#allocation3 + $0x1d8] sm:$0xff] %vm890_vm5, %v817_v5 }
 0x448   :  { %v11199_v5 = vpop.f32.mrf.mxu0 }
 0x449   :  { %v2287_v43 = vpop.permute.xlu1 %2286  ;;  %v2028_v6 = vpop.permute.xlu0 %2027  ;;  %v3022_v40 = vld [vmem:[#allocation3 + $0x1b8] sm:$0xff] }
 0x44a   :  { %2423 = vst.msk [vmem:[#allocation3 + $0x1c0] sm:$0xff] %vm2366_vm10, %v2287_v43  ;;  %8736 = vmatmul.mubr.msk.f32.gmra.mxu0 %vm3036_vm13, %v3022_v40  ;;  %v11201_v43 = vpop.f32.mrf.mxu0  ;;  %v3620_v40 = vsel %vm3618_vm14, %v11197_v3, 0.0 }
 0x44b   :  { %2163 = vst.msk [vmem:[#allocation3 + $0x1c8] sm:$0xff] %vm2105_vm9, %v2028_v6  ;;  %17368 = vst [vmem:[#allocation10_spill] sm:$0xff] %v11201_v43 }
 0x44c   :  { %v11203_v6 = vpop.f32.mrf.mxu0 }
 0x44d   :  { %v1494_v8 = vpop.permute.xlu1 %1493  ;;  %v1235_v14 = vpop.permute.xlu0 %1234 }
 0x44e   :  { %1628 = vst.msk [vmem:[#allocation3 + $0x1d0] sm:$0xff] %vm1569_vm7, %v1494_v8  ;;  %v3619_v8 = vsel %vm3618_vm14, %v11199_v5, 0.0 }
 0x44f   :  { %1368 = vst.msk [vmem:[#allocation3 + $0x1d8] sm:$0xff] %vm1308_vm6, %v1235_v14  ;;  %v11209_v14 = vpop.f32.mrf.mxu0 }
 0x450   :  { %17369 = vst [vmem:[#allocation11_spill] sm:$0xff] %v11209_v14 }
 0x451   :  { %v2556_v33 = vpop.permute.xlu1 %2555  ;;  %v2289_v39 = vpop.permute.xlu0 %2288 }
 0x452   :  { %2692 = vst.msk [vmem:[#allocation3 + $0x1c0] sm:$0xff] %vm2635_vm11, %v2556_v33  ;;  %v3622_v33 = vsel %vm3618_vm14, %v11203_v6, 0.0 }
 0x453   :  { %2424 = vst.msk [vmem:[#allocation3 + $0x1c8] sm:$0xff] %vm2366_vm10, %v2289_v39  ;;  %v3621_v39 = vadd.f32 %v3620_v40, %v3619_v8 }
 0x455   :  { %v1763_v42 = vpop.permute.xlu1 %1762  ;;  %v1496_v10 = vpop.permute.xlu0 %1495 }
 0x456   :  { %1897 = vst.msk [vmem:[#allocation3 + $0x1d0] sm:$0xff] %vm1838_vm8, %v1763_v42  ;;  %v3623_v42 = vadd.f32 %v3622_v33, %v3621_v39 }
 0x457   :  { %1629 = vst.msk [vmem:[#allocation3 + $0x1d8] sm:$0xff] %vm1569_vm7, %v1496_v10  ;;  %v11213_v10 = vpop.f32.mrf.mxu0 }
 0x458   :  { %17370 = vst [vmem:[#allocation12_spill] sm:$0xff] %v11213_v10 }
 0x459   :  { %v2823_v17 = vpop.permute.xlu1 %2822  ;;  %v2558_v45 = vpop.permute.xlu0 %2557 }
 0x45a   :  { %2959 = vst.msk [vmem:[#allocation3 + $0x1c0] sm:$0xff] %vm2902_vm12, %v2823_v17  ;;  %v11215_v17 = vpop.f32.mrf.mxu0 }
 0x45b   :  { %2693 = vst.msk [vmem:[#allocation3 + $0x1c8] sm:$0xff] %vm2635_vm11, %v2558_v45  ;;  %v3624_v45 = vsel %vm3618_vm14, %v11201_v43, 0.0 }
 0x45d   :  { %v1765_v18 = vpop.permute.xlu1 %1764  ;;  %v819_v48 = vpop.permute.xlu0 %818 }
 0x45e   :  { %1898 = vst.msk [vmem:[#allocation3 + $0x1d8] sm:$0xff] %vm1838_vm8, %v1765_v18  ;;  %v3626_v18 = vsel %vm3618_vm14, %v11213_v10, 0.0 }
 0x45f   :  { %951 = vst.msk [vmem:[#allocation3 + $0x1e0] sm:$0xff] %vm890_vm5, %v819_v48  ;;  %v3625_v48 = vadd.f32 %v3624_v45, %v3623_v42 }
 0x461   :  { %v2825_v22 = vpop.permute.xlu1 %2824  ;;  %v2030_v24 = vpop.permute.xlu0 %2029  ;;  %v3023_v26 = vld [vmem:[#allocation3 + $0x1c0] sm:$0xff] }
 0x462   :  { %2960 = vst.msk [vmem:[#allocation3 + $0x1c8] sm:$0xff] %vm2902_vm12, %v2825_v22  ;;  %8738 = vmatprep.mubr.msk.f32.mxu0 %vm3036_vm13, %v3023_v26  ;;  %v3627_v22 = vadd.f32 %v3626_v18, %v3625_v48 }
 0x463   :  { %2164 = vst.msk [vmem:[#allocation3 + $0x1d0] sm:$0xff] %vm2105_vm9, %v2030_v24  ;;  %v11221_v24 = vpop.f32.mrf.mxu0 }
 0x465   :  { %v1237_v27 = vpop.permute.xlu1 %1236  ;;  %v821_v32 = vpop.permute.xlu0 %820 }
 0x466   :  { %1369 = vst.msk [vmem:[#allocation3 + $0x1e0] sm:$0xff] %vm1308_vm6, %v1237_v27  ;;  %v11223_v26 = vpop.f32.mrf.mxu0  ;;  %v3628_v27 = vsel %vm3618_vm14, %v11209_v14, 0.0 }
 0x467   :  { %952 = vst.msk [vmem:[#allocation3 + $0x1e8] sm:$0xff] %vm890_vm5, %v821_v32  ;;  %v3630_v32 = vsel %vm3618_vm14, %v11221_v24, 0.0 }
 0x469   :  { %v2291_v23 = vpop.permute.xlu1 %2290  ;;  %v2032_v47 = vpop.permute.xlu0 %2031  ;;  %v3024_v35 = vld [vmem:[#allocation3 + $0x1c8] sm:$0xff] }
 0x46a   :  { %2425 = vst.msk [vmem:[#allocation3 + $0x1d0] sm:$0xff] %vm2366_vm10, %v2291_v23  ;;  %8739 = vmatmul.mubr.msk.f32.gmra.mxu0 %vm3036_vm13, %v3024_v35  ;;  %v3629_v23 = vadd.f32 %v3628_v27, %v3627_v22  ;;  %v11229_v35 = vpop.f32.mrf.mxu0 }
 0x46b   :  { %2165 = vst.msk [vmem:[#allocation3 + $0x1d8] sm:$0xff] %vm2105_vm9, %v2032_v47 }
 0x46c   :  { %v3631_v47 = vadd.f32 %v3630_v32, %v3629_v23 }
 0x46d   :  { %v1498_v54 = vpop.permute.xlu1 %1497  ;;  %v1239_v56 = vpop.permute.xlu0 %1238 }
 0x46e   :  { %1630 = vst.msk [vmem:[#allocation3 + $0x1e0] sm:$0xff] %vm1569_vm7, %v1498_v54  ;;  %v11231_v54 = vpop.f32.mrf.mxu0 }
 0x46f   :  { %1370 = vst.msk [vmem:[#allocation3 + $0x1e8] sm:$0xff] %vm1308_vm6, %v1239_v56  ;;  %v3632_v56 = vsel %vm3618_vm14, %v11215_v17, 0.0 }
 0x471   :  { %v2560_v28 = vpop.permute.xlu1 %2559  ;;  %v2293_v57 = vpop.permute.xlu0 %2292 }
 0x472   :  { %2694 = vst.msk [vmem:[#allocation3 + $0x1d0] sm:$0xff] %vm2635_vm11, %v2560_v28  ;;  %v3634_v28 = vsel %vm3618_vm14, %v11229_v35, 0.0 }
 0x473   :  { %2426 = vst.msk [vmem:[#allocation3 + $0x1d8] sm:$0xff] %vm2366_vm10, %v2293_v57  ;;  %v3633_v57 = vadd.f32 %v3632_v56, %v3631_v47 }
 0x475   :  { %v1767_v50 = vpop.permute.xlu1 %1766  ;;  %v1500_v58 = vpop.permute.xlu0 %1499 }
 0x476   :  { %1899 = vst.msk [vmem:[#allocation3 + $0x1e0] sm:$0xff] %vm1838_vm8, %v1767_v50  ;;  %v3635_v50 = vadd.f32 %v3634_v28, %v3633_v57 }
 0x477   :  { %1631 = vst.msk [vmem:[#allocation3 + $0x1e8] sm:$0xff] %vm1569_vm7, %v1500_v58  ;;  %v11237_v58 = vpop.f32.mrf.mxu0 }
 0x479   :  { %v2827_v19 = vpop.permute.xlu1 %2826  ;;  %v2562_v38 = vpop.permute.xlu0 %2561 }
 0x47a   :  { %2961 = vst.msk [vmem:[#allocation3 + $0x1d0] sm:$0xff] %vm2902_vm12, %v2827_v19  ;;  %v11239_v19 = vpop.f32.mrf.mxu0 }
 0x47b   :  { %2695 = vst.msk [vmem:[#allocation3 + $0x1d8] sm:$0xff] %vm2635_vm11, %v2562_v38  ;;  %v3636_v38 = vsel %vm3618_vm14, %v11223_v26, 0.0 }
 0x47d   :  { %v1769_v37 = vpop.permute.xlu1 %1768  ;;  %v823_v16 = vpop.permute.xlu0 %822 }
 0x47e   :  { %1900 = vst.msk [vmem:[#allocation3 + $0x1e8] sm:$0xff] %vm1838_vm8, %v1769_v37  ;;  %v3638_v37 = vsel %vm3618_vm14, %v11237_v58, 0.0 }
 0x47f   :  { %953 = vst.msk [vmem:[#allocation3 + $0x1f0] sm:$0xff] %vm890_vm5, %v823_v16  ;;  %v3637_v16 = vadd.f32 %v3636_v38, %v3635_v50 }
 0x481   :  { %v2829_v41 = vpop.permute.xlu1 %2828  ;;  %v2034_v4 = vpop.permute.xlu0 %2033  ;;  %v3025_v31 = vld [vmem:[#allocation3 + $0x1d0] sm:$0xff] }
 0x482   :  { %2962 = vst.msk [vmem:[#allocation3 + $0x1d8] sm:$0xff] %vm2902_vm12, %v2829_v41  ;;  %8741 = vmatprep.mubr.msk.f32.mxu0 %vm3036_vm13, %v3025_v31  ;;  %v3639_v41 = vadd.f32 %v3638_v37, %v3637_v16 }
 0x483   :  { %2166 = vst.msk [vmem:[#allocation3 + $0x1e0] sm:$0xff] %vm2105_vm9, %v2034_v4  ;;  %v11245_v4 = vpop.f32.mrf.mxu0 }
 0x485   :  { %v825_v52 = vpop.permute.xlu0 %824  ;;  %v1241_v62 = vpop.permute.xlu1 %1240 }
 0x486   :  { %954 = vst.msk [vmem:[#allocation3 + $0x1f8] sm:$0xff] %vm890_vm5, %v825_v52  ;;  %v11247_v31 = vpop.f32.mrf.mxu0  ;;  %v3640_v52 = vsel %vm3618_vm14, %v11231_v54, 0.0  ;;  %vm6098_vm5 = vcmask 1044484  }
 0x487   :  { %1371 = vst.msk [vmem:[#allocation3 + $0x1f0] sm:$0xff] %vm1308_vm6, %v1241_v62  ;;  %v3642_v62 = vsel %vm3618_vm14, %v11245_v4, 0.0 }
 0x489   :  { %v2036_v1 = vpop.permute.xlu0 %2035  ;;  %v2295_v21 = vpop.permute.xlu1 %2294  ;;  %v3026_v44 = vld [vmem:[#allocation3 + $0x1d8] sm:$0xff] }
 0x48a   :  { %2167 = vst.msk [vmem:[#allocation3 + $0x1e8] sm:$0xff] %vm2105_vm9, %v2036_v1  ;;  %8742 = vmatmul.mubr.msk.f32.gmra.mxu0 %vm3036_vm13, %v3026_v44  ;;  %v3641_v1 = vadd.f32 %v3640_v52, %v3639_v41  ;;  %v11253_v44 = vpop.f32.mrf.mxu0 }
 0x48b   :  { %2427 = vst.msk [vmem:[#allocation3 + $0x1e0] sm:$0xff] %vm2366_vm10, %v2295_v21 }
 0x48c   :  { %v3643_v21 = vadd.f32 %v3642_v62, %v3641_v1 }
 0x48d   :  { %v1243_v46 = vpop.permute.xlu0 %1242  ;;  %v1502_v11 = vpop.permute.xlu1 %1501 }
 0x48e   :  { %1372 = vst.msk [vmem:[#allocation3 + $0x1f8] sm:$0xff] %vm1308_vm6, %v1243_v46  ;;  %v11255_v46 = vpop.f32.mrf.mxu0  ;;  %vm6100_vm6 = vcmask 1045509  }
 0x48f   :  { %1632 = vst.msk [vmem:[#allocation3 + $0x1f0] sm:$0xff] %vm1569_vm7, %v1502_v11  ;;  %v3644_v11 = vsel %vm3618_vm14, %v11239_v19, 0.0 }
 0x491   :  { %v2297_v15 = vpop.permute.xlu0 %2296  ;;  %v2564_v0 = vpop.permute.xlu1 %2563 }
 0x492   :  { %2428 = vst.msk [vmem:[#allocation3 + $0x1e8] sm:$0xff] %vm2366_vm10, %v2297_v15  ;;  %v3646_v15 = vsel %vm3618_vm14, %v11253_v44, 0.0 }
 0x493   :  { %2696 = vst.msk [vmem:[#allocation3 + $0x1e0] sm:$0xff] %vm2635_vm11, %v2564_v0  ;;  %v3645_v0 = vadd.f32 %v3644_v11, %v3643_v21 }
 0x495   :  { %v1504_v13 = vpop.permute.xlu0 %1503  ;;  %v1771_v51 = vpop.permute.xlu1 %1770 }
 0x496   :  { %1633 = vst.msk [vmem:[#allocation3 + $0x1f8] sm:$0xff] %vm1569_vm7, %v1504_v13  ;;  %v3647_v13 = vadd.f32 %v3646_v15, %v3645_v0  ;;  %vm6102_vm7 = vcmask 1046534  }
 0x497   :  { %1901 = vst.msk [vmem:[#allocation3 + $0x1f0] sm:$0xff] %vm1838_vm8, %v1771_v51  ;;  %v11261_v51 = vpop.f32.mrf.mxu0 }
 0x499   :  { %v2566_v12 = vpop.permute.xlu0 %2565  ;;  %v2831_v53 = vpop.permute.xlu1 %2830 }
 0x49a   :  { %2697 = vst.msk [vmem:[#allocation3 + $0x1e8] sm:$0xff] %vm2635_vm11, %v2566_v12  ;;  %v11263_v12 = vpop.f32.mrf.mxu0 }
 0x49b   :  { %2963 = vst.msk [vmem:[#allocation3 + $0x1e0] sm:$0xff] %vm2902_vm12, %v2831_v53  ;;  %v3648_v53 = vsel %vm3618_vm14, %v11247_v31, 0.0 }
 0x49d   :  { %v1773_v20 = vpop.permute.xlu0 %1772  ;;  %v2038_v36 = vpop.permute.xlu1 %2037 }
 0x49e   :  { %1902 = vst.msk [vmem:[#allocation3 + $0x1f8] sm:$0xff] %vm1838_vm8, %v1773_v20  ;;  %v3650_v20 = vsel %vm3618_vm14, %v11261_v51, 0.0  ;;  %vm6104_vm8 = vcmask 1047559  }
 0x49f   :  { %2168 = vst.msk [vmem:[#allocation3 + $0x1f0] sm:$0xff] %vm2105_vm9, %v2038_v36  ;;  %v3649_v36 = vadd.f32 %v3648_v53, %v3647_v13 }
 0x4a1   :  { %v2833_v55 = vpop.permute.xlu0 %2832  ;;  %v2040_v25 = vpop.permute.xlu1 %2039 }
 0x4a2   :  { %v3027_v30 = vld [vmem:[#allocation3 + $0x1e0] sm:$0xff]  ;;  %2964 = vst.msk [vmem:[#allocation3 + $0x1e8] sm:$0xff] %vm2902_vm12, %v2833_v55  ;;  %v3651_v55 = vadd.f32 %v3650_v20, %v3649_v36 }
 0x4a3   :  { %2169 = vst.msk [vmem:[#allocation3 + $0x1f8] sm:$0xff] %vm2105_vm9, %v2040_v25  ;;  %8744 = vmatprep.mubr.msk.f32.mxu0 %vm3036_vm13, %v3027_v30  ;;  %v11269_v25 = vpop.f32.mrf.mxu0  ;;  %vm6428_vm9 = vcmask 261248  }
 0x4a5   :  { %v2299_v9 = vpop.permute.xlu0 %2298  ;;  %v2301_v60 = vpop.permute.xlu1 %2300 }
 0x4a6   :  { %2429 = vst.msk [vmem:[#allocation3 + $0x1f0] sm:$0xff] %vm2366_vm10, %v2299_v9  ;;  %2430 = vst.msk [vmem:[#allocation3 + $0x1f8] sm:$0xff] %vm2366_vm10, %v2301_v60  ;;  %v11271_v30 = vpop.f32.mrf.mxu0  ;;  %v3652_v9 = vsel %vm3618_vm14, %v11255_v46, 0.0  ;;  %v3654_v60 = vsel %vm3618_vm14, %v11269_v25, 0.0  ;;  %vm6541_vm10 = vcmask 392448  }
 0x4a7   :  { %v3660_v39 = vsel %vm3618_vm14, %v11271_v30, 0.0 }
 0x4a9   :  { %v2568_v61 = vpop.permute.xlu0 %2567  ;;  %v2570_v59 = vpop.permute.xlu1 %2569  ;;  %v3028_v63 = vld [vmem:[#allocation3 + $0x1e8] sm:$0xff] }
 0x4aa   :  { %2698 = vst.msk [vmem:[#allocation3 + $0x1f0] sm:$0xff] %vm2635_vm11, %v2568_v61  ;;  %2699 = vst.msk [vmem:[#allocation3 + $0x1f8] sm:$0xff] %vm2635_vm11, %v2570_v59  ;;  %8745 = vmatmul.mubr.msk.f32.gmra.mxu0 %vm3036_vm13, %v3028_v63  ;;  %v3653_v61 = vadd.f32 %v3652_v9, %v3651_v55  ;;  %v11277_v63 = vpop.f32.mrf.mxu0  ;;  %vm6608_vm11 = vcmask 523648  }
 0x4ac   :  { %v3655_v59 = vadd.f32 %v3654_v60, %v3653_v61 }
 0x4ad   :  { %v2835_v34 = vpop.permute.xlu0 %2834  ;;  %v2837_v7 = vpop.permute.xlu1 %2836 }
 0x4ae   :  { %2965 = vst.msk [vmem:[#allocation3 + $0x1f0] sm:$0xff] %vm2902_vm12, %v2835_v34  ;;  %2966 = vst.msk [vmem:[#allocation3 + $0x1f8] sm:$0xff] %vm2902_vm12, %v2837_v7  ;;  %v11279_v34 = vpop.f32.mrf.mxu0  ;;  %v3656_v7 = vsel %vm3618_vm14, %v11263_v12, 0.0  ;;  %vm6681_vm12 = vcmask 654848  }
 0x4af   :  { %v3664_v27 = vsel %vm3618_vm14, %v11279_v34, 0.0 }
 0x4b0   :  { %v11285_v8 = vpop.f32.mrf.mxu0 }
 0x4b1   :  { %v3662_v42 = vsel %vm3618_vm14, %v11285_v8, 0.0 }
 0x4b2   :  { %v11287_v33 = vpop.f32.mrf.mxu0 }
 0x4b3   :  { %v3668_v57 = vsel %vm3618_vm14, %v11287_v33, 0.0 }
 0x4b4   :  { %v11293_v48 = vpop.f32.mrf.mxu0 }
 0x4b5   :  { %v3029_v49 = vld [vmem:[#allocation3 + $0x1f0] sm:$0xff]  ;;  %v3030_v29 = vld [vmem:[#allocation3 + $0x1f8] sm:$0xff]  ;;  %v3666_v32 = vsel %vm3618_vm14, %v11293_v48, 0.0 }
 0x4b6   :  { %8747 = vmatprep.mubr.msk.f32.mxu0 %vm3036_vm13, %v3029_v49  ;;  %v3658_v49 = vsel %vm3618_vm14, %v11277_v63, 0.0  ;;  %v11295_v22 = vpop.f32.mrf.mxu0 }
 0x4b7   :  { %8748 = vmatmul.mubr.msk.f32.gmra.mxu0 %vm3036_vm13, %v3030_v29  ;;  %v3657_v29 = vadd.f32 %v3656_v7, %v3655_v59  ;;  %v3672_v52 = vsel %vm3618_vm14, %v11295_v22, 0.0  ;;  %vm6752_vm13 = vcmask 786048  }
 0x4b8   :  { %v11301_v56 = vpop.f32.mrf.mxu0 }
 0x4b9   :  { %v3659_v40 = vadd.f32 %v3658_v49, %v3657_v29  ;;  %v3670_v50 = vsel %vm3618_vm14, %v11301_v56, 0.0 }
 0x4ba   :  { %v11303_v28 = vpop.f32.mrf.mxu0 }
 0x4bb   :  { %v3661_v45 = vadd.f32 %v3660_v39, %v3659_v40  ;;  %v3676_v0 = vsel %vm3618_vm14, %v11303_v28, 0.0 }
 0x4bc   :  { %v11309_v16 = vpop.f32.mrf.mxu0 }
 0x4bd   :  { %v3663_v18 = vadd.f32 %v3662_v42, %v3661_v45  ;;  %v3674_v62 = vsel %vm3618_vm14, %v11309_v16, 0.0 }
 0x4be   :  { %v11311_v41 = vpop.f32.mrf.mxu0 }
 0x4bf   :  { %v3665_v23 = vadd.f32 %v3664_v27, %v3663_v18  ;;  %v3680_v9 = vsel %vm3618_vm14, %v11311_v41, 0.0 }
 0x4c0   :  { %v11317_v11 = vpop.f32.mrf.mxu0 }
 0x4c1   :  { %v3667_v47 = vadd.f32 %v3666_v32, %v3665_v23  ;;  %v3678_v13 = vsel %vm3618_vm14, %v11317_v11, 0.0 }
 0x4c2   :  { %v11319_v15 = vpop.f32.mrf.mxu0 }
 0x4c3   :  { %v3669_v38 = vadd.f32 %v3668_v57, %v3667_v47  ;;  %v3684_v29 = vsel %vm3618_vm14, %v11319_v15, 0.0 }
 0x4c4   :  { %v11325_v36 = vpop.f32.mrf.mxu0 }
 0x4c5   :  { %v3671_v37 = vadd.f32 %v3670_v50, %v3669_v38  ;;  %v3682_v60 = vsel %vm3618_vm14, %v11325_v36, 0.0 }
 0x4c6   :  { %v11327_v55 = vpop.f32.mrf.mxu0 }
 0x4c7   :  { %v3673_v1 = vadd.f32 %v3672_v52, %v3671_v37  ;;  %v3688_v27 = vsel %vm3618_vm14, %v11327_v55, 0.0 }
 0x4c8   :  { %v11333_v7 = vpop.f32.mrf.mxu0 }
 0x4c9   :  { %v3675_v21 = vadd.f32 %v3674_v62, %v3673_v1  ;;  %v3686_v40 = vsel %vm3618_vm14, %v11333_v7, 0.0 }
 0x4ca   :  { %v11335_v49 = vpop.f32.mrf.mxu0 }
 0x4cb   :  { %v3677_v53 = vadd.f32 %v3676_v0, %v3675_v21  ;;  %v3692_v38 = vsel %vm3618_vm14, %v11335_v49, 0.0 }
 0x4cc   :  { %v11341_v45 = vpop.f32.mrf.mxu0 }
 0x4cd   :  { %v3679_v20 = vadd.f32 %v3678_v13, %v3677_v53  ;;  %v3690_v32 = vsel %vm3618_vm14, %v11341_v45, 0.0 }
 0x4ce   :  { %v11343_v18 = vpop.f32.mrf.mxu0 }
 0x4cf   :  { %v3681_v61 = vadd.f32 %v3680_v9, %v3679_v20  ;;  %17371 = vst [vmem:[#allocation13_spill] sm:$0xff] %v11343_v18  ;;  %v3696_v0 = vsel %vm3618_vm14, %v11343_v18, 0.0 }
 0x4d0   :  { %v11349_v57 = vpop.f32.mrf.mxu0 }
 0x4d1   :  { %v3683_v59 = vadd.f32 %v3682_v60, %v3681_v61  ;;  %v3694_v37 = vsel %vm3618_vm14, %v11349_v57, 0.0 }
 0x4d2   :  { %v11351_v50 = vpop.f32.mrf.mxu0 }
 0x4d3   :  { %v3685_v39 = vadd.f32 %v3684_v29, %v3683_v59  ;;  %17372 = vst [vmem:[#allocation14_spill] sm:$0xff] %v11351_v50  ;;  %v3700_v61 = vsel %vm3618_vm14, %v11351_v50, 0.0 }
 0x4d4   :  { %v11357_v1 = vpop.f32.mrf.mxu0 }
 0x4d5   :  { %v3687_v42 = vadd.f32 %v3686_v40, %v3685_v39  ;;  %v3698_v13 = vsel %vm3618_vm14, %v11357_v1, 0.0 }
 0x4d6   :  { %v11359_v21 = vpop.f32.mrf.mxu0 }
 0x4d7   :  { %v3689_v23 = vadd.f32 %v3688_v27, %v3687_v42  ;;  %17373 = vst [vmem:[#allocation15_spill] sm:$0xff] %v11359_v21  ;;  %v3704_v27 = vsel %vm3618_vm14, %v11359_v21, 0.0 }
 0x4d8   :  { %v11365_v9 = vpop.f32.mrf.mxu0 }
 0x4d9   :  { %v3691_v47 = vadd.f32 %v3690_v32, %v3689_v23  ;;  %17374 = vst [vmem:[#allocation16_spill] sm:$0xff] %v11365_v9  ;;  %v3702_v59 = vsel %vm3618_vm14, %v11365_v9, 0.0 }
 0x4da   :  { %v11367_v60 = vpop.f32.mrf.mxu0 }
 0x4db   :  { %v3693_v52 = vadd.f32 %v3692_v38, %v3691_v47  ;;  %17375 = vst [vmem:[#allocation17_spill] sm:$0xff] %v11367_v60 }
 0x4dc   :  { %v11373_v39 = vpop.f32.mrf.mxu0 }
 0x4dd   :  { %v3695_v62 = vadd.f32 %v3694_v37, %v3693_v52  ;;  %17376 = vst [vmem:[#allocation18_spill] sm:$0xff] %v11373_v39  ;;  %v3706_v32 = vsel %vm3618_vm14, %v11373_v39, 0.0  ;;  %v3708_v52 = vsel %vm3618_vm14, %v11367_v60, 0.0 }
 0x4de   :  { %v11375_v42 = vpop.f32.mrf.mxu0 }
 0x4df   :  { %v3697_v53 = vadd.f32 %v3696_v0, %v3695_v62  ;;  %17377 = vst [vmem:[#allocation19_spill] sm:$0xff] %v11375_v42 }
 0x4e0   :  { %v11381_v38 = vpop.f32.mrf.mxu0 }
 0x4e1   :  { %v3699_v20 = vadd.f32 %v3698_v13, %v3697_v53  ;;  %17378 = vst [vmem:[#allocation20_spill] sm:$0xff] %v11381_v38  ;;  %v3710_v62 = vsel %vm3618_vm14, %v11381_v38, 0.0 }
 0x4e2   :  { %v11383_v37 = vpop.f32.mrf.mxu0 }
 0x4e3   :  { %v3701_v29 = vadd.f32 %v3700_v61, %v3699_v20  ;;  %17379 = vst [vmem:[#allocation21_spill] sm:$0xff] %v11383_v37  ;;  %v3712_v61 = vsel %vm3618_vm14, %v11375_v42, 0.0 }
 0x4e4   :  { %v11389_v53 = vpop.f32.mrf.mxu0 }
 0x4e5   :  { %v3703_v40 = vadd.f32 %v3702_v59, %v3701_v29  ;;  %17380 = vst [vmem:[#allocation22_spill] sm:$0xff] %v11389_v53  ;;  %v3714_v59 = vsel %vm3618_vm14, %v11389_v53, 0.0 }
 0x4e6   :  { %v11391_v20 = vpop.f32.mrf.mxu0 }
 0x4e7   :  { %v3705_v23 = vadd.f32 %v3704_v27, %v3703_v40  ;;  %17381 = vst [vmem:[#allocation23_spill] sm:$0xff] %v11391_v20 }
 0x4e8   :  { %v11397_v27 = vpop.f32.mrf.mxu0 }
 0x4e9   :  { %v3707_v47 = vadd.f32 %v3706_v32, %v3705_v23  ;;  %17382 = vst [vmem:[#allocation24_spill] sm:$0xff] %v11397_v27  ;;  %v3716_v23 = vsel %vm3618_vm14, %v11383_v37, 0.0 }
 0x4ea   :  { %v11399_v32 = vpop.f32.mrf.mxu0 }
 0x4eb   :  { %v3709_v0 = vadd.f32 %v3708_v52, %v3707_v47  ;;  %17383 = vst [vmem:[#allocation25_spill] sm:$0xff] %v11399_v32  ;;  %v3718_v47 = vsel %vm3618_vm14, %v11397_v27, 0.0 }
 0x4ed   :  { %v3711_v13 = vadd.f32 %v3710_v62, %v3709_v0  ;;  %v11405_v0 = vpop.f32.mrf.mxu0 }
 0x4ee   :  { %17384 = vst [vmem:[#allocation26_spill] sm:$0xff] %v11405_v0 }
 0x4ef   :  { %v3713_v29 = vadd.f32 %v3712_v61, %v3711_v13  ;;  %v3720_v13 = vsel %vm3618_vm14, %v11391_v20, 0.0  ;;  %v3722_v61 = vsel %vm3618_vm14, %v11405_v0, 0.0 }
 0x4f1   :  { %v3715_v40 = vadd.f32 %v3714_v59, %v3713_v29 }
 0x4f3   :  { %v3717_v52 = vadd.f32 %v3716_v23, %v3715_v40  ;;  %v3724_v40 = vsel %vm3618_vm14, %v11399_v32, 0.0 }
 0x4f5   :  { %v3719_v62 = vadd.f32 %v3718_v47, %v3717_v52 }
 0x4f7   :  { %v3721_v59 = vadd.f32 %v3720_v13, %v3719_v62 }
 0x4f9   :  { %v3723_v29 = vadd.f32 %v3722_v61, %v3721_v59 }
 0x4fb   :  { %v3725_v47 = vadd.f32 %v3724_v40, %v3723_v29 }
 0x50a   :  { %v11407_v2 = vpop.f32.mrf.mxu0 }
 0x50b   :  { %17385 = vst [vmem:[#allocation27_spill] sm:$0xff] %v11407_v2  ;;  %v3728_v62 = vsel %vm3618_vm14, %v11407_v2, 0.0 }
 0x50c   :  { %v11413_v53 = vpop.f32.mrf.mxu0 }
 0x50d   :  { %17386 = vst [vmem:[#allocation28_spill] sm:$0xff] %v11413_v53  ;;  %v3726_v23 = vsel %vm3618_vm14, %v11413_v53, 0.0 }
 0x50e   :  { %v3727_v52 = vadd.f32 %v3726_v23, %v3725_v47 }
 0x510   :  { %v3729_v61 = vadd.f32 %v3728_v62, %v3727_v52 }
 0x52a   :  { %v11415_v37 = vpop.f32.mrf.mxu0 }
 0x52b   :  { %17387 = vst [vmem:[#allocation29_spill] sm:$0xff] %v11415_v37  ;;  %v3732_v29 = vsel %vm3618_vm14, %v11415_v37, 0.0 }
 0x52c   :  { %v11421_v27 = vpop.f32.mrf.mxu0 }
 0x52d   :  { %17388 = vst [vmem:[#allocation30_spill] sm:$0xff] %v11421_v27  ;;  %v3730_v13 = vsel %vm3618_vm14, %v11421_v27, 0.0 }
 0x52e   :  { %v3731_v59 = vadd.f32 %v3730_v13, %v3729_v61 }
 0x530   :  { %v3733_v23 = vadd.f32 %v3732_v29, %v3731_v59 }
 0x54a   :  { %v11423_v20 = vpop.f32.mrf.mxu0 }
 0x54b   :  { %17389 = vst [vmem:[#allocation31_spill] sm:$0xff] %v11423_v20  ;;  %v3736_v52 = vsel %vm3618_vm14, %v11423_v20, 0.0 }
 0x54c   :  { %v11429_v0 = vpop.f32.mrf.mxu0 }
 0x54d   :  { %17390 = vst [vmem:[#allocation32_spill] sm:$0xff] %v11429_v0  ;;  %v3734_v40 = vsel %vm3618_vm14, %v11429_v0, 0.0 }
 0x54e   :  { %v3735_v47 = vadd.f32 %v3734_v40, %v3733_v23 }
 0x550   :  { %v3737_v13 = vadd.f32 %v3736_v52, %v3735_v47 }
 0x56a   :  { %v11431_v32 = vpop.f32.mrf.mxu0 }
 0x56b   :  { %v3740_v37 = vsel %vm3618_vm14, %v11431_v32, 0.0 }
 0x56c   :  { %v11437_v53 = vpop.f32.mrf.mxu0 }
 0x56d   :  { %17391 = vst [vmem:[#allocation33_spill] sm:$0xff] %v11437_v53  ;;  %v3738_v62 = vsel %vm3618_vm14, %v11437_v53, 0.0 }
 0x56e   :  { %v3739_v61 = vadd.f32 %v3738_v62, %v3737_v13 }
 0x570   :  { %v3741_v29 = vadd.f32 %v3740_v37, %v3739_v61 }
 0x577   :  { %v11439_v2 = vpop.f32.mrf.mxu0 }
 0x578   :  { %v3744_v23 = vsel %vm3618_vm14, %v11439_v2, 0.0 }
 0x579   :  { %v11445_v27 = vpop.f32.mrf.mxu0 }
 0x57a   :  { %17392 = vst [vmem:[#allocation34_spill] sm:$0xff] %v11445_v27  ;;  %v3742_v59 = vsel %vm3618_vm14, %v11445_v27, 0.0 }
 0x57b   :  { %v3743_v40 = vadd.f32 %v3742_v59, %v3741_v29 }
 0x57d   :  { %v3745_v0 = vadd.f32 %v3744_v23, %v3743_v40 }
 0x57f   :  { %v3746_v20 = vrot.slane %v3745_v0, 4 }
 0x581   :  { %v3747_v42 = vadd.f32 %v3746_v20, %v3745_v0 }
 0x583   :  { %v3748_v38 = vrot.slane %v3747_v42, 2 }
 0x585   :  { %v3749_v53 = vadd.f32 %v3748_v38, %v3747_v42 }
 0x587   :  { %v3750_v47 = vrot.slane %v3749_v53, 1 }
 0x589   :  { %v3751_v52 = vadd.f32 %v3750_v47, %v3749_v53 }
 0x58b   :  { %v11453_v62 = vmul.f32 0.001953125, %v3751_v52 }
 0x58d   :  { %v3754_v13 = vsub.f32 %v11199_v5, %v11453_v62  ;;  %v3755_v27 = vsub.f32 %v11197_v3, %v11453_v62  ;;  %v3756_v37 = vsub.f32 %v11203_v6, %v11453_v62  ;;  %v3757_v61 = vsub.f32 %v11201_v43, %v11453_v62 }
 0x58e   :  { %v3758_v42 = vsub.f32 %v11213_v10, %v11453_v62  ;;  %v3759_v53 = vsub.f32 %v11209_v14, %v11453_v62  ;;  %v3760_v47 = vsub.f32 %v11221_v24, %v11453_v62  ;;  %v3761_v10 = vsub.f32 %v11215_v17, %v11453_v62 }
 0x58f   :  { %v3818_v59 = vmul.f32 %v3754_v13, %v3754_v13  ;;  %v3819_v20 = vmul.f32 %v3755_v27, %v3755_v27  ;;  %v3820_v38 = vmul.f32 %v3756_v37, %v3756_v37  ;;  %v3821_v0 = vmul.f32 %v3757_v61, %v3757_v61 }
 0x590   :  { %v3822_v52 = vmul.f32 %v3758_v42, %v3758_v42  ;;  %v3823_v37 = vmul.f32 %v3759_v53, %v3759_v53  ;;  %v3762_v61 = vsub.f32 %v11229_v35, %v11453_v62  ;;  %v3763_v42 = vsub.f32 %v11223_v26, %v11453_v62 }
 0x591   :  { %v3882_v29 = vsel %vm3618_vm14, %v3818_v59, 0.0  ;;  %v3883_v40 = vsel %vm3618_vm14, %v3819_v20, 0.0  ;;  %v3885_v13 = vsel %vm3618_vm14, %v3820_v38, 0.0  ;;  %v3887_v43 = vsel %vm3618_vm14, %v3821_v0, 0.0 }
 0x592   :  { %v3884_v23 = vadd.f32 %v3883_v40, %v3882_v29  ;;  %v3824_v59 = vmul.f32 %v3760_v47, %v3760_v47  ;;  %v3889_v20 = vsel %vm3618_vm14, %v3822_v52, 0.0  ;;  %v3825_v40 = vmul.f32 %v3761_v10, %v3761_v10 }
 0x593   :  { %v3891_v38 = vsel %vm3618_vm14, %v3823_v37, 0.0  ;;  %v3764_v53 = vsub.f32 %v11237_v58, %v11453_v62  ;;  %v3765_v47 = vsub.f32 %v11231_v54, %v11453_v62  ;;  %v3766_v10 = vsub.f32 %v11245_v4, %v11453_v62 }
 0x594   :  { %v3886_v27 = vadd.f32 %v3885_v13, %v3884_v23  ;;  %v3826_v13 = vmul.f32 %v3762_v61, %v3762_v61  ;;  %v3767_v61 = vsub.f32 %v11239_v19, %v11453_v62 }
 0x596   :  { %v3888_v14 = vadd.f32 %v3887_v43, %v3886_v27  ;;  %v3893_v43 = vsel %vm3618_vm14, %v3824_v59, 0.0  ;;  %v3827_v27 = vmul.f32 %v3763_v42, %v3763_v42  ;;  %v3897_v37 = vsel %vm3618_vm14, %v3826_v13, 0.0 }
 0x597   :  { %v3768_v42 = vsub.f32 %v11253_v44, %v11453_v62 }
 0x598   :  { %v3890_v29 = vadd.f32 %v3889_v20, %v3888_v14  ;;  %v3895_v14 = vsel %vm3618_vm14, %v3825_v40, 0.0  ;;  %v3828_v20 = vmul.f32 %v3764_v53, %v3764_v53  ;;  %v3899_v59 = vsel %vm3618_vm14, %v3827_v27, 0.0 }
 0x599   :  { %v3769_v53 = vsub.f32 %v11247_v31, %v11453_v62 }
 0x59a   :  { %v3892_v23 = vadd.f32 %v3891_v38, %v3890_v29  ;;  %v3829_v38 = vmul.f32 %v3765_v47, %v3765_v47  ;;  %v3901_v40 = vsel %vm3618_vm14, %v3828_v20, 0.0  ;;  %v3770_v47 = vsub.f32 %v11261_v51, %v11453_v62 }
 0x59c   :  { %v3894_v0 = vadd.f32 %v3893_v43, %v3892_v23  ;;  %v3830_v43 = vmul.f32 %v3766_v10, %v3766_v10  ;;  %v3903_v13 = vsel %vm3618_vm14, %v3829_v38, 0.0  ;;  %v3771_v10 = vsub.f32 %v11255_v46, %v11453_v62 }
 0x59e   :  { %v3896_v52 = vadd.f32 %v3895_v14, %v3894_v0  ;;  %v3831_v14 = vmul.f32 %v3767_v61, %v3767_v61  ;;  %v3905_v27 = vsel %vm3618_vm14, %v3830_v43, 0.0  ;;  %v3772_v61 = vsub.f32 %v11269_v25, %v11453_v62 }
 0x5a0   :  { %v3898_v29 = vadd.f32 %v3897_v37, %v3896_v52  ;;  %v3832_v37 = vmul.f32 %v3768_v42, %v3768_v42  ;;  %v3907_v20 = vsel %vm3618_vm14, %v3831_v14, 0.0  ;;  %v3773_v42 = vsub.f32 %v11263_v12, %v11453_v62 }
 0x5a2   :  { %v3900_v23 = vadd.f32 %v3899_v59, %v3898_v29  ;;  %v3833_v59 = vmul.f32 %v3769_v53, %v3769_v53  ;;  %v3909_v38 = vsel %vm3618_vm14, %v3832_v37, 0.0  ;;  %v3774_v53 = vsub.f32 %v11277_v63, %v11453_v62 }
 0x5a4   :  { %v3902_v0 = vadd.f32 %v3901_v40, %v3900_v23  ;;  %v3834_v40 = vmul.f32 %v3770_v47, %v3770_v47  ;;  %v3911_v43 = vsel %vm3618_vm14, %v3833_v59, 0.0  ;;  %v3775_v47 = vsub.f32 %v11271_v30, %v11453_v62 }
 0x5a6   :  { %v3904_v52 = vadd.f32 %v3903_v13, %v3902_v0  ;;  %v3835_v13 = vmul.f32 %v3771_v10, %v3771_v10  ;;  %v3913_v14 = vsel %vm3618_vm14, %v3834_v40, 0.0  ;;  %v3776_v10 = vsub.f32 %v11285_v8, %v11453_v62 }
 0x5a8   :  { %v3906_v29 = vadd.f32 %v3905_v27, %v3904_v52  ;;  %v3836_v27 = vmul.f32 %v3772_v61, %v3772_v61  ;;  %v3915_v37 = vsel %vm3618_vm14, %v3835_v13, 0.0  ;;  %v3777_v61 = vsub.f32 %v11279_v34, %v11453_v62 }
 0x5aa   :  { %v3908_v23 = vadd.f32 %v3907_v20, %v3906_v29  ;;  %v3837_v20 = vmul.f32 %v3773_v42, %v3773_v42  ;;  %v3917_v59 = vsel %vm3618_vm14, %v3836_v27, 0.0  ;;  %v3778_v42 = vsub.f32 %v11293_v48, %v11453_v62 }
 0x5ac   :  { %v3910_v0 = vadd.f32 %v3909_v38, %v3908_v23  ;;  %v3838_v38 = vmul.f32 %v3774_v53, %v3774_v53  ;;  %v3919_v40 = vsel %vm3618_vm14, %v3837_v20, 0.0  ;;  %v3779_v53 = vsub.f32 %v11287_v33, %v11453_v62 }
 0x5ae   :  { %v3912_v52 = vadd.f32 %v3911_v43, %v3910_v0  ;;  %v3839_v43 = vmul.f32 %v3775_v47, %v3775_v47  ;;  %v3921_v13 = vsel %vm3618_vm14, %v3838_v38, 0.0  ;;  %v3780_v47 = vsub.f32 %v11301_v56, %v11453_v62 }
 0x5b0   :  { %v3914_v29 = vadd.f32 %v3913_v14, %v3912_v52  ;;  %v3840_v14 = vmul.f32 %v3776_v10, %v3776_v10  ;;  %v3923_v27 = vsel %vm3618_vm14, %v3839_v43, 0.0  ;;  %v3781_v10 = vsub.f32 %v11295_v22, %v11453_v62 }
 0x5b2   :  { %v3916_v23 = vadd.f32 %v3915_v37, %v3914_v29  ;;  %v3841_v37 = vmul.f32 %v3777_v61, %v3777_v61  ;;  %v3925_v20 = vsel %vm3618_vm14, %v3840_v14, 0.0  ;;  %v3782_v61 = vsub.f32 %v11309_v16, %v11453_v62 }
 0x5b4   :  { %v3918_v0 = vadd.f32 %v3917_v59, %v3916_v23  ;;  %v3842_v59 = vmul.f32 %v3778_v42, %v3778_v42  ;;  %v3927_v38 = vsel %vm3618_vm14, %v3841_v37, 0.0  ;;  %v3783_v42 = vsub.f32 %v11303_v28, %v11453_v62 }
 0x5b6   :  { %v3920_v52 = vadd.f32 %v3919_v40, %v3918_v0  ;;  %v3843_v40 = vmul.f32 %v3779_v53, %v3779_v53  ;;  %v3929_v43 = vsel %vm3618_vm14, %v3842_v59, 0.0  ;;  %v3784_v53 = vsub.f32 %v11317_v11, %v11453_v62 }
 0x5b8   :  { %v3922_v29 = vadd.f32 %v3921_v13, %v3920_v52  ;;  %v3844_v13 = vmul.f32 %v3780_v47, %v3780_v47  ;;  %v3931_v14 = vsel %vm3618_vm14, %v3843_v40, 0.0  ;;  %v3785_v47 = vsub.f32 %v11311_v41, %v11453_v62 }
 0x5ba   :  { %v3924_v23 = vadd.f32 %v3923_v27, %v3922_v29  ;;  %v3845_v27 = vmul.f32 %v3781_v10, %v3781_v10  ;;  %v3933_v37 = vsel %vm3618_vm14, %v3844_v13, 0.0  ;;  %v3786_v10 = vsub.f32 %v11325_v36, %v11453_v62 }
 0x5bc   :  { %v3926_v0 = vadd.f32 %v3925_v20, %v3924_v23  ;;  %v3846_v20 = vmul.f32 %v3782_v61, %v3782_v61  ;;  %v3935_v59 = vsel %vm3618_vm14, %v3845_v27, 0.0  ;;  %v3787_v61 = vsub.f32 %v11319_v15, %v11453_v62 }
 0x5be   :  { %v3928_v52 = vadd.f32 %v3927_v38, %v3926_v0  ;;  %v3847_v38 = vmul.f32 %v3783_v42, %v3783_v42  ;;  %v3937_v40 = vsel %vm3618_vm14, %v3846_v20, 0.0  ;;  %v3788_v42 = vsub.f32 %v11333_v7, %v11453_v62 }
 0x5c0   :  { %v3930_v29 = vadd.f32 %v3929_v43, %v3928_v52  ;;  %v3848_v43 = vmul.f32 %v3784_v53, %v3784_v53  ;;  %v3939_v13 = vsel %vm3618_vm14, %v3847_v38, 0.0  ;;  %v3789_v53 = vsub.f32 %v11327_v55, %v11453_v62 }
 0x5c2   :  { %v3932_v23 = vadd.f32 %v3931_v14, %v3930_v29  ;;  %v3849_v14 = vmul.f32 %v3785_v47, %v3785_v47  ;;  %v3941_v27 = vsel %vm3618_vm14, %v3848_v43, 0.0  ;;  %v3790_v47 = vsub.f32 %v11341_v45, %v11453_v62 }
 0x5c4   :  { %v3934_v0 = vadd.f32 %v3933_v37, %v3932_v23  ;;  %v3850_v37 = vmul.f32 %v3786_v10, %v3786_v10  ;;  %v3943_v20 = vsel %vm3618_vm14, %v3849_v14, 0.0  ;;  %v3791_v10 = vsub.f32 %v11335_v49, %v11453_v62 }
 0x5c6   :  { %v3936_v52 = vadd.f32 %v3935_v59, %v3934_v0  ;;  %v3851_v59 = vmul.f32 %v3787_v61, %v3787_v61  ;;  %v3945_v38 = vsel %vm3618_vm14, %v3850_v37, 0.0  ;;  %v3792_v61 = vsub.f32 %v11349_v57, %v11453_v62 }
 0x5c8   :  { %v3938_v29 = vadd.f32 %v3937_v40, %v3936_v52  ;;  %v3852_v40 = vmul.f32 %v3788_v42, %v3788_v42  ;;  %v3947_v43 = vsel %vm3618_vm14, %v3851_v59, 0.0  ;;  %v3793_v42 = vsub.f32 %v11343_v18, %v11453_v62 }
 0x5ca   :  { %v3940_v23 = vadd.f32 %v3939_v13, %v3938_v29  ;;  %v3853_v13 = vmul.f32 %v3789_v53, %v3789_v53  ;;  %v3949_v14 = vsel %vm3618_vm14, %v3852_v40, 0.0  ;;  %v3794_v53 = vsub.f32 %v11357_v1, %v11453_v62  ;;  %v6245_v40 = vld [vmem:[#allocation4 + $0x8] sm:$0x3] }
 0x5cc   :  { %v3942_v0 = vadd.f32 %v3941_v27, %v3940_v23  ;;  %v3854_v27 = vmul.f32 %v3790_v47, %v3790_v47  ;;  %v3951_v37 = vsel %vm3618_vm14, %v3853_v13, 0.0 }
 0x5ce   :  { %v3944_v52 = vadd.f32 %v3943_v20, %v3942_v0  ;;  %v3855_v20 = vmul.f32 %v3791_v10, %v3791_v10  ;;  %v3953_v59 = vsel %vm3618_vm14, %v3854_v27, 0.0  ;;  %v6333_v10 = vrot.slane %v6245_v40, 1 }
 0x5d0   :  { %v3946_v29 = vadd.f32 %v3945_v38, %v3944_v52  ;;  %v3856_v38 = vmul.f32 %v3792_v61, %v3792_v61  ;;  %v3858_v61 = vmul.f32 %v3794_v53, %v3794_v53 }
 0x5d2   :  { %v3948_v23 = vadd.f32 %v3947_v43, %v3946_v29  ;;  %v3795_v29 = vsub.f32 %v11351_v50, %v11453_v62  ;;  %v6244_v43 = vld [vmem:[#allocation4] sm:$0xff]  ;;  %v3957_v27 = vsel %vm3618_vm14, %v3856_v38, 0.0  ;;  %v3961_v53 = vsel %vm3618_vm14, %v3858_v61, 0.0 }
 0x5d3   :  { %v6332_v18 = vrot.slane %v6244_v43, 1  ;;  %6284 = vst.msk [vmem:[#allocation5] sm:$0xff] %vm3618_vm14, %v6244_v43 }
 0x5d4   :  { %v3950_v0 = vadd.f32 %v3949_v14, %v3948_v23  ;;  %v3857_v23 = vmul.f32 %v3793_v42, %v3793_v42  ;;  %v3955_v14 = vsel %vm3618_vm14, %v3855_v20, 0.0  ;;  %v3797_v42 = vsub.f32 %v11359_v21, %v11453_v62 }
 0x5d5   :  { %v3859_v20 = vmul.f32 %v3795_v29, %v3795_v29 }
 0x5d6   :  { %v3952_v52 = vadd.f32 %v3951_v37, %v3950_v0  ;;  %v3796_v0 = vsub.f32 %v11365_v9, %v11453_v62  ;;  %v6334_v37 = vsel %vm537_vm3, %v6332_v18, %v6333_v10  ;;  %v3799_v18 = vsub.f32 %v11367_v60, %v11453_v62 }
 0x5d7   :  { %6380 = vrot.lane.b32.xlu0 %v6334_v37, %s8835_s28  ;;  %v3861_v38 = vmul.f32 %v3797_v42, %v3797_v42  ;;  %v3963_v10 = vsel %vm3618_vm14, %v3859_v20, 0.0  ;;  %v6445_v20 = vrot.slane %v6244_v43, 2 }
 0x5d8   :  { %v3954_v47 = vadd.f32 %v3953_v59, %v3952_v52  ;;  %v3959_v52 = vsel %vm3618_vm14, %v3857_v23, 0.0 }
 0x5d9   :  { %v3967_v61 = vsel %vm3618_vm14, %v3861_v38, 0.0  ;;  %v17397_v38 = vld [vmem:[#allocation24_spill] sm:$0xff] }
 0x5da   :  { %v3956_v13 = vadd.f32 %v3955_v14, %v3954_v47  ;;  %v3798_v47 = vsub.f32 %v11373_v39, %v11453_v62  ;;  %v3860_v14 = vmul.f32 %v3796_v0, %v3796_v0  ;;  %v3863_v39 = vmul.f32 %v3799_v18, %v3799_v18 }
 0x5dc   :  { %v3958_v50 = vadd.f32 %v3957_v27, %v3956_v13  ;;  %v17393_v27 = vld [vmem:[#allocation20_spill] sm:$0xff]  ;;  %v3862_v37 = vmul.f32 %v3798_v47, %v3798_v47  ;;  %v17396_v47 = vld [vmem:[#allocation21_spill] sm:$0xff] }
 0x5dd   :  { %v3800_v29 = vsub.f32 %v17393_v27, %v11453_v62 }
 0x5de   :  { %v3960_v59 = vadd.f32 %v3959_v52, %v3958_v50  ;;  %v3965_v50 = vsel %vm3618_vm14, %v3860_v14, 0.0  ;;  %v17394_v52 = vld [vmem:[#allocation19_spill] sm:$0xff]  ;;  %v3803_v14 = vsub.f32 %v17396_v47, %v11453_v62 }
 0x5df   :  { %v3801_v0 = vsub.f32 %v17394_v52, %v11453_v62  ;;  %v3864_v60 = vmul.f32 %v3800_v29, %v3800_v29 }
 0x5e0   :  { %v3962_v9 = vadd.f32 %v3961_v53, %v3960_v59  ;;  %v17395_v59 = vld [vmem:[#allocation22_spill] sm:$0xff] }
 0x5e1   :  { %v3802_v53 = vsub.f32 %v17395_v59, %v11453_v62 }
 0x5e2   :  { %v3964_v13 = vadd.f32 %v3963_v10, %v3962_v9  ;;  %v3969_v9 = vsel %vm3618_vm14, %v3862_v37, 0.0  ;;  %v6446_v10 = vrot.slane %v6245_v40, 2  ;;  %v3973_v37 = vsel %vm3618_vm14, %v3864_v60, 0.0  ;;  %v17398_v40 = vld [vmem:[#allocation23_spill] sm:$0xff] }
 0x5e3   :  { %v3866_v29 = vmul.f32 %v3802_v53, %v3802_v53 }
 0x5e4   :  { %v3966_v23 = vadd.f32 %v3965_v50, %v3964_v13  ;;  %v3865_v13 = vmul.f32 %v3801_v0, %v3801_v0  ;;  %v3971_v50 = vsel %vm3618_vm14, %v3863_v39, 0.0  ;;  %v6447_v18 = vsel %vm955_vm2, %v6445_v20, %v6446_v10  ;;  %v17399_v39 = vld [vmem:[#allocation26_spill] sm:$0xff] }
 0x5e5   :  { %6493 = vrot.lane.b32.xlu1 %v6447_v18, %s8839_s22  ;;  %v3806_v20 = vsub.f32 %v17399_v39, %v11453_v62  ;;  %v3977_v10 = vsel %vm3618_vm14, %v3866_v29, 0.0  ;;  %v17400_v18 = vld [vmem:[#allocation25_spill] sm:$0xff] }
 0x5e6   :  { %v3968_v42 = vadd.f32 %v3967_v61, %v3966_v23  ;;  %v3804_v23 = vsub.f32 %v17397_v38, %v11453_v62  ;;  %v3805_v61 = vsub.f32 %v17398_v40, %v11453_v62  ;;  %v3975_v0 = vsel %vm3618_vm14, %v3865_v13, 0.0 }
 0x5e7   :  { %v3807_v53 = vsub.f32 %v17400_v18, %v11453_v62  ;;  %v3870_v40 = vmul.f32 %v3806_v20, %v3806_v20 }
 0x5e8   :  { %v3970_v27 = vadd.f32 %v3969_v9, %v3968_v42  ;;  %v3867_v42 = vmul.f32 %v3803_v14, %v3803_v14  ;;  %v3869_v38 = vmul.f32 %v3805_v61, %v3805_v61 }
 0x5e9   :  { %v3871_v39 = vmul.f32 %v3807_v53, %v3807_v53 }
 0x5ea   :  { %v3972_v52 = vadd.f32 %v3971_v50, %v3970_v27  ;;  %v3868_v27 = vmul.f32 %v3804_v23, %v3804_v23  ;;  %v3979_v60 = vsel %vm3618_vm14, %v3867_v42, 0.0  ;;  %v3983_v29 = vsel %vm3618_vm14, %v3869_v38, 0.0 }
 0x5eb   :  { %v3985_v42 = vsel %vm3618_vm14, %v3870_v40, 0.0 }
 0x5ec   :  { %v3974_v43 = vadd.f32 %v3973_v37, %v3972_v52  ;;  %v17401_v37 = vld [vmem:[#allocation28_spill] sm:$0xff]  ;;  %v3981_v13 = vsel %vm3618_vm14, %v3868_v27, 0.0  ;;  %v3987_v27 = vsel %vm3618_vm14, %v3871_v39, 0.0 }
 0x5ed   :  { %v3808_v14 = vsub.f32 %v17401_v37, %v11453_v62 }
 0x5ee   :  { %v3976_v9 = vadd.f32 %v3975_v0, %v3974_v43  ;;  %v17402_v0 = vld [vmem:[#allocation27_spill] sm:$0xff] }
 0x5ef   :  { %v3809_v23 = vsub.f32 %v17402_v0, %v11453_v62  ;;  %v3872_v18 = vmul.f32 %v3808_v14, %v3808_v14 }
 0x5f0   :  { %v3978_v50 = vadd.f32 %v3977_v10, %v3976_v9  ;;  %v17403_v10 = vld [vmem:[#allocation30_spill] sm:$0xff] }
 0x5f1   :  { %v3810_v61 = vsub.f32 %v17403_v10, %v11453_v62  ;;  %v3873_v37 = vmul.f32 %v3809_v23, %v3809_v23  ;;  %v3989_v38 = vsel %vm3618_vm14, %v3872_v18, 0.0 }
 0x5f2   :  { %v3980_v52 = vadd.f32 %v3979_v60, %v3978_v50  ;;  %v17404_v60 = vld [vmem:[#allocation29_spill] sm:$0xff] }
 0x5f3   :  { %v3811_v20 = vsub.f32 %v17404_v60, %v11453_v62  ;;  %v3874_v0 = vmul.f32 %v3810_v61, %v3810_v61  ;;  %v3991_v40 = vsel %vm3618_vm14, %v3873_v37, 0.0  ;;  %v3815_v61 = vsub.f32 %v11431_v32, %v11453_v62 }
 0x5f4   :  { %v3982_v43 = vadd.f32 %v3981_v13, %v3980_v52  ;;  %v17405_v13 = vld [vmem:[#allocation32_spill] sm:$0xff] }
 0x5f5   :  { %v3812_v53 = vsub.f32 %v17405_v13, %v11453_v62  ;;  %v3875_v10 = vmul.f32 %v3811_v20, %v3811_v20  ;;  %v3993_v39 = vsel %vm3618_vm14, %v3874_v0, 0.0 }
 0x5f6   :  { %v3984_v9 = vadd.f32 %v3983_v29, %v3982_v43  ;;  %v17406_v29 = vld [vmem:[#allocation31_spill] sm:$0xff] }
 0x5f7   :  { %v3813_v14 = vsub.f32 %v17406_v29, %v11453_v62  ;;  %v3876_v60 = vmul.f32 %v3812_v53, %v3812_v53  ;;  %v3995_v18 = vsel %vm3618_vm14, %v3875_v10, 0.0  ;;  %v3817_v53 = vsub.f32 %v11439_v2, %v11453_v62 }
 0x5f8   :  { %v3986_v50 = vadd.f32 %v3985_v42, %v3984_v9  ;;  %v17407_v42 = vld [vmem:[#allocation33_spill] sm:$0xff] }
 0x5f9   :  { %v3814_v23 = vsub.f32 %v17407_v42, %v11453_v62  ;;  %v3997_v37 = vsel %vm3618_vm14, %v3876_v60, 0.0  ;;  %v3881_v10 = vmul.f32 %v3817_v53, %v3817_v53 }
 0x5fa   :  { %v3988_v52 = vadd.f32 %v3987_v27, %v3986_v50  ;;  %v3877_v27 = vmul.f32 %v3813_v14, %v3813_v14 }
 0x5fb   :  { %v3878_v29 = vmul.f32 %v3814_v23, %v3814_v23  ;;  %v4007_v60 = vsel %vm3618_vm14, %v3881_v10, 0.0 }
 0x5fc   :  { %v3990_v43 = vadd.f32 %v3989_v38, %v3988_v52  ;;  %v17408_v38 = vld [vmem:[#allocation34_spill] sm:$0xff]  ;;  %v3999_v0 = vsel %vm3618_vm14, %v3877_v27, 0.0 }
 0x5fd   :  { %v3816_v20 = vsub.f32 %v17408_v38, %v11453_v62  ;;  %v4001_v14 = vsel %vm3618_vm14, %v3878_v29, 0.0  ;;  %v4024_v29 = vlaneseq }
 0x5fe   :  { %v3992_v9 = vadd.f32 %v3991_v40, %v3990_v43  ;;  %v3879_v40 = vmul.f32 %v3815_v61, %v3815_v61 }
 0x5ff   :  { %v11652_v53 = vshrl.u32 %v4024_v29, 7 }
 0x600   :  { %v3994_v50 = vadd.f32 %v3993_v39, %v3992_v9  ;;  %v3880_v39 = vmul.f32 %v3816_v20, %v3816_v20 }
 0x601   :  { %17409 = vst [vmem:[#allocation33_spill] sm:$0xff] %v11652_v53 }
 0x602   :  { %v3996_v52 = vadd.f32 %v3995_v18, %v3994_v50  ;;  %v4003_v50 = vsel %vm3618_vm14, %v3879_v40, 0.0  ;;  %v4005_v23 = vsel %vm3618_vm14, %v3880_v39, 0.0  ;;  %v8840_v40 = vmov 1983009808  }
 0x604   :  { %v3998_v43 = vadd.f32 %v3997_v37, %v3996_v52 }
 0x606   :  { %v4000_v9 = vadd.f32 %v3999_v0, %v3998_v43 }
 0x608   :  { %v4002_v13 = vadd.f32 %v4001_v14, %v4000_v9  ;;  %v4016_v9 = vld [vmem:[%s16949_s2] sm:$0x1]  ;;  %s8841_s2 = smov 48  }
 0x60a   :  { %v4004_v18 = vadd.f32 %v4003_v50, %v4002_v13  ;;  %v4357_v13 = vunpack.c.l.s4 %v8840_v40 }
 0x60c   :  { %v4006_v47 = vadd.f32 %v4005_v23, %v4004_v18  ;;  %v4358_v14 = vunpack.c.0.s8 %v4357_v13 }
 0x60e   :  { %v4008_v52 = vadd.f32 %v4007_v60, %v4006_v47  ;;  %v11658_v47 = vsub.s32 0, %v11652_v53  ;;  %v11668_v18 = vsub.s32 %v4358_v14, %v11652_v53 }
 0x610   :  { %v4009_v37 = vrot.slane %v4008_v52, 4  ;;  %17410 = vst [vmem:[#allocation34_spill] sm:$0xff] %v11658_v47  ;;  %17411 = vst [vmem:[#allocation35_spill] sm:$0xff] %v11668_v18 }
 0x612   :  { %v4010_v59 = vadd.f32 %v4009_v37, %v4008_v52 }
 0x614   :  { %v4011_v61 = vrot.slane %v4010_v59, 2 }
 0x616   :  { %v4012_v21 = vadd.f32 %v4011_v61, %v4010_v59 }
 0x618   :  { %v4013_v27 = vrot.slane %v4012_v21, 1 }
 0x61a   :  { %v4014_v43 = vadd.f32 %v4013_v27, %v4012_v21  ;;  %v4020_v21 = vld [vmem:[%s16950_s3] sm:$0x1]  ;;  %s8842_s3 = smov 64  }
 0x61c   :  { %v4015_v20 = vmul.f32 0.001953125, %v4014_v43 }
 0x61e   :  { %v4017_v0 = vadd.f32 1e-05, %v4015_v20 }
 0x620   :  { %8805 = vrsqrt.f32 %v4017_v0 }
 0x62d   :  { %v8806_v39 = vpop.eup %8805 }
 0x62e   :  { %v4019_v59 = vmul.f32 %v8806_v39, %v4016_v9 }
 0x630   :  { %v4021_v10 = vmul.f32 %v4019_v59, %v11453_v62  ;;  %v11665_v50 = vrot.slane %v4019_v59, %v11658_v47 }
 0x632   :  { %v4022_v23 = vsub.f32 %v4020_v21, %v4021_v10  ;;  %v4089_v60 = vmul.f32 %v11665_v50, %v17407_v42  ;;  %v4090_v52 = vmul.f32 %v11431_v32, %v11665_v50  ;;  %v4091_v37 = vmul.f32 %v11665_v50, %v17408_v38  ;;  %v17412_v38 = vld [vmem:[#allocation10_spill] sm:$0xff] }
 0x633   :  { %v4092_v61 = vmul.f32 %v11439_v2, %v11665_v50  ;;  %v11680_v62 = vmul.f32 %v11665_v50, %v11199_v5  ;;  %v11684_v27 = vmul.f32 %v11197_v3, %v11665_v50  ;;  %v11688_v42 = vmul.f32 %v11665_v50, %v11203_v6  ;;  %v17413_v2 = vld [vmem:[#allocation12_spill] sm:$0xff]  ;;  %v17414_v5 = vld [vmem:[#allocation11_spill] sm:$0xff] }
 0x634   :  { %v11691_v32 = vrot.slane %v4022_v23, %v11658_v47  ;;  %v11695_v43 = vmul.f32 %v17412_v38, %v11665_v50  ;;  %v11699_v20 = vmul.f32 %v11665_v50, %v17413_v2  ;;  %v11703_v0 = vmul.f32 %v17414_v5, %v11665_v50 }
 0x635   :  { %v11707_v3 = vmul.f32 %v11665_v50, %v11221_v24  ;;  %v11711_v6 = vmul.f32 %v11215_v17, %v11665_v50  ;;  %v11715_v29 = vmul.f32 %v11665_v50, %v11229_v35  ;;  %v11719_v40 = vmul.f32 %v11223_v26, %v11665_v50 }
 0x636   :  { %v4159_v13 = vadd.f32 %v11691_v32, %v4089_v60  ;;  %v4160_v9 = vadd.f32 %v11691_v32, %v4090_v52  ;;  %v4161_v39 = vadd.f32 %v11691_v32, %v4091_v37  ;;  %v4162_v24 = vadd.f32 %v11691_v32, %v4092_v61 }
 0x637   :  { %v11727_v17 = vmul.f32 %v11665_v50, %v11237_v58  ;;  %v11731_v35 = vmul.f32 %v11231_v54, %v11665_v50  ;;  %v11735_v26 = vmul.f32 %v11665_v50, %v11245_v4  ;;  %v11739_v14 = vmul.f32 %v11239_v19, %v11665_v50 }
 0x638   :  { %v4223_v59 = vmax.f32 %v4159_v13, 0.0  ;;  %v4224_v21 = vmax.f32 %v4160_v9, 0.0  ;;  %v4225_v10 = vmax.f32 %v4161_v39, 0.0  ;;  %v4226_v23 = vmax.f32 %v4162_v24, 0.0 }
 0x639   :  { %v11743_v58 = vmul.f32 %v11665_v50, %v11253_v44  ;;  %v11747_v54 = vmul.f32 %v11247_v31, %v11665_v50  ;;  %v11751_v4 = vmul.f32 %v11665_v50, %v11261_v51  ;;  %v11755_v19 = vmul.f32 %v11255_v46, %v11665_v50 }
 0x63a   :  { %v4317_v60 = vsel %vm3618_vm14, %v4223_v59, -inf  ;;  %v4318_v52 = vsel %vm3618_vm14, %v4225_v10, -inf  ;;  %v4320_v37 = vsel %vm3618_vm14, %v4224_v21, -inf  ;;  %v4321_v44 = vsel %vm3618_vm14, %v4226_v23, -inf }
 0x63b   :  { %v4319_v61 = vmax.f32 %v4317_v60, %v4318_v52  ;;  %v4322_v38 = vmax.f32 %v4320_v37, %v4321_v44  ;;  %v11763_v31 = vmul.f32 %v11665_v50, %v11269_v25  ;;  %v11767_v51 = vmul.f32 %v11263_v12, %v11665_v50 }
 0x63c   :  { %v11771_v46 = vmul.f32 %v11665_v50, %v11277_v63  ;;  %v11775_v2 = vmul.f32 %v11271_v30, %v11665_v50  ;;  %v11779_v5 = vmul.f32 %v11665_v50, %v11285_v8  ;;  %v11783_v25 = vmul.f32 %v11279_v34, %v11665_v50 }
 0x63d   :  { %v4865_v13 = vcombine.high %v4319_v61, %v4319_v61  ;;  %v4872_v12 = vrot.slane %v4319_v61, %v11668_v18  ;;  %v4882_v9 = vcombine.high %v4322_v38, %v4322_v38  ;;  %v4889_v39 = vrot.slane %v4322_v38, %v11668_v18 }
 0x63e   :  { %17415 = vst [vmem:[#allocation10_spill] sm:$0xff] %v11775_v2  ;;  %17416 = vst [vmem:[#allocation12_spill] sm:$0xff] %v11779_v5  ;;  %v11789_v63 = vmul.f32 %v11665_v50, %v11293_v48  ;;  %v11793_v30 = vmul.f32 %v11287_v33, %v11665_v50  ;;  %v11797_v8 = vmul.f32 %v11665_v50, %v11301_v56 }
 0x63f   :  { %17417 = vst [vmem:[#allocation11_spill] sm:$0xff] %v11783_v25  ;;  %v11801_v34 = vmul.f32 %v11295_v22, %v11665_v50  ;;  %v4879_v24 = vrot.slane %v4865_v13, %v11668_v18  ;;  %v4880_v59 = vcombine.high %v4872_v12, %v4872_v12  ;;  %v4896_v21 = vrot.slane %v4882_v9, %v11668_v18 }
 0x640   :  { %17418 = vst [vmem:[#allocation36_spill] sm:$0xff] %v11789_v63  ;;  %17419 = vst [vmem:[#allocation37_spill] sm:$0xff] %v11793_v30  ;;  %v4897_v10 = vcombine.high %v4889_v39, %v4889_v39  ;;  %v5868_v48 = vsel %vm5027_vm15, %v4872_v12, -inf  ;;  %v5896_v23 = vsel %vm5027_vm15, %v4889_v39, -inf  ;;  %v11809_v33 = vmul.f32 %v11665_v50, %v11309_v16 }
 0x641   :  { %17420 = vst [vmem:[#allocation38_spill] sm:$0xff] %v11797_v8  ;;  %17421 = vst [vmem:[#allocation39_spill] sm:$0xff] %v11801_v34  ;;  %v11813_v56 = vmul.f32 %v11303_v28, %v11665_v50  ;;  %v4881_v22 = vcombine.high %v4879_v24, %v4879_v24  ;;  %v4898_v60 = vcombine.high %v4896_v21, %v4896_v21  ;;  %v5869_v52 = vrot.slane %v5868_v48, 4 }
 0x642   :  { %17422 = vst [vmem:[#allocation40_spill] sm:$0xff] %v11809_v33  ;;  %v5875_v37 = vsel %vm5027_vm15, %v4880_v59, -inf  ;;  %v5882_v61 = vsel %vm5027_vm15, %v4879_v24, -inf  ;;  %v5897_v38 = vrot.slane %v5896_v23, 4  ;;  %v5903_v13 = vsel %vm5027_vm15, %v4897_v10, -inf }
 0x643   :  { %17423 = vst [vmem:[#allocation41_spill] sm:$0xff] %v11813_v56  ;;  %v5876_v44 = vrot.slane %v5875_v37, 4  ;;  %v5870_v12 = vmax.f32 %v5868_v48, %v5869_v52  ;;  %v5883_v9 = vrot.slane %v5882_v61, 4  ;;  %v5889_v16 = vsel %vm5027_vm15, %v4881_v22, -inf }
 0x644   :  { %v5904_v39 = vrot.slane %v5903_v13, 4  ;;  %v5890_v53 = vrot.slane %v5889_v16, 4  ;;  %v5898_v47 = vmax.f32 %v5896_v23, %v5897_v38  ;;  %v5910_v18 = vsel %vm5027_vm15, %v4896_v21, -inf }
 0x645   :  { %v5877_v28 = vmax.f32 %v5875_v37, %v5876_v44  ;;  %v5871_v59 = vrot.slane %v5870_v12, 2  ;;  %v5884_v56 = vmax.f32 %v5882_v61, %v5883_v9  ;;  %v5911_v24 = vrot.slane %v5910_v18, 4 }
 0x646   :  { %v5905_v33 = vmax.f32 %v5903_v13, %v5904_v39  ;;  %v5891_v10 = vmax.f32 %v5889_v16, %v5890_v53  ;;  %v5899_v8 = vrot.slane %v5898_v47, 2  ;;  %v5917_v48 = vsel %vm5027_vm15, %v4898_v60, -inf }
 0x647   :  { %v5878_v34 = vrot.slane %v5877_v28, 2  ;;  %v5872_v22 = vmax.f32 %v5870_v12, %v5871_v59  ;;  %v5885_v52 = vrot.slane %v5884_v56, 2  ;;  %v5912_v37 = vmax.f32 %v5910_v18, %v5911_v24 }
 0x648   :  { %v5906_v30 = vrot.slane %v5905_v33, 2  ;;  %v5892_v44 = vrot.slane %v5891_v10, 2  ;;  %v5900_v21 = vmax.f32 %v5898_v47, %v5899_v8  ;;  %v5918_v38 = vrot.slane %v5917_v48, 4 }
 0x649   :  { %v5879_v23 = vmax.f32 %v5877_v28, %v5878_v34  ;;  %v5873_v61 = vrot.slane %v5872_v22, 1  ;;  %v5886_v13 = vmax.f32 %v5884_v56, %v5885_v52  ;;  %v5913_v39 = vrot.slane %v5912_v37, 2 }
 0x64a   :  { %v5907_v9 = vmax.f32 %v5905_v33, %v5906_v30  ;;  %v5893_v53 = vmax.f32 %v5891_v10, %v5892_v44  ;;  %v5901_v16 = vrot.slane %v5900_v21, 1  ;;  %v5919_v25 = vmax.f32 %v5917_v48, %v5918_v38 }
 0x64b   :  { %v5880_v63 = vrot.slane %v5879_v23, 1  ;;  %v5874_v60 = vmax.f32 %v5872_v22, %v5873_v61  ;;  %v5887_v5 = vrot.slane %v5886_v13, 1  ;;  %v5914_v59 = vmax.f32 %v5912_v37, %v5913_v39 }
 0x64c   :  { %v5908_v12 = vrot.slane %v5907_v9, 1  ;;  %v5894_v18 = vrot.slane %v5893_v53, 1  ;;  %v5902_v24 = vmax.f32 %v5900_v21, %v5901_v16  ;;  %v5920_v34 = vrot.slane %v5919_v25, 2  ;;  %v17428_v16 = vld [vmem:[#allocation18_spill] sm:$0xff] }
 0x64d   :  { %v5881_v2 = vmax.f32 %v5879_v23, %v5880_v63  ;;  %v5888_v28 = vmax.f32 %v5886_v13, %v5887_v5  ;;  %v5915_v8 = vrot.slane %v5914_v59, 1  ;;  %v11823_v56 = vmul.f32 %v11665_v50, %v11317_v11  ;;  %v17426_v13 = vld [vmem:[#allocation16_spill] sm:$0xff] }
 0x64e   :  { %v5909_v47 = vmax.f32 %v5907_v9, %v5908_v12  ;;  %v5895_v30 = vmax.f32 %v5893_v53, %v5894_v18  ;;  %v5921_v33 = vmax.f32 %v5919_v25, %v5920_v34  ;;  %v11828_v48 = vmul.f32 %v11311_v41, %v11665_v50  ;;  %v17427_v9 = vld [vmem:[#allocation15_spill] sm:$0xff]  ;;  %v17429_v12 = vld [vmem:[#allocation17_spill] sm:$0xff] }
 0x64f   :  { %v6204_v10 = vsel %vm17355_vm0, %v5881_v2, %v5874_v60  ;;  %v5916_v22 = vmax.f32 %v5914_v59, %v5915_v8  ;;  %v11833_v5 = vmul.f32 %v11665_v50, %v11325_v36  ;;  %v11837_v52 = vmul.f32 %v11319_v15, %v11665_v50  ;;  %v17430_v59 = vld [vmem:[#allocation20_spill] sm:$0xff]  ;;  %v17433_v8 = vld [vmem:[#allocation21_spill] sm:$0xff] }
 0x650   :  { %v6205_v63 = vsel %vm6094_vm1, %v5888_v28, %v6204_v10  ;;  %v5922_v11 = vrot.slane %v5921_v33, 1  ;;  %v11842_v2 = vmul.f32 %v11665_v50, %v11333_v7  ;;  %v11846_v41 = vmul.f32 %v11327_v55, %v11665_v50  ;;  %v17424_v55 = vld [vmem:[#allocation13_spill] sm:$0xff]  ;;  %v17432_v28 = vld [vmem:[#allocation22_spill] sm:$0xff] }
 0x651   :  { %v6206_v25 = vsel %vm6096_vm4, %v5895_v30, %v6205_v63  ;;  %v11851_v36 = vmul.f32 %v11665_v50, %v11341_v45  ;;  %v11855_v15 = vmul.f32 %v11335_v49, %v11665_v50  ;;  %v11859_v23 = vmul.f32 %v11665_v50, %v11349_v57  ;;  %v17425_v49 = vld [vmem:[#allocation14_spill] sm:$0xff] }
 0x652   :  { %v6207_v37 = vsel %vm6098_vm5, %v5902_v24, %v6206_v25  ;;  %v5923_v7 = vmax.f32 %v5921_v33, %v5922_v11  ;;  %v11864_v21 = vmul.f32 %v17424_v55, %v11665_v50  ;;  %v11868_v38 = vmul.f32 %v11665_v50, %v11357_v1  ;;  %v17431_v24 = vld [vmem:[#allocation19_spill] sm:$0xff]  ;;  %v17434_v33 = vld [vmem:[#allocation24_spill] sm:$0xff]  ;;  %v17436_v11 = vld [vmem:[#allocation26_spill] sm:$0xff] }
 0x653   :  { %v6208_v44 = vsel %vm6100_vm6, %v5909_v47, %v6207_v37  ;;  %v4070_v61 = vmul.f32 %v17425_v49, %v11665_v50  ;;  %v4071_v57 = vmul.f32 %v11665_v50, %v17426_v13  ;;  %v4072_v39 = vmul.f32 %v17427_v9, %v11665_v50  ;;  %v17437_v37 = vld [vmem:[#allocation25_spill] sm:$0xff]  ;;  %v17440_v13 = vld [vmem:[#allocation30_spill] sm:$0xff] }
 0x654   :  { %v6209_v45 = vsel %vm6102_vm7, %v5916_v22, %v6208_v44  ;;  %v4073_v60 = vmul.f32 %v11665_v50, %v17428_v16  ;;  %v4074_v1 = vmul.f32 %v17429_v12, %v11665_v50  ;;  %v4075_v18 = vmul.f32 %v11665_v50, %v17430_v59  ;;  %v17435_v22 = vld [vmem:[#allocation23_spill] sm:$0xff]  ;;  %v17438_v44 = vld [vmem:[#allocation28_spill] sm:$0xff] }
 0x655   :  { %v6210_v53 = vsel %vm6104_vm8, %v5923_v7, %v6209_v45  ;;  %v4076_v34 = vmul.f32 %v17431_v24, %v11665_v50  ;;  %v4077_v47 = vmul.f32 %v11665_v50, %v17432_v28  ;;  %v4078_v30 = vmul.f32 %v17433_v8, %v11665_v50  ;;  %v17439_v45 = vld [vmem:[#allocation27_spill] sm:$0xff]  ;;  %v17442_v12 = vld [vmem:[#allocation32_spill] sm:$0xff] }
 0x656   :  { %v4079_v10 = vmul.f32 %v11665_v50, %v17434_v33  ;;  %6243 = vst.msk [vmem:[#allocation4 + $0x121] sm:$0xff] %vm3618_vm14, %v6210_v53  ;;  %v4080_v63 = vmul.f32 %v17435_v22, %v11665_v50  ;;  %v4081_v25 = vmul.f32 %v11665_v50, %v17436_v11  ;;  %v4082_v7 = vmul.f32 %v17437_v37, %v11665_v50  ;;  %v17441_v53 = vld [vmem:[#allocation29_spill] sm:$0xff]  ;;  %v17443_v24 = vld [vmem:[#allocation31_spill] sm:$0xff] }
 0x657   :  { %v4083_v55 = vmul.f32 %v11665_v50, %v17438_v44  ;;  %v4084_v49 = vmul.f32 %v17439_v45, %v11665_v50  ;;  %v4085_v9 = vmul.f32 %v11665_v50, %v17440_v13  ;;  %v4086_v16 = vmul.f32 %v17441_v53, %v11665_v50  ;;  %v17446_v44 = vld [vmem:[#allocation12_spill] sm:$0xff]  ;;  %v17448_v45 = vld [vmem:[#allocation11_spill] sm:$0xff]  ;;  %v17452_v53 = vld [vmem:[#allocation37_spill] sm:$0xff] }
 0x658   :  { %v4087_v59 = vmul.f32 %v11665_v50, %v17442_v12  ;;  %v4088_v28 = vmul.f32 %v17443_v24, %v11665_v50  ;;  %v11913_v8 = vadd.f32 %v11691_v32, %v11680_v62  ;;  %v11917_v33 = vadd.f32 %v11691_v32, %v11684_v27  ;;  %v17450_v13 = vld [vmem:[#allocation36_spill] sm:$0xff]  ;;  %v17453_v12 = vld [vmem:[#allocation38_spill] sm:$0xff] }
 0x659   :  { %v11921_v22 = vadd.f32 %v11691_v32, %v11688_v42  ;;  %v11925_v11 = vadd.f32 %v11691_v32, %v11695_v43  ;;  %v11929_v37 = vadd.f32 %v11691_v32, %v11699_v20  ;;  %v11933_v50 = vadd.f32 %v11691_v32, %v11703_v0 }
 0x65a   :  { %v11937_v62 = vadd.f32 %v11691_v32, %v11707_v3  ;;  %v11941_v27 = vadd.f32 %v11691_v32, %v11711_v6  ;;  %v11945_v42 = vadd.f32 %v11691_v32, %v11715_v29  ;;  %v11949_v43 = vadd.f32 %v11691_v32, %v11719_v40 }
 0x65b   :  { %v11953_v20 = vadd.f32 %v11691_v32, %v11727_v17  ;;  %v11957_v0 = vadd.f32 %v11691_v32, %v11731_v35  ;;  %v11961_v3 = vadd.f32 %v11691_v32, %v11735_v26  ;;  %v11965_v6 = vadd.f32 %v11691_v32, %v11739_v14 }
 0x65c   :  { %v11969_v29 = vadd.f32 %v11691_v32, %v11743_v58  ;;  %v11973_v40 = vadd.f32 %v11691_v32, %v11747_v54  ;;  %v11977_v17 = vadd.f32 %v11691_v32, %v11751_v4  ;;  %v11981_v35 = vadd.f32 %v11691_v32, %v11755_v19  ;;  %v17445_v54 = vld [vmem:[#allocation10_spill] sm:$0xff] }
 0x65d   :  { %17444 = vst [vmem:[#allocation13_spill] sm:$0xff] %v11961_v3  ;;  %v11985_v26 = vadd.f32 %v11691_v32, %v11763_v31  ;;  %v11989_v14 = vadd.f32 %v11691_v32, %v11767_v51  ;;  %v11993_v58 = vadd.f32 %v11691_v32, %v11771_v46  ;;  %v11997_v4 = vadd.f32 %v11691_v32, %v17445_v54  ;;  %v17454_v54 = vld [vmem:[#allocation39_spill] sm:$0xff] }
 0x65e   :  { %v12001_v19 = vadd.f32 %v11691_v32, %v17446_v44  ;;  %v12005_v31 = vadd.f32 %v11691_v32, %v17448_v45  ;;  %v12009_v51 = vadd.f32 %v11691_v32, %v17450_v13  ;;  %v12013_v46 = vadd.f32 %v11691_v32, %v17452_v53 }
 0x65f   :  { %v12017_v24 = vadd.f32 %v11691_v32, %v17453_v12  ;;  %v12021_v44 = vadd.f32 %v11691_v32, %v17454_v54  ;;  %v12033_v53 = vadd.f32 %v11691_v32, %v11823_v56  ;;  %v12037_v12 = vadd.f32 %v11691_v32, %v11828_v48 }
 0x660   :  { %17447 = vst [vmem:[#allocation14_spill] sm:$0xff] %v12001_v19  ;;  %17449 = vst [vmem:[#allocation16_spill] sm:$0xff] %v12005_v31  ;;  %v17456_v19 = vld [vmem:[#allocation40_spill] sm:$0xff]  ;;  %v17457_v31 = vld [vmem:[#allocation41_spill] sm:$0xff]  ;;  %v12041_v54 = vadd.f32 %v11691_v32, %v11833_v5  ;;  %v12053_v56 = vadd.f32 %v11691_v32, %v11846_v41  ;;  %v12057_v48 = vadd.f32 %v11691_v32, %v11851_v36 }
 0x661   :  { %17451 = vst [vmem:[#allocation15_spill] sm:$0xff] %v12009_v51  ;;  %17455 = vst [vmem:[#allocation18_spill] sm:$0xff] %v12021_v44  ;;  %v12025_v45 = vadd.f32 %v11691_v32, %v17456_v19  ;;  %v12029_v13 = vadd.f32 %v11691_v32, %v17457_v31  ;;  %v12045_v19 = vadd.f32 %v11691_v32, %v11837_v52 }
 0x662   :  { %v12049_v31 = vadd.f32 %v11691_v32, %v11842_v2  ;;  %17458 = vst [vmem:[#allocation17_spill] sm:$0xff] %v12053_v56  ;;  %v12061_v5 = vadd.f32 %v11691_v32, %v11855_v15  ;;  %v12065_v52 = vadd.f32 %v11691_v32, %v11859_v23  ;;  %v12069_v2 = vadd.f32 %v11691_v32, %v11864_v21 }
 0x663   :  { %v12073_v41 = vadd.f32 %v11691_v32, %v11868_v38  ;;  %v12076_v56 = vadd.f32 %v11691_v32, %v4070_v61  ;;  %v12079_v36 = vadd.f32 %v11691_v32, %v4071_v57  ;;  %v12082_v15 = vadd.f32 %v11691_v32, %v4072_v39 }
 0x664   :  { %17459 = vst [vmem:[#allocation20_spill] sm:$0xff] %v12065_v52  ;;  %v12085_v23 = vadd.f32 %v11691_v32, %v4073_v60  ;;  %v12088_v52 = vadd.f32 %v11691_v32, %v4074_v1  ;;  %v12091_v21 = vadd.f32 %v11691_v32, %v4075_v18  ;;  %v12094_v38 = vadd.f32 %v11691_v32, %v4076_v34 }
 0x665   :  { %17460 = vst [vmem:[#allocation19_spill] sm:$0xff] %v12082_v15  ;;  %v12097_v61 = vadd.f32 %v11691_v32, %v4077_v47  ;;  %v12100_v57 = vadd.f32 %v11691_v32, %v4078_v30  ;;  %v12103_v39 = vadd.f32 %v11691_v32, %v4079_v10  ;;  %v12106_v60 = vadd.f32 %v11691_v32, %v4080_v63 }
 0x666   :  { %17461 = vst [vmem:[#allocation22_spill] sm:$0xff] %v12088_v52  ;;  %17462 = vst [vmem:[#allocation21_spill] sm:$0xff] %v12094_v38  ;;  %v12109_v1 = vadd.f32 %v11691_v32, %v4081_v25  ;;  %v12112_v18 = vadd.f32 %v11691_v32, %v4082_v7  ;;  %v12115_v34 = vadd.f32 %v11691_v32, %v4083_v55  ;;  %v4163_v7 = vmax.f32 %v11913_v8, 0.0 }
 0x667   :  { %17463 = vst [vmem:[#allocation24_spill] sm:$0xff] %v12100_v57  ;;  %17464 = vst [vmem:[#allocation23_spill] sm:$0xff] %v12103_v39  ;;  %v12118_v47 = vadd.f32 %v11691_v32, %v4084_v49  ;;  %v12121_v30 = vadd.f32 %v11691_v32, %v4085_v9  ;;  %v12124_v10 = vadd.f32 %v11691_v32, %v4086_v16  ;;  %v4164_v55 = vmax.f32 %v11917_v33, 0.0  ;;  %v17475_v3 = vld [vmem:[#allocation16_spill] sm:$0xff] }
 0x668   :  { %17465 = vst [vmem:[#allocation26_spill] sm:$0xff] %v12106_v60  ;;  %17466 = vst [vmem:[#allocation25_spill] sm:$0xff] %v12109_v1  ;;  %v12127_v63 = vadd.f32 %v11691_v32, %v4087_v59  ;;  %v12130_v25 = vadd.f32 %v11691_v32, %v4088_v28  ;;  %v4166_v49 = vmax.f32 %v11925_v11, 0.0  ;;  %v4167_v9 = vmax.f32 %v11929_v37, 0.0 }
 0x669   :  { %17467 = vst [vmem:[#allocation28_spill] sm:$0xff] %v12112_v18  ;;  %17468 = vst [vmem:[#allocation27_spill] sm:$0xff] %v12115_v34  ;;  %v4165_v34 = vmax.f32 %v11921_v22, 0.0  ;;  %v4169_v16 = vmax.f32 %v11937_v62, 0.0  ;;  %v4170_v59 = vmax.f32 %v11941_v27, 0.0  ;;  %v17476_v51 = vld [vmem:[#allocation17_spill] sm:$0xff] }
 0x66a   :  { %17469 = vst [vmem:[#allocation30_spill] sm:$0xff] %v12118_v47  ;;  %17470 = vst [vmem:[#allocation29_spill] sm:$0xff] %v12121_v30  ;;  %v17474_v30 = vld [vmem:[#allocation14_spill] sm:$0xff]  ;;  %v4227_v28 = vsel %vm3618_vm14, %v4163_v7, -inf  ;;  %v4230_v33 = vsel %vm3618_vm14, %v4164_v55, -inf  ;;  %v4231_v22 = vsel %vm3618_vm14, %v4166_v49, -inf }
 0x66b   :  { %17471 = vst [vmem:[#allocation32_spill] sm:$0xff] %v12124_v10  ;;  %17472 = vst [vmem:[#allocation31_spill] sm:$0xff] %v12127_v63  ;;  %v4171_v63 = vmax.f32 %v11945_v42, 0.0  ;;  %v17477_v44 = vld [vmem:[#allocation20_spill] sm:$0xff]  ;;  %v4228_v8 = vsel %vm3618_vm14, %v4165_v34, -inf  ;;  %v12197_v11 = vsel %vm3618_vm14, %v4167_v9, -inf  ;;  %v4232_v27 = vmax.f32 %v4230_v33, %v4231_v22 }
 0x66c   :  { %17473 = vst [vmem:[#allocation10_spill] sm:$0xff] %v12130_v25  ;;  %v4229_v1 = vmax.f32 %v4227_v28, %v4228_v8  ;;  %17481 = vst [vmem:[#allocation12_spill] sm:$0xff] %v12197_v11  ;;  %v12200_v62 = vsel %vm3618_vm14, %v4169_v16, -inf  ;;  %v17483_v42 = vmax.f32 %v11933_v50, 0.0  ;;  %v12208_v7 = vsel %vm3618_vm14, %v4170_v59, -inf  ;;  %v17487_v49 = vld [vmem:[#allocation35_spill] sm:$0xff] }
 0x66d   :  { %17482 = vst [vmem:[#allocation11_spill] sm:$0xff] %v12200_v62  ;;  %17485 = vst [vmem:[#allocation37_spill] sm:$0xff] %v12208_v7  ;;  %v12211_v34 = vsel %vm3618_vm14, %v4171_v63, -inf  ;;  %v17488_v9 = vmax.f32 %v11953_v20, 0.0  ;;  %v17490_v8 = vmax.f32 %v11949_v43, 0.0  ;;  %v4372_v33 = vcombine.high %v4232_v27, %v4232_v27 }
 0x66e   :  { %v12205_v32 = vsel %vm3618_vm14, %v17483_v42, -inf  ;;  %17486 = vst [vmem:[#allocation38_spill] sm:$0xff] %v12211_v34  ;;  %v4355_v55 = vcombine.high %v4229_v1, %v4229_v1  ;;  %v4362_v28 = vrot.slane %v4229_v1, %v17487_v49  ;;  %v4379_v59 = vrot.slane %v4232_v27, %v17487_v49  ;;  %v17494_v42 = vld [vmem:[#allocation13_spill] sm:$0xff] }
 0x66f   :  { %17484 = vst [vmem:[#allocation36_spill] sm:$0xff] %v12205_v32  ;;  %v12217_v16 = vsel %vm3618_vm14, %v17488_v9, -inf  ;;  %v12222_v50 = vsel %vm3618_vm14, %v17490_v8, -inf  ;;  %v17492_v22 = vmax.f32 %v11957_v0, 0.0  ;;  %v17495_v1 = vmax.f32 %v17494_v42, 0.0 }
 0x670   :  { %17489 = vst [vmem:[#allocation39_spill] sm:$0xff] %v12217_v16  ;;  %17491 = vst [vmem:[#allocation40_spill] sm:$0xff] %v12222_v50  ;;  %v4369_v9 = vrot.slane %v4355_v55, %v17487_v49  ;;  %v4370_v37 = vcombine.high %v4362_v28, %v4362_v28  ;;  %v5028_v43 = vsel %vm5027_vm15, %v4362_v28, -inf  ;;  %v17497_v8 = vmax.f32 %v11969_v29, 0.0 }
 0x671   :  { %v12228_v63 = vsel %vm3618_vm14, %v17492_v22, -inf  ;;  %v12233_v20 = vsel %vm3618_vm14, %v17495_v1, -inf  ;;  %v4386_v0 = vrot.slane %v4372_v33, %v17487_v49  ;;  %v4387_v27 = vcombine.high %v4379_v59, %v4379_v59 }
 0x672   :  { %17493 = vst [vmem:[#allocation41_spill] sm:$0xff] %v12228_v63  ;;  %17496 = vst [vmem:[#allocation14_spill] sm:$0xff] %v12233_v20  ;;  %v12240_v50 = vsel %vm3618_vm14, %v17497_v8, -inf  ;;  %v5029_v22 = vrot.slane %v5028_v43, 4  ;;  %v5056_v63 = vsel %vm5027_vm15, %v4379_v59, -inf  ;;  %v4371_v42 = vcombine.high %v4369_v9, %v4369_v9 }
 0x673   :  { %17498 = vst [vmem:[#allocation16_spill] sm:$0xff] %v12240_v50  ;;  %v5035_v1 = vsel %vm5027_vm15, %v4370_v37, -inf  ;;  %v5042_v20 = vsel %vm5027_vm15, %v4369_v9, -inf  ;;  %v5057_v55 = vrot.slane %v5056_v63, 4  ;;  %v4388_v34 = vcombine.high %v4386_v0, %v4386_v0 }
 0x674   :  { %v5030_v16 = vmax.f32 %v5028_v43, %v5029_v22  ;;  %v5036_v28 = vrot.slane %v5035_v1, 4  ;;  %v5043_v32 = vrot.slane %v5042_v20, 4  ;;  %v5049_v29 = vsel %vm5027_vm15, %v4371_v42, -inf }
 0x675   :  { %v5058_v8 = vmax.f32 %v5056_v63, %v5057_v55  ;;  %v5063_v50 = vsel %vm5027_vm15, %v4387_v27, -inf  ;;  %v5070_v33 = vsel %vm5027_vm15, %v4386_v0, -inf  ;;  %v5050_v11 = vrot.slane %v5049_v29, 4 }
 0x676   :  { %v5031_v49 = vrot.slane %v5030_v16, 2  ;;  %v5037_v7 = vmax.f32 %v5035_v1, %v5036_v28  ;;  %v5044_v59 = vmax.f32 %v5042_v20, %v5043_v32  ;;  %v5064_v37 = vrot.slane %v5063_v50, 4 }
 0x677   :  { %v5059_v62 = vrot.slane %v5058_v8, 2  ;;  %v5071_v25 = vrot.slane %v5070_v33, 4  ;;  %v5077_v9 = vsel %vm5027_vm15, %v4388_v34, -inf  ;;  %v5051_v38 = vmax.f32 %v5049_v29, %v5050_v11 }
 0x678   :  { %v5032_v10 = vmax.f32 %v5030_v16, %v5031_v49  ;;  %v5038_v43 = vrot.slane %v5037_v7, 2  ;;  %v5045_v22 = vrot.slane %v5044_v59, 2  ;;  %v5065_v42 = vmax.f32 %v5063_v50, %v5064_v37 }
 0x679   :  { %v5060_v52 = vmax.f32 %v5058_v8, %v5059_v62  ;;  %v5072_v63 = vmax.f32 %v5070_v33, %v5071_v25  ;;  %v5078_v55 = vrot.slane %v5077_v9, 4  ;;  %v5052_v18 = vrot.slane %v5051_v38, 2 }
 0x67a   :  { %v5033_v27 = vrot.slane %v5032_v10, 1  ;;  %v5039_v47 = vmax.f32 %v5037_v7, %v5038_v43  ;;  %v5046_v0 = vmax.f32 %v5044_v59, %v5045_v22  ;;  %v5066_v32 = vrot.slane %v5065_v42, 2 }
 0x67b   :  { %v5061_v1 = vrot.slane %v5060_v52, 1  ;;  %v5073_v20 = vrot.slane %v5072_v63, 2  ;;  %v5079_v28 = vmax.f32 %v5077_v9, %v5078_v55  ;;  %v5053_v34 = vmax.f32 %v5051_v38, %v5052_v18 }
 0x67c   :  { %v5034_v15 = vmax.f32 %v5032_v10, %v5033_v27  ;;  %v5040_v60 = vrot.slane %v5039_v47, 1  ;;  %v5047_v57 = vrot.slane %v5046_v0, 1  ;;  %v5067_v16 = vmax.f32 %v5065_v42, %v5066_v32 }
 0x67d   :  { %v5062_v49 = vmax.f32 %v5060_v52, %v5061_v1  ;;  %v5074_v39 = vmax.f32 %v5072_v63, %v5073_v20  ;;  %v5080_v11 = vrot.slane %v5079_v28, 2  ;;  %v5054_v25 = vrot.slane %v5053_v34, 1 }
 0x67e   :  { %v5041_v62 = vmax.f32 %v5039_v47, %v5040_v60  ;;  %v5048_v50 = vmax.f32 %v5046_v0, %v5047_v57  ;;  %v17499_v29 = vmax.f32 %v11965_v6, 0.0  ;;  %v5068_v8 = vrot.slane %v5067_v16, 1 }
 0x67f   :  { %v5075_v33 = vrot.slane %v5074_v39, 1  ;;  %v5081_v59 = vmax.f32 %v5079_v28, %v5080_v11  ;;  %v17500_v10 = vmax.f32 %v11973_v40, 0.0  ;;  %v5055_v52 = vmax.f32 %v5053_v34, %v5054_v25 }
 0x680   :  { %v12253_v7 = vsel %vm3618_vm14, %v17499_v29, -inf  ;;  %v6093_v38 = vsel %vm17355_vm0, %v5041_v62, %v5034_v15  ;;  %v17501_v60 = vmax.f32 %v11977_v17, 0.0  ;;  %v17502_v6 = vmax.f32 %v11985_v26, 0.0 }
 0x681   :  { %v12258_v37 = vsel %vm3618_vm14, %v17500_v10, -inf  ;;  %v5069_v47 = vmax.f32 %v5067_v16, %v5068_v8  ;;  %v5076_v9 = vmax.f32 %v5074_v39, %v5075_v33  ;;  %v5082_v43 = vrot.slane %v5081_v59, 1 }
 0x682   :  { %v12264_v57 = vsel %vm3618_vm14, %v17501_v60, -inf  ;;  %v12269_v18 = vsel %vm3618_vm14, %v17502_v6, -inf  ;;  %v6095_v40 = vsel %vm6094_vm1, %v5048_v50, %v6093_v38  ;;  %v17503_v42 = vmax.f32 %v11981_v35, 0.0  ;;  %v17513_v50 = vld [vmem:[#allocation18_spill] sm:$0xff] }
 0x683   :  { %v6097_v22 = vsel %vm6096_vm4, %v5055_v52, %v6095_v40  ;;  %v17504_v17 = vmax.f32 %v11989_v14, 0.0  ;;  %v17505_v26 = vmax.f32 %v11993_v58, 0.0  ;;  %v5083_v27 = vmax.f32 %v5081_v59, %v5082_v43  ;;  %v17509_v58 = vld [vmem:[#allocation15_spill] sm:$0xff] }
 0x684   :  { %v12276_v15 = vsel %vm3618_vm14, %v17503_v42, -inf  ;;  %v6099_v39 = vsel %vm6098_vm5, %v5062_v49, %v6097_v22  ;;  %v17506_v0 = vmax.f32 %v17474_v30, 0.0  ;;  %v17507_v35 = vmax.f32 %v11997_v4, 0.0 }
 0x685   :  { %v4255_v63 = vsel %vm3618_vm14, %v17504_v17, -inf  ;;  %v4257_v55 = vsel %vm3618_vm14, %v17505_v26, -inf  ;;  %v6101_v20 = vsel %vm6100_vm6, %v5069_v47, %v6099_v39  ;;  %v17508_v14 = vmax.f32 %v17475_v3, 0.0 }
 0x686   :  { %v4258_v1 = vsel %vm3618_vm14, %v17506_v0, -inf  ;;  %v4260_v32 = vsel %vm3618_vm14, %v17507_v35, -inf  ;;  %v17510_v34 = vmax.f32 %v17509_v58, 0.0  ;;  %v17511_v49 = vmax.f32 %v12017_v24, 0.0  ;;  %v17530_v0 = vld [vmem:[#allocation19_spill] sm:$0xff]  ;;  %v17534_v58 = vld [vmem:[#allocation22_spill] sm:$0xff] }
 0x687   :  { %v4261_v28 = vsel %vm3618_vm14, %v17508_v14, -inf  ;;  %v6103_v11 = vsel %vm6102_vm7, %v5076_v9, %v6101_v20  ;;  %v17512_v4 = vmax.f32 %v12013_v46, 0.0  ;;  %v17514_v25 = vmax.f32 %v17513_v50, 0.0 }
 0x688   :  { %v4263_v16 = vsel %vm3618_vm14, %v17510_v34, -inf  ;;  %v4264_v30 = vsel %vm3618_vm14, %v17511_v49, -inf  ;;  %v17515_v29 = vmax.f32 %v12025_v45, 0.0  ;;  %v6105_v33 = vsel %vm6104_vm8, %v5083_v27, %v6103_v11  ;;  %v17536_v49 = vld [vmem:[#allocation21_spill] sm:$0xff] }
 0x689   :  { %v4266_v62 = vsel %vm3618_vm14, %v17512_v4, -inf  ;;  %v4267_v3 = vsel %vm3618_vm14, %v17514_v25, -inf  ;;  %v17516_v24 = vmax.f32 %v12033_v53, 0.0  ;;  %v17517_v10 = vmax.f32 %v12029_v13, 0.0  ;;  %6228 = vst.msk [vmem:[#allocation4 + $0x11] sm:$0xff] %vm3618_vm14, %v6105_v33  ;;  %v17539_v25 = vld [vmem:[#allocation23_spill] sm:$0xff] }
 0x68a   :  { %v4269_v8 = vsel %vm3618_vm14, %v17515_v29, -inf  ;;  %v17518_v52 = vmax.f32 %v12037_v12, 0.0  ;;  %v17519_v45 = vmax.f32 %v12041_v54, 0.0  ;;  %v17520_v6 = vmax.f32 %v12049_v31, 0.0  ;;  %v17541_v33 = vld [vmem:[#allocation24_spill] sm:$0xff] }
 0x68b   :  { %v4270_v59 = vsel %vm3618_vm14, %v17516_v24, -inf  ;;  %v4272_v46 = vsel %vm3618_vm14, %v17517_v10, -inf  ;;  %v17521_v47 = vmax.f32 %v12045_v19, 0.0  ;;  %v17522_v9 = vmax.f32 %v17476_v51, 0.0  ;;  %v17543_v10 = vld [vmem:[#allocation26_spill] sm:$0xff] }
 0x68c   :  { %v4273_v38 = vsel %vm3618_vm14, %v17518_v52, -inf  ;;  %v4275_v60 = vsel %vm3618_vm14, %v17519_v45, -inf  ;;  %v4276_v53 = vsel %vm3618_vm14, %v17520_v6, -inf  ;;  %v17523_v43 = vmax.f32 %v12057_v48, 0.0  ;;  %v17545_v6 = vld [vmem:[#allocation25_spill] sm:$0xff] }
 0x68d   :  { %v4278_v13 = vsel %vm3618_vm14, %v17521_v47, -inf  ;;  %v4279_v12 = vsel %vm3618_vm14, %v17522_v9, -inf  ;;  %v17524_v54 = vmax.f32 %v17477_v44, 0.0  ;;  %v17525_v31 = vmax.f32 %v12061_v5, 0.0 }
 0x68e   :  { %v4281_v40 = vsel %vm3618_vm14, %v17523_v43, -inf  ;;  %v17526_v19 = vmax.f32 %v12069_v2, 0.0  ;;  %v17527_v51 = vmax.f32 %v12073_v41, 0.0  ;;  %v17528_v48 = vmax.f32 %v12079_v36, 0.0  ;;  %v17547_v43 = vld [vmem:[#allocation27_spill] sm:$0xff] }
 0x68f   :  { %v4282_v22 = vsel %vm3618_vm14, %v17524_v54, -inf  ;;  %v4284_v42 = vsel %vm3618_vm14, %v17525_v31, -inf  ;;  %v17529_v44 = vmax.f32 %v12076_v56, 0.0  ;;  %v17531_v5 = vmax.f32 %v17530_v0, 0.0  ;;  %v17549_v31 = vld [vmem:[#allocation28_spill] sm:$0xff] }
 0x690   :  { %v4285_v17 = vsel %vm3618_vm14, %v17526_v19, -inf  ;;  %v4287_v26 = vsel %vm3618_vm14, %v17527_v51, -inf  ;;  %v4288_v27 = vsel %vm3618_vm14, %v17528_v48, -inf  ;;  %v17532_v2 = vmax.f32 %v12085_v23, 0.0  ;;  %v17551_v48 = vld [vmem:[#allocation30_spill] sm:$0xff] }
 0x691   :  { %v4290_v39 = vsel %vm3618_vm14, %v17529_v44, -inf  ;;  %v4291_v35 = vsel %vm3618_vm14, %v17531_v5, -inf  ;;  %v17533_v41 = vmax.f32 %v12091_v21, 0.0  ;;  %v17535_v36 = vmax.f32 %v17534_v58, 0.0  ;;  %v17553_v5 = vld [vmem:[#allocation29_spill] sm:$0xff]  ;;  %v17555_v58 = vld [vmem:[#allocation31_spill] sm:$0xff] }
 0x692   :  { %v4293_v20 = vsel %vm3618_vm14, %v17532_v2, -inf  ;;  %v17537_v56 = vmax.f32 %v17536_v49, 0.0  ;;  %v17538_v4 = vmax.f32 %v12097_v61, 0.0  ;;  %v17540_v23 = vmax.f32 %v17539_v25, 0.0 }
 0x693   :  { %v4294_v14 = vsel %vm3618_vm14, %v17533_v41, -inf  ;;  %v4296_v34 = vsel %vm3618_vm14, %v17535_v36, -inf  ;;  %v17542_v21 = vmax.f32 %v17541_v33, 0.0  ;;  %v17544_v52 = vmax.f32 %v17543_v10, 0.0  ;;  %v12406_v10 = vld [vmem:[#allocation4 + $0x10] sm:$0xff] }
 0x694   :  { %v4297_v11 = vsel %vm3618_vm14, %v17537_v56, -inf  ;;  %v4299_v50 = vsel %vm3618_vm14, %v17538_v4, -inf  ;;  %v4300_v29 = vsel %vm3618_vm14, %v17540_v23, -inf  ;;  %v17546_v47 = vmax.f32 %v17545_v6, 0.0  ;;  %v17557_v56 = vld [vmem:[#allocation32_spill] sm:$0xff]  ;;  %v17559_v23 = vld [vmem:[#allocation10_spill] sm:$0xff]  ;;  %6560 = vrot.lane.b32.xlu0 %v12406_v10, %s8841_s2 }
 0x695   :  { %v4302_v24 = vsel %vm3618_vm14, %v17542_v21, -inf  ;;  %v4303_v45 = vsel %vm3618_vm14, %v17544_v52, -inf  ;;  %v17548_v61 = vmax.f32 %v17547_v43, 0.0  ;;  %v17550_v19 = vmax.f32 %v17549_v31, 0.0  ;;  %v12408_v52 = vld [vmem:[#allocation4 + $0x18] sm:$0x3] }
 0x696   :  { %v4305_v9 = vsel %vm3618_vm14, %v17546_v47, -inf  ;;  %v17552_v44 = vmax.f32 %v17551_v48, 0.0  ;;  %v17554_v2 = vmax.f32 %v17553_v5, 0.0  ;;  %v17556_v36 = vmax.f32 %v17555_v58, 0.0  ;;  %v17561_v6 = vld [vmem:[#allocation11_spill] sm:$0xff]  ;;  %v17562_v47 = vld [vmem:[#allocation12_spill] sm:$0xff] }
 0x697   :  { %v4306_v54 = vsel %vm3618_vm14, %v17548_v61, -inf  ;;  %v4308_v51 = vsel %vm3618_vm14, %v17550_v19, -inf  ;;  %v17558_v4 = vmax.f32 %v17557_v56, 0.0  ;;  %v17560_v33 = vmax.f32 %v17559_v23, 0.0  ;;  %v17563_v61 = vld [vmem:[#allocation37_spill] sm:$0xff]  ;;  %v17564_v31 = vld [vmem:[#allocation36_spill] sm:$0xff] }
 0x698   :  { %v4309_v0 = vsel %vm3618_vm14, %v17552_v44, -inf  ;;  %v4311_v41 = vsel %vm3618_vm14, %v17554_v2, -inf  ;;  %v4312_v49 = vsel %vm3618_vm14, %v17556_v36, -inf  ;;  %v12412_v43 = vmax.f32 %v17562_v47, %v17561_v6  ;;  %v17565_v48 = vld [vmem:[#allocation39_spill] sm:$0xff]  ;;  %v17566_v44 = vld [vmem:[#allocation38_spill] sm:$0xff]  ;;  %v17567_v2 = vld [vmem:[#allocation41_spill] sm:$0xff] }
 0x699   :  { %v4314_v25 = vsel %vm3618_vm14, %v17558_v4, -inf  ;;  %v4315_v21 = vsel %vm3618_vm14, %v17560_v33, -inf  ;;  %v12416_v19 = vmax.f32 %v17564_v31, %v17563_v61  ;;  %v12420_v5 = vmax.f32 %v17566_v44, %v17565_v48  ;;  %v17568_v58 = vld [vmem:[#allocation40_spill] sm:$0xff]  ;;  %6285 = vst.msk [vmem:[#allocation5 + $0x10] sm:$0xff] %vm3618_vm14, %v12406_v10  ;;  %v17570_v6 = vld [vmem:[#allocation14_spill] sm:$0xff] }
 0x69a   :  { %v12424_v36 = vmax.f32 %v17568_v58, %v17567_v2  ;;  %v6335_v56 = vrot.slane %v12406_v10, 1  ;;  %v6336_v23 = vrot.slane %v12408_v52, 1  ;;  %v17569_v33 = vld [vmem:[#allocation16_spill] sm:$0xff]  ;;  %v12439_v61 = vmax.f32 %v12253_v7, %v12258_v37 }
 0x69b   :  { %v12435_v47 = vmax.f32 %v17570_v6, %v17569_v33  ;;  %v12443_v31 = vmax.f32 %v12264_v57, %v12269_v18  ;;  %v12446_v48 = vmax.f32 %v12276_v15, %v4255_v63  ;;  %v12448_v44 = vmax.f32 %v4257_v55, %v4258_v1 }
 0x69c   :  { %v6337_v2 = vsel %vm537_vm3, %v6335_v56, %v6336_v23  ;;  %v12451_v58 = vmax.f32 %v4260_v32, %v4261_v28  ;;  %v12453_v4 = vmax.f32 %v4263_v16, %v4264_v30  ;;  %v12455_v33 = vmax.f32 %v4266_v62, %v4267_v3 }
 0x69d   :  { %6633 = vrot.lane.b32.xlu1 %v6337_v2, %s8842_s3  ;;  %v12458_v7 = vmax.f32 %v4269_v8, %v4270_v59  ;;  %v12460_v37 = vmax.f32 %v4272_v46, %v4273_v38  ;;  %v12462_v57 = vmax.f32 %v4275_v60, %v4276_v53  ;;  %v12464_v18 = vmax.f32 %v4278_v13, %v4279_v12  ;;  %v17571_v38 = vld [vmem:[#allocation35_spill] sm:$0xff] }
 0x69e   :  { %v12466_v15 = vmax.f32 %v4281_v40, %v4282_v22  ;;  %v12468_v63 = vmax.f32 %v4284_v42, %v4285_v17  ;;  %v12470_v55 = vmax.f32 %v4287_v26, %v4288_v27  ;;  %v12472_v1 = vmax.f32 %v4290_v39, %v4291_v35  ;;  %6382 = vrot.lane.b32.xlu0 %v6337_v2, %s8835_s28 }
 0x69f   :  { %v12475_v32 = vmax.f32 %v4293_v20, %v4294_v14  ;;  %v12477_v28 = vmax.f32 %v4296_v34, %v4297_v11  ;;  %v12479_v16 = vmax.f32 %v4299_v50, %v4300_v29  ;;  %v12481_v30 = vmax.f32 %v4302_v24, %v4303_v45 }
 0x6a0   :  { %v12483_v62 = vmax.f32 %v4305_v9, %v4306_v54  ;;  %v12485_v3 = vmax.f32 %v4308_v51, %v4309_v0  ;;  %v12487_v8 = vmax.f32 %v4311_v41, %v4312_v49  ;;  %v12489_v59 = vmax.f32 %v4314_v25, %v4315_v21 }
 0x6a1   :  { %v4389_v46 = vcombine.high %v12412_v43, %v12412_v43  ;;  %v12495_v60 = vrot.slane %v12412_v43, %v17571_v38  ;;  %v4406_v53 = vcombine.high %v12416_v19, %v12416_v19  ;;  %v12501_v13 = vrot.slane %v12416_v19, %v17571_v38 }
 0x6a2   :  { %v4423_v12 = vcombine.high %v12420_v5, %v12420_v5  ;;  %v12507_v40 = vrot.slane %v12420_v5, %v17571_v38  ;;  %v4440_v22 = vcombine.high %v12424_v36, %v12424_v36  ;;  %v12513_v42 = vrot.slane %v12424_v36, %v17571_v38 }
 0x6a3   :  { %v4457_v17 = vcombine.high %v12435_v47, %v12435_v47  ;;  %v12519_v26 = vrot.slane %v12435_v47, %v17571_v38  ;;  %v4474_v27 = vcombine.high %v12439_v61, %v12439_v61  ;;  %v12525_v39 = vrot.slane %v12439_v61, %v17571_v38 }
 0x6a4   :  { %v4491_v35 = vcombine.high %v12443_v31, %v12443_v31  ;;  %v12531_v20 = vrot.slane %v12443_v31, %v17571_v38  ;;  %v4508_v14 = vcombine.high %v12446_v48, %v12446_v48  ;;  %v12537_v34 = vrot.slane %v12446_v48, %v17571_v38 }
 0x6a5   :  { %17572 = vst [vmem:[#allocation17_spill] sm:$0xff] %v12519_v26  ;;  %17573 = vst [vmem:[#allocation20_spill] sm:$0xff] %v12525_v39  ;;  %v4525_v11 = vcombine.high %v12448_v44, %v12448_v44  ;;  %v12543_v50 = vrot.slane %v12448_v44, %v17571_v38  ;;  %v4542_v29 = vcombine.high %v12451_v58, %v12451_v58 }
 0x6a6   :  { %17574 = vst [vmem:[#allocation13_spill] sm:$0xff] %v12531_v20  ;;  %17575 = vst [vmem:[#allocation15_spill] sm:$0xff] %v12537_v34  ;;  %v12549_v24 = vrot.slane %v12451_v58, %v17571_v38  ;;  %v4559_v45 = vcombine.high %v12453_v4, %v12453_v4  ;;  %v12555_v9 = vrot.slane %v12453_v4, %v17571_v38 }
 0x6a7   :  { %17576 = vst [vmem:[#allocation18_spill] sm:$0xff] %v12543_v50  ;;  %v4576_v54 = vcombine.high %v12455_v33, %v12455_v33  ;;  %v12561_v51 = vrot.slane %v12455_v33, %v17571_v38  ;;  %v4593_v0 = vcombine.high %v12458_v7, %v12458_v7  ;;  %v12567_v41 = vrot.slane %v12458_v7, %v17571_v38 }
 0x6a8   :  { %17577 = vst [vmem:[#allocation19_spill] sm:$0xff] %v12549_v24  ;;  %17578 = vst [vmem:[#allocation22_spill] sm:$0xff] %v12555_v9  ;;  %v4610_v49 = vcombine.high %v12460_v37, %v12460_v37  ;;  %v12573_v25 = vrot.slane %v12460_v37, %v17571_v38  ;;  %v4627_v21 = vcombine.high %v12462_v57, %v12462_v57 }
 0x6a9   :  { %17579 = vst [vmem:[#allocation21_spill] sm:$0xff] %v12561_v51  ;;  %17580 = vst [vmem:[#allocation23_spill] sm:$0xff] %v12567_v41  ;;  %v12579_v43 = vrot.slane %v12462_v57, %v17571_v38  ;;  %v4644_v19 = vcombine.high %v12464_v18, %v12464_v18  ;;  %v12585_v5 = vrot.slane %v12464_v18, %v17571_v38 }
 0x6aa   :  { %17581 = vst [vmem:[#allocation24_spill] sm:$0xff] %v12573_v25  ;;  %v4661_v36 = vcombine.high %v12466_v15, %v12466_v15  ;;  %v12591_v56 = vrot.slane %v12466_v15, %v17571_v38  ;;  %v4678_v4 = vcombine.high %v12468_v63, %v12468_v63  ;;  %v12597_v23 = vrot.slane %v12468_v63, %v17571_v38 }
 0x6ab   :  { %17582 = vst [vmem:[#allocation26_spill] sm:$0xff] %v12579_v43  ;;  %17583 = vst [vmem:[#allocation25_spill] sm:$0xff] %v12585_v5  ;;  %v4695_v6 = vcombine.high %v12470_v55, %v12470_v55  ;;  %v12603_v47 = vrot.slane %v12470_v55, %v17571_v38  ;;  %v4712_v61 = vcombine.high %v12472_v1, %v12472_v1 }
 0x6ac   :  { %17584 = vst [vmem:[#allocation27_spill] sm:$0xff] %v12591_v56  ;;  %17585 = vst [vmem:[#allocation28_spill] sm:$0xff] %v12597_v23  ;;  %v12609_v31 = vrot.slane %v12472_v1, %v17571_v38  ;;  %v4729_v48 = vcombine.high %v12475_v32, %v12475_v32  ;;  %v12615_v44 = vrot.slane %v12475_v32, %v17571_v38 }
 0x6ad   :  { %17586 = vst [vmem:[#allocation30_spill] sm:$0xff] %v12603_v47  ;;  %v4746_v2 = vcombine.high %v12477_v28, %v12477_v28  ;;  %v12621_v58 = vrot.slane %v12477_v28, %v17571_v38  ;;  %v4763_v33 = vcombine.high %v12479_v16, %v12479_v16  ;;  %v12627_v7 = vrot.slane %v12479_v16, %v17571_v38 }
 0x6ae   :  { %17587 = vst [vmem:[#allocation29_spill] sm:$0xff] %v12609_v31  ;;  %17588 = vst [vmem:[#allocation31_spill] sm:$0xff] %v12615_v44  ;;  %v4780_v37 = vcombine.high %v12481_v30, %v12481_v30  ;;  %v12633_v57 = vrot.slane %v12481_v30, %v17571_v38  ;;  %v4797_v18 = vcombine.high %v12483_v62, %v12483_v62  ;;  %v6449_v30 = vrot.slane %v12408_v52, 2 }
 0x6af   :  { %17589 = vst [vmem:[#allocation32_spill] sm:$0xff] %v12621_v58  ;;  %17590 = vst [vmem:[#allocation10_spill] sm:$0xff] %v12627_v7  ;;  %v12639_v15 = vrot.slane %v12483_v62, %v17571_v38  ;;  %v4814_v63 = vcombine.high %v12485_v3, %v12485_v3  ;;  %v12645_v55 = vrot.slane %v12485_v3, %v17571_v38 }
 0x6b0   :  { %17591 = vst [vmem:[#allocation11_spill] sm:$0xff] %v12633_v57  ;;  %v4831_v1 = vcombine.high %v12487_v8, %v12487_v8  ;;  %v12651_v32 = vrot.slane %v12487_v8, %v17571_v38  ;;  %v4848_v28 = vcombine.high %v12489_v59, %v12489_v59  ;;  %v12657_v16 = vrot.slane %v12489_v59, %v17571_v38 }
 0x6b1   :  { %17592 = vst [vmem:[#allocation12_spill] sm:$0xff] %v12639_v15  ;;  %17593 = vst [vmem:[#allocation37_spill] sm:$0xff] %v12645_v55  ;;  %v12661_v62 = vrot.slane %v4389_v46, %v17571_v38  ;;  %v12666_v55 = vrot.slane %v4406_v53, %v17571_v38  ;;  %v12676_v52 = vrot.slane %v4440_v22, %v17571_v38  ;;  %v17600_v46 = vrot.slane %v12406_v10, 2 }
 0x6b2   :  { %17594 = vst [vmem:[#allocation36_spill] sm:$0xff] %v12651_v32  ;;  %17595 = vst [vmem:[#allocation39_spill] sm:$0xff] %v12657_v16  ;;  %v12671_v32 = vrot.slane %v4423_v12, %v17571_v38  ;;  %v12684_v3 = vrot.slane %v4457_v17, %v17571_v38  ;;  %v12690_v59 = vrot.slane %v4474_v27, %v17571_v38  ;;  %v12819_v53 = vsel %vm5027_vm15, %v12513_v42, -inf }
 0x6b3   :  { %17596 = vst [vmem:[#allocation38_spill] sm:$0xff] %v12661_v62  ;;  %17597 = vst [vmem:[#allocation41_spill] sm:$0xff] %v12666_v55  ;;  %v6450_v62 = vsel %vm955_vm2, %v17600_v46, %v6449_v30  ;;  %v12695_v22 = vrot.slane %v4491_v35, %v17571_v38  ;;  %v12700_v17 = vrot.slane %v4508_v14, %v17571_v38  ;;  %v12831_v10 = vsel %vm5027_vm15, %v12531_v20, -inf }
 0x6b4   :  { %17598 = vst [vmem:[#allocation40_spill] sm:$0xff] %v12671_v32  ;;  %17599 = vst [vmem:[#allocation16_spill] sm:$0xff] %v12676_v52  ;;  %6704 = vrot.lane.b32.xlu1 %v6450_v62, %s8843_s12  ;;  %v12705_v12 = vrot.slane %v4525_v11, %v17571_v38  ;;  %6495 = vrot.lane.b32.xlu0 %v6450_v62, %s8839_s22  ;;  %v12711_v35 = vrot.slane %v4542_v29, %v17571_v38  ;;  %v12835_v8 = vsel %vm5027_vm15, %v12537_v34, -inf }
 0x6b5   :  { %17601 = vst [vmem:[#allocation14_spill] sm:$0xff] %v12684_v3  ;;  %17602 = vst [vmem:[#allocation42_spill] sm:$0xff] %v12690_v59  ;;  %v12716_v14 = vrot.slane %v4559_v45, %v17571_v38  ;;  %v12721_v11 = vrot.slane %v4576_v54, %v17571_v38  ;;  %v12726_v62 = vrot.slane %v4593_v0, %v17571_v38  ;;  %v12851_v20 = vsel %vm5027_vm15, %v12561_v51, -inf }
 0x6b6   :  { %17603 = vst [vmem:[#allocation43_spill] sm:$0xff] %v12695_v22  ;;  %17604 = vst [vmem:[#allocation44_spill] sm:$0xff] %v12700_v17  ;;  %v12731_v30 = vrot.slane %v4610_v49, %v17571_v38  ;;  %v12736_v46 = vrot.slane %v4627_v21, %v17571_v38  ;;  %v12741_v27 = vrot.slane %v4644_v19, %v17571_v38  ;;  %v12855_v34 = vsel %vm5027_vm15, %v12567_v41, -inf }
 0x6b7   :  { %17605 = vst [vmem:[#allocation45_spill] sm:$0xff] %v12705_v12  ;;  %17606 = vst [vmem:[#allocation46_spill] sm:$0xff] %v12711_v35  ;;  %v12746_v29 = vrot.slane %v4661_v36, %v17571_v38  ;;  %v12751_v45 = vrot.slane %v4678_v4, %v17571_v38  ;;  %v12756_v54 = vrot.slane %v4695_v6, %v17571_v38  ;;  %v12871_v51 = vsel %vm5027_vm15, %v12591_v56, -inf }
 0x6b8   :  { %17607 = vst [vmem:[#allocation47_spill] sm:$0xff] %v12716_v14  ;;  %17608 = vst [vmem:[#allocation48_spill] sm:$0xff] %v12721_v11  ;;  %v12761_v0 = vrot.slane %v4712_v61, %v17571_v38  ;;  %v12766_v49 = vrot.slane %v4729_v48, %v17571_v38  ;;  %v12771_v21 = vrot.slane %v4746_v2, %v17571_v38  ;;  %v12807_v2 = vsel %vm5027_vm15, %v12495_v60, -inf }
 0x6b9   :  { %17609 = vst [vmem:[#allocation49_spill] sm:$0xff] %v12726_v62  ;;  %17610 = vst [vmem:[#allocation50_spill] sm:$0xff] %v12731_v30  ;;  %v12776_v19 = vrot.slane %v4763_v33, %v17571_v38  ;;  %v12781_v36 = vrot.slane %v4780_v37, %v17571_v38  ;;  %v12786_v4 = vrot.slane %v4797_v18, %v17571_v38  ;;  %v17623_v33 = vld [vmem:[#allocation37_spill] sm:$0xff]  ;;  %v17625_v37 = vld [vmem:[#allocation36_spill] sm:$0xff]  ;;  %v12827_v18 = vsel %vm5027_vm15, %v12525_v39, -inf }
 0x6ba   :  { %17611 = vst [vmem:[#allocation51_spill] sm:$0xff] %v12736_v46  ;;  %17612 = vst [vmem:[#allocation52_spill] sm:$0xff] %v12741_v27  ;;  %v12791_v6 = vrot.slane %v4814_v63, %v17571_v38  ;;  %v12796_v61 = vrot.slane %v4831_v1, %v17571_v38  ;;  %v12801_v48 = vrot.slane %v4848_v28, %v17571_v38  ;;  %v12811_v63 = vsel %vm5027_vm15, %v12501_v13, -inf }
 0x6bb   :  { %17613 = vst [vmem:[#allocation53_spill] sm:$0xff] %v12746_v29  ;;  %17614 = vst [vmem:[#allocation54_spill] sm:$0xff] %v12751_v45  ;;  %v12815_v1 = vsel %vm5027_vm15, %v12507_v40, -inf  ;;  %v12823_v28 = vsel %vm5027_vm15, %v12519_v26, -inf  ;;  %v12839_v38 = vsel %vm5027_vm15, %v12543_v50, -inf  ;;  %v12843_v26 = vsel %vm5027_vm15, %v12549_v24, -inf }
 0x6bc   :  { %17615 = vst [vmem:[#allocation55_spill] sm:$0xff] %v12756_v54  ;;  %17616 = vst [vmem:[#allocation56_spill] sm:$0xff] %v12761_v0  ;;  %v12847_v39 = vsel %vm5027_vm15, %v12555_v9, -inf  ;;  %v12859_v50 = vsel %vm5027_vm15, %v12573_v25, -inf  ;;  %v12863_v24 = vsel %vm5027_vm15, %v12579_v43, -inf  ;;  %v12867_v9 = vsel %vm5027_vm15, %v12585_v5, -inf }
 0x6bd   :  { %17617 = vst [vmem:[#allocation57_spill] sm:$0xff] %v12766_v49  ;;  %17618 = vst [vmem:[#allocation58_spill] sm:$0xff] %v12771_v21  ;;  %v12875_v41 = vsel %vm5027_vm15, %v12597_v23, -inf  ;;  %v12879_v25 = vsel %vm5027_vm15, %v12603_v47, -inf  ;;  %v12883_v43 = vsel %vm5027_vm15, %v12609_v31, -inf  ;;  %v12887_v5 = vsel %vm5027_vm15, %v12615_v44, -inf }
 0x6be   :  { %17619 = vst [vmem:[#allocation59_spill] sm:$0xff] %v12776_v19  ;;  %17620 = vst [vmem:[#allocation60_spill] sm:$0xff] %v12781_v36  ;;  %v12891_v56 = vsel %vm5027_vm15, %v12621_v58, -inf  ;;  %v12895_v23 = vsel %vm5027_vm15, %v12627_v7, -inf  ;;  %v12899_v47 = vsel %vm5027_vm15, %v12633_v57, -inf  ;;  %v12903_v31 = vsel %vm5027_vm15, %v12639_v15, -inf }
 0x6bf   :  { %17621 = vst [vmem:[#allocation61_spill] sm:$0xff] %v12786_v4  ;;  %17622 = vst [vmem:[#allocation62_spill] sm:$0xff] %v12791_v6  ;;  %v12907_v44 = vsel %vm5027_vm15, %v17623_v33, -inf  ;;  %v12911_v58 = vsel %vm5027_vm15, %v17625_v37, -inf  ;;  %v12915_v7 = vsel %vm5027_vm15, %v12657_v16, -inf  ;;  %v12993_v16 = vsel %vm5027_vm15, %v12666_v55, -inf }
 0x6c0   :  { %17624 = vst [vmem:[#allocation63_spill] sm:$0xff] %v12796_v61  ;;  %17626 = vst [vmem:[#allocation64_spill] sm:$0xff] %v12801_v48  ;;  %v13004_v37 = vsel %vm5027_vm15, %v12671_v32, -inf }
 0x6c1   :  { %17627 = vst [vmem:[#allocation65_spill] sm:$0xff] %v12879_v25  ;;  %17628 = vst [vmem:[#allocation66_spill] sm:$0xff] %v12883_v43  ;;  %v17739_v25 = vrot.slane %v12815_v1, 4 }
 0x6c2   :  { %17629 = vst [vmem:[#allocation67_spill] sm:$0xff] %v12887_v5  ;;  %17630 = vst [vmem:[#allocation68_spill] sm:$0xff] %v12891_v56  ;;  %v13235_v5 = vsel %vm5027_vm15, %v12781_v36, -inf  ;;  %v13246_v56 = vsel %vm5027_vm15, %v12786_v4, -inf }
 0x6c3   :  { %17631 = vst [vmem:[#allocation69_spill] sm:$0xff] %v12895_v23  ;;  %17632 = vst [vmem:[#allocation70_spill] sm:$0xff] %v12899_v47  ;;  %v17637_v23 = vld [vmem:[#allocation38_spill] sm:$0xff]  ;;  %v17638_v47 = vcombine.high %v12495_v60, %v12495_v60  ;;  %v13015_v60 = vsel %vm5027_vm15, %v12676_v52, -inf }
 0x6c4   :  { %17633 = vst [vmem:[#allocation71_spill] sm:$0xff] %v12903_v31  ;;  %17634 = vst [vmem:[#allocation72_spill] sm:$0xff] %v12907_v44  ;;  %v12982_v33 = vsel %vm5027_vm15, %v17637_v23, -inf  ;;  %v13279_v31 = vsel %vm5027_vm15, %v12801_v48, -inf  ;;  %v17735_v44 = vcombine.high %v17637_v23, %v17637_v23  ;;  %v17737_v23 = vld [vmem:[#allocation41_spill] sm:$0xff] }
 0x6c5   :  { %17635 = vst [vmem:[#allocation73_spill] sm:$0xff] %v12911_v58  ;;  %17636 = vst [vmem:[#allocation74_spill] sm:$0xff] %v12915_v7  ;;  %v12978_v7 = vsel %vm5027_vm15, %v17638_v47, -inf  ;;  %v17639_v58 = vcombine.high %v12501_v13, %v12501_v13  ;;  %v17640_v47 = vcombine.high %v12507_v40, %v12507_v40  ;;  %v13026_v13 = vsel %vm5027_vm15, %v12684_v3, -inf }
 0x6c6   :  { %v13037_v40 = vsel %vm5027_vm15, %v12690_v59, -inf  ;;  %17715 = vst [vmem:[#allocation85_spill] sm:$0xff] %v13235_v5  ;;  %17719 = vst [vmem:[#allocation86_spill] sm:$0xff] %v13246_v56 }
 0x6c7   :  { %v12989_v15 = vsel %vm5027_vm15, %v17639_v58, -inf  ;;  %v13000_v57 = vsel %vm5027_vm15, %v17640_v47, -inf  ;;  %v17642_v58 = vcombine.high %v12513_v42, %v12513_v42  ;;  %v17644_v47 = vld [vmem:[#allocation17_spill] sm:$0xff]  ;;  %v13048_v42 = vsel %vm5027_vm15, %v12695_v22, -inf  ;;  %17733 = vst [vmem:[#allocation89_spill] sm:$0xff] %v13279_v31 }
 0x6c8   :  { %17641 = vst [vmem:[#allocation38_spill] sm:$0xff] %v13000_v57  ;;  %v17645_v57 = vcombine.high %v17644_v47, %v17644_v47  ;;  %v13059_v47 = vsel %vm5027_vm15, %v12700_v17, -inf  ;;  %v5120_v48 = vrot.slane %v12989_v15, 4 }
 0x6c9   :  { %v13011_v55 = vsel %vm5027_vm15, %v17642_v58, -inf  ;;  %v17647_v58 = vld [vmem:[#allocation20_spill] sm:$0xff] }
 0x6ca   :  { %17643 = vst [vmem:[#allocation75_spill] sm:$0xff] %v13011_v55  ;;  %v13022_v32 = vsel %vm5027_vm15, %v17645_v57, -inf  ;;  %v17648_v55 = vcombine.high %v17647_v58, %v17647_v58  ;;  %v17650_v57 = vld [vmem:[#allocation13_spill] sm:$0xff]  ;;  %v13070_v58 = vsel %vm5027_vm15, %v12705_v12, -inf }
 0x6cb   :  { %17646 = vst [vmem:[#allocation17_spill] sm:$0xff] %v13022_v32  ;;  %v17651_v32 = vcombine.high %v17650_v57, %v17650_v57  ;;  %v13081_v57 = vsel %vm5027_vm15, %v12711_v35, -inf }
 0x6cc   :  { %v13033_v52 = vsel %vm5027_vm15, %v17648_v55, -inf  ;;  %v17653_v55 = vld [vmem:[#allocation15_spill] sm:$0xff] }
 0x6cd   :  { %17649 = vst [vmem:[#allocation20_spill] sm:$0xff] %v13033_v52  ;;  %v13044_v3 = vsel %vm5027_vm15, %v17651_v32, -inf  ;;  %v17654_v52 = vcombine.high %v17653_v55, %v17653_v55  ;;  %v17656_v32 = vld [vmem:[#allocation18_spill] sm:$0xff]  ;;  %v13092_v55 = vsel %vm5027_vm15, %v12716_v14, -inf }
 0x6ce   :  { %17652 = vst [vmem:[#allocation13_spill] sm:$0xff] %v13044_v3  ;;  %v17657_v3 = vcombine.high %v17656_v32, %v17656_v32  ;;  %v13103_v32 = vsel %vm5027_vm15, %v12721_v11, -inf }
 0x6cf   :  { %v13055_v59 = vsel %vm5027_vm15, %v17654_v52, -inf  ;;  %v17659_v52 = vld [vmem:[#allocation19_spill] sm:$0xff] }
 0x6d0   :  { %17655 = vst [vmem:[#allocation15_spill] sm:$0xff] %v13055_v59  ;;  %v13066_v22 = vsel %vm5027_vm15, %v17657_v3, -inf  ;;  %v17660_v59 = vcombine.high %v17659_v52, %v17659_v52  ;;  %v17662_v3 = vld [vmem:[#allocation22_spill] sm:$0xff]  ;;  %v13114_v52 = vsel %vm5027_vm15, %v12726_v62, -inf }
 0x6d1   :  { %17658 = vst [vmem:[#allocation18_spill] sm:$0xff] %v13066_v22  ;;  %v17663_v22 = vcombine.high %v17662_v3, %v17662_v3  ;;  %17671 = vst [vmem:[#allocation76_spill] sm:$0xff] %v13114_v52  ;;  %v13125_v3 = vsel %vm5027_vm15, %v12731_v30, -inf }
 0x6d2   :  { %v13077_v17 = vsel %vm5027_vm15, %v17660_v59, -inf  ;;  %v17665_v59 = vld [vmem:[#allocation21_spill] sm:$0xff]  ;;  %17675 = vst [vmem:[#allocation77_spill] sm:$0xff] %v13125_v3 }
 0x6d3   :  { %17661 = vst [vmem:[#allocation19_spill] sm:$0xff] %v13077_v17  ;;  %v13088_v12 = vsel %vm5027_vm15, %v17663_v22, -inf  ;;  %v17666_v17 = vcombine.high %v17665_v59, %v17665_v59  ;;  %v17668_v22 = vld [vmem:[#allocation23_spill] sm:$0xff]  ;;  %v13136_v59 = vsel %vm5027_vm15, %v12736_v46, -inf }
 0x6d4   :  { %17664 = vst [vmem:[#allocation22_spill] sm:$0xff] %v13088_v12  ;;  %v17669_v12 = vcombine.high %v17668_v22, %v17668_v22  ;;  %v13147_v22 = vsel %vm5027_vm15, %v12741_v27, -inf }
 0x6d5   :  { %v13099_v35 = vsel %vm5027_vm15, %v17666_v17, -inf  ;;  %v17672_v17 = vld [vmem:[#allocation24_spill] sm:$0xff] }
 0x6d6   :  { %17667 = vst [vmem:[#allocation21_spill] sm:$0xff] %v13099_v35  ;;  %v13110_v14 = vsel %vm5027_vm15, %v17669_v12, -inf  ;;  %v17673_v35 = vcombine.high %v17672_v17, %v17672_v17  ;;  %v17676_v12 = vld [vmem:[#allocation26_spill] sm:$0xff]  ;;  %v13158_v17 = vsel %vm5027_vm15, %v12746_v29, -inf }
 0x6d7   :  { %17670 = vst [vmem:[#allocation23_spill] sm:$0xff] %v13110_v14  ;;  %v17677_v14 = vcombine.high %v17676_v12, %v17676_v12  ;;  %17685 = vst [vmem:[#allocation78_spill] sm:$0xff] %v13158_v17  ;;  %v13169_v12 = vsel %vm5027_vm15, %v12751_v45, -inf }
 0x6d8   :  { %v13121_v11 = vsel %vm5027_vm15, %v17673_v35, -inf  ;;  %v17679_v35 = vld [vmem:[#allocation25_spill] sm:$0xff]  ;;  %17689 = vst [vmem:[#allocation79_spill] sm:$0xff] %v13169_v12  ;;  %v17830_v12 = vld [vmem:[#allocation66_spill] sm:$0xff] }
 0x6d9   :  { %17674 = vst [vmem:[#allocation24_spill] sm:$0xff] %v13121_v11  ;;  %v13132_v62 = vsel %vm5027_vm15, %v17677_v14, -inf  ;;  %v17680_v11 = vcombine.high %v17679_v35, %v17679_v35  ;;  %v17682_v14 = vld [vmem:[#allocation27_spill] sm:$0xff]  ;;  %v13180_v35 = vsel %vm5027_vm15, %v12756_v54, -inf }
 0x6da   :  { %17678 = vst [vmem:[#allocation26_spill] sm:$0xff] %v13132_v62  ;;  %v17683_v62 = vcombine.high %v17682_v14, %v17682_v14  ;;  %17693 = vst [vmem:[#allocation80_spill] sm:$0xff] %v13180_v35  ;;  %v13191_v14 = vsel %vm5027_vm15, %v12761_v0, -inf }
 0x6db   :  { %v13143_v30 = vsel %vm5027_vm15, %v17680_v11, -inf  ;;  %v17686_v11 = vld [vmem:[#allocation28_spill] sm:$0xff]  ;;  %17697 = vst [vmem:[#allocation81_spill] sm:$0xff] %v13191_v14 }
 0x6dc   :  { %17681 = vst [vmem:[#allocation25_spill] sm:$0xff] %v13143_v30  ;;  %v13154_v46 = vsel %vm5027_vm15, %v17683_v62, -inf  ;;  %v17687_v30 = vcombine.high %v17686_v11, %v17686_v11  ;;  %v17690_v62 = vld [vmem:[#allocation30_spill] sm:$0xff]  ;;  %v13202_v11 = vsel %vm5027_vm15, %v12766_v49, -inf }
 0x6dd   :  { %17684 = vst [vmem:[#allocation27_spill] sm:$0xff] %v13154_v46  ;;  %v17691_v46 = vcombine.high %v17690_v62, %v17690_v62  ;;  %17701 = vst [vmem:[#allocation82_spill] sm:$0xff] %v13202_v11  ;;  %v13213_v62 = vsel %vm5027_vm15, %v12771_v21, -inf }
 0x6de   :  { %v13165_v27 = vsel %vm5027_vm15, %v17687_v30, -inf  ;;  %v17694_v30 = vld [vmem:[#allocation29_spill] sm:$0xff]  ;;  %17705 = vst [vmem:[#allocation83_spill] sm:$0xff] %v13213_v62 }
 0x6df   :  { %17688 = vst [vmem:[#allocation28_spill] sm:$0xff] %v13165_v27  ;;  %v13176_v29 = vsel %vm5027_vm15, %v17691_v46, -inf  ;;  %v17695_v27 = vcombine.high %v17694_v30, %v17694_v30  ;;  %v17698_v46 = vld [vmem:[#allocation31_spill] sm:$0xff]  ;;  %v13224_v30 = vsel %vm5027_vm15, %v12776_v19, -inf }
 0x6e0   :  { %17692 = vst [vmem:[#allocation30_spill] sm:$0xff] %v13176_v29  ;;  %v17699_v29 = vcombine.high %v17698_v46, %v17698_v46  ;;  %17710 = vst [vmem:[#allocation84_spill] sm:$0xff] %v13224_v30 }
 0x6e1   :  { %v13187_v45 = vsel %vm5027_vm15, %v17695_v27, -inf  ;;  %v17702_v27 = vld [vmem:[#allocation32_spill] sm:$0xff] }
 0x6e2   :  { %17696 = vst [vmem:[#allocation29_spill] sm:$0xff] %v13187_v45  ;;  %v13198_v54 = vsel %vm5027_vm15, %v17699_v29, -inf  ;;  %v17703_v45 = vcombine.high %v17702_v27, %v17702_v27  ;;  %v17707_v29 = vld [vmem:[#allocation10_spill] sm:$0xff] }
 0x6e3   :  { %17700 = vst [vmem:[#allocation31_spill] sm:$0xff] %v13198_v54  ;;  %v17708_v54 = vcombine.high %v17707_v29, %v17707_v29  ;;  %v13257_v29 = vsel %vm5027_vm15, %v12791_v6, -inf }
 0x6e4   :  { %v13209_v0 = vsel %vm5027_vm15, %v17703_v45, -inf  ;;  %v17712_v45 = vld [vmem:[#allocation11_spill] sm:$0xff]  ;;  %17723 = vst [vmem:[#allocation87_spill] sm:$0xff] %v13257_v29  ;;  %v5121_v29 = vmax.f32 %v12989_v15, %v5120_v48 }
 0x6e5   :  { %17704 = vst [vmem:[#allocation32_spill] sm:$0xff] %v13209_v0  ;;  %v13220_v49 = vsel %vm5027_vm15, %v17708_v54, -inf  ;;  %v17713_v0 = vcombine.high %v17712_v45, %v17712_v45  ;;  %v17716_v54 = vld [vmem:[#allocation12_spill] sm:$0xff]  ;;  %v13268_v45 = vsel %vm5027_vm15, %v12796_v61, -inf  ;;  %v5099_v61 = vrot.slane %v12982_v33, 4 }
 0x6e6   :  { %17709 = vst [vmem:[#allocation10_spill] sm:$0xff] %v13220_v49  ;;  %v17717_v49 = vcombine.high %v17716_v54, %v17716_v54  ;;  %17728 = vst [vmem:[#allocation88_spill] sm:$0xff] %v13268_v45 }
 0x6e7   :  { %v13231_v21 = vsel %vm5027_vm15, %v17713_v0, -inf  ;;  %v17720_v0 = vld [vmem:[#allocation37_spill] sm:$0xff] }
 0x6e8   :  { %17714 = vst [vmem:[#allocation11_spill] sm:$0xff] %v13231_v21  ;;  %v13242_v19 = vsel %vm5027_vm15, %v17717_v49, -inf  ;;  %v17721_v21 = vcombine.high %v17720_v0, %v17720_v0  ;;  %v17725_v49 = vld [vmem:[#allocation36_spill] sm:$0xff] }
 0x6e9   :  { %17718 = vst [vmem:[#allocation12_spill] sm:$0xff] %v13242_v19  ;;  %v17726_v19 = vcombine.high %v17725_v49, %v17725_v49  ;;  %v17734_v49 = vrot.slane %v12807_v2, 4 }
 0x6ea   :  { %v13253_v36 = vsel %vm5027_vm15, %v17721_v21, -inf  ;;  %v17730_v21 = vld [vmem:[#allocation39_spill] sm:$0xff] }
 0x6eb   :  { %17722 = vst [vmem:[#allocation37_spill] sm:$0xff] %v13253_v36  ;;  %v13264_v4 = vsel %vm5027_vm15, %v17726_v19, -inf  ;;  %v17731_v36 = vcombine.high %v17730_v21, %v17730_v21  ;;  %v5086_v19 = vmax.f32 %v12807_v2, %v17734_v49  ;;  %v5105_v21 = vsel %vm5027_vm15, %v17735_v44, -inf }
 0x6ec   :  { %17727 = vst [vmem:[#allocation36_spill] sm:$0xff] %v13264_v4  ;;  %v5092_v4 = vrot.slane %v12978_v7, 4  ;;  %v5106_v45 = vrot.slane %v5105_v21, 4  ;;  %v5127_v2 = vrot.slane %v12993_v16, 4  ;;  %v5100_v49 = vmax.f32 %v12982_v33, %v5099_v61 }
 0x6ed   :  { %v13275_v6 = vsel %vm5027_vm15, %v17731_v36, -inf  ;;  %v17736_v36 = vrot.slane %v12811_v63, 4  ;;  %v5087_v31 = vrot.slane %v5086_v19, 2  ;;  %v17738_v44 = vcombine.high %v17737_v23, %v17737_v23 }
 0x6ee   :  { %17732 = vst [vmem:[#allocation39_spill] sm:$0xff] %v13275_v6  ;;  %v5093_v0 = vmax.f32 %v12978_v7, %v5092_v4  ;;  %v5128_v27 = vmax.f32 %v12993_v16, %v5127_v2  ;;  %v5101_v30 = vrot.slane %v5100_v49, 2  ;;  %v5122_v4 = vrot.slane %v5121_v29, 2 }
 0x6ef   :  { %v5114_v6 = vmax.f32 %v12811_v63, %v17736_v36  ;;  %v5133_v56 = vsel %vm5027_vm15, %v17738_v44, -inf  ;;  %v5088_v5 = vmax.f32 %v5086_v19, %v5087_v31  ;;  %v5107_v36 = vmax.f32 %v5105_v21, %v5106_v45 }
 0x6f0   :  { %v5094_v63 = vrot.slane %v5093_v0, 2  ;;  %v5134_v46 = vrot.slane %v5133_v56, 4  ;;  %v5129_v33 = vrot.slane %v5128_v27, 2  ;;  %v5102_v14 = vmax.f32 %v5100_v49, %v5101_v30 }
 0x6f1   :  { %v5115_v54 = vrot.slane %v5114_v6, 2  ;;  %v5089_v62 = vrot.slane %v5088_v5, 1  ;;  %v5108_v61 = vrot.slane %v5107_v36, 2  ;;  %v5123_v48 = vmax.f32 %v5121_v29, %v5122_v4  ;;  %v17745_v4 = vld [vmem:[#allocation75_spill] sm:$0xff] }
 0x6f2   :  { %v5095_v11 = vmax.f32 %v5093_v0, %v5094_v63  ;;  %v5135_v43 = vmax.f32 %v5133_v56, %v5134_v46  ;;  %v5130_v31 = vmax.f32 %v5128_v27, %v5129_v33  ;;  %v5103_v19 = vrot.slane %v5102_v14, 1  ;;  %v17741_v56 = vld [vmem:[#allocation38_spill] sm:$0xff]  ;;  %v17785_v33 = vld [vmem:[#allocation23_spill] sm:$0xff] }
 0x6f3   :  { %v5116_v7 = vmax.f32 %v5114_v6, %v5115_v54  ;;  %v5090_v23 = vmax.f32 %v5088_v5, %v5089_v62  ;;  %v5109_v44 = vmax.f32 %v5107_v36, %v5108_v61  ;;  %v5124_v21 = vrot.slane %v5123_v48, 1  ;;  %v17800_v63 = vld [vmem:[#allocation51_spill] sm:$0xff] }
 0x6f4   :  { %v5096_v35 = vrot.slane %v5095_v11, 1  ;;  %v5136_v16 = vrot.slane %v5135_v43, 2  ;;  %v5131_v54 = vrot.slane %v5130_v31, 1  ;;  %v13306_v0 = vmax.f32 %v12815_v1, %v17739_v25 }
 0x6f5   :  { %v5117_v15 = vrot.slane %v5116_v7, 1  ;;  %v5110_v6 = vrot.slane %v5109_v44, 1  ;;  %v5104_v30 = vmax.f32 %v5102_v14, %v5103_v19  ;;  %v5125_v49 = vmax.f32 %v5123_v48, %v5124_v21  ;;  %v17749_v21 = vld [vmem:[#allocation17_spill] sm:$0xff] }
 0x6f6   :  { %v5097_v2 = vmax.f32 %v5095_v11, %v5096_v35  ;;  %17740 = vst [vmem:[#allocation41_spill] sm:$0xff] %v13306_v0  ;;  %v5137_v29 = vmax.f32 %v5135_v43, %v5136_v16  ;;  %v5132_v46 = vmax.f32 %v5130_v31, %v5131_v54  ;;  %v17742_v11 = vld [vmem:[#allocation40_spill] sm:$0xff]  ;;  %v17744_v1 = vrot.slane %v12819_v53, 4  ;;  %v17750_v54 = vld [vmem:[#allocation14_spill] sm:$0xff] }
 0x6f7   :  { %v5118_v45 = vmax.f32 %v5116_v7, %v5117_v15  ;;  %v5111_v62 = vmax.f32 %v5109_v44, %v5110_v6  ;;  %v17743_v7 = vcombine.high %v17742_v11, %v17742_v11  ;;  %v17746_v15 = vld [vmem:[#allocation16_spill] sm:$0xff]  ;;  %v17748_v19 = vrot.slane %v12823_v28, 4  ;;  %v17779_v6 = vld [vmem:[#allocation21_spill] sm:$0xff] }
 0x6f8   :  { %v6106_v27 = vsel %vm17355_vm0, %v5097_v2, %v5090_v23  ;;  %v5138_v36 = vrot.slane %v5137_v29, 1  ;;  %v13321_v43 = vmax.f32 %v12819_v53, %v17744_v1  ;;  %v17747_v48 = vcombine.high %v17746_v15, %v17746_v15 }
 0x6f9   :  { %v6107_v35 = vsel %vm6094_vm1, %v5104_v30, %v6106_v27  ;;  %v13316_v25 = vsel %vm5027_vm15, %v17743_v7, -inf  ;;  %v13336_v53 = vmax.f32 %v12823_v28, %v17748_v19  ;;  %v17751_v30 = vcombine.high %v17750_v54, %v17750_v54  ;;  %v17753_v27 = vld [vmem:[#allocation20_spill] sm:$0xff] }
 0x6fa   :  { %v6108_v14 = vsel %vm6096_vm4, %v5111_v62, %v6107_v35  ;;  %v13330_v23 = vsel %vm5027_vm15, %v17747_v48, -inf  ;;  %v5139_v44 = vmax.f32 %v5137_v29, %v5138_v36  ;;  %v17752_v29 = vrot.slane %v12827_v18, 4  ;;  %v17773_v35 = vld [vmem:[#allocation22_spill] sm:$0xff] }
 0x6fb   :  { %v6109_v31 = vsel %vm6098_vm5, %v5118_v45, %v6108_v14  ;;  %v13345_v62 = vsel %vm5027_vm15, %v17751_v30, -inf  ;;  %v17756_v14 = vrot.slane %v12831_v10, 4  ;;  %v17760_v54 = vrot.slane %v12835_v8, 4  ;;  %v17761_v30 = vld [vmem:[#allocation15_spill] sm:$0xff] }
 0x6fc   :  { %v6110_v2 = vsel %vm6100_vm6, %v5125_v49, %v6109_v31  ;;  %v13350_v45 = vmax.f32 %v12827_v18, %v17752_v29  ;;  %v17754_v49 = vld [vmem:[#allocation42_spill] sm:$0xff]  ;;  %v17757_v18 = vld [vmem:[#allocation13_spill] sm:$0xff]  ;;  %v17758_v31 = vld [vmem:[#allocation43_spill] sm:$0xff] }
 0x6fd   :  { %v6111_v28 = vsel %vm6102_vm7, %v5132_v46, %v6110_v2  ;;  %v17755_v11 = vcombine.high %v17754_v49, %v17754_v49  ;;  %v13365_v15 = vmax.f32 %v12831_v10, %v17756_v14  ;;  %v17759_v19 = vcombine.high %v17758_v31, %v17758_v31  ;;  %v17765_v31 = vld [vmem:[#allocation18_spill] sm:$0xff]  ;;  %v17769_v46 = vld [vmem:[#allocation19_spill] sm:$0xff] }
 0x6fe   :  { %v6112_v1 = vsel %vm6104_vm8, %v5139_v44, %v6111_v28  ;;  %v13379_v44 = vmax.f32 %v12835_v8, %v17760_v54  ;;  %v17762_v28 = vld [vmem:[#allocation44_spill] sm:$0xff]  ;;  %v17766_v54 = vld [vmem:[#allocation45_spill] sm:$0xff] }
 0x6ff   :  { %v13359_v7 = vsel %vm5027_vm15, %v17755_v11, -inf  ;;  %6229 = vst.msk [vmem:[#allocation4 + $0x21] sm:$0xff] %vm3618_vm14, %v6112_v1  ;;  %v13374_v2 = vsel %vm5027_vm15, %v17759_v19, -inf  ;;  %v17763_v49 = vcombine.high %v17762_v28, %v17762_v28  ;;  %v17764_v1 = vrot.slane %v12839_v38, 4 }
 0x700   :  { %v17767_v10 = vcombine.high %v17766_v54, %v17766_v54  ;;  %v17768_v28 = vrot.slane %v12843_v26, 4  ;;  %v17772_v54 = vrot.slane %v12847_v39, 4 }
 0x701   :  { %v13387_v11 = vsel %vm5027_vm15, %v17763_v49, -inf  ;;  %v13392_v14 = vmax.f32 %v12839_v38, %v17764_v1  ;;  %v17770_v1 = vld [vmem:[#allocation46_spill] sm:$0xff] }
 0x702   :  { %v13400_v29 = vsel %vm5027_vm15, %v17767_v10, -inf  ;;  %v13405_v49 = vmax.f32 %v12843_v26, %v17768_v28  ;;  %v17771_v19 = vcombine.high %v17770_v1, %v17770_v1  ;;  %v13418_v10 = vmax.f32 %v12847_v39, %v17772_v54  ;;  %v17774_v28 = vld [vmem:[#allocation47_spill] sm:$0xff]  ;;  %v17780_v54 = vld [vmem:[#allocation48_spill] sm:$0xff] }
 0x703   :  { %v17775_v48 = vcombine.high %v17774_v28, %v17774_v28  ;;  %v17777_v1 = vrot.slane %v12851_v20, 4  ;;  %v17781_v36 = vcombine.high %v17780_v54, %v17780_v54  ;;  %v17783_v28 = vrot.slane %v12855_v34, 4 }
 0x704   :  { %v13413_v8 = vsel %vm5027_vm15, %v17771_v19, -inf  ;;  %v17789_v54 = vrot.slane %v12859_v50, 4 }
 0x705   :  { %v13426_v38 = vsel %vm5027_vm15, %v17775_v48, -inf  ;;  %v13431_v19 = vmax.f32 %v12851_v20, %v17777_v1  ;;  %v13439_v26 = vsel %vm5027_vm15, %v17781_v36, -inf  ;;  %v13444_v48 = vmax.f32 %v12855_v34, %v17783_v28  ;;  %v17786_v1 = vld [vmem:[#allocation49_spill] sm:$0xff]  ;;  %v17794_v20 = vld [vmem:[#allocation50_spill] sm:$0xff] }
 0x706   :  { %17776 = vst [vmem:[#allocation38_spill] sm:$0xff] %v13426_v38  ;;  %17782 = vst [vmem:[#allocation75_spill] sm:$0xff] %v13439_v26  ;;  %v17787_v16 = vcombine.high %v17786_v1, %v17786_v1  ;;  %v13457_v36 = vmax.f32 %v12859_v50, %v17789_v54  ;;  %v13461_v28 = vld [vmem:[#allocation4 + $0x20] sm:$0xff]  ;;  %v13463_v61 = vld [vmem:[#allocation4 + $0x28] sm:$0x3]  ;;  %v17795_v52 = vcombine.high %v17794_v20, %v17794_v20  ;;  %v17940_v38 = vrot.slane %v13136_v59, 4 }
 0x707   :  { %17778 = vst [vmem:[#allocation40_spill] sm:$0xff] %v13431_v19  ;;  %17784 = vst [vmem:[#allocation16_spill] sm:$0xff] %v13444_v48  ;;  %v17799_v50 = vld [vmem:[#allocation26_spill] sm:$0xff]  ;;  %v6451_v34 = vrot.slane %v13461_v28, 2  ;;  %v6452_v3 = vrot.slane %v13463_v61, 2  ;;  %6771 = vrot.lane.b32.xlu1 %v13461_v28, %s8844_s13  ;;  %6562 = vrot.lane.b32.xlu0 %v13461_v28, %s8841_s2 }
 0x708   :  { %v13452_v39 = vsel %vm5027_vm15, %v17787_v16, -inf  ;;  %17790 = vst [vmem:[#allocation14_spill] sm:$0xff] %v13457_v36  ;;  %17792 = vst [vmem:[#allocation20_spill] sm:$0xff] %v13461_v28  ;;  %v13469_v1 = vsel %vm5027_vm15, %v17795_v52, -inf  ;;  %v17797_v16 = vrot.slane %v12863_v24, 4  ;;  %v17801_v36 = vcombine.high %v17800_v63, %v17800_v63 }
 0x709   :  { %17788 = vst [vmem:[#allocation17_spill] sm:$0xff] %v13452_v39  ;;  %17793 = vst [vmem:[#allocation42_spill] sm:$0xff] %v13463_v61  ;;  %v17803_v52 = vrot.slane %v12867_v9, 4  ;;  %v13511_v61 = vsel %vm955_vm2, %v6451_v34, %v6452_v3 }
 0x70a   :  { %17796 = vst [vmem:[#allocation13_spill] sm:$0xff] %v13469_v1  ;;  %v13474_v39 = vmax.f32 %v12863_v24, %v17797_v16  ;;  %v13484_v20 = vsel %vm5027_vm15, %v17801_v36, -inf  ;;  %6286 = vst.msk [vmem:[#allocation5 + $0x20] sm:$0xff] %vm3618_vm14, %v13461_v28  ;;  %v17806_v16 = vld [vmem:[#allocation52_spill] sm:$0xff]  ;;  %v17813_v24 = vld [vmem:[#allocation53_spill] sm:$0xff] }
 0x70b   :  { %17802 = vst [vmem:[#allocation15_spill] sm:$0xff] %v13484_v20  ;;  %v13489_v1 = vmax.f32 %v12867_v9, %v17803_v52  ;;  %v17807_v5 = vcombine.high %v17806_v16, %v17806_v16  ;;  %v17809_v52 = vrot.slane %v12871_v51, 4  ;;  %17811 = vst [vmem:[#allocation19_spill] sm:$0xff] %v13511_v61  ;;  %v17814_v36 = vcombine.high %v17813_v24, %v17813_v24  ;;  %v17819_v28 = vld [vmem:[#allocation54_spill] sm:$0xff] }
 0x70c   :  { %17798 = vst [vmem:[#allocation43_spill] sm:$0xff] %v13474_v39  ;;  %6931 = vst.msk [vmem:[#allocation5 + $0x8] sm:$0xff] %vm3618_vm14, %v13511_v61  ;;  %v17820_v63 = vcombine.high %v17819_v28, %v17819_v28  ;;  %v17831_v28 = vrot.slane %v17830_v12, 4 }
 0x70d   :  { %17804 = vst [vmem:[#allocation44_spill] sm:$0xff] %v13489_v1  ;;  %v13503_v9 = vsel %vm5027_vm15, %v17807_v5, -inf  ;;  %v13508_v54 = vmax.f32 %v12871_v51, %v17809_v52  ;;  %v13519_v16 = vsel %vm5027_vm15, %v17814_v36, -inf  ;;  %v17816_v5 = vrot.slane %v12875_v41, 4  ;;  %v17822_v36 = vld [vmem:[#allocation65_spill] sm:$0xff] }
 0x70e   :  { %17808 = vst [vmem:[#allocation18_spill] sm:$0xff] %v13503_v9  ;;  %17815 = vst [vmem:[#allocation46_spill] sm:$0xff] %v13519_v16  ;;  %v13534_v24 = vsel %vm5027_vm15, %v17820_v63, -inf  ;;  %v17823_v16 = vrot.slane %v17822_v36, 4  ;;  %v13552_v63 = vmax.f32 %v17830_v12, %v17831_v28  ;;  %v17843_v28 = vld [vmem:[#allocation57_spill] sm:$0xff] }
 0x70f   :  { %17810 = vst [vmem:[#allocation45_spill] sm:$0xff] %v13508_v54  ;;  %v13526_v51 = vmax.f32 %v12875_v41, %v17816_v5  ;;  %17821 = vst [vmem:[#allocation47_spill] sm:$0xff] %v13534_v24  ;;  %v17827_v5 = vld [vmem:[#allocation55_spill] sm:$0xff]  ;;  %v17844_v3 = vcombine.high %v17843_v28, %v17843_v28 }
 0x710   :  { %v13539_v17 = vmax.f32 %v17822_v36, %v17823_v16  ;;  %v17828_v34 = vcombine.high %v17827_v5, %v17827_v5  ;;  %17832 = vst [vmem:[#allocation23_spill] sm:$0xff] %v13552_v63  ;;  %v17835_v36 = vld [vmem:[#allocation56_spill] sm:$0xff]  ;;  %v17838_v54 = vld [vmem:[#allocation67_spill] sm:$0xff]  ;;  %v17862_v63 = vld [vmem:[#allocation70_spill] sm:$0xff] }
 0x711   :  { %17817 = vst [vmem:[#allocation22_spill] sm:$0xff] %v13526_v51  ;;  %v17836_v1 = vcombine.high %v17835_v36, %v17835_v36  ;;  %v17839_v5 = vrot.slane %v17838_v54, 4  ;;  %v13573_v16 = vsel %vm5027_vm15, %v17844_v3, -inf  ;;  %v17846_v51 = vld [vmem:[#allocation68_spill] sm:$0xff] }
 0x712   :  { %17824 = vst [vmem:[#allocation21_spill] sm:$0xff] %v13539_v17  ;;  %v13547_v52 = vsel %vm5027_vm15, %v17828_v34, -inf  ;;  %17845 = vst [vmem:[#allocation26_spill] sm:$0xff] %v13573_v16  ;;  %v17847_v36 = vrot.slane %v17846_v51, 4  ;;  %v17854_v17 = vld [vmem:[#allocation69_spill] sm:$0xff] }
 0x713   :  { %17829 = vst [vmem:[#allocation48_spill] sm:$0xff] %v13547_v52  ;;  %v13560_v41 = vsel %vm5027_vm15, %v17836_v1, -inf  ;;  %v13565_v34 = vmax.f32 %v17838_v54, %v17839_v5  ;;  %v17851_v5 = vld [vmem:[#allocation58_spill] sm:$0xff]  ;;  %v17855_v28 = vrot.slane %v17854_v17, 4 }
 0x714   :  { %17837 = vst [vmem:[#allocation49_spill] sm:$0xff] %v13560_v41  ;;  %v13578_v1 = vmax.f32 %v17846_v51, %v17847_v36  ;;  %v17852_v61 = vcombine.high %v17851_v5, %v17851_v5  ;;  %v17859_v36 = vld [vmem:[#allocation59_spill] sm:$0xff]  ;;  %v17863_v5 = vrot.slane %v17862_v63, 4 }
 0x715   :  { %17840 = vst [vmem:[#allocation50_spill] sm:$0xff] %v13565_v34  ;;  %v13591_v3 = vmax.f32 %v17854_v17, %v17855_v28  ;;  %v17860_v24 = vcombine.high %v17859_v36, %v17859_v36  ;;  %v17867_v28 = vld [vmem:[#allocation60_spill] sm:$0xff]  ;;  %v6948_v34 = vld [vmem:[#allocation5 + $0x8] sm:$0xff] }
 0x716   :  { %17848 = vst [vmem:[#allocation51_spill] sm:$0xff] %v13578_v1  ;;  %v13586_v12 = vsel %vm5027_vm15, %v17852_v61, -inf  ;;  %v13604_v61 = vmax.f32 %v17862_v63, %v17863_v5  ;;  %v17868_v52 = vcombine.high %v17867_v28, %v17867_v28  ;;  %v17870_v36 = vld [vmem:[#allocation71_spill] sm:$0xff]  ;;  %8539 = vmatprep.mubr.msk.f32.mxu1 %vm3618_vm14, %v6948_v34  ;;  %v17888_v34 = vld [vmem:[#allocation36_spill] sm:$0xff]  ;;  %v17904_v1 = vrot.slane %v13026_v13, 4 }
 0x717   :  { %17853 = vst [vmem:[#allocation52_spill] sm:$0xff] %v13586_v12  ;;  %17856 = vst [vmem:[#allocation53_spill] sm:$0xff] %v13591_v3  ;;  %v13599_v54 = vsel %vm5027_vm15, %v17860_v24, -inf  ;;  %v17871_v16 = vrot.slane %v17870_v36, 4  ;;  %v17883_v3 = vld [vmem:[#allocation62_spill] sm:$0xff]  ;;  %v17889_v12 = vld [vmem:[#allocation88_spill] sm:$0xff] }
 0x718   :  { %17861 = vst [vmem:[#allocation54_spill] sm:$0xff] %v13599_v54  ;;  %17864 = vst [vmem:[#allocation65_spill] sm:$0xff] %v13604_v61  ;;  %v13612_v51 = vsel %vm5027_vm15, %v17868_v52, -inf  ;;  %v17875_v61 = vld [vmem:[#allocation61_spill] sm:$0xff]  ;;  %v17878_v52 = vld [vmem:[#allocation72_spill] sm:$0xff]  ;;  %v17884_v5 = vcombine.high %v17883_v3, %v17883_v3 }
 0x719   :  { %17869 = vst [vmem:[#allocation55_spill] sm:$0xff] %v13612_v51  ;;  %v13617_v24 = vmax.f32 %v17870_v36, %v17871_v16  ;;  %v17876_v41 = vcombine.high %v17875_v61, %v17875_v61  ;;  %v17879_v28 = vrot.slane %v17878_v52, 4  ;;  %v17886_v61 = vld [vmem:[#allocation73_spill] sm:$0xff]  ;;  %v17893_v36 = vld [vmem:[#allocation74_spill] sm:$0xff] }
 0x71a   :  { %v13639_v63 = vsel %vm5027_vm15, %v17884_v5, -inf  ;;  %v17894_v3 = vrot.slane %v17893_v36, 4 }
 0x71b   :  { %17872 = vst [vmem:[#allocation66_spill] sm:$0xff] %v13617_v24  ;;  %v13625_v17 = vsel %vm5027_vm15, %v17876_v41, -inf  ;;  %v13631_v51 = vmax.f32 %v17878_v52, %v17879_v28  ;;  %17885 = vst [vmem:[#allocation57_spill] sm:$0xff] %v13639_v63  ;;  %v17887_v41 = vrot.slane %v17886_v61, 4  ;;  %v17890_v28 = vld [vmem:[#allocation63_spill] sm:$0xff] }
 0x71c   :  { %17877 = vst [vmem:[#allocation56_spill] sm:$0xff] %v13625_v17  ;;  %v17891_v16 = vcombine.high %v17890_v28, %v17890_v28  ;;  %v13657_v5 = vmax.f32 %v17893_v36, %v17894_v3  ;;  %v17895_v63 = vld [vmem:[#allocation39_spill] sm:$0xff]  ;;  %v17900_v36 = vrot.slane %v13004_v37, 4  ;;  %v17902_v28 = vrot.slane %v13015_v60, 4 }
 0x71d   :  { %17880 = vst [vmem:[#allocation67_spill] sm:$0xff] %v13631_v51  ;;  %v13644_v17 = vmax.f32 %v17886_v61, %v17887_v41  ;;  %v17896_v51 = vld [vmem:[#allocation89_spill] sm:$0xff]  ;;  %v17897_v41 = vld [vmem:[#allocation64_spill] sm:$0xff]  ;;  %v13700_v61 = vmax.f32 %v13026_v13, %v17904_v1  ;;  %v17907_v13 = vrot.slane %v17757_v18, 4 }
 0x71e   :  { %v13652_v24 = vsel %vm5027_vm15, %v17891_v16, -inf  ;;  %v17898_v54 = vcombine.high %v17897_v41, %v17897_v41  ;;  %v17899_v16 = vrot.slane %v17741_v56, 4  ;;  %v13676_v3 = vmax.f32 %v13004_v37, %v17900_v36 }
 0x71f   :  { %17892 = vst [vmem:[#allocation68_spill] sm:$0xff] %v13652_v24  ;;  %v17901_v41 = vrot.slane %v17745_v4, 4  ;;  %v13688_v0 = vmax.f32 %v13015_v60, %v17902_v28  ;;  %v17903_v37 = vrot.slane %v17749_v21, 4  ;;  %v17905_v60 = vrot.slane %v17753_v27, 4 }
 0x720   :  { %v13665_v52 = vsel %vm5027_vm15, %v17898_v54, -inf  ;;  %v13671_v24 = vmax.f32 %v17741_v56, %v17899_v16  ;;  %v17906_v16 = vrot.slane %v13037_v40, 4  ;;  %v13719_v1 = vmax.f32 %v17757_v18, %v17907_v13 }
 0x721   :  { %v13683_v54 = vmax.f32 %v17745_v4, %v17901_v41  ;;  %v13695_v36 = vmax.f32 %v17749_v21, %v17903_v37  ;;  %v13707_v28 = vmax.f32 %v17753_v27, %v17905_v60  ;;  %v17908_v41 = vrot.slane %v13048_v42, 4 }
 0x722   :  { %v13712_v56 = vmax.f32 %v13037_v40, %v17906_v16  ;;  %v17909_v40 = vrot.slane %v17761_v30, 4  ;;  %v17910_v37 = vrot.slane %v13059_v47, 4  ;;  %v17912_v60 = vrot.slane %v13070_v58, 4 }
 0x723   :  { %v13724_v4 = vmax.f32 %v13048_v42, %v17908_v41  ;;  %v17911_v42 = vrot.slane %v17765_v31, 4  ;;  %v17915_v13 = vrot.slane %v13081_v57, 4  ;;  %vm6819_vm15 = vcmask 917248  }
 0x724   :  { %v13731_v16 = vmax.f32 %v17761_v30, %v17909_v40  ;;  %v13736_v21 = vmax.f32 %v13059_v47, %v17910_v37  ;;  %v13748_v27 = vmax.f32 %v13070_v58, %v17912_v60  ;;  %v17913_v47 = vrot.slane %v17769_v46, 4 }
 0x725   :  { %v13743_v41 = vmax.f32 %v17765_v31, %v17911_v42  ;;  %v13760_v18 = vmax.f32 %v13081_v57, %v17915_v13  ;;  %v17917_v58 = vrot.slane %v17773_v35, 4  ;;  %v17919_v40 = vrot.slane %v13092_v55, 4 }
 0x726   :  { %v13755_v37 = vmax.f32 %v17769_v46, %v17913_v47  ;;  %v17921_v57 = vrot.slane %v17779_v6, 4  ;;  %v17923_v42 = vrot.slane %v13103_v32, 4  ;;  %v17926_v47 = vld [vmem:[#allocation76_spill] sm:$0xff] }
 0x727   :  { %17916 = vst [vmem:[#allocation69_spill] sm:$0xff] %v13760_v18  ;;  %v13767_v60 = vmax.f32 %v17773_v35, %v17917_v58  ;;  %v13772_v30 = vmax.f32 %v13092_v55, %v17919_v40  ;;  %v17924_v55 = vrot.slane %v17785_v33, 4  ;;  %v17927_v46 = vrot.slane %v17926_v47, 4  ;;  %v17934_v58 = vld [vmem:[#allocation77_spill] sm:$0xff] }
 0x728   :  { %17914 = vst [vmem:[#allocation58_spill] sm:$0xff] %v13755_v37  ;;  %v13779_v13 = vmax.f32 %v17779_v6, %v17921_v57  ;;  %v13784_v31 = vmax.f32 %v13103_v32, %v17923_v42  ;;  %v17929_v6 = vld [vmem:[#allocation17_spill] sm:$0xff]  ;;  %v17931_v32 = vld [vmem:[#allocation24_spill] sm:$0xff]  ;;  %v17935_v48 = vrot.slane %v17934_v58, 4  ;;  %v13820_v57 = vmax.f32 %v13136_v59, %v17940_v38  ;;  %v17949_v59 = vld [vmem:[#allocation27_spill] sm:$0xff] }
 0x729   :  { %17918 = vst [vmem:[#allocation59_spill] sm:$0xff] %v13767_v60  ;;  %17920 = vst [vmem:[#allocation70_spill] sm:$0xff] %v13772_v30  ;;  %v13791_v40 = vmax.f32 %v17785_v33, %v17924_v55  ;;  %v13796_v19 = vmax.f32 %v17926_v47, %v17927_v46  ;;  %v17932_v42 = vrot.slane %v17931_v32, 4  ;;  %v17937_v33 = vld [vmem:[#allocation13_spill] sm:$0xff]  ;;  %v17938_v46 = vrot.slane %v17799_v50, 4 }
 0x72a   :  { %17922 = vst [vmem:[#allocation60_spill] sm:$0xff] %v13779_v13  ;;  %v17930_v13 = vld [vmem:[#allocation14_spill] sm:$0xff]  ;;  %v13808_v26 = vmax.f32 %v17934_v58, %v17935_v48  ;;  %17941 = vst [vmem:[#allocation36_spill] sm:$0xff] %v13820_v57  ;;  %v17943_v48 = vld [vmem:[#allocation25_spill] sm:$0xff]  ;;  %v17950_v38 = vrot.slane %v17949_v59, 4 }
 0x72b   :  { %17925 = vst [vmem:[#allocation71_spill] sm:$0xff] %v13791_v40  ;;  %17928 = vst [vmem:[#allocation61_spill] sm:$0xff] %v13796_v19  ;;  %v13803_v35 = vmax.f32 %v17931_v32, %v17932_v42  ;;  %v13815_v47 = vmax.f32 %v17799_v50, %v17938_v46  ;;  %v17944_v58 = vrot.slane %v17943_v48, 4  ;;  %v17946_v40 = vrot.slane %v13147_v22, 4  ;;  %v17968_v57 = vld [vmem:[#allocation80_spill] sm:$0xff] }
 0x72c   :  { %17936 = vst [vmem:[#allocation62_spill] sm:$0xff] %v13808_v26  ;;  %v13839_v32 = vmax.f32 %v17949_v59, %v17950_v38 }
 0x72d   :  { %17933 = vst [vmem:[#allocation72_spill] sm:$0xff] %v13803_v35  ;;  %17939 = vst [vmem:[#allocation73_spill] sm:$0xff] %v13815_v47  ;;  %v13827_v55 = vmax.f32 %v17943_v48, %v17944_v58  ;;  %v13832_v39 = vmax.f32 %v13147_v22, %v17946_v40  ;;  %v17952_v35 = vld [vmem:[#allocation78_spill] sm:$0xff]  ;;  %v17957_v22 = vld [vmem:[#allocation28_spill] sm:$0xff] }
 0x72e   :  { %17951 = vst [vmem:[#allocation74_spill] sm:$0xff] %v13839_v32  ;;  %v17953_v42 = vrot.slane %v17952_v35, 4  ;;  %v17958_v40 = vrot.slane %v17957_v22, 4  ;;  %v17960_v47 = vld [vmem:[#allocation79_spill] sm:$0xff] }
 0x72f   :  { %17945 = vst [vmem:[#allocation88_spill] sm:$0xff] %v13827_v55  ;;  %17947 = vst [vmem:[#allocation63_spill] sm:$0xff] %v13832_v39  ;;  %v17961_v46 = vrot.slane %v17960_v47, 4  ;;  %v17969_v55 = vrot.slane %v17968_v57, 4  ;;  %v17976_v39 = vld [vmem:[#allocation81_spill] sm:$0xff] }
 0x730   :  { %v13844_v20 = vmax.f32 %v17952_v35, %v17953_v42  ;;  %v13851_v50 = vmax.f32 %v17957_v22, %v17958_v40  ;;  %v17965_v35 = vld [vmem:[#allocation30_spill] sm:$0xff]  ;;  %v17977_v32 = vrot.slane %v17976_v39, 4 }
 0x731   :  { %v13856_v9 = vmax.f32 %v17960_v47, %v17961_v46  ;;  %v17966_v42 = vrot.slane %v17965_v35, 4  ;;  %v13868_v48 = vmax.f32 %v17968_v57, %v17969_v55  ;;  %v17973_v47 = vld [vmem:[#allocation29_spill] sm:$0xff]  ;;  %v17981_v57 = vld [vmem:[#allocation31_spill] sm:$0xff] }
 0x732   :  { %17954 = vst [vmem:[#allocation39_spill] sm:$0xff] %v13844_v20  ;;  %17959 = vst [vmem:[#allocation89_spill] sm:$0xff] %v13851_v50  ;;  %v17974_v46 = vrot.slane %v17973_v47, 4  ;;  %v13880_v59 = vmax.f32 %v17976_v39, %v17977_v32  ;;  %v17982_v55 = vrot.slane %v17981_v57, 4  ;;  %v17984_v20 = vld [vmem:[#allocation82_spill] sm:$0xff]  ;;  %v17989_v39 = vld [vmem:[#allocation32_spill] sm:$0xff] }
 0x733   :  { %17962 = vst [vmem:[#allocation64_spill] sm:$0xff] %v13856_v9  ;;  %v13863_v58 = vmax.f32 %v17965_v35, %v17966_v42  ;;  %17970 = vst [vmem:[#allocation17_spill] sm:$0xff] %v13868_v48  ;;  %v17985_v50 = vrot.slane %v17984_v20, 4  ;;  %v17990_v32 = vrot.slane %v17989_v39, 4  ;;  %v17992_v9 = vld [vmem:[#allocation83_spill] sm:$0xff]  ;;  %v18000_v48 = vld [vmem:[#allocation84_spill] sm:$0xff] }
 0x734   :  { %v13875_v38 = vmax.f32 %v17973_v47, %v17974_v46  ;;  %17978 = vst [vmem:[#allocation24_spill] sm:$0xff] %v13880_v59  ;;  %v13887_v40 = vmax.f32 %v17981_v57, %v17982_v55  ;;  %v18008_v59 = vld [vmem:[#allocation85_spill] sm:$0xff] }
 0x735   :  { %17967 = vst [vmem:[#allocation76_spill] sm:$0xff] %v13863_v58  ;;  %v13892_v22 = vmax.f32 %v17984_v20, %v17985_v50  ;;  %v13899_v42 = vmax.f32 %v17989_v39, %v17990_v32  ;;  %v17993_v58 = vrot.slane %v17992_v9, 4  ;;  %v17997_v20 = vld [vmem:[#allocation10_spill] sm:$0xff] }
 0x736   :  { %17975 = vst [vmem:[#allocation14_spill] sm:$0xff] %v13875_v38  ;;  %17983 = vst [vmem:[#allocation77_spill] sm:$0xff] %v13887_v40  ;;  %v17998_v50 = vrot.slane %v17997_v20, 4  ;;  %v18001_v38 = vrot.slane %v18000_v48, 4  ;;  %v18009_v40 = vrot.slane %v18008_v59, 4 }
 0x737   :  { %17986 = vst [vmem:[#allocation13_spill] sm:$0xff] %v13892_v22  ;;  %17991 = vst [vmem:[#allocation25_spill] sm:$0xff] %v13899_v42  ;;  %v13904_v35 = vmax.f32 %v17992_v9, %v17993_v58  ;;  %v18005_v9 = vld [vmem:[#allocation11_spill] sm:$0xff]  ;;  %v18015_v22 = vld [vmem:[#allocation86_spill] sm:$0xff] }
 0x738   :  { %v13911_v46 = vmax.f32 %v17997_v20, %v17998_v50  ;;  %v13916_v47 = vmax.f32 %v18000_v48, %v18001_v38  ;;  %v18006_v58 = vrot.slane %v18005_v9, 4  ;;  %v13928_v57 = vmax.f32 %v18008_v59, %v18009_v40  ;;  %v18012_v48 = vld [vmem:[#allocation12_spill] sm:$0xff]  ;;  %v18019_v59 = vld [vmem:[#allocation37_spill] sm:$0xff] }
 0x739   :  { %17994 = vst [vmem:[#allocation27_spill] sm:$0xff] %v13904_v35  ;;  %v18013_v38 = vrot.slane %v18012_v48, 4  ;;  %v18016_v42 = vrot.slane %v18015_v22, 4  ;;  %v18020_v40 = vrot.slane %v18019_v59, 4  ;;  %v18022_v35 = vld [vmem:[#allocation87_spill] sm:$0xff] }
 0x73a   :  { %17999 = vst [vmem:[#allocation78_spill] sm:$0xff] %v13911_v46  ;;  %18002 = vst [vmem:[#allocation28_spill] sm:$0xff] %v13916_v47  ;;  %v13923_v55 = vmax.f32 %v18005_v9, %v18006_v58  ;;  %v18017_v9 = vld [vmem:[#allocation56_spill] sm:$0xff]  ;;  %v18023_v46 = vrot.slane %v18022_v35, 4  ;;  %v18027_v47 = vrot.slane %v17889_v12, 4 }
 0x73b   :  { %v13935_v32 = vmax.f32 %v18012_v48, %v18013_v38  ;;  %v13940_v39 = vmax.f32 %v18015_v22, %v18016_v42  ;;  %v13947_v50 = vmax.f32 %v18019_v59, %v18020_v40  ;;  %v18024_v48 = vld [vmem:[#allocation57_spill] sm:$0xff]  ;;  %v18025_v22 = vrot.slane %v17888_v34, 4  ;;  %v18029_v59 = vld [vmem:[#allocation68_spill] sm:$0xff] }
 0x73c   :  { %18007 = vst [vmem:[#allocation79_spill] sm:$0xff] %v13923_v55  ;;  %v18018_v55 = vld [vmem:[#allocation67_spill] sm:$0xff]  ;;  %v13952_v20 = vmax.f32 %v18022_v35, %v18023_v46  ;;  %v13964_v58 = vmax.f32 %v17889_v12, %v18027_v47  ;;  %v18030_v35 = vrot.slane %v17895_v63, 4  ;;  %v18034_v40 = vrot.slane %v13316_v25, 4 }
 0x73d   :  { %18014 = vst [vmem:[#allocation30_spill] sm:$0xff] %v13935_v32  ;;  %18021 = vst [vmem:[#allocation80_spill] sm:$0xff] %v13947_v50  ;;  %v13959_v42 = vmax.f32 %v17888_v34, %v18025_v22  ;;  %v18031_v32 = vrot.slane %v17896_v51, 4  ;;  %v18032_v22 = vld [vmem:[#allocation41_spill] sm:$0xff]  ;;  %v18037_v50 = vrot.slane %v13336_v53, 2  ;;  %v18039_v34 = vrot.slane %v13350_v45, 2 }
 0x73e   :  { %18028 = vst [vmem:[#allocation81_spill] sm:$0xff] %v13964_v58  ;;  %v13971_v46 = vmax.f32 %v17895_v63, %v18030_v35  ;;  %v13989_v63 = vmax.f32 %v13316_v25, %v18034_v40  ;;  %v18035_v35 = vrot.slane %v13321_v43, 2  ;;  %v18041_v40 = vrot.slane %v13365_v15, 2  ;;  %v18166_v58 = vld [vmem:[#allocation42_spill] sm:$0xff] }
 0x73f   :  { %18026 = vst [vmem:[#allocation29_spill] sm:$0xff] %v13959_v42  ;;  %v13976_v38 = vmax.f32 %v17896_v51, %v18031_v32  ;;  %v18033_v42 = vrot.slane %v18032_v22, 2  ;;  %v14006_v47 = vmax.f32 %v13336_v53, %v18037_v50  ;;  %v14018_v32 = vmax.f32 %v13350_v45, %v18039_v34 }
 0x740   :  { %v13994_v51 = vmax.f32 %v13321_v43, %v18035_v35  ;;  %v18038_v43 = vrot.slane %v13345_v62, 4  ;;  %v18040_v53 = vrot.slane %v13359_v7, 4  ;;  %v14030_v25 = vmax.f32 %v13365_v15, %v18041_v40 }
 0x741   :  { %v13982_v12 = vmax.f32 %v18032_v22, %v18033_v42  ;;  %v18036_v42 = vrot.slane %v13330_v23, 4  ;;  %v18042_v45 = vrot.slane %v13374_v2, 4  ;;  %v18044_v15 = vrot.slane %v13387_v11, 4 }
 0x742   :  { %v14013_v35 = vmax.f32 %v13345_v62, %v18038_v43  ;;  %v14025_v50 = vmax.f32 %v13359_v7, %v18040_v53  ;;  %v18045_v43 = vrot.slane %v13392_v14, 2  ;;  %v18048_v53 = vrot.slane %v13405_v49, 2 }
 0x743   :  { %v14001_v22 = vmax.f32 %v13330_v23, %v18036_v42  ;;  %v14037_v34 = vmax.f32 %v13374_v2, %v18042_v45  ;;  %v18043_v42 = vrot.slane %v13379_v44, 2  ;;  %v14049_v40 = vmax.f32 %v13387_v11, %v18044_v15  ;;  %v18056_v15 = vld [vmem:[#allocation40_spill] sm:$0xff] }
 0x744   :  { %v14054_v62 = vmax.f32 %v13392_v14, %v18045_v43  ;;  %v14066_v7 = vmax.f32 %v13405_v49, %v18048_v53  ;;  %v18050_v14 = vrot.slane %v13413_v8, 4  ;;  %v18052_v45 = vrot.slane %v13418_v10, 2  ;;  %v18053_v49 = vld [vmem:[#allocation38_spill] sm:$0xff] }
 0x745   :  { %v14042_v23 = vmax.f32 %v13379_v44, %v18043_v42  ;;  %v18046_v44 = vrot.slane %v13400_v29, 4  ;;  %v18054_v53 = vrot.slane %v18053_v49, 4  ;;  %v18057_v18 = vrot.slane %v18056_v15, 2 }
 0x746   :  { %18049 = vst [vmem:[#allocation82_spill] sm:$0xff] %v14066_v7  ;;  %v14073_v43 = vmax.f32 %v13413_v8, %v18050_v14  ;;  %v14078_v2 = vmax.f32 %v13418_v10, %v18052_v45  ;;  %v18059_v8 = vld [vmem:[#allocation60_spill] sm:$0xff]  ;;  %v18060_v10 = vld [vmem:[#allocation75_spill] sm:$0xff] }
 0x747   :  { %v14061_v42 = vmax.f32 %v13400_v29, %v18046_v44  ;;  %v14085_v11 = vmax.f32 %v18053_v49, %v18054_v53  ;;  %v14090_v37 = vmax.f32 %v18056_v15, %v18057_v18  ;;  %v18061_v45 = vrot.slane %v18060_v10, 4  ;;  %v18063_v44 = vld [vmem:[#allocation16_spill] sm:$0xff]  ;;  %v18090_v49 = vld [vmem:[#allocation45_spill] sm:$0xff] }
 0x748   :  { %18051 = vst [vmem:[#allocation32_spill] sm:$0xff] %v14073_v43  ;;  %v18064_v30 = vrot.slane %v18063_v44, 2  ;;  %v18067_v18 = vrot.slane %v17929_v6, 4  ;;  %v18069_v43 = vrot.slane %v17930_v13, 2 }
 0x749   :  { %18047 = vst [vmem:[#allocation31_spill] sm:$0xff] %v14061_v42  ;;  %18055 = vst [vmem:[#allocation83_spill] sm:$0xff] %v14085_v11  ;;  %v14097_v29 = vmax.f32 %v18060_v10, %v18061_v45  ;;  %v18074_v11 = vld [vmem:[#allocation43_spill] sm:$0xff]  ;;  %v18194_v42 = vld [vmem:[#allocation70_spill] sm:$0xff] }
 0x74a   :  { %18058 = vst [vmem:[#allocation10_spill] sm:$0xff] %v14090_v37  ;;  %v14102_v60 = vmax.f32 %v18063_v44, %v18064_v30  ;;  %v14109_v15 = vmax.f32 %v17929_v6, %v18067_v18  ;;  %v14114_v14 = vmax.f32 %v17930_v13, %v18069_v43  ;;  %v18072_v30 = vrot.slane %v17937_v33, 4  ;;  %v18079_v13 = vld [vmem:[#allocation15_spill] sm:$0xff] }
 0x74b   :  { %18062 = vst [vmem:[#allocation84_spill] sm:$0xff] %v14097_v29  ;;  %v18075_v53 = vrot.slane %v18074_v11, 2  ;;  %v18080_v43 = vrot.slane %v18079_v13, 4  ;;  %v18082_v29 = vld [vmem:[#allocation44_spill] sm:$0xff] }
 0x74c   :  { %18065 = vst [vmem:[#allocation11_spill] sm:$0xff] %v14102_v60  ;;  %18068 = vst [vmem:[#allocation85_spill] sm:$0xff] %v14109_v15  ;;  %v14121_v44 = vmax.f32 %v17937_v33, %v18072_v30  ;;  %v18083_v26 = vrot.slane %v18082_v29, 2  ;;  %v18091_v15 = vrot.slane %v18090_v49, 2 }
 0x74d   :  { %18070 = vst [vmem:[#allocation12_spill] sm:$0xff] %v14114_v14  ;;  %v14126_v19 = vmax.f32 %v18074_v11, %v18075_v53  ;;  %v14133_v45 = vmax.f32 %v18079_v13, %v18080_v43  ;;  %v18087_v11 = vld [vmem:[#allocation18_spill] sm:$0xff] }
 0x74e   :  { %18073 = vst [vmem:[#allocation86_spill] sm:$0xff] %v14121_v44  ;;  %v14138_v10 = vmax.f32 %v18082_v29, %v18083_v26  ;;  %v18088_v53 = vrot.slane %v18087_v11, 4  ;;  %v14150_v6 = vmax.f32 %v18090_v49, %v18091_v15  ;;  %v18095_v26 = vld [vmem:[#allocation46_spill] sm:$0xff]  ;;  %v18103_v49 = vld [vmem:[#allocation47_spill] sm:$0xff] }
 0x74f   :  { %18076 = vst [vmem:[#allocation56_spill] sm:$0xff] %v14126_v19  ;;  %18081 = vst [vmem:[#allocation67_spill] sm:$0xff] %v14133_v45  ;;  %v18096_v29 = vrot.slane %v18095_v26, 4  ;;  %v18098_v14 = vld [vmem:[#allocation22_spill] sm:$0xff]  ;;  %v18104_v15 = vrot.slane %v18103_v49, 4  ;;  %v18106_v19 = vld [vmem:[#allocation21_spill] sm:$0xff] }
 0x750   :  { %18084 = vst [vmem:[#allocation37_spill] sm:$0xff] %v14138_v10  ;;  %v14145_v18 = vmax.f32 %v18087_v11, %v18088_v53  ;;  %18092 = vst [vmem:[#allocation57_spill] sm:$0xff] %v14150_v6  ;;  %v18099_v44 = vrot.slane %v18098_v14, 2  ;;  %v18107_v45 = vrot.slane %v18106_v19, 2  ;;  %v18114_v10 = vld [vmem:[#allocation23_spill] sm:$0xff]  ;;  %v18122_v6 = vld [vmem:[#allocation50_spill] sm:$0xff] }
 0x751   :  { %v14157_v30 = vmax.f32 %v18095_v26, %v18096_v29  ;;  %v14169_v43 = vmax.f32 %v18103_v49, %v18104_v15 }
 0x752   :  { %18089 = vst [vmem:[#allocation87_spill] sm:$0xff] %v14145_v18  ;;  %v14162_v33 = vmax.f32 %v18098_v14, %v18099_v44  ;;  %v14174_v13 = vmax.f32 %v18106_v19, %v18107_v45  ;;  %v18111_v14 = vld [vmem:[#allocation48_spill] sm:$0xff]  ;;  %v18115_v18 = vrot.slane %v18114_v10, 2  ;;  %v18119_v19 = vld [vmem:[#allocation49_spill] sm:$0xff] }
 0x753   :  { %18097 = vst [vmem:[#allocation68_spill] sm:$0xff] %v14157_v30  ;;  %18105 = vst [vmem:[#allocation38_spill] sm:$0xff] %v14169_v43  ;;  %v18112_v44 = vrot.slane %v18111_v14, 4  ;;  %v18120_v45 = vrot.slane %v18119_v19, 4  ;;  %v18123_v30 = vrot.slane %v18122_v6, 2 }
 0x754   :  { %18100 = vst [vmem:[#allocation41_spill] sm:$0xff] %v14162_v33  ;;  %18108 = vst [vmem:[#allocation40_spill] sm:$0xff] %v14174_v13  ;;  %v14186_v11 = vmax.f32 %v18114_v10, %v18115_v18  ;;  %v18127_v10 = vld [vmem:[#allocation26_spill] sm:$0xff]  ;;  %v18130_v33 = vld [vmem:[#allocation51_spill] sm:$0xff] }
 0x755   :  { %v14181_v53 = vmax.f32 %v18111_v14, %v18112_v44  ;;  %v14193_v29 = vmax.f32 %v18119_v19, %v18120_v45  ;;  %v14198_v26 = vmax.f32 %v18122_v6, %v18123_v30  ;;  %v18128_v18 = vrot.slane %v18127_v10, 4  ;;  %v18135_v6 = vld [vmem:[#allocation52_spill] sm:$0xff]  ;;  %v18138_v13 = vld [vmem:[#allocation53_spill] sm:$0xff] }
 0x756   :  { %18116 = vst [vmem:[#allocation75_spill] sm:$0xff] %v14186_v11  ;;  %v18131_v43 = vrot.slane %v18130_v33, 2  ;;  %v18136_v30 = vrot.slane %v18135_v6, 4  ;;  %v18145_v11 = vld [vmem:[#allocation65_spill] sm:$0xff] }
 0x757   :  { %18113 = vst [vmem:[#allocation60_spill] sm:$0xff] %v14181_v53  ;;  %18121 = vst [vmem:[#allocation16_spill] sm:$0xff] %v14193_v29  ;;  %v14205_v15 = vmax.f32 %v18127_v10, %v18128_v18  ;;  %v18139_v53 = vrot.slane %v18138_v13, 2  ;;  %v18146_v29 = vrot.slane %v18145_v11, 2 }
 0x758   :  { %18124 = vst [vmem:[#allocation43_spill] sm:$0xff] %v14198_v26  ;;  %v14210_v49 = vmax.f32 %v18130_v33, %v18131_v43  ;;  %v14217_v44 = vmax.f32 %v18135_v6, %v18136_v30  ;;  %v18142_v33 = vld [vmem:[#allocation54_spill] sm:$0xff]  ;;  %v18147_v6 = vld [vmem:[#allocation79_spill] sm:$0xff] }
 0x759   :  { %18129 = vst [vmem:[#allocation15_spill] sm:$0xff] %v14205_v15  ;;  %v14222_v14 = vmax.f32 %v18138_v13, %v18139_v53  ;;  %v18143_v43 = vrot.slane %v18142_v33, 4  ;;  %v14234_v19 = vmax.f32 %v18145_v11, %v18146_v29  ;;  %v18148_v13 = vld [vmem:[#allocation55_spill] sm:$0xff]  ;;  %v18151_v26 = vld [vmem:[#allocation66_spill] sm:$0xff]  ;;  %v18154_v11 = vrot.slane %v18017_v9, 4 }
 0x75a   :  { %18132 = vst [vmem:[#allocation44_spill] sm:$0xff] %v14210_v49  ;;  %18137 = vst [vmem:[#allocation18_spill] sm:$0xff] %v14217_v44  ;;  %v18149_v53 = vrot.slane %v18148_v13, 4  ;;  %v18152_v15 = vrot.slane %v18151_v26, 2  ;;  %v18156_v44 = vrot.slane %v18018_v55, 2 }
 0x75b   :  { %v14229_v45 = vmax.f32 %v18142_v33, %v18143_v43  ;;  %v18153_v33 = vld [vmem:[#allocation30_spill] sm:$0xff]  ;;  %v14253_v29 = vmax.f32 %v18017_v9, %v18154_v11  ;;  %v6339_v9 = vrot.slane %v18166_v58, 1 }
 0x75c   :  { %v14241_v18 = vmax.f32 %v18148_v13, %v18149_v53  ;;  %v14246_v10 = vmax.f32 %v18151_v26, %v18152_v15  ;;  %v14258_v30 = vmax.f32 %v18018_v55, %v18156_v44  ;;  %v18158_v13 = vld [vmem:[#allocation80_spill] sm:$0xff]  ;;  %v18159_v26 = vrot.slane %v18024_v48, 4 }
 0x75d   :  { %18144 = vst [vmem:[#allocation45_spill] sm:$0xff] %v14229_v45  ;;  %18155 = vst [vmem:[#allocation22_spill] sm:$0xff] %v14253_v29  ;;  %v18160_v45 = vrot.slane %v13644_v17, 2  ;;  %v18162_v55 = vrot.slane %v18029_v59, 4  ;;  %v18165_v29 = vld [vmem:[#allocation20_spill] sm:$0xff] }
 0x75e   :  { %18150 = vst [vmem:[#allocation46_spill] sm:$0xff] %v14241_v18  ;;  %18157 = vst [vmem:[#allocation47_spill] sm:$0xff] %v14258_v30  ;;  %v14265_v15 = vmax.f32 %v18024_v48, %v18159_v26  ;;  %v18163_v18 = vrot.slane %v13657_v5, 2  ;;  %v6338_v11 = vrot.slane %v18165_v29, 1  ;;  %v18169_v29 = vrot.slane %v13683_v54, 2 }
 0x75f   :  { %v14270_v43 = vmax.f32 %v13644_v17, %v18160_v45  ;;  %v14277_v44 = vmax.f32 %v18029_v59, %v18162_v55  ;;  %v18164_v17 = vrot.slane %v13665_v52, 4  ;;  %v18167_v55 = vrot.slane %v13671_v24, 2 }
 0x760   :  { %v14282_v53 = vmax.f32 %v13657_v5, %v18163_v18  ;;  %v18168_v18 = vrot.slane %v13676_v3, 2  ;;  %v14309_v58 = vmax.f32 %v13683_v54, %v18169_v29  ;;  %v18170_v59 = vrot.slane %v13688_v0, 2 }
 0x761   :  { %v14289_v45 = vmax.f32 %v13665_v52, %v18164_v17  ;;  %v14297_v5 = vmax.f32 %v13671_v24, %v18167_v55  ;;  %v6340_v17 = vsel %vm537_vm3, %v6338_v11, %v6339_v9  ;;  %v18172_v54 = vrot.slane %v13700_v61, 2 }
 0x762   :  { %v14302_v26 = vmax.f32 %v13676_v3, %v18168_v18  ;;  %v14315_v24 = vmax.f32 %v13688_v0, %v18170_v59  ;;  %6844 = vrot.lane.b32.xlu1 %v6340_v17, %s8845_s24  ;;  %v18171_v18 = vrot.slane %v13695_v36, 2  ;;  %6635 = vrot.lane.b32.xlu0 %v6340_v17, %s8842_s3  ;;  %v18173_v59 = vrot.slane %v13707_v28, 2 }
 0x763   :  { %v14328_v9 = vmax.f32 %v13700_v61, %v18172_v54  ;;  %v18174_v3 = vrot.slane %v13712_v56, 2  ;;  %v18175_v54 = vrot.slane %v13719_v1, 2  ;;  %v18176_v0 = vrot.slane %v13724_v4, 2 }
 0x764   :  { %v14323_v52 = vmax.f32 %v13695_v36, %v18171_v18  ;;  %v14336_v29 = vmax.f32 %v13707_v28, %v18173_v59  ;;  %v18178_v61 = vrot.slane %v13736_v21, 2  ;;  %v18181_v59 = vrot.slane %v13748_v27, 2 }
 0x765   :  { %v14341_v36 = vmax.f32 %v13712_v56, %v18174_v3  ;;  %v14348_v11 = vmax.f32 %v13719_v1, %v18175_v54  ;;  %v14353_v55 = vmax.f32 %v13724_v4, %v18176_v0  ;;  %v18177_v56 = vrot.slane %v13731_v16, 2 }
 0x766   :  { %v14365_v18 = vmax.f32 %v13736_v21, %v18178_v61  ;;  %v18179_v4 = vrot.slane %v13743_v41, 2  ;;  %v14377_v28 = vmax.f32 %v13748_v27, %v18181_v59  ;;  %6384 = vrot.lane.b32.xlu1 %v6340_v17, %s8835_s28  ;;  %v18183_v21 = vld [vmem:[#allocation19_spill] sm:$0xff]  ;;  %v18184_v61 = vld [vmem:[#allocation58_spill] sm:$0xff]  ;;  %v18190_v27 = vld [vmem:[#allocation32_spill] sm:$0xff] }
 0x767   :  { %v14360_v3 = vmax.f32 %v13731_v16, %v18177_v56  ;;  %6706 = vrot.lane.b32.xlu0 %v18183_v21, %s8843_s12  ;;  %v18185_v54 = vrot.slane %v18184_v61, 2  ;;  %v18191_v56 = vld [vmem:[#allocation59_spill] sm:$0xff]  ;;  %v18200_v16 = vrot.slane %v13784_v31, 2 }
 0x768   :  { %v14372_v0 = vmax.f32 %v13743_v41, %v18179_v4  ;;  %18182 = vst [vmem:[#allocation48_spill] sm:$0xff] %v14377_v28  ;;  %v18187_v41 = vld [vmem:[#allocation69_spill] sm:$0xff]  ;;  %v18192_v7 = vrot.slane %v18191_v56, 2  ;;  %v18195_v28 = vrot.slane %v18194_v42, 2 }
 0x769   :  { %v14387_v1 = vmax.f32 %v18184_v61, %v18185_v54  ;;  %v18188_v4 = vrot.slane %v18187_v41, 2  ;;  %v14416_v59 = vmax.f32 %v13784_v31, %v18200_v16  ;;  %v18211_v31 = vld [vmem:[#allocation72_spill] sm:$0xff] }
 0x76a   :  { %18180 = vst [vmem:[#allocation21_spill] sm:$0xff] %v14372_v0  ;;  %v14399_v17 = vmax.f32 %v18191_v56, %v18192_v7  ;;  %v14404_v0 = vmax.f32 %v18194_v42, %v18195_v28  ;;  %v18203_v42 = vld [vmem:[#allocation71_spill] sm:$0xff]  ;;  %6497 = vrot.lane.b32.xlu1 %v18183_v21, %s8839_s22  ;;  %v18212_v16 = vrot.slane %v18211_v31, 2  ;;  %v18214_v56 = vld [vmem:[#allocation62_spill] sm:$0xff]  ;;  %v18222_v21 = vld [vmem:[#allocation36_spill] sm:$0xff] }
 0x76b   :  { %18186 = vst [vmem:[#allocation23_spill] sm:$0xff] %v14387_v1  ;;  %v14392_v48 = vmax.f32 %v18187_v41, %v18188_v4  ;;  %v18198_v41 = vrot.slane %v18059_v8, 2  ;;  %18201 = vst [vmem:[#allocation52_spill] sm:$0xff] %v14416_v59  ;;  %v18204_v28 = vrot.slane %v18203_v42, 2  ;;  %v18206_v1 = vld [vmem:[#allocation61_spill] sm:$0xff]  ;;  %v18238_v7 = vld [vmem:[#allocation39_spill] sm:$0xff] }
 0x76c   :  { %18193 = vst [vmem:[#allocation50_spill] sm:$0xff] %v14399_v17  ;;  %18196 = vst [vmem:[#allocation26_spill] sm:$0xff] %v14404_v0  ;;  %v18207_v37 = vrot.slane %v18206_v1, 2  ;;  %v14437_v17 = vmax.f32 %v18211_v31, %v18212_v16 }
 0x76d   :  { %18189 = vst [vmem:[#allocation49_spill] sm:$0xff] %v14392_v48  ;;  %v14411_v4 = vmax.f32 %v18059_v8, %v18198_v41  ;;  %v14423_v61 = vmax.f32 %v18203_v42, %v18204_v28  ;;  %v18215_v42 = vrot.slane %v18214_v56, 2  ;;  %v18219_v41 = vld [vmem:[#allocation73_spill] sm:$0xff] }
 0x76e   :  { %v14428_v54 = vmax.f32 %v18206_v1, %v18207_v37  ;;  %18213 = vst [vmem:[#allocation65_spill] sm:$0xff] %v14437_v17  ;;  %v18220_v8 = vrot.slane %v18219_v41, 2  ;;  %v18239_v17 = vrot.slane %v18238_v7, 2 }
 0x76f   :  { %18199 = vst [vmem:[#allocation51_spill] sm:$0xff] %v14411_v4  ;;  %18205 = vst [vmem:[#allocation53_spill] sm:$0xff] %v14423_v61  ;;  %v14442_v28 = vmax.f32 %v18214_v56, %v18215_v42  ;;  %v18223_v4 = vrot.slane %v18222_v21, 2  ;;  %v18227_v56 = vld [vmem:[#allocation88_spill] sm:$0xff] }
 0x770   :  { %18208 = vst [vmem:[#allocation54_spill] sm:$0xff] %v14428_v54  ;;  %v14449_v0 = vmax.f32 %v18219_v41, %v18220_v8  ;;  %v18228_v42 = vrot.slane %v18227_v56, 2  ;;  %v18230_v54 = vld [vmem:[#allocation63_spill] sm:$0xff]  ;;  %v14478_v31 = vmax.f32 %v18238_v7, %v18239_v17  ;;  %v18251_v17 = vld [vmem:[#allocation76_spill] sm:$0xff] }
 0x771   :  { %18216 = vst [vmem:[#allocation79_spill] sm:$0xff] %v14442_v28  ;;  %v14454_v60 = vmax.f32 %v18222_v21, %v18223_v4  ;;  %v18231_v1 = vrot.slane %v18230_v54, 2  ;;  %v18235_v4 = vld [vmem:[#allocation74_spill] sm:$0xff]  ;;  %v18246_v28 = vld [vmem:[#allocation64_spill] sm:$0xff]  ;;  %v18252_v7 = vrot.slane %v18251_v17, 2 }
 0x772   :  { %18221 = vst [vmem:[#allocation55_spill] sm:$0xff] %v14449_v0  ;;  %v14461_v37 = vmax.f32 %v18227_v56, %v18228_v42  ;;  %v18236_v21 = vrot.slane %v18235_v4, 2  ;;  %18240 = vst [vmem:[#allocation42_spill] sm:$0xff] %v14478_v31  ;;  %v18247_v0 = vrot.slane %v18246_v28, 2  ;;  %v18270_v31 = vld [vmem:[#allocation13_spill] sm:$0xff] }
 0x773   :  { %18224 = vst [vmem:[#allocation66_spill] sm:$0xff] %v14454_v60  ;;  %v14466_v61 = vmax.f32 %v18230_v54, %v18231_v1  ;;  %v18243_v54 = vld [vmem:[#allocation89_spill] sm:$0xff]  ;;  %v14497_v42 = vmax.f32 %v18251_v17, %v18252_v7 }
 0x774   :  { %18229 = vst [vmem:[#allocation30_spill] sm:$0xff] %v14461_v37  ;;  %v14473_v16 = vmax.f32 %v18235_v4, %v18236_v21  ;;  %v18244_v1 = vrot.slane %v18243_v54, 2  ;;  %v14490_v8 = vmax.f32 %v18246_v28, %v18247_v0  ;;  %v18254_v60 = vld [vmem:[#allocation17_spill] sm:$0xff]  ;;  %v18259_v0 = vld [vmem:[#allocation14_spill] sm:$0xff] }
 0x775   :  { %18232 = vst [vmem:[#allocation80_spill] sm:$0xff] %v14466_v61  ;;  %18253 = vst [vmem:[#allocation69_spill] sm:$0xff] %v14497_v42  ;;  %v18255_v37 = vrot.slane %v18254_v60, 2  ;;  %v18260_v28 = vrot.slane %v18259_v0, 2  ;;  %v18262_v61 = vld [vmem:[#allocation24_spill] sm:$0xff] }
 0x776   :  { %18237 = vst [vmem:[#allocation20_spill] sm:$0xff] %v14473_v16  ;;  %v14485_v41 = vmax.f32 %v18243_v54, %v18244_v1  ;;  %18248 = vst [vmem:[#allocation58_spill] sm:$0xff] %v14490_v8  ;;  %v18263_v16 = vrot.slane %v18262_v61, 2  ;;  %v18276_v8 = vld [vmem:[#allocation27_spill] sm:$0xff] }
 0x777   :  { %v14502_v56 = vmax.f32 %v18254_v60, %v18255_v37  ;;  %v14509_v21 = vmax.f32 %v18259_v0, %v18260_v28  ;;  %v18267_v60 = vld [vmem:[#allocation77_spill] sm:$0xff]  ;;  %v18277_v42 = vrot.slane %v18276_v8, 2 }
 0x778   :  { %18245 = vst [vmem:[#allocation19_spill] sm:$0xff] %v14485_v41  ;;  %v14514_v4 = vmax.f32 %v18262_v61, %v18263_v16  ;;  %v18268_v37 = vrot.slane %v18267_v60, 2  ;;  %v18271_v41 = vrot.slane %v18270_v31, 2  ;;  %v18273_v61 = vld [vmem:[#allocation25_spill] sm:$0xff] }
 0x779   :  { %18256 = vst [vmem:[#allocation32_spill] sm:$0xff] %v14502_v56  ;;  %18261 = vst [vmem:[#allocation59_spill] sm:$0xff] %v14509_v21  ;;  %v18274_v16 = vrot.slane %v18273_v61, 2  ;;  %v14538_v17 = vmax.f32 %v18276_v8, %v18277_v42  ;;  %v18282_v21 = vld [vmem:[#allocation28_spill] sm:$0xff]  ;;  %v18285_v8 = vrot.slane %v18147_v6, 2 }
 0x77a   :  { %18264 = vst [vmem:[#allocation70_spill] sm:$0xff] %v14514_v4  ;;  %v14521_v1 = vmax.f32 %v18267_v60, %v18268_v37  ;;  %v14526_v54 = vmax.f32 %v18270_v31, %v18271_v41  ;;  %v18278_v60 = vld [vmem:[#allocation18_spill] sm:$0xff]  ;;  %v18283_v49 = vrot.slane %v18282_v21, 2 }
 0x77b   :  { %v14533_v7 = vmax.f32 %v18273_v61, %v18274_v16  ;;  %v18279_v31 = vld [vmem:[#allocation78_spill] sm:$0xff]  ;;  %v18284_v61 = vld [vmem:[#allocation45_spill] sm:$0xff]  ;;  %v14557_v42 = vmax.f32 %v18147_v6, %v18285_v8 }
 0x77c   :  { %18269 = vst [vmem:[#allocation71_spill] sm:$0xff] %v14521_v1  ;;  %v18280_v41 = vrot.slane %v18279_v31, 2  ;;  %v14550_v0 = vmax.f32 %v18282_v21, %v18283_v49  ;;  %v18287_v1 = vrot.slane %v13928_v57, 2  ;;  %v18289_v49 = vrot.slane %v18153_v33, 2 }
 0x77d   :  { %18275 = vst [vmem:[#allocation61_spill] sm:$0xff] %v14533_v7  ;;  %18286 = vst [vmem:[#allocation62_spill] sm:$0xff] %v14557_v42  ;;  %v18290_v7 = vrot.slane %v13940_v39, 2  ;;  %v18296_v42 = vld [vmem:[#allocation81_spill] sm:$0xff] }
 0x77e   :  { %v14545_v28 = vmax.f32 %v18279_v31, %v18280_v41  ;;  %v14562_v37 = vmax.f32 %v13928_v57, %v18287_v1  ;;  %v18288_v31 = vld [vmem:[#allocation46_spill] sm:$0xff]  ;;  %v14569_v21 = vmax.f32 %v18153_v33, %v18289_v49  ;;  %v18292_v57 = vrot.slane %v18158_v13, 2 }
 0x77f   :  { %v14574_v16 = vmax.f32 %v13940_v39, %v18290_v7  ;;  %v18294_v39 = vld [vmem:[#allocation29_spill] sm:$0xff]  ;;  %v18297_v30 = vrot.slane %v18296_v42, 2  ;;  %v18299_v49 = vrot.slane %v13976_v38, 2 }
 0x780   :  { %18281 = vst [vmem:[#allocation72_spill] sm:$0xff] %v14545_v28  ;;  %v14581_v1 = vmax.f32 %v18158_v13, %v18292_v57  ;;  %v18293_v28 = vrot.slane %v13952_v20, 2  ;;  %v18295_v7 = vrot.slane %v18294_v39, 2  ;;  %v18302_v13 = vrot.slane %v13989_v63, 2 }
 0x781   :  { %v14598_v6 = vmax.f32 %v18296_v42, %v18297_v30  ;;  %v14610_v33 = vmax.f32 %v13976_v38, %v18299_v49  ;;  %v18306_v57 = vrot.slane %v14006_v47, 1 }
 0x782   :  { %v14586_v41 = vmax.f32 %v13952_v20, %v18293_v28  ;;  %v14593_v8 = vmax.f32 %v18294_v39, %v18295_v7  ;;  %v18298_v20 = vrot.slane %v13971_v46, 2  ;;  %v18300_v7 = vrot.slane %v13982_v12, 1 }
 0x783   :  { %v14640_v42 = vmax.f32 %v14006_v47, %v18306_v57  ;;  %v18309_v39 = vrot.slane %v14018_v32, 1  ;;  %v18311_v47 = vrot.slane %v14025_v50, 2 }
 0x784   :  { %v14605_v28 = vmax.f32 %v13971_v46, %v18298_v20  ;;  %v14616_v30 = vmax.f32 %v13982_v12, %v18300_v7  ;;  %v14623_v46 = vmax.f32 %v13989_v63, %v18302_v13  ;;  %v18303_v20 = vrot.slane %v13994_v51, 1 }
 0x785   :  { %v18305_v12 = vrot.slane %v14001_v22, 2  ;;  %18307 = vst [vmem:[#allocation88_spill] sm:$0xff] %v14640_v42  ;;  %v14652_v49 = vmax.f32 %v14018_v32, %v18309_v39  ;;  %v14659_v57 = vmax.f32 %v14025_v50, %v18311_v47  ;;  %v18312_v13 = vrot.slane %v14030_v25, 1  ;;  %v18324_v47 = vld [vmem:[#allocation82_spill] sm:$0xff] }
 0x786   :  { %18301 = vst [vmem:[#allocation73_spill] sm:$0xff] %v14616_v30  ;;  %v14628_v38 = vmax.f32 %v13994_v51, %v18303_v20  ;;  %v18308_v51 = vrot.slane %v14013_v35, 2  ;;  %v18314_v32 = vrot.slane %v14037_v34, 2  ;;  %v18337_v42 = vld [vmem:[#allocation10_spill] sm:$0xff]  ;;  %v18344_v30 = vld [vmem:[#allocation11_spill] sm:$0xff] }
 0x787   :  { %v14635_v7 = vmax.f32 %v14001_v22, %v18305_v12  ;;  %18310 = vst [vmem:[#allocation63_spill] sm:$0xff] %v14652_v49  ;;  %v14664_v63 = vmax.f32 %v14030_v25, %v18312_v13  ;;  %v18315_v12 = vrot.slane %v14042_v23, 1  ;;  %v18317_v25 = vrot.slane %v14049_v40, 2  ;;  %v18321_v49 = vld [vmem:[#allocation48_spill] sm:$0xff] }
 0x788   :  { %18304 = vst [vmem:[#allocation36_spill] sm:$0xff] %v14628_v38  ;;  %v14647_v20 = vmax.f32 %v14013_v35, %v18308_v51  ;;  %v14671_v39 = vmax.f32 %v14037_v34, %v18314_v32  ;;  %v18318_v51 = vrot.slane %v14054_v62, 1  ;;  %v18320_v34 = vld [vmem:[#allocation21_spill] sm:$0xff]  ;;  %v18330_v38 = vrot.slane %v14078_v2, 1 }
 0x789   :  { %18313 = vst [vmem:[#allocation74_spill] sm:$0xff] %v14664_v63  ;;  %v14676_v22 = vmax.f32 %v14042_v23, %v18315_v12  ;;  %v14683_v13 = vmax.f32 %v14049_v40, %v18317_v25  ;;  %v18322_v23 = vld [vmem:[#allocation31_spill] sm:$0xff] }
 0x78a   :  { %v14688_v35 = vmax.f32 %v14054_v62, %v18318_v51  ;;  %v18323_v12 = vrot.slane %v18322_v23, 2  ;;  %v18327_v40 = vld [vmem:[#allocation23_spill] sm:$0xff]  ;;  %v18328_v62 = vrot.slane %v18190_v27, 2  ;;  %v14712_v32 = vmax.f32 %v14078_v2, %v18330_v38  ;;  %v18341_v2 = vld [vmem:[#allocation84_spill] sm:$0xff] }
 0x78b   :  { %18316 = vst [vmem:[#allocation39_spill] sm:$0xff] %v14676_v22  ;;  %v18325_v22 = vrot.slane %v18324_v47, 1  ;;  %v18342_v38 = vrot.slane %v18341_v2, 2 }
 0x78c   :  { %18319 = vst [vmem:[#allocation89_spill] sm:$0xff] %v14688_v35  ;;  %v14695_v50 = vmax.f32 %v18322_v23, %v18323_v12  ;;  %v14707_v51 = vmax.f32 %v18190_v27, %v18328_v62  ;;  %18331 = vst [vmem:[#allocation17_spill] sm:$0xff] %v14712_v32  ;;  %v18345_v32 = vrot.slane %v18344_v30, 1  ;;  %v18360_v23 = vld [vmem:[#allocation56_spill] sm:$0xff]  ;;  %v18368_v27 = vld [vmem:[#allocation37_spill] sm:$0xff] }
 0x78d   :  { %v14700_v63 = vmax.f32 %v18324_v47, %v18325_v22  ;;  %v18334_v22 = vld [vmem:[#allocation83_spill] sm:$0xff]  ;;  %v14731_v12 = vmax.f32 %v18341_v2, %v18342_v38  ;;  %v18384_v2 = vld [vmem:[#allocation41_spill] sm:$0xff] }
 0x78e   :  { %18329 = vst [vmem:[#allocation76_spill] sm:$0xff] %v14707_v51  ;;  %v18335_v47 = vrot.slane %v18334_v22, 2  ;;  %v14736_v35 = vmax.f32 %v18344_v30, %v18345_v32  ;;  %v18352_v51 = vld [vmem:[#allocation12_spill] sm:$0xff]  ;;  %v18357_v30 = vld [vmem:[#allocation86_spill] sm:$0xff] }
 0x78f   :  { %18326 = vst [vmem:[#allocation64_spill] sm:$0xff] %v14700_v63  ;;  %v18338_v63 = vrot.slane %v18337_v42, 1  ;;  %18343 = vst [vmem:[#allocation77_spill] sm:$0xff] %v14731_v12  ;;  %v18358_v32 = vrot.slane %v18357_v30, 2 }
 0x790   :  { %v14719_v25 = vmax.f32 %v18334_v22, %v18335_v47  ;;  %18346 = vst [vmem:[#allocation13_spill] sm:$0xff] %v14736_v35  ;;  %v18361_v35 = vrot.slane %v18360_v23, 1  ;;  %v18376_v22 = vld [vmem:[#allocation57_spill] sm:$0xff] }
 0x791   :  { %v14724_v48 = vmax.f32 %v18337_v42, %v18338_v63  ;;  %v18349_v42 = vld [vmem:[#allocation85_spill] sm:$0xff]  ;;  %v14755_v47 = vmax.f32 %v18357_v30, %v18358_v32  ;;  %v18399_v30 = vld [vmem:[#allocation75_spill] sm:$0xff] }
 0x792   :  { %18336 = vst [vmem:[#allocation14_spill] sm:$0xff] %v14719_v25  ;;  %v18350_v63 = vrot.slane %v18349_v42, 2  ;;  %v14760_v25 = vmax.f32 %v18360_v23, %v18361_v35  ;;  %v18373_v35 = vld [vmem:[#allocation87_spill] sm:$0xff] }
 0x793   :  { %18339 = vst [vmem:[#allocation24_spill] sm:$0xff] %v14724_v48  ;;  %v18353_v48 = vrot.slane %v18352_v51, 1  ;;  %18359 = vst [vmem:[#allocation18_spill] sm:$0xff] %v14755_v47  ;;  %v18374_v23 = vrot.slane %v18373_v35, 2 }
 0x794   :  { %v14743_v62 = vmax.f32 %v18349_v42, %v18350_v63  ;;  %18362 = vst [vmem:[#allocation78_spill] sm:$0xff] %v14760_v25  ;;  %v18377_v25 = vrot.slane %v18376_v22, 1  ;;  %v18392_v42 = vld [vmem:[#allocation40_spill] sm:$0xff] }
 0x795   :  { %v14748_v59 = vmax.f32 %v18352_v51, %v18353_v48  ;;  %v18365_v48 = vld [vmem:[#allocation67_spill] sm:$0xff]  ;;  %v14779_v63 = vmax.f32 %v18373_v35, %v18374_v23 }
 0x796   :  { %18351 = vst [vmem:[#allocation25_spill] sm:$0xff] %v14743_v62  ;;  %v18366_v51 = vrot.slane %v18365_v48, 2  ;;  %v14784_v62 = vmax.f32 %v18376_v22, %v18377_v25  ;;  %v18387_v35 = vld [vmem:[#allocation19_spill] sm:$0xff]  ;;  %v18389_v25 = vld [vmem:[#allocation38_spill] sm:$0xff] }
 0x797   :  { %18354 = vst [vmem:[#allocation27_spill] sm:$0xff] %v14748_v59  ;;  %v18369_v59 = vrot.slane %v18368_v27, 1  ;;  %18375 = vst [vmem:[#allocation46_spill] sm:$0xff] %v14779_v63  ;;  %v18390_v22 = vrot.slane %v18389_v25, 2 }
 0x798   :  { %v14767_v38 = vmax.f32 %v18365_v48, %v18366_v51  ;;  %18378 = vst [vmem:[#allocation29_spill] sm:$0xff] %v14784_v62  ;;  %v18379_v48 = vld [vmem:[#allocation20_spill] sm:$0xff]  ;;  %v18393_v62 = vrot.slane %v18392_v42, 1 }
 0x799   :  { %v14772_v12 = vmax.f32 %v18368_v27, %v18369_v59  ;;  %v18381_v59 = vld [vmem:[#allocation68_spill] sm:$0xff]  ;;  %v14803_v51 = vmax.f32 %v18389_v25, %v18390_v22  ;;  %v18402_v25 = vld [vmem:[#allocation59_spill] sm:$0xff] }
 0x79a   :  { %18367 = vst [vmem:[#allocation28_spill] sm:$0xff] %v14767_v38  ;;  %v18382_v27 = vrot.slane %v18381_v59, 2  ;;  %v14808_v38 = vmax.f32 %v18392_v42, %v18393_v62  ;;  %v18403_v62 = vld [vmem:[#allocation16_spill] sm:$0xff] }
 0x79b   :  { %18370 = vst [vmem:[#allocation45_spill] sm:$0xff] %v14772_v12  ;;  %v18385_v12 = vrot.slane %v18384_v2, 1  ;;  %18391 = vst [vmem:[#allocation48_spill] sm:$0xff] %v14803_v51  ;;  %v18404_v42 = vrot.slane %v18403_v62, 2  ;;  %v18412_v51 = vld [vmem:[#allocation44_spill] sm:$0xff] }
 0x79c   :  { %v14791_v32 = vmax.f32 %v18381_v59, %v18382_v27  ;;  %18394 = vst [vmem:[#allocation31_spill] sm:$0xff] %v14808_v38  ;;  %v18395_v59 = vld [vmem:[#allocation69_spill] sm:$0xff] }
 0x79d   :  { %v14796_v47 = vmax.f32 %v18384_v2, %v18385_v12  ;;  %v18396_v12 = vld [vmem:[#allocation60_spill] sm:$0xff]  ;;  %v14827_v27 = vmax.f32 %v18403_v62, %v18404_v42  ;;  %v18415_v62 = vld [vmem:[#allocation61_spill] sm:$0xff]  ;;  %v18421_v42 = vrot.slane %v18284_v61, 2 }
 0x79e   :  { %18383 = vst [vmem:[#allocation81_spill] sm:$0xff] %v14791_v32  ;;  %v18397_v2 = vrot.slane %v18396_v12, 2  ;;  %v18406_v32 = vld [vmem:[#allocation43_spill] sm:$0xff] }
 0x79f   :  { %18386 = vst [vmem:[#allocation21_spill] sm:$0xff] %v14796_v47  ;;  %v18400_v47 = vrot.slane %v18399_v30, 1  ;;  %18405 = vst [vmem:[#allocation83_spill] sm:$0xff] %v14827_v27  ;;  %v18407_v38 = vrot.slane %v18406_v32, 1  ;;  %v18425_v27 = vrot.slane %v18288_v31, 2 }
 0x7a0   :  { %v14815_v23 = vmax.f32 %v18396_v12, %v18397_v2  ;;  %v18409_v12 = vld [vmem:[#allocation71_spill] sm:$0xff] }
 0x7a1   :  { %v14820_v63 = vmax.f32 %v18399_v30, %v18400_v47  ;;  %v14832_v56 = vmax.f32 %v18406_v32, %v18407_v38  ;;  %v18410_v47 = vld [vmem:[#allocation15_spill] sm:$0xff]  ;;  %v18416_v38 = vrot.slane %v18278_v60, 2 }
 0x7a2   :  { %18398 = vst [vmem:[#allocation82_spill] sm:$0xff] %v14815_v23  ;;  %v18411_v30 = vrot.slane %v18410_v47, 2  ;;  %v18417_v23 = vrot.slane %v14222_v14, 1 }
 0x7a3   :  { %18401 = vst [vmem:[#allocation23_spill] sm:$0xff] %v14820_v63  ;;  %18408 = vst [vmem:[#allocation10_spill] sm:$0xff] %v14832_v56  ;;  %v18413_v63 = vrot.slane %v18412_v51, 1  ;;  %v14851_v32 = vmax.f32 %v18278_v60, %v18416_v38  ;;  %v14868_v60 = vmax.f32 %v18284_v61, %v18421_v42  ;;  %v18422_v38 = vrot.slane %v14234_v19, 1 }
 0x7a4   :  { %v14839_v22 = vmax.f32 %v18410_v47, %v18411_v30  ;;  %v14856_v2 = vmax.f32 %v14222_v14, %v18417_v23  ;;  %v6994_v47 = vld [vmem:[%s16951_s4 + $0x78] sm:$0xff]  ;;  %v18424_v23 = vld [vmem:[#allocation62_spill] sm:$0xff]  ;;  %v18426_v61 = vrot.slane %v14246_v10, 1 }
 0x7a5   :  { %v14844_v4 = vmax.f32 %v18412_v51, %v18413_v63  ;;  %v14861_v63 = vld [vmem:[#allocation4 + $0xa0] sm:$0xff]  ;;  %v18420_v51 = vld [vmem:[#allocation72_spill] sm:$0xff]  ;;  %v14873_v14 = vmax.f32 %v14234_v19, %v18422_v38  ;;  %7046 = vmatpush1.msra.mxu1 %v6994_v47  ;;  %v18428_v19 = vmov 0.0   ;;  %v18435_v38 = vrot.slane %v14270_v43, 1 }
 0x7a6   :  { %18418 = vst [vmem:[#allocation11_spill] sm:$0xff] %v14856_v2  ;;  %18419 = vst [vmem:[#allocation85_spill] sm:$0xff] %v14861_v63  ;;  %v14882_v2 = vmax.f32 %v18288_v31, %v18425_v27  ;;  %v14887_v42 = vmax.f32 %v14246_v10, %v18426_v61  ;;  %7047 = vmatprep.subr.mxu1 %v18428_v19  ;;  %v18434_v61 = vrot.slane %v14265_v15, 2 }
 0x7a7   :  { %18414 = vst [vmem:[#allocation84_spill] sm:$0xff] %v14844_v4  ;;  %18423 = vst [vmem:[#allocation12_spill] sm:$0xff] %v14873_v14  ;;  %v18431_v14 = vld [vmem:[#allocation47_spill] sm:$0xff] }
 0x7a8   :  { %6292 = vst.msk [vmem:[#allocation5 + $0x80] sm:$0xff] %vm3618_vm14, %v14861_v63  ;;  %18427 = vst [vmem:[#allocation86_spill] sm:$0xff] %v14887_v42  ;;  %v18429_v63 = vld [vmem:[#allocation22_spill] sm:$0xff]  ;;  %v18432_v56 = vrot.slane %v18431_v14, 1  ;;  %v14907_v47 = vmax.f32 %v14265_v15, %v18434_v61  ;;  %v14912_v42 = vmax.f32 %v14270_v43, %v18435_v38  ;;  %v18437_v15 = vrot.slane %v14277_v44, 2 }
 0x7a9   :  { %v18430_v4 = vrot.slane %v18429_v63, 2  ;;  %v18438_v43 = vrot.slane %v14282_v53, 1 }
 0x7aa   :  { %v14900_v31 = vmax.f32 %v18431_v14, %v18432_v56  ;;  %18436 = vst [vmem:[#allocation67_spill] sm:$0xff] %v14912_v42  ;;  %v6992_v56 = vld [vmem:[%s16951_s4 + $0x68] sm:$0xff]  ;;  %v14925_v61 = vmax.f32 %v14277_v44, %v18437_v15  ;;  %v18441_v14 = vrot.slane %v14297_v5, 1 }
 0x7ab   :  { %v14895_v30 = vmax.f32 %v18429_v63, %v18430_v4  ;;  %v6993_v4 = vld [vmem:[%s16951_s4 + $0x70] sm:$0xff]  ;;  %v14930_v38 = vmax.f32 %v14282_v53, %v18438_v43  ;;  %v18442_v53 = vrot.slane %v14302_v26, 1  ;;  %v18444_v43 = vrot.slane %v14309_v58, 1 }
 0x7ac   :  { %18433 = vst [vmem:[#allocation56_spill] sm:$0xff] %v14900_v31  ;;  %7048 = vmatpush1.msra.mxu1 %v6993_v4  ;;  %v18440_v31 = vrot.slane %v14289_v45, 2  ;;  %v14942_v44 = vmax.f32 %v14297_v5, %v18441_v14  ;;  %v18448_v14 = vrot.slane %v14323_v52, 1  ;;  %v18456_v5 = vrot.slane %v14353_v55, 1 }
 0x7ad   :  { %18439 = vst [vmem:[#allocation37_spill] sm:$0xff] %v14930_v38  ;;  %7049 = vmatprep.subr.mxu1 %v18428_v19  ;;  %v14948_v4 = vmax.f32 %v14302_v26, %v18442_v53  ;;  %v14954_v27 = vmax.f32 %v14309_v58, %v18444_v43  ;;  %v18449_v53 = vrot.slane %v14328_v9, 1 }
 0x7ae   :  { %v14937_v63 = vmax.f32 %v14289_v45, %v18440_v31  ;;  %v18446_v45 = vrot.slane %v14315_v24, 1  ;;  %7050 = vmatpush1.msra.mxu1 %v6992_v56  ;;  %v14965_v26 = vmax.f32 %v14323_v52, %v18448_v14  ;;  %v6990_v56 = vld [vmem:[%s16951_s4 + $0x58] sm:$0xff]  ;;  %v18451_v52 = vrot.slane %v14336_v29, 1 }
 0x7af   :  { %18443 = vst [vmem:[#allocation87_spill] sm:$0xff] %v14948_v4  ;;  %18445 = vst [vmem:[#allocation57_spill] sm:$0xff] %v14954_v27  ;;  %v14970_v15 = vmax.f32 %v14328_v9, %v18449_v53  ;;  %7051 = vmatprep.subr.mxu1 %v18428_v19  ;;  %v18453_v9 = vrot.slane %v14341_v36, 1  ;;  %v18455_v53 = vrot.slane %v14348_v11, 1  ;;  %v14999_v10 = vmax.f32 %v14353_v55, %v18456_v5  ;;  %v18518_v4 = vld [vmem:[#allocation58_spill] sm:$0xff] }
 0x7b0   :  { %v14959_v31 = vmax.f32 %v14315_v24, %v18446_v45  ;;  %v6991_v24 = vld [vmem:[%s16951_s4 + $0x60] sm:$0xff]  ;;  %v14983_v43 = vmax.f32 %v14336_v29, %v18451_v52  ;;  %v18458_v52 = vrot.slane %v14360_v3, 1  ;;  %v18463_v5 = vrot.slane %v18321_v49, 1 }
 0x7b1   :  { %18450 = vst [vmem:[#allocation68_spill] sm:$0xff] %v14970_v15  ;;  %v14988_v45 = vmax.f32 %v14341_v36, %v18453_v9  ;;  %v14994_v58 = vmax.f32 %v14348_v11, %v18455_v53  ;;  %7052 = vmatpush1.msra.mxu1 %v6991_v24  ;;  %18457 = vst [vmem:[#allocation38_spill] sm:$0xff] %v14999_v10  ;;  %v18460_v9 = vrot.slane %v14365_v18, 1  ;;  %v18462_v24 = vrot.slane %v18320_v34, 1 }
 0x7b2   :  { %18447 = vst [vmem:[#allocation20_spill] sm:$0xff] %v14959_v31  ;;  %18452 = vst [vmem:[#allocation41_spill] sm:$0xff] %v14983_v43  ;;  %v15005_v36 = vmax.f32 %v14360_v3, %v18458_v52  ;;  %7053 = vmatprep.subr.mxu1 %v18428_v19  ;;  %v15022_v53 = vmax.f32 %v18321_v49, %v18463_v5  ;;  %v18473_v5 = vld [vmem:[#allocation26_spill] sm:$0xff]  ;;  %v18477_v3 = vld [vmem:[#allocation51_spill] sm:$0xff] }
 0x7b3   :  { %18454 = vst [vmem:[#allocation19_spill] sm:$0xff] %v14988_v45  ;;  %v15010_v14 = vmax.f32 %v14365_v18, %v18460_v9  ;;  %v15017_v55 = vmax.f32 %v18320_v34, %v18462_v24  ;;  %7054 = vmatpush1.msra.mxu1 %v6990_v56  ;;  %v18465_v18 = vrot.slane %v18327_v40, 1  ;;  %v18467_v9 = vld [vmem:[#allocation49_spill] sm:$0xff]  ;;  %v18470_v34 = vld [vmem:[#allocation76_spill] sm:$0xff] }
 0x7b4   :  { %18459 = vst [vmem:[#allocation40_spill] sm:$0xff] %v15005_v36  ;;  %18464 = vst [vmem:[#allocation60_spill] sm:$0xff] %v15022_v53  ;;  %v18468_v11 = vrot.slane %v18467_v9, 1  ;;  %7055 = vmatprep.subr.mxu1 %v18428_v19  ;;  %v6989_v56 = vld [vmem:[%s16951_s4 + $0x50] sm:$0xff]  ;;  %v18483_v43 = vld [vmem:[#allocation77_spill] sm:$0xff] }
 0x7b5   :  { %18461 = vst [vmem:[#allocation69_spill] sm:$0xff] %v15010_v14  ;;  %v15028_v52 = vmax.f32 %v18327_v40, %v18465_v18  ;;  %v18471_v14 = vld [vmem:[#allocation50_spill] sm:$0xff]  ;;  %v6988_v40 = vld [vmem:[%s16951_s4 + $0x48] sm:$0xff]  ;;  %7056 = vmatpush1.msra.mxu1 %v6989_v56  ;;  %v18484_v31 = vld [vmem:[#allocation53_spill] sm:$0xff] }
 0x7b6   :  { %v15033_v29 = vmax.f32 %v18467_v9, %v18468_v11  ;;  %v18472_v45 = vrot.slane %v18471_v14, 1  ;;  %v18474_v11 = vrot.slane %v18473_v5, 1  ;;  %v18476_v9 = vld [vmem:[#allocation14_spill] sm:$0xff]  ;;  %v18485_v27 = vrot.slane %v18484_v31, 1  ;;  %7057 = vmatprep.subr.mxu1 %v18428_v19  ;;  %v18493_v56 = vld [vmem:[#allocation79_spill] sm:$0xff] }
 0x7b7   :  { %18466 = vst [vmem:[#allocation75_spill] sm:$0xff] %v15028_v52  ;;  %v18494_v38 = vrot.slane %v18493_v56, 1  ;;  %v18497_v53 = vld [vmem:[#allocation55_spill] sm:$0xff]  ;;  %7058 = vmatpush1.msra.mxu1 %v6988_v40  ;;  %v18509_v40 = vld [vmem:[#allocation46_spill] sm:$0xff] }
 0x7b8   :  { %18469 = vst [vmem:[#allocation59_spill] sm:$0xff] %v15033_v29  ;;  %v15039_v49 = vmax.f32 %v18471_v14, %v18472_v45  ;;  %v15051_v18 = vmax.f32 %v18473_v5, %v18474_v11  ;;  %v18478_v45 = vrot.slane %v18477_v3, 1  ;;  %v18480_v29 = vld [vmem:[#allocation52_spill] sm:$0xff]  ;;  %v15068_v5 = vmax.f32 %v18484_v31, %v18485_v27  ;;  %v18486_v11 = vld [vmem:[#allocation54_spill] sm:$0xff]  ;;  %7059 = vmatprep.subr.mxu1 %v18428_v19 }
 0x7b9   :  { %v18481_v52 = vrot.slane %v18480_v29, 1  ;;  %v18487_v24 = vrot.slane %v18486_v11, 1  ;;  %v18496_v27 = vld [vmem:[#allocation18_spill] sm:$0xff]  ;;  %v18498_v10 = vrot.slane %v18497_v53, 1 }
 0x7ba   :  { %18475 = vst [vmem:[#allocation16_spill] sm:$0xff] %v15051_v18  ;;  %v15057_v14 = vmax.f32 %v18477_v3, %v18478_v45  ;;  %v18489_v3 = vld [vmem:[#allocation25_spill] sm:$0xff] }
 0x7bb   :  { %v15062_v36 = vmax.f32 %v18480_v29, %v18481_v52  ;;  %v15073_v18 = vmax.f32 %v18486_v11, %v18487_v24  ;;  %v15091_v24 = vmax.f32 %v18497_v53, %v18498_v10  ;;  %v18499_v11 = vld [vmem:[#allocation66_spill] sm:$0xff]  ;;  %v6986_v53 = vld [vmem:[%s16951_s4 + $0x38] sm:$0xff] }
 0x7bc   :  { %18479 = vst [vmem:[#allocation43_spill] sm:$0xff] %v15057_v14  ;;  %v18490_v14 = vld [vmem:[#allocation65_spill] sm:$0xff]  ;;  %v18500_v45 = vrot.slane %v18499_v11, 1  ;;  %v6987_v10 = vld [vmem:[%s16951_s4 + $0x40] sm:$0xff] }
 0x7bd   :  { %18482 = vst [vmem:[#allocation71_spill] sm:$0xff] %v15062_v36  ;;  %18488 = vst [vmem:[#allocation15_spill] sm:$0xff] %v15073_v18  ;;  %v18491_v29 = vrot.slane %v18490_v14, 1  ;;  %v15085_v36 = vmax.f32 %v18493_v56, %v18494_v38  ;;  %v18506_v56 = vld [vmem:[#allocation80_spill] sm:$0xff]  ;;  %7060 = vmatpush1.msra.mxu1 %v6987_v10 }
 0x7be   :  { %v15096_v18 = vmax.f32 %v18499_v11, %v18500_v45  ;;  %v18507_v31 = vrot.slane %v18506_v56, 1  ;;  %v18512_v11 = vld [vmem:[#allocation42_spill] sm:$0xff]  ;;  %v18519_v45 = vrot.slane %v18518_v4, 1  ;;  %7061 = vmatprep.subr.mxu1 %v18428_v19  ;;  %v18523_v10 = vld [vmem:[#allocation32_spill] sm:$0xff] }
 0x7bf   :  { %v15080_v52 = vmax.f32 %v18490_v14, %v18491_v29  ;;  %18495 = vst [vmem:[#allocation61_spill] sm:$0xff] %v15085_v36  ;;  %v18502_v14 = vld [vmem:[#allocation28_spill] sm:$0xff]  ;;  %v18515_v29 = vld [vmem:[#allocation81_spill] sm:$0xff]  ;;  %7062 = vmatpush1.msra.mxu1 %v6986_v53  ;;  %v6984_v53 = vld [vmem:[%s16951_s4 + $0x28] sm:$0xff] }
 0x7c0   :  { %18501 = vst [vmem:[#allocation72_spill] sm:$0xff] %v15096_v18  ;;  %v15107_v36 = vmax.f32 %v18506_v56, %v18507_v31  ;;  %v18513_v31 = vrot.slane %v18512_v11, 1  ;;  %v15136_v42 = vmax.f32 %v18518_v4, %v18519_v45  ;;  %v18529_v45 = vld [vmem:[#allocation70_spill] sm:$0xff]  ;;  %7063 = vmatprep.subr.mxu1 %v18428_v19 }
 0x7c1   :  { %18492 = vst [vmem:[#allocation44_spill] sm:$0xff] %v15080_v52  ;;  %v18503_v52 = vld [vmem:[#allocation30_spill] sm:$0xff] }
 0x7c2   :  { %v18504_v15 = vrot.slane %v18503_v52, 1  ;;  %18508 = vst [vmem:[#allocation22_spill] sm:$0xff] %v15107_v36  ;;  %v15125_v56 = vmax.f32 %v18512_v11, %v18513_v31  ;;  %18520 = vst [vmem:[#allocation50_spill] sm:$0xff] %v15136_v42  ;;  %v18524_v31 = vrot.slane %v18523_v10, 1 }
 0x7c4   :  { %v15102_v38 = vmax.f32 %v18503_v52, %v18504_v15  ;;  %v18510_v15 = vrot.slane %v18379_v48, 1  ;;  %18514 = vst [vmem:[#allocation49_spill] sm:$0xff] %v15125_v56  ;;  %v15148_v36 = vmax.f32 %v18523_v10, %v18524_v31  ;;  %v18533_v56 = vrot.slane %v18409_v12, 1 }
 0x7c5   :  { %v18534_v31 = vrot.slane %v14526_v54, 1 }
 0x7c6   :  { %18505 = vst [vmem:[#allocation62_spill] sm:$0xff] %v15102_v38  ;;  %v15120_v52 = vmax.f32 %v18379_v48, %v18510_v15  ;;  %v18516_v38 = vrot.slane %v18387_v35, 1  ;;  %v18521_v48 = vld [vmem:[#allocation48_spill] sm:$0xff]  ;;  %18525 = vst [vmem:[#allocation26_spill] sm:$0xff] %v15148_v36  ;;  %v18530_v15 = vrot.slane %v18529_v45, 1  ;;  %v15165_v10 = vmax.f32 %v18409_v12, %v18533_v56 }
 0x7c7   :  { %v15170_v36 = vmax.f32 %v14526_v54, %v18534_v31  ;;  %v18536_v12 = vrot.slane %v18415_v62, 1  ;;  %v18538_v54 = vrot.slane %v14538_v17, 1  ;;  %v18540_v31 = vrot.slane %v18420_v51, 1 }
 0x7c8   :  { %18511 = vst [vmem:[#allocation47_spill] sm:$0xff] %v15120_v52  ;;  %v15131_v18 = vmax.f32 %v18387_v35, %v18516_v38  ;;  %v18522_v52 = vrot.slane %v18395_v59, 1  ;;  %v18526_v35 = vld [vmem:[#allocation82_spill] sm:$0xff]  ;;  %v15159_v42 = vmax.f32 %v18529_v45, %v18530_v15  ;;  %v5698_v45 = vrot.slane %v14851_v32, 1 }
 0x7c9   :  { %v5614_v38 = vrot.slane %v18526_v35, 1  ;;  %18535 = vst [vmem:[#allocation52_spill] sm:$0xff] %v15170_v36  ;;  %v15183_v56 = vmax.f32 %v18415_v62, %v18536_v12  ;;  %v15188_v15 = vmax.f32 %v14538_v17, %v18538_v54  ;;  %v5726_v62 = vrot.slane %v14868_v60, 1 }
 0x7ca   :  { %18517 = vst [vmem:[#allocation76_spill] sm:$0xff] %v15131_v18  ;;  %v15142_v11 = vmax.f32 %v18395_v59, %v18522_v52  ;;  %v18527_v18 = vrot.slane %v18402_v25, 1  ;;  %18531 = vst [vmem:[#allocation51_spill] sm:$0xff] %v15159_v42  ;;  %v18532_v59 = vld [vmem:[#allocation83_spill] sm:$0xff]  ;;  %v15194_v42 = vmax.f32 %v18420_v51, %v18540_v31  ;;  %v18542_v12 = vrot.slane %v18424_v23, 1 }
 0x7cb   :  { %v5642_v52 = vrot.slane %v18532_v59, 1  ;;  %18537 = vst [vmem:[#allocation77_spill] sm:$0xff] %v15183_v56  ;;  %18539 = vst [vmem:[#allocation53_spill] sm:$0xff] %v15188_v15  ;;  %v18544_v54 = vrot.slane %v14562_v37, 1  ;;  %v5754_v51 = vrot.slane %v14882_v2, 1 }
 0x7cc   :  { %v15154_v4 = vmax.f32 %v18402_v25, %v18527_v18  ;;  %v5670_v25 = vrot.slane %v14839_v22, 1  ;;  %v6985_v18 = vld [vmem:[%s16951_s4 + $0x30] sm:$0xff]  ;;  %v15205_v17 = vmax.f32 %v18424_v23, %v18542_v12  ;;  %v5782_v23 = vrot.slane %v14895_v30, 1 }
 0x7cd   :  { %7064 = vmatpush1.msra.mxu1 %v6985_v18  ;;  %v15210_v15 = vmax.f32 %v14562_v37, %v18544_v54  ;;  %v18546_v18 = vrot.slane %v14569_v21, 1  ;;  %v18548_v37 = vrot.slane %v14581_v1, 1  ;;  %v18550_v54 = vrot.slane %v14586_v41, 1 }
 0x7ce   :  { %18528 = vst [vmem:[#allocation14_spill] sm:$0xff] %v15154_v4  ;;  %v18541_v4 = vrot.slane %v14550_v0, 1  ;;  %18543 = vst [vmem:[#allocation54_spill] sm:$0xff] %v15205_v17  ;;  %7065 = vmatprep.subr.mxu1 %v18428_v19  ;;  %v18556_v17 = vrot.slane %v14623_v46, 1 }
 0x7cf   :  { %18545 = vst [vmem:[#allocation25_spill] sm:$0xff] %v15210_v15  ;;  %7066 = vmatpush1.msra.mxu1 %v6984_v53  ;;  %v15228_v12 = vmax.f32 %v14581_v1, %v18548_v37  ;;  %v15233_v15 = vmax.f32 %v14586_v41, %v18550_v54  ;;  %v6983_v53 = vld [vmem:[%s16951_s4 + $0x20] sm:$0xff]  ;;  %v6982_v1 = vld [vmem:[%s16951_s4 + $0x18] sm:$0xff]  ;;  %v18553_v41 = vrot.slane %v14598_v6, 1  ;;  %v5838_v37 = vrot.slane %v14925_v61, 1 }
 0x7d0   :  { %v15199_v36 = vmax.f32 %v14550_v0, %v18541_v4  ;;  %v15217_v0 = vmax.f32 %v14569_v21, %v18546_v18  ;;  %v18547_v4 = vrot.slane %v14574_v16, 1  ;;  %v5810_v21 = vrot.slane %v14907_v47, 1  ;;  %7067 = vmatprep.subr.mxu1 %v18428_v19 }
 0x7d1   :  { %18549 = vst [vmem:[#allocation65_spill] sm:$0xff] %v15228_v12  ;;  %18551 = vst [vmem:[#allocation79_spill] sm:$0xff] %v15233_v15  ;;  %v18552_v18 = vrot.slane %v14593_v8, 1  ;;  %7068 = vmatpush1.msra.mxu1 %v6983_v53  ;;  %v5866_v12 = vrot.slane %v14937_v63, 1 }
 0x7d2   :  { %v15222_v31 = vmax.f32 %v14574_v16, %v18547_v4  ;;  %v15251_v4 = vmax.f32 %v14598_v6, %v18553_v41  ;;  %v15268_v6 = vmax.f32 %v14623_v46, %v18556_v17  ;;  %v18557_v41 = vrot.slane %v14635_v7, 1  ;;  %7069 = vmatprep.subr.mxu1 %v18428_v19 }
 0x7d3   :  { %v15239_v16 = vmax.f32 %v14593_v8, %v18552_v18  ;;  %v18554_v8 = vrot.slane %v14605_v28, 1  ;;  %v18555_v18 = vrot.slane %v14610_v33, 1  ;;  %v18560_v46 = vrot.slane %v14671_v39, 1  ;;  %7070 = vmatpush1.msra.mxu1 %v6982_v1 }
 0x7d4   :  { %v15273_v56 = vmax.f32 %v14635_v7, %v18557_v41  ;;  %v18561_v7 = vrot.slane %v14683_v13, 1  ;;  %7071 = vmatprep.subr.mxu1 %v18428_v19  ;;  %v18568_v1 = vrot.slane %v18496_v27, 1 }
 0x7d5   :  { %v15257_v54 = vmax.f32 %v14605_v28, %v18554_v8  ;;  %v15262_v15 = vmax.f32 %v14610_v33, %v18555_v18  ;;  %v18558_v28 = vrot.slane %v14647_v20, 1  ;;  %v18559_v33 = vrot.slane %v14659_v57, 1 }
 0x7d6   :  { %v15289_v17 = vmax.f32 %v14671_v39, %v18560_v46  ;;  %v15294_v18 = vmax.f32 %v14683_v13, %v18561_v7  ;;  %v18565_v46 = vrot.slane %v18483_v43, 1  ;;  %v18567_v7 = vrot.slane %v18489_v3, 1 }
 0x7d7   :  { %v15278_v8 = vmax.f32 %v14647_v20, %v18558_v28  ;;  %v15284_v53 = vmax.f32 %v14659_v57, %v18559_v33  ;;  %v18562_v20 = vrot.slane %v14695_v50, 1  ;;  %v18563_v28 = vrot.slane %v18470_v34, 1 }
 0x7d8   :  { %v18564_v33 = vrot.slane %v18476_v9, 1  ;;  %v15314_v13 = vmax.f32 %v18483_v43, %v18565_v46  ;;  %v15331_v43 = vmax.f32 %v18496_v27, %v18568_v1  ;;  %v18571_v46 = vrot.slane %v18515_v29, 1 }
 0x7d9   :  { %v15299_v41 = vmax.f32 %v14695_v50, %v18562_v20  ;;  %v15304_v57 = vmax.f32 %v18470_v34, %v18563_v28  ;;  %v15319_v50 = vmax.f32 %v18489_v3, %v18567_v7  ;;  %v6981_v34 = vld [vmem:[%s16951_s4 + $0x10] sm:$0xff]  ;;  %v18569_v20 = vrot.slane %v18502_v14, 1 }
 0x7da   :  { %v15309_v39 = vmax.f32 %v18476_v9, %v18564_v33  ;;  %18566 = vst [vmem:[#allocation18_spill] sm:$0xff] %v15314_v13  ;;  %v6980_v9 = vld [vmem:[%s16951_s4 + $0x8] sm:$0xff]  ;;  %v18570_v28 = vrot.slane %v18509_v40, 1  ;;  %v5559_v7 = vmax.f32 %v18515_v29, %v18571_v46  ;;  %7072 = vmatpush1.msra.mxu1 %v6981_v34  ;;  %v18572_v13 = vrot.slane %v18521_v48, 1 }
 0x7db   :  { %v15336_v3 = vmax.f32 %v18502_v14, %v18569_v20  ;;  %v5615_v1 = vmax.f32 %v18526_v35, %v5614_v38  ;;  %v15353_v14 = vmax.f32 %v18532_v59, %v5642_v52  ;;  %v5671_v20 = vmax.f32 %v14839_v22, %v5670_v25  ;;  %7073 = vmatprep.subr.mxu1 %v18428_v19  ;;  %v18573_v59 = vld [vmem:[#allocation73_spill] sm:$0xff] }
 0x7dc   :  { %v15341_v33 = vmax.f32 %v18509_v40, %v18570_v28  ;;  %v15349_v27 = vmax.f32 %v18521_v48, %v18572_v13  ;;  %v15358_v40 = vmax.f32 %v14851_v32, %v5698_v45  ;;  %v5727_v29 = vmax.f32 %v14868_v60, %v5726_v62  ;;  %7074 = vmatpush1.msra.mxu1 %v6980_v9  ;;  %v18574_v60 = vld [vmem:[#allocation88_spill] sm:$0xff]  ;;  %v18576_v52 = vld [vmem:[#allocation89_spill] sm:$0xff]  ;;  %v15406_v13 = vpop.permute.xlu0 %6380  ;;  %v18584_v9 = vld [vmem:[#allocation11_spill] sm:$0xff] }
 0x7dd   :  { %v15362_v34 = vmax.f32 %v14882_v2, %v5754_v51  ;;  %v5783_v48 = vmax.f32 %v14895_v30, %v5782_v23  ;;  %v15366_v35 = vmax.f32 %v14907_v47, %v5810_v21  ;;  %v5839_v38 = vmax.f32 %v14925_v61, %v5838_v37  ;;  %7075 = vmatprep.subr.mxu1 %v18428_v19  ;;  %v6979_v2 = vld [vmem:[%s16951_s4] sm:$0xff]  ;;  %v6996_v30 = vld [vmem:[%s16951_s4 + $0x88] sm:$0xff]  ;;  %v18577_v25 = vld [vmem:[#allocation17_spill] sm:$0xff] }
 0x7de   :  { %v15370_v22 = vmax.f32 %v14937_v63, %v5866_v12  ;;  %v6113_v32 = vsel %vm17355_vm0, %v14942_v44, %v18573_v59  ;;  %v6120_v47 = vsel %vm17355_vm0, %v14965_v26, %v18574_v60  ;;  %v18575_v63 = vld [vmem:[#allocation74_spill] sm:$0xff]  ;;  %v6134_v44 = vsel %vm17355_vm0, %v15017_v55, %v18576_v52  ;;  %7076 = vmatpush1.msra.mxu1 %v6979_v2  ;;  %v18578_v62 = vld [vmem:[#allocation13_spill] sm:$0xff]  ;;  %v18581_v21 = vld [vmem:[#allocation47_spill] sm:$0xff] }
 0x7df   :  { %v6127_v61 = vsel %vm17355_vm0, %v14994_v58, %v18575_v63  ;;  %v6141_v45 = vsel %vm17355_vm0, %v15039_v49, %v18577_v25  ;;  %v6148_v51 = vsel %vm17355_vm0, %v15068_v5, %v18578_v62  ;;  %v18579_v23 = vld [vmem:[#allocation78_spill] sm:$0xff]  ;;  %v18580_v12 = vld [vmem:[#allocation29_spill] sm:$0xff]  ;;  %v18582_v37 = vld [vmem:[#allocation31_spill] sm:$0xff]  ;;  %7105 = vmatprep.subr.mxu1 %v18428_v19  ;;  %6429 = vst.msk [vmem:[#allocation5] sm:$0xff] %vm6428_vm9, %v15406_v13 }
 0x7e0   :  { %v6155_v26 = vsel %vm17355_vm0, %v15091_v24, %v18579_v23  ;;  %v6162_v58 = vsel %vm17355_vm0, %v18581_v21, %v18580_v12  ;;  %v6169_v55 = vsel %vm17355_vm0, %v15142_v11, %v18582_v37  ;;  %v18583_v49 = vld [vmem:[#allocation10_spill] sm:$0xff]  ;;  %v6183_v24 = vsel %vm17355_vm0, %v15194_v42, %v18584_v9  ;;  %v18586_v59 = vld [vmem:[#allocation67_spill] sm:$0xff]  ;;  %7106 = vmatpush2.msra.mxu1 %v6996_v30  ;;  %v18588_v63 = vld [vmem:[#allocation68_spill] sm:$0xff] }
 0x7e1   :  { %v6176_v5 = vsel %vm17355_vm0, %v15165_v10, %v18583_v49  ;;  %v18585_v28 = vld [vmem:[#allocation86_spill] sm:$0xff]  ;;  %v6197_v11 = vsel %vm17355_vm0, %v15239_v16, %v18586_v59  ;;  %v18587_v2 = vld [vmem:[#allocation87_spill] sm:$0xff]  ;;  %v6121_v52 = vsel %vm6094_vm1, %v18588_v63, %v6120_v47  ;;  %v18590_v62 = vld [vmem:[#allocation60_spill] sm:$0xff]  ;;  %7107 = vmatprep.subr.mxu1 %v18428_v19  ;;  %v6184_v9 = vsel %vm6094_vm1, %v15199_v36, %v6183_v24  ;;  %v15465_v24 = vpop.permute.xlu0 %6560 }
 0x7e2   :  { %v6190_v46 = vsel %vm17355_vm0, %v15217_v0, %v18585_v28  ;;  %v6114_v60 = vsel %vm6094_vm1, %v18587_v2, %v6113_v32  ;;  %v18589_v10 = vld [vmem:[#allocation38_spill] sm:$0xff]  ;;  %v6135_v42 = vsel %vm6094_vm1, %v18590_v62, %v6134_v44  ;;  %v18591_v16 = vld [vmem:[#allocation16_spill] sm:$0xff]  ;;  %v18592_v23 = vld [vmem:[#allocation15_spill] sm:$0xff]  ;;  %v6185_v2 = vsel %vm6096_vm4, %v5727_v29, %v6184_v9 }
 0x7e3   :  { %v6128_v25 = vsel %vm6094_vm1, %v18589_v10, %v6127_v61  ;;  %v6995_v0 = vld [vmem:[%s16951_s4 + $0x80] sm:$0xff]  ;;  %v6142_v30 = vsel %vm6094_vm1, %v18591_v16, %v6141_v45  ;;  %v6149_v32 = vsel %vm6094_vm1, %v18592_v23, %v6148_v51  ;;  %v18593_v12 = vld [vmem:[#allocation72_spill] sm:$0xff]  ;;  %v18594_v21 = vld [vmem:[#allocation49_spill] sm:$0xff]  ;;  %v6191_v45 = vsel %vm6094_vm1, %v15222_v31, %v6190_v46  ;;  %v15485_v10 = vpop.permute.xlu1 %6493 }
 0x7e4   :  { %v6156_v47 = vsel %vm6094_vm1, %v18593_v12, %v6155_v26  ;;  %v6163_v61 = vsel %vm6094_vm1, %v18594_v21, %v6162_v58  ;;  %7108 = vmatpush2.msra.mxu1 %v6995_v0  ;;  %v18595_v44 = vld [vmem:[#allocation26_spill] sm:$0xff]  ;;  %v18596_v37 = vld [vmem:[#allocation52_spill] sm:$0xff]  ;;  %v6198_v51 = vsel %vm6094_vm1, %v15251_v4, %v6197_v11  ;;  %v6115_v26 = vsel %vm6096_vm4, %v15268_v6, %v6114_v60  ;;  %v18598_v6 = vld [vmem:[#allocation57_spill] sm:$0xff] }
 0x7e5   :  { %v6170_v19 = vsel %vm6094_vm1, %v18595_v44, %v6169_v55  ;;  %v6177_v49 = vsel %vm6094_vm1, %v18596_v37, %v6176_v5  ;;  %v6122_v58 = vsel %vm6096_vm4, %v15278_v8, %v6121_v52  ;;  %v6129_v55 = vsel %vm6096_vm4, %v15289_v17, %v6128_v25  ;;  %v18597_v28 = vld [vmem:[#allocation36_spill] sm:$0xff]  ;;  %v18600_v52 = vld [vmem:[#allocation63_spill] sm:$0xff]  ;;  %v18606_v0 = vld [vmem:[#allocation21_spill] sm:$0xff]  ;;  %6542 = vst.msk [vmem:[#allocation5] sm:$0xff] %vm6541_vm10, %v15485_v10 }
 0x7e6   :  { %v6116_v5 = vsel %vm6098_vm5, %v18597_v28, %v6115_v26  ;;  %v6136_v36 = vsel %vm6096_vm4, %v15299_v41, %v6135_v42  ;;  %v6143_v31 = vsel %vm6096_vm4, %v15309_v39, %v6142_v30  ;;  %v6150_v4 = vsel %vm6096_vm4, %v15319_v50, %v6149_v32  ;;  %v18599_v11 = vld [vmem:[#allocation20_spill] sm:$0xff]  ;;  %v18604_v62 = vld [vmem:[#allocation27_spill] sm:$0xff]  ;;  %v15512_v26 = vpop.permute.xlu0 %6382  ;;  %6609 = vst.msk [vmem:[#allocation5] sm:$0xff] %vm6608_vm11, %v15465_v24 }
 0x7e7   :  { %v6117_v8 = vsel %vm6100_vm6, %v18598_v6, %v6116_v5  ;;  %v6157_v17 = vsel %vm6096_vm4, %v15336_v3, %v6156_v47  ;;  %v6164_v46 = vsel %vm6096_vm4, %v5559_v7, %v6163_v61  ;;  %v6171_v59 = vsel %vm6096_vm4, %v5615_v1, %v6170_v19  ;;  %v18601_v7 = vld [vmem:[#allocation39_spill] sm:$0xff]  ;;  %v18603_v25 = vld [vmem:[#allocation24_spill] sm:$0xff]  ;;  %v18611_v19 = vld [vmem:[#allocation37_spill] sm:$0xff]  ;;  %6430 = vst.msk [vmem:[#allocation5 + $0x10] sm:$0xff] %vm6428_vm9, %v15512_v26 }
 0x7e8   :  { %v6118_v41 = vsel %vm6102_vm7, %v18599_v11, %v6117_v8  ;;  %v6178_v39 = vsel %vm6096_vm4, %v5671_v20, %v6177_v49  ;;  %v6192_v50 = vsel %vm6096_vm4, %v5783_v48, %v6191_v45  ;;  %v6199_v63 = vsel %vm6096_vm4, %v5839_v38, %v6198_v51  ;;  %v18602_v20 = vld [vmem:[#allocation64_spill] sm:$0xff]  ;;  %v18605_v38 = vld [vmem:[#allocation45_spill] sm:$0xff]  ;;  %v18607_v30 = vld [vmem:[#allocation23_spill] sm:$0xff] }
 0x7e9   :  { %v6119_v60 = vsel %vm6104_vm8, %v15273_v56, %v6118_v41  ;;  %v6123_v3 = vsel %vm6098_vm5, %v18600_v52, %v6122_v58  ;;  %v6130_v1 = vsel %vm6098_vm5, %v18601_v7, %v6129_v55  ;;  %v6137_v29 = vsel %vm6098_vm5, %v18602_v20, %v6136_v36  ;;  %v18608_v32 = vld [vmem:[#allocation84_spill] sm:$0xff]  ;;  %v18612_v49 = vld [vmem:[#allocation41_spill] sm:$0xff]  ;;  %v18614_v58 = vld [vmem:[#allocation75_spill] sm:$0xff]  ;;  %v15538_v20 = vpop.permute.xlu1 %6633 }
 0x7ea   :  { %6230 = vst.msk [vmem:[#allocation4 + $0x31] sm:$0xff] %vm3618_vm14, %v6119_v60  ;;  %v6144_v48 = vsel %vm6098_vm5, %v18603_v25, %v6143_v31  ;;  %v6151_v56 = vsel %vm6098_vm5, %v18604_v62, %v6150_v4  ;;  %v6158_v42 = vsel %vm6098_vm5, %v18605_v38, %v6157_v17  ;;  %v6165_v16 = vsel %vm6098_vm5, %v18606_v0, %v6164_v46  ;;  %v18609_v47 = vld [vmem:[#allocation12_spill] sm:$0xff]  ;;  %v18615_v28 = vld [vmem:[#allocation43_spill] sm:$0xff]  ;;  %v18617_v4 = vld [vmem:[#allocation62_spill] sm:$0xff] }
 0x7eb   :  { %v6172_v23 = vsel %vm6098_vm5, %v18607_v30, %v6171_v59  ;;  %v6179_v12 = vsel %vm6098_vm5, %v18608_v32, %v6178_v39  ;;  %v6186_v21 = vsel %vm6098_vm5, %v18609_v47, %v6185_v2  ;;  %v18610_v61 = vld [vmem:[#allocation56_spill] sm:$0xff]  ;;  %v6200_v37 = vsel %vm6098_vm5, %v18611_v19, %v6199_v63  ;;  %v18619_v46 = vld [vmem:[#allocation14_spill] sm:$0xff]  ;;  %v18620_v11 = vld [vmem:[#allocation77_spill] sm:$0xff]  ;;  %6682 = vst.msk [vmem:[#allocation5] sm:$0xff] %vm6681_vm12, %v15538_v20 }
 0x7ec   :  { %v6193_v44 = vsel %vm6098_vm5, %v18610_v61, %v6192_v50  ;;  %v6124_v9 = vsel %vm6100_vm6, %v18612_v49, %v6123_v3  ;;  %v18613_v45 = vld [vmem:[#allocation40_spill] sm:$0xff]  ;;  %v6138_v55 = vsel %vm6100_vm6, %v18614_v58, %v6137_v29  ;;  %v6145_v5 = vsel %vm6100_vm6, %v18615_v28, %v6144_v48  ;;  %v18621_v39 = vld [vmem:[#allocation54_spill] sm:$0xff]  ;;  %v18622_v50 = vld [vmem:[#allocation65_spill] sm:$0xff] }
 0x7ed   :  { %v6131_v51 = vsel %vm6100_vm6, %v18613_v45, %v6130_v1  ;;  %v18616_v36 = vld [vmem:[#allocation44_spill] sm:$0xff]  ;;  %v6159_v6 = vsel %vm6100_vm6, %v18617_v4, %v6158_v42  ;;  %v6173_v59 = vsel %vm6100_vm6, %v18619_v46, %v6172_v23  ;;  %v6180_v41 = vsel %vm6100_vm6, %v18620_v11, %v6179_v12  ;;  %v18623_v52 = vld [vmem:[#allocation19_spill] sm:$0xff]  ;;  %v18624_v7 = vld [vmem:[#allocation69_spill] sm:$0xff] }
 0x7ee   :  { %v6152_v31 = vsel %vm6100_vm6, %v18616_v36, %v6151_v56  ;;  %v18618_v8 = vld [vmem:[#allocation76_spill] sm:$0xff]  ;;  %v6187_v2 = vsel %vm6100_vm6, %v18621_v39, %v6186_v21  ;;  %v6194_v60 = vsel %vm6100_vm6, %v18622_v50, %v6193_v44  ;;  %v6201_v63 = vsel %vm6100_vm6, %v15257_v54, %v6200_v37  ;;  %v18625_v29 = vld [vmem:[#allocation59_spill] sm:$0xff]  ;;  %v18627_v56 = vld [vmem:[#allocation61_spill] sm:$0xff] }
 0x7ef   :  { %v6166_v17 = vsel %vm6100_vm6, %v18618_v8, %v6165_v16  ;;  %v6125_v3 = vsel %vm6102_vm7, %v18623_v52, %v6124_v9  ;;  %v6132_v1 = vsel %vm6102_vm7, %v18624_v7, %v6131_v51  ;;  %v6139_v25 = vsel %vm6102_vm7, %v18625_v29, %v6138_v55  ;;  %v18626_v48 = vld [vmem:[#allocation71_spill] sm:$0xff]  ;;  %v18628_v42 = vld [vmem:[#allocation22_spill] sm:$0xff]  ;;  %v18631_v47 = vld [vmem:[#allocation53_spill] sm:$0xff]  ;;  %v6496_v51 = vpop.permute.xlu0 %6495 }
 0x7f0   :  { %v6146_v62 = vsel %vm6102_vm7, %v18626_v48, %v6145_v5  ;;  %v6153_v38 = vsel %vm6102_vm7, %v18627_v56, %v6152_v31  ;;  %v6160_v54 = vsel %vm6102_vm7, %v18628_v42, %v6159_v6  ;;  %v18629_v30 = vld [vmem:[#allocation50_spill] sm:$0xff]  ;;  %v18630_v32 = vld [vmem:[#allocation51_spill] sm:$0xff]  ;;  %v6181_v21 = vsel %vm6102_vm7, %v18631_v47, %v6180_v41  ;;  %v18632_v61 = vld [vmem:[#allocation25_spill] sm:$0xff]  ;;  %6543 = vst.msk [vmem:[#allocation5 + $0x10] sm:$0xff] %vm6541_vm10, %v6496_v51 }
 0x7f1   :  { %v6250_v0 = vld [vmem:[#allocation4 + $0x30] sm:$0xff]  ;;  %v6251_v16 = vld [vmem:[#allocation4 + $0x38] sm:$0x3]  ;;  %v6167_v23 = vsel %vm6102_vm7, %v18629_v30, %v6166_v17  ;;  %v6174_v12 = vsel %vm6102_vm7, %v18630_v32, %v6173_v59  ;;  %v6188_v44 = vsel %vm6102_vm7, %v18632_v61, %v6187_v2  ;;  %v18633_v49 = vld [vmem:[#allocation79_spill] sm:$0xff]  ;;  %v6202_v45 = vsel %vm6102_vm7, %v15262_v15, %v6201_v63 }
 0x7f2   :  { %6773 = vrot.lane.b32.xlu0 %v6250_v0, %s8844_s13  ;;  %6287 = vst.msk [vmem:[#allocation5 + $0x30] sm:$0xff] %vm3618_vm14, %v6250_v0  ;;  %6564 = vrot.lane.b32.xlu1 %v6250_v0, %s8841_s2  ;;  %v6341_v19 = vrot.slane %v6250_v0, 1  ;;  %v6342_v37 = vrot.slane %v6251_v16, 1  ;;  %v6195_v9 = vsel %vm6102_vm7, %v18633_v49, %v6194_v60  ;;  %v6126_v58 = vsel %vm6104_vm8, %v15284_v53, %v6125_v3  ;;  %v18634_v5 = vld [vmem:[#allocation18_spill] sm:$0xff] }
 0x7f3   :  { %v6133_v55 = vsel %vm6104_vm8, %v15294_v18, %v6132_v1  ;;  %v6140_v28 = vsel %vm6104_vm8, %v15304_v57, %v6139_v25  ;;  %v6147_v36 = vsel %vm6104_vm8, %v18634_v5, %v6146_v62  ;;  %v6154_v4 = vsel %vm6104_vm8, %v15331_v43, %v6153_v38  ;;  %6231 = vst.msk [vmem:[#allocation4 + $0x41] sm:$0xff] %vm3618_vm14, %v6126_v58  ;;  %v6563_v17 = vpop.permute.xlu0 %6562 }
 0x7f4   :  { %v6343_v31 = vsel %vm537_vm3, %v6341_v19, %v6342_v37  ;;  %v6161_v15 = vsel %vm6104_vm8, %v15341_v33, %v6160_v54  ;;  %v6168_v53 = vsel %vm6104_vm8, %v15349_v27, %v6167_v23  ;;  %6232 = vst.msk [vmem:[#allocation4 + $0x51] sm:$0xff] %vm3618_vm14, %v6133_v55  ;;  %6233 = vst.msk [vmem:[#allocation4 + $0x61] sm:$0xff] %vm3618_vm14, %v6140_v28  ;;  %v6705_v27 = vpop.permute.xlu1 %6704  ;;  %v6455_v6 = vrot.slane %v6251_v16, 2 }
 0x7f5   :  { %6234 = vst.msk [vmem:[#allocation4 + $0x71] sm:$0xff] %vm3618_vm14, %v6147_v36  ;;  %v6175_v18 = vsel %vm6104_vm8, %v15353_v14, %v6174_v12  ;;  %v6182_v57 = vsel %vm6104_vm8, %v15358_v40, %v6181_v21  ;;  %v6189_v43 = vsel %vm6104_vm8, %v15362_v34, %v6188_v44  ;;  %v6196_v33 = vsel %vm6104_vm8, %v15366_v35, %v6195_v9  ;;  %v15602_v34 = vld [vmem:[#allocation4 + $0x90] sm:$0xff] }
 0x7f6   :  { %6235 = vst.msk [vmem:[#allocation4 + $0x81] sm:$0xff] %vm3618_vm14, %v6154_v4  ;;  %6236 = vst.msk [vmem:[#allocation4 + $0xb1] sm:$0xff] %vm3618_vm14, %v6161_v15  ;;  %6846 = vrot.lane.b32.xlu0 %v6343_v31, %s8845_s24  ;;  %6637 = vrot.lane.b32.xlu1 %v6343_v31, %s8842_s3  ;;  %v6203_v14 = vsel %vm6104_vm8, %v15370_v22, %v6202_v45  ;;  %v6454_v40 = vrot.slane %v6250_v0, 2  ;;  %v6909_v8 = vrot.slane %v15602_v34, 2  ;;  %v15606_v22 = vld [vmem:[#allocation4 + $0x98] sm:$0x3] }
 0x7f7   :  { %6237 = vst.msk [vmem:[#allocation4 + $0xc1] sm:$0xff] %vm3618_vm14, %v6168_v53  ;;  %6238 = vst.msk [vmem:[#allocation4 + $0xd1] sm:$0xff] %vm3618_vm14, %v6175_v18  ;;  %v6910_v46 = vrot.slane %v15606_v22, 2  ;;  %vm6892_vm0 = vcmask 1048448   ;;  %v6636_v45 = vpop.permute.xlu0 %6635 }
 0x7f8   :  { %6239 = vst.msk [vmem:[#allocation4 + $0xe1] sm:$0xff] %vm3618_vm14, %v6182_v57  ;;  %6240 = vst.msk [vmem:[#allocation4 + $0xf1] sm:$0xff] %vm3618_vm14, %v6189_v43  ;;  %v6456_v35 = vsel %vm955_vm2, %v6454_v40, %v6455_v6  ;;  %v6772_v26 = vpop.permute.xlu1 %6771 }
 0x7f9   :  { %6241 = vst.msk [vmem:[#allocation4 + $0x101] sm:$0xff] %vm3618_vm14, %v6196_v33  ;;  %6242 = vst.msk [vmem:[#allocation4 + $0x111] sm:$0xff] %vm3618_vm14, %v6203_v14  ;;  %v6911_v41 = vsel %vm955_vm2, %v6909_v8, %v6910_v46  ;;  %v15766_v46 = vld [vmem:[#allocation4 + $0x128] sm:$0x3] }
 0x7fa   :  { %6932 = vst.msk [vmem:[#allocation5 + $0x18] sm:$0xff] %vm3618_vm14, %v6456_v35  ;;  %6386 = vrot.lane.b32.xlu0 %v6343_v31, %s8835_s28  ;;  %6708 = vrot.lane.b32.xlu1 %v6456_v35, %s8843_s12  ;;  %v6252_v59 = vld [vmem:[#allocation4 + $0x40] sm:$0xff]  ;;  %v6253_v13 = vld [vmem:[#allocation4 + $0x48] sm:$0x3]  ;;  %6938 = vst.msk [vmem:[#allocation5 + $0x78] sm:$0xff] %vm3618_vm14, %v6911_v41 }
 0x7fb   :  { %v15619_v11 = vld [vmem:[#allocation4 + $0x50] sm:$0xff]  ;;  %6610 = vst.msk [vmem:[#allocation5 + $0x10] sm:$0xff] %vm6608_vm11, %v6563_v17  ;;  %v6457_v10 = vrot.slane %v6252_v59, 2  ;;  %v6458_v39 = vrot.slane %v6253_v13, 2  ;;  %v15628_v2 = vld [vmem:[#allocation4 + $0x58] sm:$0x3]  ;;  %v6707_v43 = vpop.permute.xlu0 %6706 }
 0x7fc   :  { %6288 = vst.msk [vmem:[#allocation5 + $0x40] sm:$0xff] %vm3618_vm14, %v6252_v59  ;;  %6289 = vst.msk [vmem:[#allocation5 + $0x50] sm:$0xff] %vm3618_vm14, %v15619_v11  ;;  %v6344_v50 = vrot.slane %v6252_v59, 1  ;;  %v6345_v24 = vrot.slane %v6253_v13, 1  ;;  %v6460_v60 = vrot.slane %v15619_v11, 2  ;;  %v6461_v63 = vrot.slane %v15628_v2, 2  ;;  %v6845_v9 = vpop.permute.xlu1 %6844 }
 0x7fd   :  { %v15635_v52 = vld [vmem:[#allocation4 + $0x60] sm:$0xff]  ;;  %v15637_v3 = vld [vmem:[#allocation4 + $0x70] sm:$0xff]  ;;  %6753 = vst.msk [vmem:[#allocation5] sm:$0xff] %vm6752_vm13, %v6705_v27  ;;  %v15643_v7 = vsel %vm955_vm2, %v6457_v10, %v6458_v39  ;;  %v15647_v1 = vld [vmem:[#allocation4 + $0x68] sm:$0x3] }
 0x7fe   :  { %6499 = vrot.lane.b32.xlu0 %v6456_v35, %s8839_s22  ;;  %6775 = vrot.lane.b32.xlu1 %v6252_v59, %s8844_s13  ;;  %6290 = vst.msk [vmem:[#allocation5 + $0x60] sm:$0xff] %vm3618_vm14, %v15635_v52  ;;  %v6463_v20 = vrot.slane %v15635_v52, 2  ;;  %6291 = vst.msk [vmem:[#allocation5 + $0x70] sm:$0xff] %vm3618_vm14, %v15637_v3  ;;  %v15652_v29 = vld [vmem:[#allocation4 + $0x78] sm:$0x3]  ;;  %v15658_v25 = vsel %vm955_vm2, %v6460_v60, %v6461_v63  ;;  %v6464_v48 = vrot.slane %v15647_v1, 2 }
 0x7ff   :  { %6820 = vst.msk [vmem:[#allocation5] sm:$0xff] %vm6819_vm15, %v6772_v26  ;;  %v15661_v62 = vld [vmem:[#allocation4 + $0x80] sm:$0xff]  ;;  %v15663_v56 = vld [vmem:[#allocation4 + $0x88] sm:$0x3]  ;;  %v15665_v38 = vld [vmem:[#allocation4 + $0xb0] sm:$0xff]  ;;  %v6466_v42 = vrot.slane %v15637_v3, 2  ;;  %v6346_v0 = vsel %vm537_vm3, %v6344_v50, %v6345_v24 }
 0x800   :  { %6933 = vst.msk [vmem:[#allocation5 + $0x28] sm:$0xff] %vm3618_vm14, %v15643_v7  ;;  %6934 = vst.msk [vmem:[#allocation5 + $0x38] sm:$0xff] %vm3618_vm14, %v15658_v25  ;;  %v6467_v54 = vrot.slane %v15652_v29, 2  ;;  %v15675_v16 = vsel %vm955_vm2, %v6463_v20, %v6464_v48  ;;  %v6698_v30 = vrot.slane %v15661_v62, 2  ;;  %v15678_v23 = vld [vmem:[#allocation4 + $0xc0] sm:$0xff]  ;;  %v15680_v32 = vld [vmem:[#allocation4 + $0xd0] sm:$0xff]  ;;  %v6385_v57 = vpop.permute.xlu1 %6384 }
 0x801   :  { %6293 = vst.msk [vmem:[#allocation5 + $0x90] sm:$0xff] %vm3618_vm14, %v15665_v38  ;;  %6935 = vst.msk [vmem:[#allocation5 + $0x48] sm:$0xff] %vm3618_vm14, %v15675_v16  ;;  %v6699_v47 = vrot.slane %v15663_v56, 2  ;;  %v15692_v21 = vld [vmem:[#allocation4 + $0xc8] sm:$0x3]  ;;  %v15696_v61 = vld [vmem:[#allocation4 + $0xe0] sm:$0xff] }
 0x802   :  { %6566 = vrot.lane.b32.xlu0 %v6252_v59, %s8841_s2  ;;  %6848 = vrot.lane.b32.xlu1 %v6346_v0, %s8845_s24  ;;  %v15687_v12 = vsel %vm955_vm2, %v6466_v42, %v6467_v54  ;;  %6294 = vst.msk [vmem:[#allocation5 + $0xa0] sm:$0xff] %vm3618_vm14, %v15678_v23  ;;  %6295 = vst.msk [vmem:[#allocation5 + $0xb0] sm:$0xff] %vm3618_vm14, %v15680_v32  ;;  %v15705_v19 = vld [vmem:[#allocation4 + $0xd8] sm:$0x3]  ;;  %v15707_v37 = vld [vmem:[#allocation4 + $0xf0] sm:$0xff]  ;;  %v6475_v51 = vrot.slane %v15678_v23, 2 }
 0x803   :  { %6936 = vst.msk [vmem:[#allocation5 + $0x58] sm:$0xff] %vm3618_vm14, %v15687_v12  ;;  %6296 = vst.msk [vmem:[#allocation5 + $0xc0] sm:$0xff] %vm3618_vm14, %v15696_v61  ;;  %v15703_v44 = vsel %vm955_vm2, %v6698_v30, %v6699_v47  ;;  %v15709_v49 = vld [vmem:[#allocation4 + $0x100] sm:$0xff]  ;;  %v6476_v58 = vrot.slane %v15692_v21, 2  ;;  %v15715_v55 = vld [vmem:[#allocation4 + $0xe8] sm:$0x3] }
 0x804   :  { %6937 = vst.msk [vmem:[#allocation5 + $0x68] sm:$0xff] %vm3618_vm14, %v15703_v44  ;;  %6297 = vst.msk [vmem:[#allocation5 + $0xd0] sm:$0xff] %vm3618_vm14, %v15707_v37  ;;  %v15721_v28 = vld [vmem:[#allocation4 + $0x110] sm:$0xff]  ;;  %v6478_v5 = vrot.slane %v15680_v32, 2  ;;  %v6479_v31 = vrot.slane %v15705_v19, 2  ;;  %v6481_v15 = vrot.slane %v15696_v61, 2  ;;  %v6498_v10 = vpop.permute.xlu1 %6497 }
 0x805   :  { %6298 = vst.msk [vmem:[#allocation5 + $0xe0] sm:$0xff] %vm3618_vm14, %v15709_v49  ;;  %6299 = vst.msk [vmem:[#allocation5 + $0xf0] sm:$0xff] %vm3618_vm14, %v15721_v28  ;;  %v15731_v36 = vsel %vm955_vm2, %v6475_v51, %v6476_v58  ;;  %v15734_v4 = vld [vmem:[#allocation4 + $0xf8] sm:$0x3]  ;;  %v6482_v53 = vrot.slane %v15715_v55, 2  ;;  %v6484_v27 = vrot.slane %v15707_v37, 2 }
 0x806   :  { %6639 = vrot.lane.b32.xlu0 %v6346_v0, %s8842_s3  ;;  %6388 = vrot.lane.b32.xlu1 %v6346_v0, %s8835_s28  ;;  %6893 = vst.msk [vmem:[#allocation5] sm:$0xff] %vm6892_vm0, %v6845_v9  ;;  %v15740_v18 = vld [vmem:[#allocation4 + $0x108] sm:$0x3]  ;;  %v15743_v33 = vsel %vm955_vm2, %v6478_v5, %v6479_v31  ;;  %v6485_v40 = vrot.slane %v15734_v4, 2  ;;  %v15758_v6 = vld [vmem:[#allocation4 + $0x118] sm:$0x3] }
 0x807   :  { %6683 = vst.msk [vmem:[#allocation5 + $0x10] sm:$0xff] %vm6681_vm12, %v6636_v45  ;;  %v15755_v14 = vsel %vm955_vm2, %v6481_v15, %v6482_v53  ;;  %v15760_v35 = vld [vmem:[#allocation4 + $0x120] sm:$0xff]  ;;  %v6487_v8 = vrot.slane %v15709_v49, 2  ;;  %v6488_v17 = vrot.slane %v15740_v18, 2  ;;  %v6347_v59 = vrot.slane %v15619_v11, 1  ;;  %v6950_v63 = vld [vmem:[#allocation5 + $0x18] sm:$0xff] }
 0x808   :  { %6939 = vst.msk [vmem:[#allocation5 + $0x88] sm:$0xff] %vm3618_vm14, %v15731_v36  ;;  %6940 = vst.msk [vmem:[#allocation5 + $0x98] sm:$0xff] %vm3618_vm14, %v15743_v33  ;;  %v15770_v13 = vsel %vm955_vm2, %v6484_v27, %v6485_v40  ;;  %v6490_v41 = vrot.slane %v15721_v28, 2  ;;  %v6348_v26 = vrot.slane %v15628_v2, 1  ;;  %v6491_v24 = vrot.slane %v15758_v6, 2  ;;  %v15834_v0 = vld [vmem:[#allocation4 + $0x130] sm:$0xff] }
 0x809   :  { %6431 = vst.msk [vmem:[#allocation5 + $0x20] sm:$0xff] %vm6428_vm9, %v6385_v57  ;;  %v15777_v50 = vsel %vm955_vm2, %v6487_v8, %v6488_v17  ;;  %v6701_v60 = vrot.slane %v15760_v35, 2  ;;  %v6702_v2 = vrot.slane %v15766_v46, 2  ;;  %v6350_v48 = vrot.slane %v15635_v52, 1  ;;  %v15839_v47 = vld [vmem:[#allocation4 + $0x138] sm:$0x3] }
 0x80a   :  { %6710 = vrot.lane.b32.xlu0 %v15643_v7, %s8843_s12  ;;  %6501 = vrot.lane.b32.xlu1 %v15643_v7, %s8839_s22  ;;  %6754 = vst.msk [vmem:[#allocation5 + $0x10] sm:$0xff] %vm6752_vm13, %v6707_v43  ;;  %v15790_v7 = vsel %vm955_vm2, %v6490_v41, %v6491_v24  ;;  %v6351_v42 = vrot.slane %v15647_v1, 1  ;;  %v6353_v1 = vrot.slane %v15637_v3, 1  ;;  %v6627_v30 = vrot.slane %v15661_v62, 1  ;;  %v18635_v45 = vld [vmem:[#allocation85_spill] sm:$0xff] }
 0x80b   :  { %6941 = vst.msk [vmem:[#allocation5 + $0xa8] sm:$0xff] %vm3618_vm14, %v15755_v14  ;;  %6942 = vst.msk [vmem:[#allocation5 + $0xb8] sm:$0xff] %vm3618_vm14, %v15770_v13  ;;  %v15796_v20 = vsel %vm955_vm2, %v6701_v60, %v6702_v2  ;;  %v6913_v9 = vrot.slane %v15839_v47, 2  ;;  %v6356_v51 = vrot.slane %v18635_v45, 1  ;;  %v6267_v57 = vld [vmem:[#allocation4 + $0xb8] sm:$0x3] }
 0x80c   :  { %6544 = vst.msk [vmem:[#allocation5 + $0x20] sm:$0xff] %vm6541_vm10, %v6498_v10  ;;  %v6352_v54 = vsel %vm537_vm3, %v6350_v48, %v6351_v42  ;;  %v6839_v43 = vrot.slane %v15606_v22, 1  ;;  %v6359_v27 = vrot.slane %v15665_v38, 1  ;;  %v6360_v40 = vrot.slane %v6267_v57, 1  ;;  %v6952_v42 = vld [vmem:[#allocation5 + $0x28] sm:$0xff] }
 0x80d   :  { %v6947_v39 = vld [vmem:[#allocation5] sm:$0xff]  ;;  %6943 = vst.msk [vmem:[#allocation5 + $0xc8] sm:$0xff] %vm3618_vm14, %v15777_v50  ;;  %6944 = vst.msk [vmem:[#allocation5 + $0xd8] sm:$0xff] %vm3618_vm14, %v15790_v7  ;;  %v6363_v41 = vrot.slane %v15692_v21, 1  ;;  %v6365_v21 = vrot.slane %v15680_v32, 1  ;;  %v6368_v60 = vrot.slane %v15696_v61, 1 }
 0x80e   :  { %6777 = vrot.lane.b32.xlu0 %v15619_v11, %s8844_s13  ;;  %6568 = vrot.lane.b32.xlu1 %v15619_v11, %s8841_s2  ;;  %v6349_v11 = vsel %vm537_vm3, %v6347_v59, %v6348_v26  ;;  %6945 = vst.msk [vmem:[#allocation5 + $0xe8] sm:$0xff] %vm3618_vm14, %v15796_v20  ;;  %v6361_v17 = vsel %vm537_vm3, %v6359_v27, %v6360_v40  ;;  %v6473_v59 = vrot.slane %v6267_v57, 2  ;;  %v6366_v26 = vrot.slane %v15705_v19, 1 }
 0x80f   :  { %7110 = vmatmul.mubr.f32.vlgmr.msra.gmra.mxu1 %v6947_v39  ;;  %v6369_v2 = vrot.slane %v15715_v55, 1 }
 0x810   :  { %8540 = vmatprep.mubr.msk.f32.mxu1 %vm3618_vm14, %v6950_v63  ;;  %v6367_v39 = vsel %vm537_vm3, %v6365_v21, %v6366_v26  ;;  %v6631_v21 = vrot.slane %v15766_v46, 1 }
 0x812   :  { %6850 = vrot.lane.b32.xlu0 %v6349_v11, %s8845_s24  ;;  %6641 = vrot.lane.b32.xlu1 %v6349_v11, %s8842_s3 }
 0x816   :  { %6390 = vrot.lane.b32.xlu0 %v6349_v11, %s8835_s28  ;;  %6712 = vrot.lane.b32.xlu1 %v15658_v25, %s8843_s12 }
 0x81a   :  { %6503 = vrot.lane.b32.xlu0 %v15658_v25, %s8839_s22  ;;  %6779 = vrot.lane.b32.xlu1 %v15635_v52, %s8844_s13  ;;  %v6354_v25 = vrot.slane %v15652_v29, 1  ;;  %v6265_v29 = vld [vmem:[#allocation4 + $0xa8] sm:$0x3] }
 0x81b   :  { %v6357_v58 = vrot.slane %v6265_v29, 1  ;;  %v6470_v15 = vrot.slane %v6265_v29, 2 }
 0x81e   :  { %6570 = vrot.lane.b32.xlu0 %v15635_v52, %s8841_s2  ;;  %6852 = vrot.lane.b32.xlu1 %v6352_v54, %s8845_s24  ;;  %v6355_v52 = vsel %vm537_vm3, %v6353_v1, %v6354_v25 }
 0x822   :  { %6643 = vrot.lane.b32.xlu0 %v6352_v54, %s8842_s3  ;;  %6392 = vrot.lane.b32.xlu1 %v6352_v54, %s8835_s28 }
 0x826   :  { %6714 = vrot.lane.b32.xlu0 %v15675_v16, %s8843_s12  ;;  %6505 = vrot.lane.b32.xlu1 %v15675_v16, %s8839_s22  ;;  %v6912_v16 = vrot.slane %v15834_v0, 2 }
 0x828   :  { %v6914_v5 = vsel %vm955_vm2, %v6912_v16, %v6913_v9  ;;  %v6954_v16 = vld [vmem:[#allocation5 + $0x38] sm:$0xff] }
 0x829   :  { %6946 = vst.msk [vmem:[#allocation5 + $0xf8] sm:$0xff] %vm3618_vm14, %v6914_v5  ;;  %v6374_v5 = vrot.slane %v15709_v49, 1 }
 0x82a   :  { %6781 = vrot.lane.b32.xlu0 %v15637_v3, %s8844_s13  ;;  %6572 = vrot.lane.b32.xlu1 %v15637_v3, %s8841_s2  ;;  %v6628_v3 = vrot.slane %v15663_v56, 1  ;;  %v6358_v56 = vsel %vm537_vm3, %v6356_v51, %v6357_v58 }
 0x82c   :  { %v6629_v31 = vsel %vm537_vm3, %v6627_v30, %v6628_v3  ;;  %v6371_v30 = vrot.slane %v15707_v37, 1  ;;  %v6372_v3 = vrot.slane %v15734_v4, 1 }
 0x82e   :  { %6854 = vrot.lane.b32.xlu0 %v6355_v52, %s8845_s24  ;;  %6645 = vrot.lane.b32.xlu1 %v6355_v52, %s8842_s3 }
 0x832   :  { %6394 = vrot.lane.b32.xlu0 %v6355_v52, %s8835_s28  ;;  %6716 = vrot.lane.b32.xlu1 %v15687_v12, %s8843_s12 }
 0x836   :  { %6507 = vrot.lane.b32.xlu0 %v15687_v12, %s8839_s22  ;;  %6783 = vrot.lane.b32.xlu1 %v15661_v62, %s8844_s13  ;;  %v6469_v12 = vrot.slane %v18635_v45, 2  ;;  %v6373_v45 = vsel %vm537_vm3, %v6371_v30, %v6372_v3 }
 0x838   :  { %v6471_v53 = vsel %vm955_vm2, %v6469_v12, %v6470_v15 }
 0x83a   :  { %6574 = vrot.lane.b32.xlu0 %v15661_v62, %s8841_s2  ;;  %6856 = vrot.lane.b32.xlu1 %v6629_v31, %s8845_s24  ;;  %v6838_v62 = vrot.slane %v15602_v34, 1 }
 0x83c   :  { %v6840_v8 = vsel %vm537_vm3, %v6838_v62, %v6839_v43 }
 0x83e   :  { %6647 = vrot.lane.b32.xlu0 %v6629_v31, %s8842_s3  ;;  %6396 = vrot.lane.b32.xlu1 %v6358_v56, %s8835_s28  ;;  %v6375_v31 = vrot.slane %v15740_v18, 1 }
 0x842   :  { %6718 = vrot.lane.b32.xlu0 %v15703_v44, %s8843_s12  ;;  %6509 = vrot.lane.b32.xlu1 %v6471_v53, %s8839_s22  ;;  %v6472_v44 = vrot.slane %v15665_v38, 2  ;;  %v6956_v53 = vld [vmem:[#allocation5 + $0x48] sm:$0xff] }
 0x844   :  { %v6474_v22 = vsel %vm955_vm2, %v6472_v44, %v6473_v59  ;;  %v6377_v44 = vrot.slane %v15721_v28, 1  ;;  %vm7190_vm2 = vcmask 261120  }
 0x846   :  { %6785 = vrot.lane.b32.xlu0 %v15602_v34, %s8844_s13  ;;  %6576 = vrot.lane.b32.xlu1 %v15665_v38, %s8841_s2  ;;  %v6362_v34 = vrot.slane %v15678_v23, 1 }
 0x848   :  { %v6364_v38 = vsel %vm537_vm3, %v6362_v34, %v6363_v41 }
 0x84a   :  { %6858 = vrot.lane.b32.xlu0 %v6840_v8, %s8845_s24  ;;  %6649 = vrot.lane.b32.xlu1 %v6361_v17, %s8842_s3  ;;  %v6958_v8 = vld [vmem:[#allocation5 + $0x58] sm:$0xff] }
 0x84e   :  { %6398 = vrot.lane.b32.xlu0 %v6361_v17, %s8835_s28  ;;  %6720 = vrot.lane.b32.xlu1 %v6474_v22, %s8843_s12  ;;  %v6378_v17 = vrot.slane %v15758_v6, 1 }
 0x852   :  { %6511 = vrot.lane.b32.xlu0 %v6474_v22, %s8839_s22  ;;  %6787 = vrot.lane.b32.xlu1 %v15678_v23, %s8844_s13  ;;  %v6379_v22 = vsel %vm537_vm3, %v6377_v44, %v6378_v17  ;;  %v6970_v44 = vld [vmem:[#allocation5 + $0xb8] sm:$0xff] }
 0x856   :  { %6578 = vrot.lane.b32.xlu0 %v15678_v23, %s8841_s2  ;;  %6860 = vrot.lane.b32.xlu1 %v6364_v38, %s8845_s24 }
 0x85a   :  { %6651 = vrot.lane.b32.xlu0 %v6364_v38, %s8842_s3  ;;  %6400 = vrot.lane.b32.xlu1 %v6364_v38, %s8835_s28  ;;  %v6630_v38 = vrot.slane %v15760_v35, 1 }
 0x85e   :  { %6722 = vrot.lane.b32.xlu0 %v15731_v36, %s8843_s12  ;;  %6513 = vrot.lane.b32.xlu1 %v15731_v36, %s8839_s22 }
 0x862   :  { %6789 = vrot.lane.b32.xlu0 %v15680_v32, %s8844_s13  ;;  %6580 = vrot.lane.b32.xlu1 %v15680_v32, %s8841_s2 }
 0x864   :  { %v6774_v23 = vpop.permute.xlu0 %6773  ;;  %v6565_v10 = vpop.permute.xlu1 %6564 }
 0x865   :  { %6821 = vst.msk [vmem:[#allocation5 + $0x10] sm:$0xff] %vm6819_vm15, %v6774_v23 }
 0x866   :  { %6611 = vst.msk [vmem:[#allocation5 + $0x20] sm:$0xff] %vm6608_vm11, %v6565_v10  ;;  %6862 = vrot.lane.b32.xlu0 %v6367_v39, %s8845_s24  ;;  %6653 = vrot.lane.b32.xlu1 %v6367_v39, %s8842_s3 }
 0x868   :  { %v6847_v36 = vpop.permute.xlu0 %6846  ;;  %v6638_v19 = vpop.permute.xlu1 %6637 }
 0x869   :  { %6894 = vst.msk [vmem:[#allocation5 + $0x10] sm:$0xff] %vm6892_vm0, %v6847_v36 }
 0x86a   :  { %6684 = vst.msk [vmem:[#allocation5 + $0x20] sm:$0xff] %vm6681_vm12, %v6638_v19  ;;  %6402 = vrot.lane.b32.xlu0 %v6367_v39, %s8835_s28  ;;  %6724 = vrot.lane.b32.xlu1 %v15743_v33, %s8843_s12  ;;  %v6960_v39 = vld [vmem:[#allocation5 + $0x68] sm:$0xff]  ;;  %v6841_v19 = vrot.slane %v15834_v0, 1 }
 0x86c   :  { %v6387_v32 = vpop.permute.xlu0 %6386  ;;  %v6709_v24 = vpop.permute.xlu1 %6708 }
 0x86d   :  { %6432 = vst.msk [vmem:[#allocation5 + $0x30] sm:$0xff] %vm6428_vm9, %v6387_v32  ;;  %v6842_v32 = vrot.slane %v15839_v47, 1  ;;  %v6962_v47 = vld [vmem:[#allocation5 + $0x78] sm:$0xff] }
 0x86e   :  { %6755 = vst.msk [vmem:[#allocation5 + $0x20] sm:$0xff] %vm6752_vm13, %v6709_v24  ;;  %6515 = vrot.lane.b32.xlu0 %v15743_v33, %s8839_s22  ;;  %6791 = vrot.lane.b32.xlu1 %v15696_v61, %s8844_s13  ;;  %v6370_v33 = vsel %vm537_vm3, %v6368_v60, %v6369_v2 }
 0x86f   :  { %v6843_v60 = vsel %vm537_vm3, %v6841_v19, %v6842_v32  ;;  %v6974_v19 = vld [vmem:[#allocation5 + $0xd8] sm:$0xff] }
 0x870   :  { %v6500_v63 = vpop.permute.xlu0 %6499  ;;  %v6949_v11 = vld [vmem:[#allocation5 + $0x10] sm:$0xff]  ;;  %v6776_v48 = vpop.permute.xlu1 %6775 }
 0x871   :  { %6545 = vst.msk [vmem:[#allocation5 + $0x30] sm:$0xff] %vm6541_vm10, %v6500_v63  ;;  %7115 = vmatmul.mubr.f32.gmra.mxu1 %v6949_v11 }
 0x872   :  { %6822 = vst.msk [vmem:[#allocation5 + $0x20] sm:$0xff] %vm6819_vm15, %v6776_v48  ;;  %6582 = vrot.lane.b32.xlu0 %v15696_v61, %s8841_s2  ;;  %8541 = vmatprep.mubr.msk.f32.mxu1 %vm3618_vm14, %v6952_v42 }
 0x873   :  { %6864 = vrot.lane.b32.xlu1 %v6370_v33, %s8845_s24 }
 0x874   :  { %v6567_v54 = vpop.permute.xlu0 %6566  ;;  %v6849_v55 = vpop.permute.xlu1 %6848 }
 0x875   :  { %6612 = vst.msk [vmem:[#allocation5 + $0x30] sm:$0xff] %vm6608_vm11, %v6567_v54 }
 0x876   :  { %6895 = vst.msk [vmem:[#allocation5 + $0x20] sm:$0xff] %vm6892_vm0, %v6849_v55  ;;  %6655 = vrot.lane.b32.xlu0 %v6370_v33, %s8842_s3 }
 0x877   :  { %6404 = vrot.lane.b32.xlu1 %v6370_v33, %s8835_s28 }
 0x878   :  { %v6640_v1 = vpop.permute.xlu0 %6639  ;;  %v6389_v25 = vpop.permute.xlu1 %6388 }
 0x879   :  { %6685 = vst.msk [vmem:[#allocation5 + $0x30] sm:$0xff] %vm6681_vm12, %v6640_v1 }
 0x87a   :  { %6433 = vst.msk [vmem:[#allocation5 + $0x40] sm:$0xff] %vm6428_vm9, %v6389_v25  ;;  %6726 = vrot.lane.b32.xlu0 %v15755_v14, %s8843_s12 }
 0x87b   :  { %6517 = vrot.lane.b32.xlu1 %v15755_v14, %s8839_s22 }
 0x87c   :  { %v6711_v61 = vpop.permute.xlu0 %6710  ;;  %v6502_v52 = vpop.permute.xlu1 %6501 }
 0x87d   :  { %v6951_v29 = vld [vmem:[#allocation5 + $0x20] sm:$0xff]  ;;  %6756 = vst.msk [vmem:[#allocation5 + $0x30] sm:$0xff] %vm6752_vm13, %v6711_v61  ;;  %v6964_v61 = vld [vmem:[#allocation5 + $0x88] sm:$0xff] }
 0x87e   :  { %6546 = vst.msk [vmem:[#allocation5 + $0x40] sm:$0xff] %vm6541_vm10, %v6502_v52  ;;  %7120 = vmatmul.mubr.f32.gmra.mxu1 %v6951_v29  ;;  %6793 = vrot.lane.b32.xlu0 %v15707_v37, %s8844_s13 }
 0x87f   :  { %8542 = vmatprep.mubr.msk.f32.mxu1 %vm3618_vm14, %v6954_v16  ;;  %6584 = vrot.lane.b32.xlu1 %v15707_v37, %s8841_s2 }
 0x880   :  { %v6778_v14 = vpop.permute.xlu0 %6777  ;;  %v6569_v9 = vpop.permute.xlu1 %6568 }
 0x881   :  { %6823 = vst.msk [vmem:[#allocation5 + $0x30] sm:$0xff] %vm6819_vm15, %v6778_v14 }
 0x882   :  { %6613 = vst.msk [vmem:[#allocation5 + $0x40] sm:$0xff] %vm6608_vm11, %v6569_v9  ;;  %6866 = vrot.lane.b32.xlu0 %v6373_v45, %s8845_s24 }
 0x883   :  { %6657 = vrot.lane.b32.xlu1 %v6373_v45, %s8842_s3 }
 0x884   :  { %v6851_v4 = vpop.permute.xlu0 %6850  ;;  %v6642_v51 = vpop.permute.xlu1 %6641 }
 0x885   :  { %6896 = vst.msk [vmem:[#allocation5 + $0x30] sm:$0xff] %vm6892_vm0, %v6851_v4  ;;  %v6966_v4 = vld [vmem:[#allocation5 + $0x98] sm:$0xff] }
 0x886   :  { %6686 = vst.msk [vmem:[#allocation5 + $0x40] sm:$0xff] %vm6681_vm12, %v6642_v51  ;;  %6406 = vrot.lane.b32.xlu0 %v6373_v45, %s8835_s28 }
 0x887   :  { %6728 = vrot.lane.b32.xlu1 %v15770_v13, %s8843_s12 }
 0x888   :  { %v6391_v37 = vpop.permute.xlu0 %6390  ;;  %v6713_v58 = vpop.permute.xlu1 %6712 }
 0x889   :  { %6434 = vst.msk [vmem:[#allocation5 + $0x50] sm:$0xff] %vm6428_vm9, %v6391_v37 }
 0x88a   :  { %6757 = vst.msk [vmem:[#allocation5 + $0x40] sm:$0xff] %vm6752_vm13, %v6713_v58  ;;  %6519 = vrot.lane.b32.xlu0 %v15770_v13, %s8839_s22  ;;  %v6376_v13 = vsel %vm537_vm3, %v6374_v5, %v6375_v31 }
 0x88b   :  { %6795 = vrot.lane.b32.xlu1 %v15709_v49, %s8844_s13 }
 0x88c   :  { %v6504_v56 = vpop.permute.xlu0 %6503  ;;  %v6953_v12 = vld [vmem:[#allocation5 + $0x30] sm:$0xff]  ;;  %v6780_v15 = vpop.permute.xlu1 %6779 }
 0x88d   :  { %6547 = vst.msk [vmem:[#allocation5 + $0x50] sm:$0xff] %vm6541_vm10, %v6504_v56  ;;  %7125 = vmatmul.mubr.f32.gmra.mxu1 %v6953_v12 }
 0x88e   :  { %6824 = vst.msk [vmem:[#allocation5 + $0x40] sm:$0xff] %vm6819_vm15, %v6780_v15  ;;  %6586 = vrot.lane.b32.xlu0 %v15709_v49, %s8841_s2  ;;  %8543 = vmatprep.mubr.msk.f32.mxu1 %vm3618_vm14, %v6956_v53 }
 0x88f   :  { %6868 = vrot.lane.b32.xlu1 %v6376_v13, %s8845_s24 }
 0x890   :  { %v6571_v18 = vpop.permute.xlu0 %6570  ;;  %v6853_v57 = vpop.permute.xlu1 %6852 }
 0x891   :  { %6614 = vst.msk [vmem:[#allocation5 + $0x50] sm:$0xff] %vm6608_vm11, %v6571_v18  ;;  %v6968_v18 = vld [vmem:[#allocation5 + $0xa8] sm:$0xff] }
 0x892   :  { %6897 = vst.msk [vmem:[#allocation5 + $0x40] sm:$0xff] %vm6892_vm0, %v6853_v57  ;;  %6659 = vrot.lane.b32.xlu0 %v6376_v13, %s8842_s3 }
 0x893   :  { %6408 = vrot.lane.b32.xlu1 %v6376_v13, %s8835_s28 }
 0x894   :  { %v6644_v62 = vpop.permute.xlu0 %6643  ;;  %v6393_v43 = vpop.permute.xlu1 %6392 }
 0x895   :  { %6687 = vst.msk [vmem:[#allocation5 + $0x50] sm:$0xff] %vm6681_vm12, %v6644_v62 }
 0x896   :  { %6435 = vst.msk [vmem:[#allocation5 + $0x60] sm:$0xff] %vm6428_vm9, %v6393_v43  ;;  %6730 = vrot.lane.b32.xlu0 %v15777_v50, %s8843_s12 }
 0x897   :  { %6521 = vrot.lane.b32.xlu1 %v15777_v50, %s8839_s22 }
 0x898   :  { %v6715_v49 = vpop.permute.xlu0 %6714  ;;  %v6506_v27 = vpop.permute.xlu1 %6505 }
 0x899   :  { %v6955_v40 = vld [vmem:[#allocation5 + $0x40] sm:$0xff]  ;;  %6758 = vst.msk [vmem:[#allocation5 + $0x50] sm:$0xff] %vm6752_vm13, %v6715_v49 }
 0x89a   :  { %6548 = vst.msk [vmem:[#allocation5 + $0x60] sm:$0xff] %vm6541_vm10, %v6506_v27  ;;  %7130 = vmatmul.mubr.f32.gmra.mxu1 %v6955_v40  ;;  %6797 = vrot.lane.b32.xlu0 %v15721_v28, %s8844_s13 }
 0x89b   :  { %8544 = vmatprep.mubr.msk.f32.mxu1 %vm3618_vm14, %v6958_v8  ;;  %6588 = vrot.lane.b32.xlu1 %v15721_v28, %s8841_s2 }
 0x89c   :  { %v6782_v50 = vpop.permute.xlu0 %6781  ;;  %v6573_v59 = vpop.permute.xlu1 %6572 }
 0x89d   :  { %6825 = vst.msk [vmem:[#allocation5 + $0x50] sm:$0xff] %vm6819_vm15, %v6782_v50 }
 0x89e   :  { %6615 = vst.msk [vmem:[#allocation5 + $0x60] sm:$0xff] %vm6608_vm11, %v6573_v59  ;;  %6870 = vrot.lane.b32.xlu0 %v6379_v22, %s8845_s24 }
 0x89f   :  { %6661 = vrot.lane.b32.xlu1 %v6379_v22, %s8842_s3 }
 0x8a0   :  { %v6855_v6 = vpop.permute.xlu0 %6854  ;;  %v6646_v34 = vpop.permute.xlu1 %6645 }
 0x8a1   :  { %6898 = vst.msk [vmem:[#allocation5 + $0x50] sm:$0xff] %vm6892_vm0, %v6855_v6 }
 0x8a2   :  { %6688 = vst.msk [vmem:[#allocation5 + $0x60] sm:$0xff] %vm6681_vm12, %v6646_v34  ;;  %6410 = vrot.lane.b32.xlu0 %v6379_v22, %s8835_s28 }
 0x8a3   :  { %6732 = vrot.lane.b32.xlu1 %v15790_v7, %s8843_s12 }
 0x8a4   :  { %v6395_v28 = vpop.permute.xlu0 %6394  ;;  %v6717_v41 = vpop.permute.xlu1 %6716 }
 0x8a5   :  { %6436 = vst.msk [vmem:[#allocation5 + $0x70] sm:$0xff] %vm6428_vm9, %v6395_v28 }
 0x8a6   :  { %6759 = vst.msk [vmem:[#allocation5 + $0x60] sm:$0xff] %vm6752_vm13, %v6717_v41  ;;  %6523 = vrot.lane.b32.xlu0 %v15790_v7, %s8839_s22  ;;  %v6632_v7 = vsel %vm537_vm3, %v6630_v38, %v6631_v21  ;;  %v6972_v38 = vld [vmem:[#allocation5 + $0xc8] sm:$0xff]  ;;  %vm18640_vm3 = vcmask 1041409  }
 0x8a7   :  { %6799 = vrot.lane.b32.xlu1 %v15760_v35, %s8844_s13 }
 0x8a8   :  { %v6508_v26 = vpop.permute.xlu0 %6507  ;;  %v6957_v23 = vld [vmem:[#allocation5 + $0x50] sm:$0xff]  ;;  %v6784_v10 = vpop.permute.xlu1 %6783 }
 0x8a9   :  { %6549 = vst.msk [vmem:[#allocation5 + $0x70] sm:$0xff] %vm6541_vm10, %v6508_v26  ;;  %7135 = vmatmul.mubr.f32.gmra.mxu1 %v6957_v23 }
 0x8aa   :  { %6826 = vst.msk [vmem:[#allocation5 + $0x60] sm:$0xff] %vm6819_vm15, %v6784_v10  ;;  %6590 = vrot.lane.b32.xlu0 %v15760_v35, %s8841_s2  ;;  %8545 = vmatprep.mubr.msk.f32.mxu1 %vm3618_vm14, %v6960_v39 }
 0x8ab   :  { %6872 = vrot.lane.b32.xlu1 %v6632_v7, %s8845_s24 }
 0x8ac   :  { %v6575_v46 = vpop.permute.xlu0 %6574  ;;  %v6857_v36 = vpop.permute.xlu1 %6856 }
 0x8ad   :  { %6616 = vst.msk [vmem:[#allocation5 + $0x70] sm:$0xff] %vm6608_vm11, %v6575_v46 }
 0x8ae   :  { %6899 = vst.msk [vmem:[#allocation5 + $0x60] sm:$0xff] %vm6892_vm0, %v6857_v36  ;;  %6663 = vrot.lane.b32.xlu0 %v6632_v7, %s8842_s3 }
 0x8af   :  { %6734 = vrot.lane.b32.xlu1 %v15796_v20, %s8843_s12 }
 0x8b0   :  { %v6648_v35 = vpop.permute.xlu0 %6647  ;;  %v6397_v24 = vpop.permute.xlu1 %6396 }
 0x8b1   :  { %6689 = vst.msk [vmem:[#allocation5 + $0x70] sm:$0xff] %vm6681_vm12, %v6648_v35 }
 0x8b2   :  { %6437 = vst.msk [vmem:[#allocation5 + $0x80] sm:$0xff] %vm6428_vm9, %v6397_v24  ;;  %6801 = vrot.lane.b32.xlu0 %v15834_v0, %s8844_s13 }
 0x8b3   :  { %6874 = vrot.lane.b32.xlu1 %v6843_v60, %s8845_s24 }
 0x8b4   :  { %v6719_v2 = vpop.permute.xlu0 %6718  ;;  %v6510_v63 = vpop.permute.xlu1 %6509 }
 0x8b5   :  { %v6959_v11 = vld [vmem:[#allocation5 + $0x60] sm:$0xff]  ;;  %6760 = vst.msk [vmem:[#allocation5 + $0x70] sm:$0xff] %vm6752_vm13, %v6719_v2 }
 0x8b6   :  { %6550 = vst.msk [vmem:[#allocation5 + $0x80] sm:$0xff] %vm6541_vm10, %v6510_v63  ;;  %7140 = vmatmul.mubr.f32.gmra.mxu1 %v6959_v11 }
 0x8b7   :  { %8546 = vmatprep.mubr.msk.f32.mxu1 %vm3618_vm14, %v6962_v47 }
 0x8b8   :  { %v6786_v20 = vpop.permute.xlu0 %6785  ;;  %v6577_v48 = vpop.permute.xlu1 %6576 }
 0x8b9   :  { %6827 = vst.msk [vmem:[#allocation5 + $0x70] sm:$0xff] %vm6819_vm15, %v6786_v20  ;;  %v6976_v20 = vld [vmem:[#allocation5 + $0xe8] sm:$0xff] }
 0x8ba   :  { %6617 = vst.msk [vmem:[#allocation5 + $0x80] sm:$0xff] %vm6608_vm11, %v6577_v48 }
 0x8bc   :  { %v6859_v0 = vpop.permute.xlu0 %6858  ;;  %v6650_v42 = vpop.permute.xlu1 %6649 }
 0x8bd   :  { %6900 = vst.msk [vmem:[#allocation5 + $0x70] sm:$0xff] %vm6892_vm0, %v6859_v0 }
 0x8be   :  { %6690 = vst.msk [vmem:[#allocation5 + $0x80] sm:$0xff] %vm6681_vm12, %v6650_v42 }
 0x8c0   :  { %v6399_v33 = vpop.permute.xlu0 %6398  ;;  %v6721_v54 = vpop.permute.xlu1 %6720 }
 0x8c1   :  { %6438 = vst.msk [vmem:[#allocation5 + $0x90] sm:$0xff] %vm6428_vm9, %v6399_v33 }
 0x8c2   :  { %6761 = vst.msk [vmem:[#allocation5 + $0x80] sm:$0xff] %vm6752_vm13, %v6721_v54 }
 0x8c4   :  { %v6512_v55 = vpop.permute.xlu0 %6511  ;;  %v6961_v1 = vld [vmem:[#allocation5 + $0x70] sm:$0xff]  ;;  %v6788_v25 = vpop.permute.xlu1 %6787 }
 0x8c5   :  { %6551 = vst.msk [vmem:[#allocation5 + $0x90] sm:$0xff] %vm6541_vm10, %v6512_v55  ;;  %7145 = vmatmul.mubr.f32.gmra.mxu1 %v6961_v1  ;;  %v6978_v1 = vld [vmem:[#allocation5 + $0xf8] sm:$0xff] }
 0x8c6   :  { %6828 = vst.msk [vmem:[#allocation5 + $0x80] sm:$0xff] %vm6819_vm15, %v6788_v25  ;;  %8547 = vmatprep.mubr.msk.f32.mxu1 %vm3618_vm14, %v6964_v61 }
 0x8c8   :  { %v6579_v52 = vpop.permute.xlu0 %6578  ;;  %v6861_v29 = vpop.permute.xlu1 %6860 }
 0x8c9   :  { %6618 = vst.msk [vmem:[#allocation5 + $0x90] sm:$0xff] %vm6608_vm11, %v6579_v52 }
 0x8ca   :  { %6901 = vst.msk [vmem:[#allocation5 + $0x80] sm:$0xff] %vm6892_vm0, %v6861_v29 }
 0x8cc   :  { %v6652_v16 = vpop.permute.xlu0 %6651  ;;  %v6401_v30 = vpop.permute.xlu1 %6400 }
 0x8cd   :  { %6691 = vst.msk [vmem:[#allocation5 + $0x90] sm:$0xff] %vm6681_vm12, %v6652_v16 }
 0x8ce   :  { %6439 = vst.msk [vmem:[#allocation5 + $0xa0] sm:$0xff] %vm6428_vm9, %v6401_v30 }
 0x8cf   :  { %v16039_v3 = vpop.f32.mrf.mxu1 }
 0x8d0   :  { %v6723_v14 = vpop.permute.xlu0 %6722  ;;  %v6514_v9 = vpop.permute.xlu1 %6513 }
 0x8d1   :  { %v6963_v45 = vld [vmem:[#allocation5 + $0x80] sm:$0xff]  ;;  %6762 = vst.msk [vmem:[#allocation5 + $0x90] sm:$0xff] %vm6752_vm13, %v6723_v14  ;;  %v7113_v51 = vpop.f32.mrf.mxu1 }
 0x8d2   :  { %6552 = vst.msk [vmem:[#allocation5 + $0xa0] sm:$0xff] %vm6541_vm10, %v6514_v9  ;;  %7150 = vmatmul.mubr.f32.gmra.mxu1 %v6963_v45 }
 0x8d3   :  { %8548 = vmatprep.mubr.msk.f32.mxu1 %vm3618_vm14, %v6966_v4 }
 0x8d4   :  { %v6790_v37 = vpop.permute.xlu0 %6789  ;;  %v6581_v58 = vpop.permute.xlu1 %6580 }
 0x8d5   :  { %6829 = vst.msk [vmem:[#allocation5 + $0x90] sm:$0xff] %vm6819_vm15, %v6790_v37 }
 0x8d6   :  { %6619 = vst.msk [vmem:[#allocation5 + $0xa0] sm:$0xff] %vm6608_vm11, %v6581_v58 }
 0x8d8   :  { %v6863_v5 = vpop.permute.xlu0 %6862  ;;  %v6654_v31 = vpop.permute.xlu1 %6653 }
 0x8d9   :  { %6902 = vst.msk [vmem:[#allocation5 + $0x90] sm:$0xff] %vm6892_vm0, %v6863_v5 }
 0x8da   :  { %6692 = vst.msk [vmem:[#allocation5 + $0xa0] sm:$0xff] %vm6681_vm12, %v6654_v31 }
 0x8dc   :  { %v6403_v56 = vpop.permute.xlu0 %6402  ;;  %v6725_v12 = vpop.permute.xlu1 %6724 }
 0x8dd   :  { %6440 = vst.msk [vmem:[#allocation5 + $0xb0] sm:$0xff] %vm6428_vm9, %v6403_v56 }
 0x8de   :  { %6763 = vst.msk [vmem:[#allocation5 + $0xa0] sm:$0xff] %vm6752_vm13, %v6725_v12 }
 0x8e0   :  { %v6516_v15 = vpop.permute.xlu0 %6515  ;;  %v6965_v53 = vld [vmem:[#allocation5 + $0x90] sm:$0xff]  ;;  %v6792_v13 = vpop.permute.xlu1 %6791 }
 0x8e1   :  { %6553 = vst.msk [vmem:[#allocation5 + $0xb0] sm:$0xff] %vm6541_vm10, %v6516_v15  ;;  %7155 = vmatmul.mubr.f32.gmra.mxu1 %v6965_v53 }
 0x8e2   :  { %6830 = vst.msk [vmem:[#allocation5 + $0xa0] sm:$0xff] %vm6819_vm15, %v6792_v13  ;;  %8549 = vmatprep.mubr.msk.f32.mxu1 %vm3618_vm14, %v6968_v18 }
 0x8e4   :  { %v6583_v57 = vpop.permute.xlu0 %6582 }
 0x8e5   :  { %6620 = vst.msk [vmem:[#allocation5 + $0xb0] sm:$0xff] %vm6608_vm11, %v6583_v57  ;;  %v6865_v62 = vpop.permute.xlu1 %6864 }
 0x8e6   :  { %6903 = vst.msk [vmem:[#allocation5 + $0xa0] sm:$0xff] %vm6892_vm0, %v6865_v62 }
 0x8e8   :  { %v6656_v43 = vpop.permute.xlu0 %6655 }
 0x8e9   :  { %6693 = vst.msk [vmem:[#allocation5 + $0xb0] sm:$0xff] %vm6681_vm12, %v6656_v43  ;;  %v6405_v49 = vpop.permute.xlu1 %6404 }
 0x8ea   :  { %6441 = vst.msk [vmem:[#allocation5 + $0xc0] sm:$0xff] %vm6428_vm9, %v6405_v49 }
 0x8ec   :  { %v6727_v27 = vpop.permute.xlu0 %6726 }
 0x8ed   :  { %6764 = vst.msk [vmem:[#allocation5 + $0xb0] sm:$0xff] %vm6752_vm13, %v6727_v27  ;;  %v6518_v40 = vpop.permute.xlu1 %6517  ;;  %v6967_v8 = vld [vmem:[#allocation5 + $0xa0] sm:$0xff] }
 0x8ee   :  { %6554 = vst.msk [vmem:[#allocation5 + $0xc0] sm:$0xff] %vm6541_vm10, %v6518_v40  ;;  %7160 = vmatmul.mubr.f32.gmra.mxu1 %v6967_v8 }
 0x8ef   :  { %8550 = vmatprep.mubr.msk.f32.mxu1 %vm3618_vm14, %v6970_v44  ;;  %v7191_v44 = vsel %vm7190_vm2, %v16039_v3, 0.0 }
 0x8f0   :  { %v6794_v17 = vpop.permute.xlu0 %6793 }
 0x8f1   :  { %6831 = vst.msk [vmem:[#allocation5 + $0xb0] sm:$0xff] %vm6819_vm15, %v6794_v17  ;;  %v6585_v50 = vpop.permute.xlu1 %6584 }
 0x8f2   :  { %6621 = vst.msk [vmem:[#allocation5 + $0xc0] sm:$0xff] %vm6608_vm11, %v6585_v50 }
 0x8f4   :  { %v6867_v59 = vpop.permute.xlu0 %6866 }
 0x8f5   :  { %6904 = vst.msk [vmem:[#allocation5 + $0xb0] sm:$0xff] %vm6892_vm0, %v6867_v59  ;;  %v6658_v22 = vpop.permute.xlu1 %6657 }
 0x8f6   :  { %6694 = vst.msk [vmem:[#allocation5 + $0xc0] sm:$0xff] %vm6681_vm12, %v6658_v22 }
 0x8f8   :  { %v6407_v6 = vpop.permute.xlu0 %6406 }
 0x8f9   :  { %6442 = vst.msk [vmem:[#allocation5 + $0xd0] sm:$0xff] %vm6428_vm9, %v6407_v6  ;;  %v6729_v34 = vpop.permute.xlu1 %6728 }
 0x8fa   :  { %6765 = vst.msk [vmem:[#allocation5 + $0xc0] sm:$0xff] %vm6752_vm13, %v6729_v34 }
 0x8fc   :  { %v6520_v28 = vpop.permute.xlu0 %6519  ;;  %v6969_v41 = vld [vmem:[#allocation5 + $0xb0] sm:$0xff] }
 0x8fd   :  { %6555 = vst.msk [vmem:[#allocation5 + $0xd0] sm:$0xff] %vm6541_vm10, %v6520_v28  ;;  %7165 = vmatmul.mubr.f32.gmra.mxu1 %v6969_v41  ;;  %v6796_v21 = vpop.permute.xlu1 %6795 }
 0x8fe   :  { %8551 = vmatprep.mubr.msk.f32.mxu1 %vm3618_vm14, %v6972_v38  ;;  %6832 = vst.msk [vmem:[#allocation5 + $0xc0] sm:$0xff] %vm6819_vm15, %v6796_v21 }
 0x900   :  { %v6587_v26 = vpop.permute.xlu0 %6586 }
 0x901   :  { %6622 = vst.msk [vmem:[#allocation5 + $0xd0] sm:$0xff] %vm6608_vm11, %v6587_v26  ;;  %v6869_v23 = vpop.permute.xlu1 %6868 }
 0x902   :  { %6905 = vst.msk [vmem:[#allocation5 + $0xc0] sm:$0xff] %vm6892_vm0, %v6869_v23 }
 0x904   :  { %v6660_v10 = vpop.permute.xlu0 %6659 }
 0x905   :  { %6695 = vst.msk [vmem:[#allocation5 + $0xd0] sm:$0xff] %vm6681_vm12, %v6660_v10  ;;  %v6409_v39 = vpop.permute.xlu1 %6408 }
 0x906   :  { %6443 = vst.msk [vmem:[#allocation5 + $0xe0] sm:$0xff] %vm6428_vm9, %v6409_v39 }
 0x908   :  { %v6731_v7 = vpop.permute.xlu0 %6730 }
 0x909   :  { %6766 = vst.msk [vmem:[#allocation5 + $0xd0] sm:$0xff] %vm6752_vm13, %v6731_v7  ;;  %v6522_v46 = vpop.permute.xlu1 %6521  ;;  %v6971_v36 = vld [vmem:[#allocation5 + $0xc0] sm:$0xff] }
 0x90a   :  { %6556 = vst.msk [vmem:[#allocation5 + $0xe0] sm:$0xff] %vm6541_vm10, %v6522_v46  ;;  %7170 = vmatmul.mubr.f32.gmra.mxu1 %v6971_v36 }
 0x90b   :  { %8552 = vmatprep.mubr.msk.f32.mxu1 %vm3618_vm14, %v6974_v19 }
 0x90c   :  { %v6798_v32 = vpop.permute.xlu0 %6797 }
 0x90d   :  { %6833 = vst.msk [vmem:[#allocation5 + $0xd0] sm:$0xff] %vm6819_vm15, %v6798_v32  ;;  %v6589_v35 = vpop.permute.xlu1 %6588 }
 0x90e   :  { %6623 = vst.msk [vmem:[#allocation5 + $0xe0] sm:$0xff] %vm6608_vm11, %v6589_v35 }
 0x910   :  { %v6871_v24 = vpop.permute.xlu0 %6870 }
 0x911   :  { %6906 = vst.msk [vmem:[#allocation5 + $0xd0] sm:$0xff] %vm6892_vm0, %v6871_v24  ;;  %v6662_v60 = vpop.permute.xlu1 %6661 }
 0x912   :  { %6696 = vst.msk [vmem:[#allocation5 + $0xe0] sm:$0xff] %vm6681_vm12, %v6662_v60 }
 0x914   :  { %v6411_v47 = vpop.permute.xlu0 %6410 }
 0x915   :  { %6444 = vst.msk [vmem:[#allocation5 + $0xf0] sm:$0xff] %vm6428_vm9, %v6411_v47  ;;  %v6733_v2 = vpop.permute.xlu1 %6732 }
 0x916   :  { %6767 = vst.msk [vmem:[#allocation5 + $0xe0] sm:$0xff] %vm6752_vm13, %v6733_v2 }
 0x918   :  { %v6524_v63 = vpop.permute.xlu0 %6523  ;;  %v6973_v11 = vld [vmem:[#allocation5 + $0xd0] sm:$0xff] }
 0x919   :  { %6557 = vst.msk [vmem:[#allocation5 + $0xf0] sm:$0xff] %vm6541_vm10, %v6524_v63  ;;  %7175 = vmatmul.mubr.f32.gmra.mxu1 %v6973_v11  ;;  %v6800_v48 = vpop.permute.xlu1 %6799 }
 0x91a   :  { %8553 = vmatprep.mubr.msk.f32.mxu1 %vm3618_vm14, %v6976_v20  ;;  %6834 = vst.msk [vmem:[#allocation5 + $0xe0] sm:$0xff] %vm6819_vm15, %v6800_v48 }
 0x91c   :  { %v6591_v0 = vpop.permute.xlu0 %6590 }
 0x91d   :  { %6624 = vst.msk [vmem:[#allocation5 + $0xf0] sm:$0xff] %vm6608_vm11, %v6591_v0  ;;  %v6873_v42 = vpop.permute.xlu1 %6872 }
 0x91e   :  { %6907 = vst.msk [vmem:[#allocation5 + $0xe0] sm:$0xff] %vm6892_vm0, %v6873_v42 }
 0x920   :  { %v6664_v33 = vpop.permute.xlu0 %6663 }
 0x921   :  { %6697 = vst.msk [vmem:[#allocation5 + $0xf0] sm:$0xff] %vm6681_vm12, %v6664_v33  ;;  %v6735_v54 = vpop.permute.xlu1 %6734 }
 0x922   :  { %6768 = vst.msk [vmem:[#allocation5 + $0xf0] sm:$0xff] %vm6752_vm13, %v6735_v54 }
 0x924   :  { %v6802_v55 = vpop.permute.xlu0 %6801 }
 0x925   :  { %6835 = vst.msk [vmem:[#allocation5 + $0xf0] sm:$0xff] %vm6819_vm15, %v6802_v55  ;;  %v6875_v25 = vpop.permute.xlu1 %6874  ;;  %v6975_v61 = vld [vmem:[#allocation5 + $0xe0] sm:$0xff] }
 0x926   :  { %6908 = vst.msk [vmem:[#allocation5 + $0xf0] sm:$0xff] %vm6892_vm0, %v6875_v25  ;;  %7180 = vmatmul.mubr.f32.gmra.mxu1 %v6975_v61  ;;  %vm18653_vm0 = vmmov %vm18640_vm3 }
 0x927   :  { %8554 = vmatprep.mubr.msk.f32.mxu1 %vm3618_vm14, %v6978_v1  ;;  %vm18646_vm14 = vmmov %vm18640_vm3 }
 0x928   :  { %vm18654_vm9 = vmmov %vm18653_vm0 }
 0x929   :  { %vm18655_vm10 = vmmov %vm18653_vm0 }
 0x92a   :  { %vm18656_vm11 = vmmov %vm18653_vm0 }
 0x92b   :  { %vm18657_vm12 = vmmov %vm18653_vm0 }
 0x92c   :  { %vm18658_vm13 = vmmov %vm18653_vm0 }
 0x92d   :  { %v6977_v52 = vld [vmem:[#allocation5 + $0xf0] sm:$0xff]  ;;  %vm18659_vm15 = vmmov %vm18653_vm0 }
 0x92e   :  { %7185 = vmatmul.mubr.f32.gmra.mxu1 %v6977_v52 }
 0x931   :  { %v16092_v29 = vpop.f32.mrf.mxu1 }
 0x932   :  { %v7192_v8 = vsel %vm7190_vm2, %v16092_v29, 0.0 }
 0x933   :  { %v7118_v16 = vpop.f32.mrf.mxu1  ;;  %v7193_v50 = vadd.f32 %v7192_v8, %v7191_v44 }
 0x93e   :  { %v16094_v30 = vpop.f32.mrf.mxu1 }
 0x93f   :  { %v7194_v17 = vsel %vm7190_vm2, %v16094_v30, 0.0 }
 0x940   :  { %v7123_v14 = vpop.f32.mrf.mxu1  ;;  %v7195_v22 = vadd.f32 %v7194_v17, %v7193_v50 }
 0x94d   :  { %v16096_v9 = vpop.f32.mrf.mxu1 }
 0x94e   :  { %v7196_v59 = vsel %vm7190_vm2, %v16096_v9, 0.0 }
 0x94f   :  { %v7128_v45 = vpop.f32.mrf.mxu1  ;;  %v7197_v34 = vadd.f32 %v7196_v59, %v7195_v22 }
 0x95a   :  { %v16098_v4 = vpop.f32.mrf.mxu1 }
 0x95b   :  { %v7198_v6 = vsel %vm7190_vm2, %v16098_v4, 0.0 }
 0x95c   :  { %v7133_v51 = vpop.f32.mrf.mxu1  ;;  %v7199_v38 = vadd.f32 %v7198_v6, %v7197_v34 }
 0x969   :  { %v16100_v37 = vpop.f32.mrf.mxu1 }
 0x96a   :  { %v7200_v28 = vsel %vm7190_vm2, %v16100_v37, 0.0 }
 0x96b   :  { %v7138_v58 = vpop.f32.mrf.mxu1  ;;  %v7201_v23 = vadd.f32 %v7200_v28, %v7199_v38 }
 0x976   :  { %v16102_v5 = vpop.f32.mrf.mxu1 }
 0x977   :  { %v7202_v21 = vsel %vm7190_vm2, %v16102_v5, 0.0 }
 0x978   :  { %v7143_v31 = vpop.f32.mrf.mxu1  ;;  %v7203_v39 = vadd.f32 %v7202_v21, %v7201_v23 }
 0x985   :  { %v16104_v56 = vpop.f32.mrf.mxu1 }
 0x986   :  { %v7204_v10 = vsel %vm7190_vm2, %v16104_v56, 0.0 }
 0x987   :  { %v7148_v12 = vpop.f32.mrf.mxu1  ;;  %v7205_v46 = vadd.f32 %v7204_v10, %v7203_v39 }
 0x992   :  { %v16106_v15 = vpop.f32.mrf.mxu1 }
 0x993   :  { %v7206_v7 = vsel %vm7190_vm2, %v16106_v15, 0.0 }
 0x994   :  { %v7153_v53 = vpop.f32.mrf.mxu1  ;;  %v7207_v19 = vadd.f32 %v7206_v7, %v7205_v46 }
 0x9a1   :  { %v16108_v13 = vpop.f32.mrf.mxu1 }
 0x9a2   :  { %v7208_v36 = vsel %vm7190_vm2, %v16108_v13, 0.0 }
 0x9a3   :  { %v7158_v18 = vpop.f32.mrf.mxu1  ;;  %v7209_v35 = vadd.f32 %v7208_v36, %v7207_v19 }
 0x9ae   :  { %v16110_v57 = vpop.f32.mrf.mxu1 }
 0x9af   :  { %v7210_v32 = vsel %vm7190_vm2, %v16110_v57, 0.0 }
 0x9b0   :  { %v7163_v62 = vpop.f32.mrf.mxu1  ;;  %v7211_v60 = vadd.f32 %v7210_v32, %v7209_v35 }
 0x9bd   :  { %v16112_v43 = vpop.f32.mrf.mxu1 }
 0x9be   :  { %v7212_v24 = vsel %vm7190_vm2, %v16112_v43, 0.0 }
 0x9bf   :  { %v7168_v49 = vpop.f32.mrf.mxu1  ;;  %v7213_v63 = vadd.f32 %v7212_v24, %v7211_v60 }
 0x9ca   :  { %v16114_v27 = vpop.f32.mrf.mxu1 }
 0x9cb   :  { %v7214_v2 = vsel %vm7190_vm2, %v16114_v27, 0.0 }
 0x9cc   :  { %v7173_v40 = vpop.f32.mrf.mxu1  ;;  %v7215_v48 = vadd.f32 %v7214_v2, %v7213_v63 }
 0x9d9   :  { %v16128_v41 = vpop.f32.mrf.mxu1 }
 0x9da   :  { %v7216_v20 = vsel %vm7190_vm2, %v16128_v41, 0.0 }
 0x9db   :  { %v7178_v26 = vpop.f32.mrf.mxu1  ;;  %v7217_v42 = vadd.f32 %v7216_v20, %v7215_v48 }
 0x9e6   :  { %v16142_v47 = vpop.f32.mrf.mxu1 }
 0x9e7   :  { %v7218_v0 = vsel %vm7190_vm2, %v16142_v47, 0.0 }
 0x9e8   :  { %v7183_v11 = vpop.f32.mrf.mxu1  ;;  %v7219_v33 = vadd.f32 %v7218_v0, %v7217_v42 }
 0x9ee   :  { %v16150_v54 = vpop.f32.mrf.mxu1 }
 0x9ef   :  { %v7220_v55 = vsel %vm7190_vm2, %v16150_v54, 0.0 }
 0x9f0   :  { %v7221_v1 = vadd.f32 %v7220_v55, %v7219_v33  ;;  %v7188_v25 = vpop.f32.mrf.mxu1 }
 0x9f2   :  { %v7222_v61 = vrot.slane %v7221_v1, 4 }
 0x9f4   :  { %v7223_v52 = vadd.f32 %v7222_v61, %v7221_v1 }
 0x9f6   :  { %v7224_v16 = vrot.slane %v7223_v52, 2 }
 0x9f8   :  { %v7225_v14 = vadd.f32 %v7224_v16, %v7223_v52 }
 0x9fa   :  { %v7226_v45 = vrot.slane %v7225_v14, 1 }
 0x9fc   :  { %v7227_v51 = vadd.f32 %v7226_v45, %v7225_v14 }
 0x9fe   :  { %v16154_v58 = vmul.f32 0.0078125, %v7227_v51 }
 0xa00   :  { %v7230_v31 = vsub.f32 %v16039_v3, %v16154_v58  ;;  %v7231_v12 = vsub.f32 %v16092_v29, %v16154_v58  ;;  %v7232_v53 = vsub.f32 %v16094_v30, %v16154_v58  ;;  %v7233_v18 = vsub.f32 %v16096_v9, %v16154_v58 }
 0xa01   :  { %v7234_v40 = vsub.f32 %v16098_v4, %v16154_v58  ;;  %v7235_v44 = vsub.f32 %v16100_v37, %v16154_v58  ;;  %v7236_v6 = vsub.f32 %v16102_v5, %v16154_v58  ;;  %v7237_v21 = vsub.f32 %v16104_v56, %v16154_v58 }
 0xa02   :  { %v7246_v62 = vmul.f32 %v7230_v31, %v7230_v31  ;;  %v7247_v49 = vmul.f32 %v7231_v12, %v7231_v12  ;;  %v7248_v8 = vmul.f32 %v7232_v53, %v7232_v53  ;;  %v7249_v17 = vmul.f32 %v7233_v18, %v7233_v18 }
 0xa03   :  { %v7250_v34 = vmul.f32 %v7234_v40, %v7234_v40  ;;  %v7251_v26 = vmul.f32 %v7235_v44, %v7235_v44  ;;  %v7238_v39 = vsub.f32 %v16106_v15, %v16154_v58  ;;  %v7252_v7 = vmul.f32 %v7236_v6, %v7236_v6 }
 0xa04   :  { %v7262_v50 = vsel %vm7190_vm2, %v7246_v62, 0.0  ;;  %v7263_v59 = vsel %vm7190_vm2, %v7247_v49, 0.0  ;;  %v7265_v28 = vsel %vm7190_vm2, %v7248_v8, 0.0  ;;  %v7267_v23 = vsel %vm7190_vm2, %v7249_v17, 0.0  ;;  %v8367_v17 = vld [vmem:[%s16954_s7 + $0x78] sm:$0xff] }
 0xa05   :  { %v7264_v22 = vadd.f32 %v7263_v59, %v7262_v50  ;;  %v7269_v46 = vsel %vm7190_vm2, %v7250_v34, 0.0  ;;  %v7239_v19 = vsub.f32 %v16108_v13, %v16154_v58  ;;  %v7253_v32 = vmul.f32 %v7237_v21, %v7237_v21  ;;  %v8366_v50 = vld [vmem:[%s16954_s7 + $0x70] sm:$0xff]  ;;  %8750 = vmatprep.subr.mxu1 %v8367_v17  ;;  %v8365_v34 = vld [vmem:[%s16954_s7 + $0x68] sm:$0xff]  ;;  %v8364_v21 = vld [vmem:[%s16954_s7 + $0x60] sm:$0xff] }
 0xa06   :  { %v7271_v35 = vsel %vm7190_vm2, %v7251_v26, 0.0  ;;  %v7240_v60 = vsub.f32 %v16110_v57, %v16154_v58  ;;  %v7254_v2 = vmul.f32 %v7238_v39, %v7238_v39  ;;  %v7273_v63 = vsel %vm7190_vm2, %v7252_v7, 0.0  ;;  %8751 = vmatpush3.msra.mxu1 %v8367_v17  ;;  %v8362_v7 = vld [vmem:[%s16954_s7 + $0x50] sm:$0xff] }
 0xa07   :  { %v7266_v38 = vadd.f32 %v7265_v28, %v7264_v22  ;;  %v7241_v20 = vsub.f32 %v16112_v43, %v16154_v58  ;;  %v7255_v48 = vmul.f32 %v7239_v19, %v7239_v19  ;;  %v7275_v0 = vsel %vm7190_vm2, %v7253_v32, 0.0  ;;  %8752 = vmatprep.subr.mxu1 %v8366_v50  ;;  %v8360_v32 = vld [vmem:[%s16954_s7 + $0x40] sm:$0xff] }
 0xa08   :  { %v7242_v33 = vsub.f32 %v16114_v27, %v16154_v58  ;;  %v7256_v55 = vmul.f32 %v7240_v60, %v7240_v60  ;;  %v7277_v1 = vsel %vm7190_vm2, %v7254_v2, 0.0  ;;  %v7243_v61 = vsub.f32 %v16128_v41, %v16154_v58  ;;  %8753 = vmatpush3.msra.mxu1 %v8366_v50 }
 0xa09   :  { %v7268_v10 = vadd.f32 %v7267_v23, %v7266_v38  ;;  %v7257_v52 = vmul.f32 %v7241_v20, %v7241_v20  ;;  %v7279_v16 = vsel %vm7190_vm2, %v7255_v48, 0.0  ;;  %v7244_v45 = vsub.f32 %v16142_v47, %v16154_v58  ;;  %8754 = vmatprep.subr.mxu1 %v8365_v34  ;;  %v7300_v20 = vld [vmem:[%s16952_s5] sm:$0x1] }
 0xa0a   :  { %v7258_v51 = vmul.f32 %v7242_v33, %v7242_v33  ;;  %v7281_v31 = vsel %vm7190_vm2, %v7256_v55, 0.0  ;;  %v7245_v53 = vsub.f32 %v16150_v54, %v16154_v58  ;;  %v7259_v18 = vmul.f32 %v7243_v61, %v7243_v61  ;;  %8755 = vmatpush3.msra.mxu1 %v8365_v34  ;;  %v18636_v55 = vld [vmem:[#allocation34_spill] sm:$0xff] }
 0xa0b   :  { %v7270_v36 = vadd.f32 %v7269_v46, %v7268_v10  ;;  %v7283_v62 = vsel %vm7190_vm2, %v7257_v52, 0.0  ;;  %v7260_v40 = vmul.f32 %v7244_v45, %v7244_v45  ;;  %v8363_v10 = vld [vmem:[%s16954_s7 + $0x58] sm:$0xff]  ;;  %8756 = vmatprep.subr.mxu1 %v8364_v21 }
 0xa0c   :  { %v7285_v8 = vsel %vm7190_vm2, %v7258_v51, 0.0  ;;  %v7261_v59 = vmul.f32 %v7245_v53, %v7245_v53  ;;  %v7287_v22 = vsel %vm7190_vm2, %v7259_v18, 0.0  ;;  %8757 = vmatpush3.msra.mxu1 %v8364_v21 }
 0xa0d   :  { %v7272_v24 = vadd.f32 %v7271_v35, %v7270_v36  ;;  %v7289_v28 = vsel %vm7190_vm2, %v7260_v40, 0.0  ;;  %8758 = vmatprep.subr.mxu1 %v8363_v10  ;;  %v8361_v36 = vld [vmem:[%s16954_s7 + $0x48] sm:$0xff] }
 0xa0e   :  { %v7291_v26 = vsel %vm7190_vm2, %v7261_v59, 0.0  ;;  %8759 = vmatpush3.msra.mxu1 %v8363_v10 }
 0xa0f   :  { %v7274_v11 = vadd.f32 %v7273_v63, %v7272_v24  ;;  %8760 = vmatprep.subr.mxu1 %v8362_v7  ;;  %v8359_v24 = vld [vmem:[%s16954_s7 + $0x38] sm:$0xff] }
 0xa10   :  { %8761 = vmatpush3.msra.mxu1 %v8362_v7 }
 0xa11   :  { %v7276_v42 = vadd.f32 %v7275_v0, %v7274_v11  ;;  %8762 = vmatprep.subr.mxu1 %v8361_v36 }
 0xa12   :  { %8763 = vmatpush3.msra.mxu1 %v8361_v36 }
 0xa13   :  { %v7278_v25 = vadd.f32 %v7277_v1, %v7276_v42  ;;  %8764 = vmatprep.subr.mxu1 %v8360_v32  ;;  %v7304_v42 = vld [vmem:[%s16953_s6] sm:$0x1] }
 0xa14   :  { %8765 = vmatpush3.msra.mxu1 %v8360_v32 }
 0xa15   :  { %v7280_v14 = vadd.f32 %v7279_v16, %v7278_v25  ;;  %8766 = vmatprep.subr.mxu1 %v8359_v24 }
 0xa16   :  { %8767 = vmatpush3.msra.mxu1 %v8359_v24 }
 0xa17   :  { %v7282_v12 = vadd.f32 %v7281_v31, %v7280_v14  ;;  %v18637_v14 = vld [vmem:[#allocation33_spill] sm:$0xff] }
 0xa18   :  { %v16248_v45 = vsub.s32 1, %v18637_v14 }
 0xa19   :  { %v7284_v49 = vadd.f32 %v7283_v62, %v7282_v12 }
 0xa1b   :  { %v7286_v44 = vadd.f32 %v7285_v8, %v7284_v49 }
 0xa1d   :  { %v7288_v6 = vadd.f32 %v7287_v22, %v7286_v44 }
 0xa1f   :  { %v7290_v38 = vadd.f32 %v7289_v28, %v7288_v6  ;;  %v18638_v6 = vld [vmem:[#allocation35_spill] sm:$0xff] }
 0xa21   :  { %v7292_v23 = vadd.f32 %v7291_v26, %v7290_v38  ;;  %v8358_v38 = vld [vmem:[%s16954_s7 + $0x30] sm:$0xff] }
 0xa22   :  { %8768 = vmatprep.subr.mxu1 %v8358_v38 }
 0xa23   :  { %v7293_v39 = vrot.slane %v7292_v23, 4  ;;  %8769 = vmatpush3.msra.mxu1 %v8358_v38 }
 0xa25   :  { %v7294_v46 = vadd.f32 %v7293_v39, %v7292_v23 }
 0xa27   :  { %v7295_v19 = vrot.slane %v7294_v46, 2 }
 0xa29   :  { %v7296_v35 = vadd.f32 %v7295_v19, %v7294_v46 }
 0xa2b   :  { %v7297_v60 = vrot.slane %v7296_v35, 1 }
 0xa2d   :  { %v7298_v2 = vadd.f32 %v7297_v60, %v7296_v35 }
 0xa2f   :  { %v7299_v63 = vmul.f32 0.0078125, %v7298_v2 }
 0xa31   :  { %v7301_v11 = vadd.f32 1e-05, %v7299_v63 }
 0xa33   :  { %8807 = vrsqrt.f32 %v7301_v11 }
 0xa40   :  { %v8808_v48 = vpop.eup %8807 }
 0xa41   :  { %v7303_v0 = vmul.f32 %v8808_v48, %v7300_v20 }
 0xa43   :  { %v7305_v33 = vmul.f32 %v7303_v0, %v16154_v58  ;;  %v16239_v1 = vrot.slane %v7303_v0, %v18636_v55 }
 0xa45   :  { %v7306_v25 = vsub.f32 %v7304_v42, %v7305_v33  ;;  %v7328_v61 = vmul.f32 %v16239_v1, %v16150_v54  ;;  %v7313_v52 = vmul.f32 %v16239_v1, %v16039_v3  ;;  %v7315_v16 = vmul.f32 %v16239_v1, %v16094_v30 }
 0xa46   :  { %v7317_v58 = vmul.f32 %v16239_v1, %v16098_v4  ;;  %v7319_v31 = vmul.f32 %v16239_v1, %v16102_v5  ;;  %v7321_v54 = vmul.f32 %v16239_v1, %v16106_v15  ;;  %v7323_v3 = vmul.f32 %v16239_v1, %v16110_v57 }
 0xa47   :  { %v16251_v51 = vrot.slane %v7306_v25, %v18636_v55  ;;  %v7325_v30 = vmul.f32 %v16239_v1, %v16114_v27  ;;  %v7327_v12 = vmul.f32 %v16239_v1, %v16142_v47  ;;  %v16267_v53 = vmul.f32 %v16239_v1, %v16092_v29 }
 0xa48   :  { %v16278_v47 = vmul.f32 %v16239_v1, %v16096_v9  ;;  %v16285_v17 = vmul.f32 %v16239_v1, %v16100_v37  ;;  %v16289_v50 = vmul.f32 %v16239_v1, %v16104_v56  ;;  %v16293_v59 = vmul.f32 %v16239_v1, %v16108_v13 }
 0xa49   :  { %v7350_v4 = vadd.f32 %v16251_v51, %v7328_v61  ;;  %v7335_v5 = vadd.f32 %v16251_v51, %v7313_v52  ;;  %v7337_v18 = vadd.f32 %v16251_v51, %v7315_v16  ;;  %v7339_v15 = vadd.f32 %v16251_v51, %v7317_v58 }
 0xa4a   :  { %v7341_v57 = vadd.f32 %v16251_v51, %v7319_v31  ;;  %v7343_v62 = vadd.f32 %v16251_v51, %v7321_v54  ;;  %v7345_v27 = vadd.f32 %v16251_v51, %v7323_v3  ;;  %v16281_v44 = vadd.f32 %v16251_v51, %v7325_v30 }
 0xa4b   :  { %v7366_v29 = vmax.f32 %v7350_v4, 0.0  ;;  %v7351_v49 = vmax.f32 %v7335_v5, 0.0  ;;  %v7353_v40 = vmax.f32 %v7337_v18, 0.0  ;;  %v7355_v8 = vmax.f32 %v7339_v15, 0.0 }
 0xa4c   :  { %v7357_v28 = vmax.f32 %v7341_v57, 0.0  ;;  %v7359_v10 = vmax.f32 %v7343_v62, 0.0  ;;  %v7361_v39 = vmax.f32 %v7345_v27, 0.0  ;;  %v7349_v19 = vadd.f32 %v16251_v51, %v7327_v12 }
 0xa4d   :  { %v7638_v9 = vcombine.high %v7366_v29, %v7366_v29  ;;  %v7383_v22 = vcombine.high %v7351_v49, %v7351_v49  ;;  %v16296_v34 = vrot.slane %v7351_v49, %v18638_v6  ;;  %v16302_v37 = vrot.slane %v7366_v29, %v18638_v6 }
 0xa4e   :  { %v7417_v21 = vcombine.high %v7353_v40, %v7353_v40  ;;  %v16305_v56 = vrot.slane %v7353_v40, %v18638_v6  ;;  %v7451_v26 = vcombine.high %v7355_v8, %v7355_v8  ;;  %v16311_v23 = vrot.slane %v7355_v8, %v18638_v6 }
 0xa4f   :  { %v16308_v13 = vrot.slane %v7383_v22, %v18638_v6  ;;  %v16314_v7 = vrot.slane %v7638_v9, %v18638_v6  ;;  %v16318_v46 = vcombine.high %v16296_v34, %v16296_v34  ;;  %v16339_v2 = vcombine.high %v16302_v37, %v16302_v37 }
 0xa50   :  { %v16321_v36 = vrot.slane %v7417_v21, %v18638_v6  ;;  %v16330_v35 = vcombine.high %v16305_v56, %v16305_v56  ;;  %v16335_v60 = vrot.slane %v7451_v26, %v18638_v6  ;;  %v7822_v11 = vrot.slane %v16296_v34, %v16248_v45 }
 0xa51   :  { %v16326_v32 = vcombine.high %v16308_v13, %v16308_v13  ;;  %v7830_v24 = vrot.slane %v16308_v13, %v16248_v45  ;;  %v7826_v20 = vrot.slane %v16318_v46, %v16248_v45  ;;  %v16353_v0 = vcombine.high %v16311_v23, %v16311_v23 }
 0xa52   :  { %v16343_v63 = vcombine.high %v16321_v36, %v16321_v36  ;;  %v16357_v42 = vcombine.high %v16335_v60, %v16335_v60  ;;  %v7485_v33 = vcombine.high %v7357_v28, %v7357_v28  ;;  %v7838_v61 = vrot.slane %v16305_v56, %v16248_v45 }
 0xa53   :  { %v7834_v48 = vrot.slane %v16326_v32, %v16248_v45  ;;  %v7947_v52 = vsel %vm6094_vm1, %v7826_v20, %v7822_v11  ;;  %v16365_v16 = vrot.slane %v7357_v28, %v18638_v6  ;;  %v7842_v14 = vrot.slane %v16330_v35, %v16248_v45 }
 0xa54   :  { %v7850_v58 = vrot.slane %v16343_v63, %v16248_v45  ;;  %v7948_v31 = vsel %vm6096_vm4, %v7830_v24, %v7947_v52  ;;  %v16373_v54 = vrot.slane %v7485_v33, %v18638_v6  ;;  %v7846_v3 = vrot.slane %v16321_v36, %v16248_v45 }
 0xa55   :  { %v7949_v30 = vsel %vm6098_vm5, %v7834_v48, %v7948_v31  ;;  %v7854_v4 = vrot.slane %v16311_v23, %v16248_v45  ;;  %v16385_v18 = vcombine.high %v16365_v16, %v16365_v16  ;;  %v7858_v57 = vrot.slane %v16353_v0, %v16248_v45 }
 0xa56   :  { %v7950_v5 = vsel %vm6100_vm6, %v7838_v61, %v7949_v30  ;;  %v16394_v27 = vcombine.high %v16373_v54, %v16373_v54  ;;  %v7862_v29 = vrot.slane %v16335_v60, %v16248_v45  ;;  %v7866_v49 = vrot.slane %v16357_v42, %v16248_v45 }
 0xa57   :  { %18639 = vst [vmem:[#allocation55_spill] sm:$0xff] %v16385_v18  ;;  %v7951_v62 = vsel %vm6102_vm7, %v7842_v14, %v7950_v5  ;;  %v7870_v8 = vrot.slane %v16365_v16, %v16248_v45  ;;  %v7953_v9 = vsel %vm18640_vm3, %v7854_v4, %v7850_v58  ;;  %v7519_v22 = vcombine.high %v7359_v10, %v7359_v10  ;;  %vm18660_vm3 = vmmov %vm18653_vm0 }
 0xa58   :  { %v7952_v40 = vsel %vm6104_vm8, %v7846_v3, %v7951_v62  ;;  %v7954_v28 = vsel %vm6094_vm1, %v7858_v57, %v7953_v9  ;;  %v16407_v38 = vrot.slane %v7359_v10, %v18638_v6  ;;  %v7553_v21 = vcombine.high %v7361_v39, %v7361_v39  ;;  %v8357_v10 = vld [vmem:[%s16954_s7 + $0x28] sm:$0xff] }
 0xa59   :  { %7974 = vrot.lane.b32.xlu0 %v7952_v40, %s8839_s22  ;;  %v16410_v26 = vrot.slane %v7361_v39, %v18638_v6  ;;  %v7874_v24 = vrot.slane %v16385_v18, %v16248_v45  ;;  %v7878_v11 = vrot.slane %v16373_v54, %v16248_v45  ;;  %v7955_v20 = vsel %vm6096_vm4, %v7862_v29, %v7954_v28 }
 0xa5a   :  { %v16418_v48 = vrot.slane %v7519_v22, %v18638_v6  ;;  %v7882_v33 = vrot.slane %v16394_v27, %v16248_v45  ;;  %v7956_v39 = vsel %vm6098_vm5, %v7866_v49, %v7955_v20  ;;  %v16428_v61 = vcombine.high %v16407_v38, %v16407_v38  ;;  %8770 = vmatprep.subr.mxu1 %v8357_v10 }
 0xa5b   :  { %v16431_v52 = vrot.slane %v7553_v21, %v18638_v6  ;;  %v7957_v14 = vsel %vm6100_vm6, %v7870_v8, %v7956_v39  ;;  %v7363_v31 = vmax.f32 %v16281_v44, 0.0  ;;  %v7365_v3 = vmax.f32 %v7349_v19, 0.0  ;;  %8771 = vmatpush3.msra.mxu1 %v8357_v10 }
 0xa5c   :  { %18641 = vst [vmem:[#allocation66_spill] sm:$0xff] %v16428_v61  ;;  %v16436_v58 = vcombine.high %v16418_v48, %v16418_v48  ;;  %v7958_v4 = vsel %vm6102_vm7, %v7874_v24, %v7957_v14  ;;  %v16444_v5 = vcombine.high %v16410_v26, %v16410_v26  ;;  %v7886_v57 = vrot.slane %v16407_v38, %v16248_v45 }
 0xa5d   :  { %18642 = vst [vmem:[#allocation28_spill] sm:$0xff] %v16431_v52  ;;  %v7959_v62 = vsel %vm6104_vm8, %v7878_v11, %v7958_v4  ;;  %v16451_v29 = vcombine.high %v16431_v52, %v16431_v52  ;;  %v7894_v19 = vrot.slane %v16418_v48, %v16248_v45  ;;  %v7890_v40 = vrot.slane %v16428_v61, %v16248_v45 }
 0xa5e   :  { %18643 = vst [vmem:[#allocation30_spill] sm:$0xff] %v16436_v58  ;;  %18644 = vst [vmem:[#allocation80_spill] sm:$0xff] %v16444_v5  ;;  %7976 = vrot.lane.b32.xlu1 %v7959_v62, %s8839_s22  ;;  %v7898_v8 = vrot.slane %v16436_v58, %v16248_v45  ;;  %v7902_v9 = vrot.slane %v16410_v26, %v16248_v45  ;;  %v7960_v22 = vsel %vm18646_vm14, %v7886_v57, %v7882_v33 }
 0xa5f   :  { %18645 = vst [vmem:[#allocation46_spill] sm:$0xff] %v16451_v29  ;;  %v7587_v28 = vcombine.high %v7363_v31, %v7363_v31  ;;  %v16468_v21 = vrot.slane %v7363_v31, %v18638_v6  ;;  %v7621_v24 = vcombine.high %v7365_v3, %v7365_v3  ;;  %v7906_v11 = vrot.slane %v16444_v5, %v16248_v45  ;;  %vm18662_vm14 = vmmov %vm18653_vm0 }
 0xa60   :  { %v7910_v20 = vrot.slane %v16431_v52, %v16248_v45  ;;  %v7961_v10 = vsel %vm6094_vm1, %v7890_v40, %v7960_v22  ;;  %v16476_v39 = vrot.slane %v7365_v3, %v18638_v6  ;;  %v7914_v14 = vrot.slane %v16451_v29, %v16248_v45 }
 0xa61   :  { %18647 = vst [vmem:[#allocation42_spill] sm:$0xff] %v16468_v21  ;;  %v7962_v33 = vsel %vm6096_vm4, %v7894_v19, %v7961_v10  ;;  %v16482_v31 = vrot.slane %v7587_v28, %v18638_v6  ;;  %v16486_v4 = vcombine.high %v16468_v21, %v16468_v21  ;;  %v7336_v3 = vadd.f32 %v16251_v51, %v16267_v53 }
 0xa62   :  { %18648 = vst [vmem:[#allocation81_spill] sm:$0xff] %v16476_v39  ;;  %v7963_v57 = vsel %vm6098_vm5, %v7898_v8, %v7962_v33  ;;  %v16491_v62 = vcombine.high %v16476_v39, %v16476_v39  ;;  %v7338_v40 = vadd.f32 %v16251_v51, %v16278_v47  ;;  %v16503_v28 = vrot.slane %v7621_v24, %v18638_v6 }
 0xa63   :  { %18649 = vst [vmem:[#allocation58_spill] sm:$0xff] %v16482_v31  ;;  %18650 = vst [vmem:[#allocation48_spill] sm:$0xff] %v16486_v4  ;;  %v7964_v19 = vsel %vm6100_vm6, %v7902_v9, %v7963_v57  ;;  %v16500_v22 = vcombine.high %v16482_v31, %v16482_v31  ;;  %v7918_v8 = vrot.slane %v16468_v21, %v16248_v45  ;;  %v7352_v49 = vmax.f32 %v7336_v3, 0.0 }
 0xa64   :  { %18651 = vst [vmem:[#allocation32_spill] sm:$0xff] %v16491_v62  ;;  %v7965_v10 = vsel %vm6102_vm7, %v7906_v11, %v7964_v19  ;;  %v7922_v47 = vrot.slane %v16486_v4, %v16248_v45  ;;  %v7934_v9 = vrot.slane %v16476_v39, %v16248_v45  ;;  %v7926_v24 = vrot.slane %v16482_v31, %v16248_v45 }
 0xa65   :  { %18652 = vst [vmem:[#allocation82_spill] sm:$0xff] %v16500_v22  ;;  %v7966_v33 = vsel %vm6104_vm8, %v7910_v20, %v7965_v10  ;;  %v7930_v57 = vrot.slane %v16500_v22, %v16248_v45  ;;  %v7938_v11 = vrot.slane %v16491_v62, %v16248_v45  ;;  %v7967_v19 = vsel %vm18653_vm0, %v7918_v8, %v7914_v14 }
 0xa66   :  { %7978 = vrot.lane.b32.xlu0 %v7966_v33, %s8839_s22  ;;  %v7340_v53 = vadd.f32 %v16251_v51, %v16285_v17  ;;  %v7354_v30 = vmax.f32 %v7338_v40, 0.0  ;;  %v7942_v20 = vrot.slane %v16503_v28, %v16248_v45  ;;  %v7968_v10 = vsel %vm6094_vm1, %v7922_v47, %v7967_v19  ;;  %v8356_v17 = vld [vmem:[%s16954_s7 + $0x20] sm:$0xff] }
 0xa67   :  { %v7342_v44 = vadd.f32 %v16251_v51, %v16289_v50  ;;  %v7344_v15 = vadd.f32 %v16251_v51, %v16293_v59  ;;  %v7969_v33 = vsel %vm6096_vm4, %v7926_v24, %v7968_v10  ;;  %v7400_v14 = vcombine.high %v7352_v49, %v7352_v49  ;;  %8772 = vmatprep.subr.mxu1 %v8356_v17 }
 0xa68   :  { %v7356_v12 = vmax.f32 %v7340_v53, 0.0  ;;  %v16534_v8 = vrot.slane %v7352_v49, %v18638_v6  ;;  %v7970_v3 = vsel %vm6098_vm5, %v7930_v57, %v7969_v33  ;;  %v7434_v40 = vcombine.high %v7354_v30, %v7354_v30  ;;  %8773 = vmatpush3.msra.mxu1 %v8356_v17 }
 0xa69   :  { %v16541_v47 = vrot.slane %v7354_v30, %v18638_v6  ;;  %v7358_v50 = vmax.f32 %v7342_v44, 0.0  ;;  %v7971_v59 = vsel %vm6100_vm6, %v7934_v9, %v7970_v3  ;;  %v16545_v53 = vrot.slane %v7400_v14, %v18638_v6 }
 0xa6a   :  { %v16549_v49 = vcombine.high %v16534_v8, %v16534_v8  ;;  %v7475_v24 = vrot.slane %v7356_v12, %v18638_v6  ;;  %v7972_v57 = vsel %vm6102_vm7, %v7938_v11, %v7971_v59  ;;  %v16554_v19 = vrot.slane %v7434_v40, %v18638_v6 }
 0xa6b   :  { %v16558_v30 = vcombine.high %v16541_v47, %v16541_v47  ;;  %v8000_v44 = vrot.slane %v16534_v8, %v18636_v55  ;;  %v7973_v9 = vsel %vm6104_vm8, %v7942_v20, %v7972_v57  ;;  %v16565_v10 = vcombine.high %v16545_v53, %v16545_v53 }
 0xa6c   :  { %v8004_v33 = vrot.slane %v16549_v49, %v18636_v55  ;;  %v8008_v11 = vrot.slane %v16545_v53, %v18636_v55  ;;  %7980 = vrot.lane.b32.xlu1 %v7973_v9, %s8839_s22  ;;  %v7450_v17 = vcombine.high %v16554_v19, %v16554_v19  ;;  %v8016_v20 = vrot.slane %v16541_v47, %v18636_v55 }
 0xa6d   :  { %v8020_v3 = vrot.slane %v16558_v30, %v18636_v55  ;;  %v8012_v40 = vrot.slane %v16565_v10, %v18636_v55  ;;  %v8024_v59 = vrot.slane %v16554_v19, %v18636_v55  ;;  %v7360_v14 = vmax.f32 %v7344_v15, 0.0 }
 0xa6e   :  { %v8125_v57 = vsel %vm18654_vm9, %v8004_v33, %v8000_v44  ;;  %v8201_v25 = vrot.slane %v7450_v17, %v16248_v45  ;;  %v8205_v22 = vrot.slane %v7475_v24, %v16248_v45  ;;  %v7468_v62 = vcombine.high %v7356_v12, %v7356_v12  ;;  %vm18667_vm9 = vmmov %vm18653_vm0 }
 0xa6f   :  { %v8126_v9 = vsel %vm6094_vm1, %v8008_v11, %v8125_v57  ;;  %v16589_v29 = vcombine.high %v7475_v24, %v7475_v24  ;;  %v7502_v4 = vcombine.high %v7358_v50, %v7358_v50  ;;  %v16592_v52 = vrot.slane %v7358_v50, %v18638_v6 }
 0xa70   :  { %v8127_v39 = vsel %vm6096_vm4, %v8012_v40, %v8126_v9  ;;  %v8028_v58 = vrot.slane %v7450_v17, %v18636_v55  ;;  %v16597_v15 = vrot.slane %v7468_v62, %v18638_v6  ;;  %v7543_v33 = vrot.slane %v7360_v14, %v18638_v6 }
 0xa71   :  { %v8128_v44 = vsel %vm6098_vm5, %v8016_v20, %v8127_v39  ;;  %v16602_v12 = vrot.slane %v7502_v4, %v18638_v6  ;;  %v16606_v40 = vcombine.high %v16592_v52, %v16592_v52  ;;  %v8032_v50 = vrot.slane %v7475_v24, %v18636_v55 }
 0xa72   :  { %v8129_v11 = vsel %vm6100_vm6, %v8020_v3, %v8128_v44  ;;  %v16612_v39 = vcombine.high %v16597_v15, %v16597_v15  ;;  %v8036_v62 = vrot.slane %v16589_v29, %v18636_v55  ;;  %v8040_v20 = vrot.slane %v16597_v15, %v18636_v55 }
 0xa73   :  { %v8130_v17 = vsel %vm6102_vm7, %v8024_v59, %v8129_v11  ;;  %v16620_v3 = vsel %vm18655_vm10, %v8205_v22, %v8201_v25  ;;  %v7518_v24 = vcombine.high %v16602_v12, %v16602_v12  ;;  %v7324_v59 = vmul.f32 %v16239_v1, %v16112_v43  ;;  %vm18678_vm10 = vmmov %vm18653_vm0 }
 0xa74   :  { %v8131_v4 = vsel %vm6104_vm8, %v8028_v58, %v8130_v17  ;;  %v8044_v57 = vrot.slane %v16612_v39, %v18636_v55  ;;  %v8048_v9 = vrot.slane %v16592_v52, %v18636_v55  ;;  %v8052_v58 = vrot.slane %v16606_v40, %v18636_v55 }
 0xa75   :  { %8153 = vrot.lane.b32.xlu0 %v8131_v4, %s8842_s3  ;;  %v8132_v25 = vsel %vm18656_vm11, %v8036_v62, %v8032_v50  ;;  %v8056_v22 = vrot.slane %v16602_v12, %v18636_v55  ;;  %v8233_v43 = vrot.slane %v7518_v24, %v16248_v45  ;;  %v7326_v11 = vmul.f32 %v16239_v1, %v16128_v41  ;;  %v8355_v50 = vld [vmem:[%s16954_s7 + $0x18] sm:$0xff] }
 0xa76   :  { %v8133_v44 = vsel %vm6094_vm1, %v8040_v20, %v8132_v25  ;;  %v7346_v4 = vadd.f32 %v16251_v51, %v7324_v59  ;;  %v7536_v5 = vcombine.high %v7360_v14, %v7360_v14  ;;  %v16642_v31 = vcombine.high %v7543_v33, %v7543_v33  ;;  %8774 = vmatprep.subr.mxu1 %v8355_v50 }
 0xa77   :  { %v8134_v17 = vsel %vm6096_vm4, %v8044_v57, %v8133_v44  ;;  %v8060_v62 = vrot.slane %v7518_v24, %v18636_v55  ;;  %v8237_v25 = vrot.slane %v7543_v33, %v16248_v45  ;;  %v7348_v21 = vadd.f32 %v16251_v51, %v7326_v11  ;;  %8775 = vmatpush3.msra.mxu1 %v8355_v50 }
 0xa78   :  { %v8135_v20 = vsel %vm6098_vm5, %v8048_v9, %v8134_v17  ;;  %v7362_v1 = vmax.f32 %v7346_v4, 0.0  ;;  %v16653_v14 = vrot.slane %v7536_v5, %v18638_v6  ;;  %v8068_v59 = vrot.slane %v16642_v31, %v18636_v55 }
 0xa79   :  { %v8136_v41 = vsel %vm6100_vm6, %v8052_v58, %v8135_v20  ;;  %v16659_v24 = vsel %vm18657_vm12, %v8237_v25, %v8233_v43  ;;  %v16661_v9 = vmax.f32 %v7348_v21, 0.0  ;;  %v8064_v51 = vrot.slane %v7543_v33, %v18636_v55 }
 0xa7a   :  { %v8137_v57 = vsel %vm6102_vm7, %v8056_v22, %v8136_v41  ;;  %v16667_v58 = vcombine.high %v16653_v14, %v16653_v14  ;;  %v7570_v5 = vcombine.high %v7362_v1, %v7362_v1  ;;  %v16670_v11 = vrot.slane %v7362_v1, %v18638_v6  ;;  %v8354_v1 = vld [vmem:[%s16954_s7 + $0x10] sm:$0xff] }
 0xa7b   :  { %v8138_v44 = vsel %vm6104_vm8, %v8060_v62, %v8137_v57  ;;  %v16675_v22 = vrot.slane %v16661_v9, %v18638_v6  ;;  %v8072_v21 = vrot.slane %v16653_v14, %v18636_v55  ;;  %v8139_v33 = vsel %vm18658_vm13, %v8068_v59, %v8064_v51  ;;  %8776 = vmatprep.subr.mxu1 %v8354_v1 }
 0xa7c   :  { %8155 = vrot.lane.b32.xlu1 %v8138_v44, %s8842_s3  ;;  %v8177_v43 = vrot.slane %v16549_v49, %v16248_v45  ;;  %v16683_v17 = vrot.slane %v7570_v5, %v18638_v6  ;;  %v16687_v4 = vcombine.high %v16670_v11, %v16670_v11  ;;  %v8076_v50 = vrot.slane %v16667_v58, %v18636_v55 }
 0xa7d   :  { %v8181_v62 = vrot.slane %v16545_v53, %v16248_v45  ;;  %v8080_v20 = vrot.slane %v16670_v11, %v18636_v55  ;;  %v8140_v25 = vsel %vm6094_vm1, %v8072_v21, %v8139_v33  ;;  %v8173_v49 = vrot.slane %v16534_v8, %v16248_v45  ;;  %8777 = vmatpush3.msra.mxu1 %v8354_v1 }
 0xa7e   :  { %v8185_v41 = vrot.slane %v16565_v10, %v16248_v45  ;;  %v7586_v59 = vcombine.high %v16683_v17, %v16683_v17  ;;  %v8084_v53 = vrot.slane %v16687_v4, %v18636_v55  ;;  %v8141_v57 = vsel %vm6096_vm4, %v8076_v50, %v8140_v25 }
 0xa7f   :  { %v8269_v51 = vrot.slane %v16675_v22, %v16248_v45  ;;  %v8088_v8 = vrot.slane %v16683_v17, %v18636_v55  ;;  %v8142_v10 = vsel %vm6098_vm5, %v8080_v20, %v8141_v57  ;;  %v8189_v44 = vrot.slane %v16541_v47, %v16248_v45 }
 0xa80   :  { %v8298_v5 = vsel %vm6094_vm1, %v8177_v43, %v8173_v49  ;;  %v8092_v21 = vrot.slane %v7586_v59, %v18636_v55  ;;  %v8143_v33 = vsel %vm6100_vm6, %v8084_v53, %v8142_v10  ;;  %v8265_v50 = vrot.slane %v7586_v59, %v16248_v45  ;;  %v8353_v43 = vld [vmem:[%s16954_s7 + $0x8] sm:$0xff] }
 0xa81   :  { %v8299_v25 = vsel %vm6096_vm4, %v8181_v62, %v8298_v5  ;;  %v8144_v18 = vsel %vm6102_vm7, %v8088_v8, %v8143_v33  ;;  %v8193_v61 = vrot.slane %v16558_v30, %v16248_v45  ;;  %v8197_v20 = vrot.slane %v16554_v19, %v16248_v45  ;;  %8778 = vmatprep.subr.mxu1 %v8353_v43 }
 0xa82   :  { %v8300_v47 = vsel %vm6098_vm5, %v8185_v41, %v8299_v25  ;;  %v8145_v49 = vsel %vm6104_vm8, %v8092_v21, %v8144_v18  ;;  %v8209_v62 = vrot.slane %v16589_v29, %v16248_v45  ;;  %v8213_v59 = vrot.slane %v16597_v15, %v16248_v45  ;;  %8779 = vmatpush3.msra.mxu1 %v8353_v43  ;;  %v8352_v21 = vld [vmem:[%s16954_s7] sm:$0xff]  ;;  %s8846_s7 = smov [#allocation7]  }
 0xa83   :  { %v8301_v1 = vsel %vm6100_vm6, %v8189_v44, %v8300_v47  ;;  %v8318_v30 = vsel %vm18659_vm15, %v8269_v51, %v8265_v50  ;;  %8157 = vrot.lane.b32.xlu0 %v8145_v49, %s8842_s3  ;;  %v8217_v41 = vrot.slane %v16612_v39, %v16248_v45  ;;  %v8221_v18 = vrot.slane %v16592_v52, %v16248_v45 }
 0xa84   :  { %v8302_v19 = vsel %vm6102_vm7, %v8193_v61, %v8301_v1  ;;  %v8225_v29 = vrot.slane %v16606_v40, %v16248_v45  ;;  %v8305_v15 = vsel %vm6094_vm1, %v8209_v62, %v16620_v3  ;;  %v8241_v57 = vrot.slane %v16642_v31, %v16248_v45  ;;  %8780 = vmatprep.subr.mxu1 %v8352_v21 }
 0xa85   :  { %v8303_v53 = vsel %vm6104_vm8, %v8197_v20, %v8302_v19  ;;  %v8229_v61 = vrot.slane %v16602_v12, %v16248_v45  ;;  %v8306_v39 = vsel %vm6096_vm4, %v8213_v59, %v8305_v15  ;;  %v8245_v52 = vrot.slane %v16653_v14, %v16248_v45  ;;  %8781 = vmatpush3.msra.mxu1 %v8352_v21 }
 0xa86   :  { %8325 = vrot.lane.b32.xlu1 %v8303_v53, %s8844_s13  ;;  %v8249_v40 = vrot.slane %v16667_v58, %v16248_v45  ;;  %v8307_v51 = vsel %vm6098_vm5, %v8217_v41, %v8306_v39  ;;  %v8253_v3 = vrot.slane %v16670_v11, %v16248_v45  ;;  %v8312_v31 = vsel %vm6094_vm1, %v8241_v57, %v16659_v24 }
 0xa87   :  { %v16764_v8 = vcombine.high %v16503_v28, %v16503_v28  ;;  %v8308_v12 = vsel %vm6100_vm6, %v8221_v18, %v8307_v51  ;;  %v8313_v10 = vsel %vm6096_vm4, %v8245_v52, %v8312_v31  ;;  %v7604_v14 = vcombine.high %v16661_v9, %v16661_v9 }
 0xa88   :  { %v7619_v58 = vcombine.high %v16675_v22, %v16675_v22  ;;  %v8309_v44 = vsel %vm6102_vm7, %v8225_v29, %v8308_v12  ;;  %v8257_v11 = vrot.slane %v16687_v4, %v16248_v45  ;;  %v8314_v24 = vsel %vm6098_vm5, %v8249_v40, %v8313_v10 }
 0xa89   :  { %v16778_v5 = vcombine.high %v16314_v7, %v16314_v7  ;;  %v8310_v9 = vsel %vm6104_vm8, %v8229_v61, %v8309_v44  ;;  %v8261_v33 = vrot.slane %v16683_v17, %v16248_v45  ;;  %v8315_v50 = vsel %vm6100_vm6, %v8253_v3, %v8314_v24 }
 0xa8a   :  { %v7618_v25 = vrot.slane %v7604_v14, %v18638_v6  ;;  %8327 = vrot.lane.b32.xlu0 %v8310_v9, %s8844_s13  ;;  %v8316_v4 = vsel %vm6102_vm7, %v8257_v11, %v8315_v50  ;;  %v7946_v20 = vrot.slane %v16764_v8, %v16248_v45  ;;  %v8096_v47 = vrot.slane %v16675_v22, %v18636_v55 }
 0xa8b   :  { %v8100_v43 = vrot.slane %v7619_v58, %v18636_v55  ;;  %v8317_v49 = vsel %vm6104_vm8, %v8261_v33, %v8316_v4  ;;  %v8116_v6 = vrot.slane %v16339_v2, %v18636_v55  ;;  %v8120_v62 = vrot.slane %v16314_v7, %v18636_v55 }
 0xa8c   :  { %v7620_v17 = vcombine.high %v7618_v25, %v7618_v25  ;;  %v8104_v1 = vrot.slane %v7618_v25, %v18636_v55  ;;  %8329 = vrot.lane.b32.xlu1 %v8317_v49, %s8844_s13  ;;  %v8124_v59 = vrot.slane %v16778_v5, %v18636_v55  ;;  %v8273_v19 = vrot.slane %v7619_v58, %v16248_v45  ;;  %v18665_v49 = vld [vmem:[#allocation66_spill] sm:$0xff] }
 0xa8d   :  { %v8146_v22 = vsel %vm18660_vm3, %v8100_v43, %v8096_v47  ;;  %v8277_v53 = vrot.slane %v7618_v25, %v16248_v45  ;;  %v8285_v29 = vrot.slane %v16302_v37, %v16248_v45  ;;  %v8289_v57 = vrot.slane %v16339_v2, %v16248_v45 }
 0xa8e   :  { %v8108_v41 = vrot.slane %v7620_v17, %v18636_v55  ;;  %v8147_v18 = vsel %vm6094_vm1, %v8104_v1, %v8146_v22  ;;  %7982 = vrot.lane.b32.xlu0 %v7946_v20, %s8839_s22  ;;  %v8281_v15 = vrot.slane %v7620_v17, %v16248_v45  ;;  %v8293_v61 = vrot.slane %v16314_v7, %v16248_v45  ;;  %v18671_v22 = vld [vmem:[#allocation58_spill] sm:$0xff]  ;;  %s8463_s22 = sshll.u32 %s8846_s7, 4  ;;  %s8464_s22 = int_to_ptr.vmem [resolvable:$true] %s8463_s22 }
 0xa8f   :  { %v8319_v39 = vsel %vm6094_vm1, %v8273_v19, %v8318_v30  ;;  %v7662_v51 = vrot.slane %v16318_v46, %v18636_v55  ;;  %v7666_v3 = vrot.slane %v16308_v13, %v18636_v55  ;;  %v18661_v31 = vrot.slane %v16302_v37, %v18636_v55  ;;  %v18672_v19 = vld [vmem:[#allocation80_spill] sm:$0xff]  ;;  %p8814_p1 = scmp.lt.s32.totalorder %s8464_s22, %s8464_s22 }
 0xa90   :  { %v8148_v52 = vsel %vm6096_vm4, %v8108_v41, %v8147_v18  ;;  %v8320_v40 = vsel %vm6096_vm4, %v8277_v53, %v8319_v39  ;;  %v8297_v7 = vrot.slane %v16778_v5, %v16248_v45  ;;  %v7658_v30 = vrot.slane %v16296_v34, %v18636_v55  ;;  %v18673_v53 = vld [vmem:[#allocation30_spill] sm:$0xff] }
 0xa91   :  { %v8149_v2 = vsel %vm6098_vm5, %v18661_v31, %v8148_v52  ;;  %v8321_v12 = vsel %vm6098_vm5, %v8281_v15, %v8320_v40  ;;  %v7674_v13 = vrot.slane %v16305_v56, %v18636_v55  ;;  %v7678_v37 = vrot.slane %v16330_v35, %v18636_v55  ;;  %v18676_v40 = vld [vmem:[#allocation48_spill] sm:$0xff]  ;;  %v18679_v31 = vld [vmem:[#allocation46_spill] sm:$0xff] }
 0xa92   :  { %v8150_v10 = vsel %vm6100_vm6, %v8116_v6, %v8149_v2  ;;  %v8322_v46 = vsel %vm6100_vm6, %v8285_v29, %v8321_v12  ;;  %v7783_v44 = vsel %vm18662_vm14, %v7662_v51, %v7658_v30  ;;  %v7670_v45 = vrot.slane %v16326_v32, %v18636_v55 }
 0xa93   :  { %v8151_v14 = vsel %vm6102_vm7, %v8120_v62, %v8150_v10  ;;  %v8323_v58 = vsel %vm6102_vm7, %v8289_v57, %v8322_v46  ;;  %v7784_v24 = vsel %vm6094_vm1, %v7666_v3, %v7783_v44  ;;  %v7690_v56 = vrot.slane %v16311_v23, %v18636_v55  ;;  %v18670_v62 = vld [vmem:[#allocation42_spill] sm:$0xff]  ;;  %v18681_v46 = vld [vmem:[#allocation32_spill] sm:$0xff] }
 0xa94   :  { %v8152_v34 = vsel %vm6104_vm8, %v8124_v59, %v8151_v14  ;;  %v8324_v11 = vsel %vm6104_vm8, %v8293_v61, %v8323_v58  ;;  %v7682_v35 = vrot.slane %v16321_v36, %v18636_v55  ;;  %v7785_v5 = vsel %vm6096_vm4, %v7670_v45, %v7784_v24  ;;  %v18675_v61 = vld [vmem:[#allocation28_spill] sm:$0xff]  ;;  %v18682_v14 = vld [vmem:[#allocation82_spill] sm:$0xff] }
 0xa95   :  { %8159 = vrot.lane.b32.xlu1 %v8152_v34, %s8842_s3  ;;  %8331 = vrot.lane.b32.xlu0 %v8324_v11, %s8844_s13  ;;  %v7698_v32 = vrot.slane %v16335_v60, %v18636_v55  ;;  %v7686_v21 = vrot.slane %v16343_v63, %v18636_v55  ;;  %v7786_v9 = vsel %vm6098_vm5, %v7674_v13, %v7785_v5  ;;  %vm8453_vm11 = vcmask 64512   ;;  %s8809_s3 = scalar_lea.vmem %s8464_s22, 512 }
 0xa96   :  { %v7706_v23 = vrot.slane %v16365_v16, %v18636_v55  ;;  %v18663_v33 = vrot.slane %v16353_v0, %v18636_v55  ;;  %v7787_v36 = vsel %vm6100_vm6, %v7678_v37, %v7786_v9  ;;  %v7722_v60 = vrot.slane %v16407_v38, %v18636_v55  ;;  %p8810_p0 = scmp.ne.s32.totalorder %s8464_s22, %s8809_s3  ;;  %p8815_p2 = scmp.lt.s32.totalorder %s8809_s3, %s8809_s3 }
 0xa97   :  { %v7730_v63 = vrot.slane %v16418_v48, %v18636_v55  ;;  %v7788_v4 = vsel %vm6102_vm7, %v7682_v35, %v7787_v36  ;;  %v7714_v16 = vrot.slane %v16373_v54, %v18636_v55  ;;  %v7718_v0 = vrot.slane %v16394_v27, %v18636_v55  ;;  %v18668_v27 = vld [vmem:[#allocation55_spill] sm:$0xff] }
 0xa98   :  { %v7790_v50 = vsel %vm18653_vm0, %v18663_v33, %v7690_v56  ;;  %v18664_v20 = vrot.slane %v16357_v42, %v18636_v55  ;;  %v7789_v38 = vsel %vm6104_vm8, %v7686_v21, %v7788_v4  ;;  %v7738_v48 = vrot.slane %v16410_v26, %v18636_v55  ;;  %p8816_p3 = por %p8815_p2, %p8814_p1 }
 0xa99   :  { %v7791_v25 = vsel %vm6094_vm1, %v7698_v32, %v7790_v50  ;;  %8333 = vrot.lane.b32.xlu1 %v8297_v7, %s8844_s13  ;;  %v18666_v54 = vrot.slane %v18665_v49, %v18636_v55  ;;  %7815 = vst.msk [vmem:[#allocation6] sm:$0xff] %vm7190_vm2, %v7789_v38  ;;  %v18669_v42 = vrot.slane %v18668_v27, %v18636_v55  ;;  %v18680_v7 = vld [vmem:[#allocation81_spill] sm:$0xff] }
 0xa9a   :  { %v7792_v47 = vsel %vm6096_vm4, %v18664_v20, %v7791_v25  ;;  %v7754_v59 = vrot.slane %v18670_v62, %v18636_v55  ;;  %v7762_v26 = vrot.slane %v18671_v22, %v18636_v55  ;;  %v7742_v41 = vrot.slane %v18672_v19, %v18636_v55  ;;  %p8817_p4 = pnand %p8816_p3, %p8810_p0 }
 0xa9b   :  { %v7793_v43 = vsel %vm6098_vm5, %v7706_v23, %v7792_v47  ;;  %v7797_v17 = vsel %vm18667_vm9, %v18666_v54, %v7722_v60  ;;  %v18674_v29 = vrot.slane %v18673_v53, %v18636_v55  ;;  %v7746_v39 = vrot.slane %v18675_v61, %v18636_v55 }
 0xa9c   :  { %v7794_v1 = vsel %vm6100_vm6, %v18669_v42, %v7793_v43  ;;  %v7798_v6 = vsel %vm6094_vm1, %v7730_v63, %v7797_v17  ;;  %v18677_v51 = vrot.slane %v18676_v40, %v18636_v55  ;;  %v7750_v2 = vrot.slane %v18679_v31, %v18636_v55 }
 0xa9d   :  { %v7795_v18 = vsel %vm6102_vm7, %v7714_v16, %v7794_v1  ;;  %v7799_v15 = vsel %vm6096_vm4, %v18674_v29, %v7798_v6  ;;  %v7770_v30 = vrot.slane %v18680_v7, %v18636_v55  ;;  %v7774_v13 = vrot.slane %v18681_v46, %v18636_v55 }
 0xa9e   :  { %v7796_v57 = vsel %vm6104_vm8, %v7718_v0, %v7795_v18  ;;  %v7800_v52 = vsel %vm6098_vm5, %v7738_v48, %v7799_v15  ;;  %v7804_v3 = vsel %vm18678_vm10, %v18677_v51, %v7754_v59  ;;  %v18683_v58 = vrot.slane %v18682_v14, %v18636_v55 }
 0xa9f   :  { %7816 = vst.msk [vmem:[#allocation6 + $0x8] sm:$0xff] %vm7190_vm2, %v7796_v57  ;;  %v7801_v12 = vsel %vm6100_vm6, %v7742_v41, %v7800_v52  ;;  %v7805_v10 = vsel %vm6094_vm1, %v7762_v26, %v7804_v3  ;;  %v7778_v34 = vrot.slane %v16503_v28, %v18636_v55  ;;  %v7782_v24 = vrot.slane %v16764_v8, %v18636_v55 }
 0xaa0   :  { %v7802_v37 = vsel %vm6102_vm7, %v7746_v39, %v7801_v12  ;;  %v7806_v44 = vsel %vm6096_vm4, %v18683_v58, %v7805_v10  ;;  %vm7989_vm1 = vcmask 523521   ;;  %vm7991_vm4 = vcmask 523520  }
 0xaa1   :  { %v7803_v45 = vsel %vm6104_vm8, %v7750_v2, %v7802_v37  ;;  %v7807_v11 = vsel %vm6098_vm5, %v7770_v30, %v7806_v44  ;;  %vm8165_vm5 = vcmask 785920  }
 0xaa2   :  { %7817 = vst.msk [vmem:[#allocation6 + $0x10] sm:$0xff] %vm7190_vm2, %v7803_v45  ;;  %v7808_v56 = vsel %vm6100_vm6, %v7774_v13, %v7807_v11  ;;  %vm8340_vm6 = vcmask 1048321  }
 0xaa3   :  { %v7809_v35 = vsel %vm6102_vm7, %v7778_v34, %v7808_v56  ;;  %vm8342_vm7 = vcmask 1048320  }
 0xaa4   :  { %v7810_v5 = vsel %vm6104_vm8, %v7782_v24, %v7809_v35  ;;  %vm7995_vm8 = vcmask 516352  }
 0xaa5   :  { %7818 = vst.msk [vmem:[#allocation6 + $0x18] sm:$0xff] %vm7190_vm2, %v7810_v5  ;;  %vm8346_vm2 = vcmask 1041152  }
 0xacb   :  { %v7975_v32 = vpop.permute.xlu0 %7974 }
 0xacc   :  { %7990 = vst.msk [vmem:[#allocation6 - $0x1] sm:$0xfe] %vm7989_vm1, %v7975_v32 }
 0xad0   :  { %v7977_v28 = vpop.permute.xlu1 %7976 }
 0xad1   :  { %7992 = vst.msk [vmem:[#allocation6 + $0x7] sm:$0xff] %vm7991_vm4, %v7977_v28 }
 0xad8   :  { %v7979_v21 = vpop.permute.xlu0 %7978 }
 0xad9   :  { %7993 = vst.msk [vmem:[#allocation6 + $0xf] sm:$0xff] %vm7991_vm4, %v7979_v21 }
 0xade   :  { %v7981_v9 = vpop.permute.xlu1 %7980 }
 0xadf   :  { %7994 = vst.msk [vmem:[#allocation6 + $0x17] sm:$0xff] %vm7991_vm4, %v7981_v9 }
 0xae7   :  { %v8154_v55 = vpop.permute.xlu0 %8153 }
 0xae8   :  { %8166 = vst.msk [vmem:[#allocation6] sm:$0xff] %vm8165_vm5, %v8154_v55 }
 0xaee   :  { %v8156_v8 = vpop.permute.xlu1 %8155 }
 0xaef   :  { %8167 = vst.msk [vmem:[#allocation6 + $0x8] sm:$0xff] %vm8165_vm5, %v8156_v8 }
 0xaf5   :  { %v8158_v23 = vpop.permute.xlu0 %8157 }
 0xaf6   :  { %8168 = vst.msk [vmem:[#allocation6 + $0x10] sm:$0xff] %vm8165_vm5, %v8158_v23 }
 0xaf8   :  { %v8326_v33 = vpop.permute.xlu1 %8325 }
 0xaf9   :  { %8341 = vst.msk [vmem:[#allocation6 - $0x1] sm:$0xfe] %vm8340_vm6, %v8326_v33 }
 0xafc   :  { %v8328_v50 = vpop.permute.xlu0 %8327 }
 0xafd   :  { %8343 = vst.msk [vmem:[#allocation6 + $0x7] sm:$0xff] %vm8342_vm7, %v8328_v50 }
 0xafe   :  { %v8330_v36 = vpop.permute.xlu1 %8329 }
 0xaff   :  { %8344 = vst.msk [vmem:[#allocation6 + $0xf] sm:$0xff] %vm8342_vm7, %v8330_v36 }
 0xb00   :  { %v7983_v25 = vpop.permute.xlu0 %7982 }
 0xb01   :  { %7996 = vst.msk [vmem:[#allocation6 + $0x1f] sm:$0x1] %vm7995_vm8, %v7983_v25 }
 0xb04   :  { %v8348_v60 = vld [vmem:[#allocation6] sm:$0xff] }
 0xb05   :  { %8782 = vmatprep.mubr.f32.mxu1 %v8348_v60 }
 0xb06   :  { %v8349_v16 = vld [vmem:[#allocation6 + $0x8] sm:$0xff] }
 0xb07   :  { %v8160_v63 = vpop.permute.xlu1 %8159  ;;  %v8332_v4 = vpop.permute.xlu0 %8331  ;;  %8783 = vmatmul.mubr.f32.vlgmr.msra.gmra.mxu1 %v8349_v16 }
 0xb08   :  { %8169 = vst.msk [vmem:[#allocation6 + $0x18] sm:$0xff] %vm8165_vm5, %v8160_v63 }
 0xb09   :  { %8345 = vst.msk [vmem:[#allocation6 + $0x17] sm:$0xff] %vm8342_vm7, %v8332_v4 }
 0xb0b   :  { %v8334_v0 = vpop.permute.xlu1 %8333 }
 0xb0c   :  { %8347 = vst.msk [vmem:[#allocation6 + $0x1f] sm:$0x1] %vm8346_vm2, %v8334_v0 }
 0xb10   :  { %v8350_v20 = vld [vmem:[#allocation6 + $0x10] sm:$0xff] }
 0xb11   :  { %8785 = vmatprep.mubr.f32.mxu1 %v8350_v20 }
 0xb13   :  { %v8351_v47 = vld [vmem:[#allocation6 + $0x18] sm:$0xff] }
 0xb14   :  { %8786 = vmatmul.mubr.f32.gmra.mxu1 %v8351_v47 }
 0xbc7   :  { %v8784_v38 = vpop.f32.mrf.mxu1 }
 0xbc8   :  { %8455 = vst.msk [vmem:[#allocation7 + $0x8] sm:$0xff] %vm8453_vm11, %v8784_v38 }
 0xbc9   :  { %v8434_v43 = vpop.f32.mrf.mxu1 }
 0xbca   :  { %8454 = vst.msk [vmem:[#allocation7] sm:$0xff] %vm8453_vm11, %v8434_v43 }
 0xbd4   :  { %v8787_v48 = vpop.f32.mrf.mxu1 }
 0xbd5   :  { %8457 = vst.msk [vmem:[#allocation7 + $0x18] sm:$0xff] %vm8453_vm11, %v8787_v48 }
 0xbd6   :  { %v8444_v49 = vpop.f32.mrf.mxu1 }
 0xbd7   :  { %8456 = vst.msk [vmem:[#allocation7 + $0x10] sm:$0xff] %vm8453_vm11, %v8444_v49 }
 0xbd8   :  { %8820 = shalt.err (!%p8817_p4)
}
 0xbd9   :  { %s8847_s13 = smov 128  }
 0xbda   :  { %8469 = dma.vmem_to_hbm [thread:$0]  %s8464_s22, 512, %s16955_s8, [#allocation8], %s8847_s13, %s8847_s13, %s8833_s26  }
 0xbdb   :  { %8829 = dma.done.wait [#allocation8], 512  }
 0xbdc   :  { %8830 = vsyncadd [#allocation8], 4294966784 }
 0xbdd   :  { %8473 = vsyncpa [#allocation8], 1 }

</bundles_post_ra>
